<compile_context>
chip_gen: v7x
topology: tpu7x:2x2x1
jax: 0.10.0
libtpu: 0.0.40
codegen_flags: <defaults>
</compile_context>

<pallas_src>
import jax
import jax.numpy as jnp
from jax.experimental import pallas as pl
from jax.experimental.pallas import tpu as pltpu


def ae_kernel(x_ref,
              w1_ref, b1_ref, w2_ref, b2_ref, w3_ref, b3_ref,
              w4_ref, b4_ref, w5_ref, b5_ref, w6_ref, b6_ref,
              out_ref):
    # One (TB, D) batch tile per grid step.  Weights are bf16; dots accumulate
    # in f32 on the MXU, ReLU/Tanh run on the VPU/EUP in f32.
    x = x_ref[...].astype(jnp.bfloat16)

    def dense(a, w_ref, b_ref):
        return (jnp.dot(a, w_ref[...], preferred_element_type=jnp.float32)
                + b_ref[...])

    # ----- encoder -----
    h = jnp.maximum(dense(x, w1_ref, b1_ref), 0.0)
    h = jnp.maximum(dense(h.astype(jnp.bfloat16), w2_ref, b2_ref), 0.0)
    z = dense(h.astype(jnp.bfloat16), w3_ref, b3_ref)

    # ----- decoder -----
    h = jnp.maximum(dense(z.astype(jnp.bfloat16), w4_ref, b4_ref), 0.0)
    h = jnp.maximum(dense(h.astype(jnp.bfloat16), w5_ref, b5_ref), 0.0)
    y = dense(h.astype(jnp.bfloat16), w6_ref, b6_ref)

    out_ref[...] = jnp.tanh(y).astype(out_ref.dtype)


def init_linear(key, fan_in, fan_out):
    # nn.Linear default init: U(-1/sqrt(fan_in), 1/sqrt(fan_in)).
    kw, kb = jax.random.split(key)
    bound = 1.0 / (fan_in ** 0.5)
    w = jax.random.uniform(kw, (fan_in, fan_out), jnp.float32, -bound, bound)
    b = jax.random.uniform(kb, (1, fan_out), jnp.float32, -bound, bound)
    # Weights in bf16 (bandwidth), biases kept f32 (negligible bytes, added to
    # the f32 accumulator).  Weight stored (in, out) so the kernel does x @ W.
    return w.astype(jnp.bfloat16), b


def make_ae_params(c, h, w, key):
    d = c * h * w
    dims = [(d, 1024), (1024, 512), (512, 256),     # encoder
            (256, 512), (512, 1024), (1024, d)]     # decoder
    keys = jax.random.split(key, len(dims))
    params = []
    for k, (fi, fo) in zip(keys, dims):
        params.extend(init_linear(k, fi, fo))
    return params  # [w1, b1, ..., w6, b6]


def _round_up(x, m):
    return ((x + m - 1) // m) * m


def ae_forward(x_nchw, params, *, max_batch_tile=128):
    b, c, h, w = x_nchw.shape
    d = c * h * w
    x_flat = x_nchw.reshape(b, d)  # same as torch .view(-1, c*h*w)

    # TODO(synk): for very large d (W1 = d x 1024, W6 = 1024 x d no longer fit
    # VMEM, roughly d >~ 12K on v7x / 24K on v5e-v6e) layers 1 and 6 need a
    # K-/N-tiled inner loop instead of being held fully resident.

    # Adaptive batch tile: at least a sublane multiple (8), at most 128.
    tb = min(max_batch_tile, _round_up(b, 8))
    num_tiles = pl.cdiv(b, tb)
    b_pad = num_tiles * tb
    if b_pad != b:
        # Pad batch to the tile size; padded rows are discarded below.
        x_flat = jnp.pad(x_flat, ((0, b_pad - b), (0, 0)))

    # Batch tile moves with the grid; weights/biases use a constant index_map
    # so they are fetched once and stay VMEM-resident across all batch tiles.
    x_spec = pl.BlockSpec((tb, d), lambda i: (i, 0))
    param_specs = [pl.BlockSpec(p.shape, lambda i: (0, 0)) for p in params]
    out_spec = pl.BlockSpec((tb, d), lambda i: (i, 0))

    out_flat = pl.pallas_call(
        ae_kernel,
        out_shape=jax.ShapeDtypeStruct((b_pad, d), x_flat.dtype),
        grid=(num_tiles,),
        in_specs=[x_spec] + param_specs,
        out_specs=out_spec,
        compiler_params=pltpu.CompilerParams(
            dimension_semantics=("parallel",),   # engage both TCs on v7x
            vmem_limit_bytes=48 << 20,           # fits v7x's 64 MiB VMEM
        ),
    )(x_flat, *params)

    return out_flat[:b].reshape(b, c, h, w)


def ae_reference(x_nchw, params):
    """Pure-JAX reference using the same dtype flow as the kernel."""
    b, c, h, w = x_nchw.shape
    d = c * h * w
    a = x_nchw.reshape(b, d)
    (w1, b1, w2, b2, w3, b3, w4, b4, w5, b5, w6, b6) = params

    def dense(a, wgt, bias):
        return (jnp.dot(a.astype(jnp.bfloat16), wgt,
                        preferred_element_type=jnp.float32) + bias)

    a = jnp.maximum(dense(a, w1, b1), 0.0)
    a = jnp.maximum(dense(a, w2, b2), 0.0)
    z = dense(a, w3, b3)
    a = jnp.maximum(dense(z, w4, b4), 0.0)
    a = jnp.maximum(dense(a, w5, b5), 0.0)
    y = dense(a, w6, b6)
    return jnp.tanh(y).reshape(b, c, h, w)


if __name__ == "__main__":
    B, C, H, W = 2, 4, 16, 16  # c*h*w = 1024
    key = jax.random.PRNGKey(0)
    k_x, k_p = jax.random.split(key)

    x = jax.random.normal(k_x, (B, C, H, W), jnp.float32)
    params = make_ae_params(C, H, W, k_p)

    out = ae_forward(x, params)
    out = jax.block_until_ready(out)
    assert out.shape == (B, C, H, W), out.shape
    assert bool(jnp.all(jnp.isfinite(out)))

    ref = jax.block_until_ready(ae_reference(x, params))
    assert bool(jnp.allclose(out, ref, atol=2e-2, rtol=2e-2)), (
        float(jnp.max(jnp.abs(out - ref))))

    print("KERNEL_OK")
</pallas_src>

<mosaic_0001>
module attributes {stable_mosaic.version = 11 : i64} {
  func.func @ae_kernel(%arg0: i32, %arg1: memref<8x1024xf32, #tpu.memory_space<vmem>>, %arg2: memref<1024x1024xbf16, #tpu.memory_space<vmem>>, %arg3: memref<1x1024xf32, #tpu.memory_space<vmem>>, %arg4: memref<1024x512xbf16, #tpu.memory_space<vmem>>, %arg5: memref<1x512xf32, #tpu.memory_space<vmem>>, %arg6: memref<512x256xbf16, #tpu.memory_space<vmem>>, %arg7: memref<1x256xf32, #tpu.memory_space<vmem>>, %arg8: memref<256x512xbf16, #tpu.memory_space<vmem>>, %arg9: memref<1x512xf32, #tpu.memory_space<vmem>>, %arg10: memref<512x1024xbf16, #tpu.memory_space<vmem>>, %arg11: memref<1x1024xf32, #tpu.memory_space<vmem>>, %arg12: memref<1024x1024xbf16, #tpu.memory_space<vmem>>, %arg13: memref<1x1024xf32, #tpu.memory_space<vmem>>, %arg14: memref<8x1024xf32, #tpu.memory_space<vmem>>) attributes {dimension_semantics = [#tpu.dimension_semantics<parallel>], iteration_bounds = array<i64: 1>, scalar_prefetch = 0 : i64, scratch_operands = 0 : i64, tpu.core_type = #tpu.core_type<tc>, window_params = [{transform_indices = @transform_0, window_bounds = array<i64: 8, 1024>}, {pipeline_mode = #tpu.pipeline_mode<synchronous>, transform_indices = @transform_1, window_bounds = array<i64: 1024, 1024>}, {pipeline_mode = #tpu.pipeline_mode<synchronous>, transform_indices = @transform_2, window_bounds = array<i64: 1, 1024>}, {pipeline_mode = #tpu.pipeline_mode<synchronous>, transform_indices = @transform_3, window_bounds = array<i64: 1024, 512>}, {pipeline_mode = #tpu.pipeline_mode<synchronous>, transform_indices = @transform_4, window_bounds = array<i64: 1, 512>}, {pipeline_mode = #tpu.pipeline_mode<synchronous>, transform_indices = @transform_5, window_bounds = array<i64: 512, 256>}, {pipeline_mode = #tpu.pipeline_mode<synchronous>, transform_indices = @transform_6, window_bounds = array<i64: 1, 256>}, {pipeline_mode = #tpu.pipeline_mode<synchronous>, transform_indices = @transform_7, window_bounds = array<i64: 256, 512>}, {pipeline_mode = #tpu.pipeline_mode<synchronous>, transform_indices = @transform_8, window_bounds = array<i64: 1, 512>}, {pipeline_mode = #tpu.pipeline_mode<synchronous>, transform_indices = @transform_9, window_bounds = array<i64: 512, 1024>}, {pipeline_mode = #tpu.pipeline_mode<synchronous>, transform_indices = @transform_10, window_bounds = array<i64: 1, 1024>}, {pipeline_mode = #tpu.pipeline_mode<synchronous>, transform_indices = @transform_11, window_bounds = array<i64: 1024, 1024>}, {pipeline_mode = #tpu.pipeline_mode<synchronous>, transform_indices = @transform_12, window_bounds = array<i64: 1, 1024>}, {transform_indices = @transform_13, window_bounds = array<i64: 8, 1024>}]} {
    %c0 = arith.constant 0 : index
    %c0_0 = arith.constant 0 : index
    %0 = vector.load %arg1[%c0, %c0_0] : memref<8x1024xf32, #tpu.memory_space<vmem>>, vector<8x1024xf32>
    %1 = arith.truncf %0 : vector<8x1024xf32> to vector<8x1024xbf16>
    %c0_1 = arith.constant 0 : index
    %c0_2 = arith.constant 0 : index
    %2 = vector.load %arg2[%c0_1, %c0_2] : memref<1024x1024xbf16, #tpu.memory_space<vmem>>, vector<1024x1024xbf16>
    %cst = arith.constant dense<0.000000e+00> : vector<8x1024xf32>
    %3 = tpu.matmul %1, %2, %cst {dimension_numbers = #tpu.dot_dimension_numbers<[1], [0], [0], [1], [0, 0, 1, 1], [], []>} : vector<8x1024xbf16>, vector<1024x1024xbf16>, vector<8x1024xf32> -> vector<8x1024xf32>
    %c0_3 = arith.constant 0 : index
    %c0_4 = arith.constant 0 : index
    %4 = vector.load %arg3[%c0_3, %c0_4] : memref<1x1024xf32, #tpu.memory_space<vmem>>, vector<1x1024xf32>
    %5 = vector.broadcast %4 : vector<1x1024xf32> to vector<8x1024xf32>
    %6 = arith.addf %3, %5 : vector<8x1024xf32>
    %cst_5 = arith.constant 0.000000e+00 : f32
    %7 = vector.broadcast %cst_5 : f32 to vector<8x1024xf32>
    %8 = arith.maximumf %6, %7 : vector<8x1024xf32>
    %9 = arith.truncf %8 : vector<8x1024xf32> to vector<8x1024xbf16>
    %c0_6 = arith.constant 0 : index
    %c0_7 = arith.constant 0 : index
    %10 = vector.load %arg4[%c0_6, %c0_7] : memref<1024x512xbf16, #tpu.memory_space<vmem>>, vector<1024x512xbf16>
    %cst_8 = arith.constant dense<0.000000e+00> : vector<8x512xf32>
    %11 = tpu.matmul %9, %10, %cst_8 {dimension_numbers = #tpu.dot_dimension_numbers<[1], [0], [0], [1], [0, 0, 1, 1], [], []>} : vector<8x1024xbf16>, vector<1024x512xbf16>, vector<8x512xf32> -> vector<8x512xf32>
    %c0_9 = arith.constant 0 : index
    %c0_10 = arith.constant 0 : index
    %12 = vector.load %arg5[%c0_9, %c0_10] : memref<1x512xf32, #tpu.memory_space<vmem>>, vector<1x512xf32>
    %13 = vector.broadcast %12 : vector<1x512xf32> to vector<8x512xf32>
    %14 = arith.addf %11, %13 : vector<8x512xf32>
    %cst_11 = arith.constant 0.000000e+00 : f32
    %15 = vector.broadcast %cst_11 : f32 to vector<8x512xf32>
    %16 = arith.maximumf %14, %15 : vector<8x512xf32>
    %17 = arith.truncf %16 : vector<8x512xf32> to vector<8x512xbf16>
    %c0_12 = arith.constant 0 : index
    %c0_13 = arith.constant 0 : index
    %18 = vector.load %arg6[%c0_12, %c0_13] : memref<512x256xbf16, #tpu.memory_space<vmem>>, vector<512x256xbf16>
    %cst_14 = arith.constant dense<0.000000e+00> : vector<8x256xf32>
    %19 = tpu.matmul %17, %18, %cst_14 {dimension_numbers = #tpu.dot_dimension_numbers<[1], [0], [0], [1], [0, 0, 1, 1], [], []>} : vector<8x512xbf16>, vector<512x256xbf16>, vector<8x256xf32> -> vector<8x256xf32>
    %c0_15 = arith.constant 0 : index
    %c0_16 = arith.constant 0 : index
    %20 = vector.load %arg7[%c0_15, %c0_16] : memref<1x256xf32, #tpu.memory_space<vmem>>, vector<1x256xf32>
    %21 = vector.broadcast %20 : vector<1x256xf32> to vector<8x256xf32>
    %22 = arith.addf %19, %21 : vector<8x256xf32>
    %23 = arith.truncf %22 : vector<8x256xf32> to vector<8x256xbf16>
    %c0_17 = arith.constant 0 : index
    %c0_18 = arith.constant 0 : index
    %24 = vector.load %arg8[%c0_17, %c0_18] : memref<256x512xbf16, #tpu.memory_space<vmem>>, vector<256x512xbf16>
    %cst_19 = arith.constant dense<0.000000e+00> : vector<8x512xf32>
    %25 = tpu.matmul %23, %24, %cst_19 {dimension_numbers = #tpu.dot_dimension_numbers<[1], [0], [0], [1], [0, 0, 1, 1], [], []>} : vector<8x256xbf16>, vector<256x512xbf16>, vector<8x512xf32> -> vector<8x512xf32>
    %c0_20 = arith.constant 0 : index
    %c0_21 = arith.constant 0 : index
    %26 = vector.load %arg9[%c0_20, %c0_21] : memref<1x512xf32, #tpu.memory_space<vmem>>, vector<1x512xf32>
    %27 = vector.broadcast %26 : vector<1x512xf32> to vector<8x512xf32>
    %28 = arith.addf %25, %27 : vector<8x512xf32>
    %cst_22 = arith.constant 0.000000e+00 : f32
    %29 = vector.broadcast %cst_22 : f32 to vector<8x512xf32>
    %30 = arith.maximumf %28, %29 : vector<8x512xf32>
    %31 = arith.truncf %30 : vector<8x512xf32> to vector<8x512xbf16>
    %c0_23 = arith.constant 0 : index
    %c0_24 = arith.constant 0 : index
    %32 = vector.load %arg10[%c0_23, %c0_24] : memref<512x1024xbf16, #tpu.memory_space<vmem>>, vector<512x1024xbf16>
    %cst_25 = arith.constant dense<0.000000e+00> : vector<8x1024xf32>
    %33 = tpu.matmul %31, %32, %cst_25 {dimension_numbers = #tpu.dot_dimension_numbers<[1], [0], [0], [1], [0, 0, 1, 1], [], []>} : vector<8x512xbf16>, vector<512x1024xbf16>, vector<8x1024xf32> -> vector<8x1024xf32>
    %c0_26 = arith.constant 0 : index
    %c0_27 = arith.constant 0 : index
    %34 = vector.load %arg11[%c0_26, %c0_27] : memref<1x1024xf32, #tpu.memory_space<vmem>>, vector<1x1024xf32>
    %35 = vector.broadcast %34 : vector<1x1024xf32> to vector<8x1024xf32>
    %36 = arith.addf %33, %35 : vector<8x1024xf32>
    %cst_28 = arith.constant 0.000000e+00 : f32
    %37 = vector.broadcast %cst_28 : f32 to vector<8x1024xf32>
    %38 = arith.maximumf %36, %37 : vector<8x1024xf32>
    %39 = arith.truncf %38 : vector<8x1024xf32> to vector<8x1024xbf16>
    %c0_29 = arith.constant 0 : index
    %c0_30 = arith.constant 0 : index
    %40 = vector.load %arg12[%c0_29, %c0_30] : memref<1024x1024xbf16, #tpu.memory_space<vmem>>, vector<1024x1024xbf16>
    %cst_31 = arith.constant dense<0.000000e+00> : vector<8x1024xf32>
    %41 = tpu.matmul %39, %40, %cst_31 {dimension_numbers = #tpu.dot_dimension_numbers<[1], [0], [0], [1], [0, 0, 1, 1], [], []>} : vector<8x1024xbf16>, vector<1024x1024xbf16>, vector<8x1024xf32> -> vector<8x1024xf32>
    %c0_32 = arith.constant 0 : index
    %c0_33 = arith.constant 0 : index
    %42 = vector.load %arg13[%c0_32, %c0_33] : memref<1x1024xf32, #tpu.memory_space<vmem>>, vector<1x1024xf32>
    %43 = vector.broadcast %42 : vector<1x1024xf32> to vector<8x1024xf32>
    %44 = arith.addf %41, %43 : vector<8x1024xf32>
    %45 = math.tanh %44 : vector<8x1024xf32>
    %c0_34 = arith.constant 0 : index
    %c0_35 = arith.constant 0 : index
    %46 = vector.load %arg14[%c0_34, %c0_35] : memref<8x1024xf32, #tpu.memory_space<vmem>>, vector<8x1024xf32>
    tpu.vector_store %arg14[%c0_34, %c0_35], %45 {strides = array<i32>} : memref<8x1024xf32, #tpu.memory_space<vmem>>, vector<8x1024xf32>,
    return
  }
  func.func @transform_0(%arg0: i32) -> (i32, i32) {
    %c0_i32 = arith.constant 0 : i32
    %c0_i32_0 = arith.constant 0 : i32
    return %arg0, %c0_i32 : i32, i32
  }
  func.func @transform_1(%arg0: i32) -> (i32, i32) {
    %c0_i32 = arith.constant 0 : i32
    %c0_i32_0 = arith.constant 0 : i32
    %c0_i32_1 = arith.constant 0 : i32
    return %c0_i32, %c0_i32_0 : i32, i32
  }
  func.func @transform_2(%arg0: i32) -> (i32, i32) {
    %c0_i32 = arith.constant 0 : i32
    %c0_i32_0 = arith.constant 0 : i32
    %c0_i32_1 = arith.constant 0 : i32
    return %c0_i32, %c0_i32_0 : i32, i32
  }
  func.func @transform_3(%arg0: i32) -> (i32, i32) {
    %c0_i32 = arith.constant 0 : i32
    %c0_i32_0 = arith.constant 0 : i32
    %c0_i32_1 = arith.constant 0 : i32
    return %c0_i32, %c0_i32_0 : i32, i32
  }
  func.func @transform_4(%arg0: i32) -> (i32, i32) {
    %c0_i32 = arith.constant 0 : i32
    %c0_i32_0 = arith.constant 0 : i32
    %c0_i32_1 = arith.constant 0 : i32
    return %c0_i32, %c0_i32_0 : i32, i32
  }
  func.func @transform_5(%arg0: i32) -> (i32, i32) {
    %c0_i32 = arith.constant 0 : i32
    %c0_i32_0 = arith.constant 0 : i32
    %c0_i32_1 = arith.constant 0 : i32
    return %c0_i32, %c0_i32_0 : i32, i32
  }
  func.func @transform_6(%arg0: i32) -> (i32, i32) {
    %c0_i32 = arith.constant 0 : i32
    %c0_i32_0 = arith.constant 0 : i32
    %c0_i32_1 = arith.constant 0 : i32
    return %c0_i32, %c0_i32_0 : i32, i32
  }
  func.func @transform_7(%arg0: i32) -> (i32, i32) {
    %c0_i32 = arith.constant 0 : i32
    %c0_i32_0 = arith.constant 0 : i32
    %c0_i32_1 = arith.constant 0 : i32
    return %c0_i32, %c0_i32_0 : i32, i32
  }
  func.func @transform_8(%arg0: i32) -> (i32, i32) {
    %c0_i32 = arith.constant 0 : i32
    %c0_i32_0 = arith.constant 0 : i32
    %c0_i32_1 = arith.constant 0 : i32
    return %c0_i32, %c0_i32_0 : i32, i32
  }
  func.func @transform_9(%arg0: i32) -> (i32, i32) {
    %c0_i32 = arith.constant 0 : i32
    %c0_i32_0 = arith.constant 0 : i32
    %c0_i32_1 = arith.constant 0 : i32
    return %c0_i32, %c0_i32_0 : i32, i32
  }
  func.func @transform_10(%arg0: i32) -> (i32, i32) {
    %c0_i32 = arith.constant 0 : i32
    %c0_i32_0 = arith.constant 0 : i32
    %c0_i32_1 = arith.constant 0 : i32
    return %c0_i32, %c0_i32_0 : i32, i32
  }
  func.func @transform_11(%arg0: i32) -> (i32, i32) {
    %c0_i32 = arith.constant 0 : i32
    %c0_i32_0 = arith.constant 0 : i32
    %c0_i32_1 = arith.constant 0 : i32
    return %c0_i32, %c0_i32_0 : i32, i32
  }
  func.func @transform_12(%arg0: i32) -> (i32, i32) {
    %c0_i32 = arith.constant 0 : i32
    %c0_i32_0 = arith.constant 0 : i32
    %c0_i32_1 = arith.constant 0 : i32
    return %c0_i32, %c0_i32_0 : i32, i32
  }
  func.func @transform_13(%arg0: i32) -> (i32, i32) {
    %c0_i32 = arith.constant 0 : i32
    %c0_i32_0 = arith.constant 0 : i32
    return %arg0, %c0_i32 : i32, i32
  }
}

</mosaic_0001>

<bundles_post_ra>
// kernel: tpu_custom_call.1
= control target key start
LH: loop header
LB: loop body
LE: loop exit
PB: predicated region body
PF: predicated region fallthrough
CT: control target
= control target key end

     0   :  { %18 = vsyncpa [#allocation3], 0  ;;  %s15923_s0 = inlined_call_operand.hbm [shape: f32[8,1024], index: 0, kind: input, shape index: {}]   ;;  %s15924_s1 = inlined_call_operand.hbm [shape: bf16[1024,1024], index: 1, kind: input, shape index: {}]   ;;  %s15925_s2 = inlined_call_operand.hbm [shape: f32[1,1024], index: 2, kind: input, shape index: {}]   ;;  %s15926_s3 = inlined_call_operand.hbm [shape: bf16[1024,512], index: 3, kind: input, shape index: {}]   ;;  %s15927_s4 = inlined_call_operand.hbm [shape: f32[1,512], index: 4, kind: input, shape index: {}]   ;;  %s15928_s5 = inlined_call_operand.hbm [shape: bf16[512,256], index: 5, kind: input, shape index: {}]   ;;  %s15929_s6 = inlined_call_operand.hbm [shape: f32[1,256], index: 6, kind: input, shape index: {}]   ;;  %s15930_s7 = inlined_call_operand.hbm [shape: bf16[256,512], index: 7, kind: input, shape index: {}]   ;;  %s15931_s8 = inlined_call_operand.hbm [shape: f32[1,512], index: 8, kind: input, shape index: {}]   ;;  %s15932_s9 = inlined_call_operand.hbm [shape: bf16[512,1024], index: 9, kind: input, shape index: {}]   ;;  %s15933_s10 = inlined_call_operand.hbm [shape: f32[1,1024], index: 10, kind: input, shape index: {}]   ;;  %s15934_s11 = inlined_call_operand.hbm [shape: bf16[1024,1024], index: 11, kind: input, shape index: {}]   ;;  %s15935_s12 = inlined_call_operand.hbm [shape: f32[1,1024], index: 12, kind: input, shape index: {}]   ;;  %s15936_s13 = inlined_call_operand.hbm [shape: f32[8,1024], index: 13, kind: output, shape index: {}]  }
   0x1   :  { %19 = vsyncpa [#allocation6], 0 }
   0x2   :  { %20 = vsyncpa [#allocation9], 0 }
   0x3   :  { %21 = vsyncpa [#allocation12], 0 }
   0x4   :  { %22 = vsyncpa [#allocation15], 0 }
   0x5   :  { %23 = vsyncpa [#allocation18], 0 }
   0x6   :  { %24 = vsyncpa [#allocation21], 0 }
   0x7   :  { %25 = vsyncpa [#allocation4], 0  ;;  %s15380_s25 = smov [#allocation5]   ;;  %s15056_s29 = scalar_lea.hbm %s15924_s1, 65536 }
   0x8   :  { %s41_s26 = sshll.u32 %s15380_s25, 4  ;;  %p15057_p0 = scmp.ne.s32.totalorder %s15924_s1, %s15056_s29  ;;  %s42_s26 = int_to_ptr.vmem [resolvable:$true] %s41_s26 }
   0x9   :  { %p15060_p1 = scmp.lt.u32.totalorder %s15056_s29, %s15924_s1 }
   0xb   :  { %p15062_p2 = pnand %p15060_p1, %p15057_p0 }
   0xd   :  { %15065 = shalt.err (!%p15062_p2)
}
   0xe   :  { %s15066_s17 = scalar_lea.vmem %s42_s26, 65536  ;;  %p15071_p4 = scmp.lt.s32.totalorder %s42_s26, %s42_s26 }
   0xf   :  { %p15067_p3 = scmp.ne.s32.totalorder %s42_s26, %s15066_s17  ;;  %p15072_p5 = scmp.lt.s32.totalorder %s15066_s17, %s15066_s17 }
  0x11   :  { %p15073_p6 = por %p15072_p5, %p15071_p4 }
  0x13   :  { %p15074_p7 = pnand %p15073_p6, %p15067_p3 }
  0x15   :  { %15077 = shalt.err (!%p15074_p7)
}
  0x16   :  { %s15937_s18 = smov 512   ;;  %s15382_s19 = smov 32  }
  0x17   :  { %47 = dma.hbm_to_vmem [thread:$0]  %s15924_s1, 65536, %s42_s26, [#allocation6], %s15937_s18, %s15937_s18, %s15382_s19  }
  0x18   :  { %s15383_s22 = smov [#allocation8]   ;;  %s15078_s27 = scalar_lea.hbm %s15926_s3, 32768 }
  0x19   :  { %s63_s23 = sshll.u32 %s15383_s22, 4  ;;  %p15079_p8 = scmp.ne.s32.totalorder %s15926_s3, %s15078_s27  ;;  %s64_s23 = int_to_ptr.vmem [resolvable:$true] %s63_s23 }
  0x1a   :  { %p15082_p9 = scmp.lt.u32.totalorder %s15078_s27, %s15926_s3 }
  0x1c   :  { %p15084_p10 = pnand %p15082_p9, %p15079_p8 }
  0x1e   :  { %15087 = shalt.err (!%p15084_p10)
}
  0x1f   :  { %s15088_s15 = scalar_lea.vmem %s64_s23, 32768  ;;  %p15093_p12 = scmp.lt.s32.totalorder %s64_s23, %s64_s23 }
  0x20   :  { %p15089_p11 = scmp.ne.s32.totalorder %s64_s23, %s15088_s15  ;;  %p15094_p13 = scmp.lt.s32.totalorder %s15088_s15, %s15088_s15 }
  0x22   :  { %p15095_p0 = por %p15094_p13, %p15093_p12 }
  0x24   :  { %p15096_p1 = pnand %p15095_p0, %p15089_p11 }
  0x26   :  { %15099 = shalt.err (!%p15096_p1)
}
  0x27   :  { %s15384_s1 = smov 256   ;;  %s15385_s26 = smov 16  }
  0x28   :  { %69 = dma.hbm_to_vmem [thread:$0]  %s15926_s3, 32768, %s64_s23, [#allocation9], %s15384_s1, %s15384_s1, %s15385_s26  }
  0x29   :  { %s15386_s20 = smov [#allocation11]   ;;  %s15100_s25 = scalar_lea.hbm %s15928_s5, 8192 }
  0x2a   :  { %s85_s21 = sshll.u32 %s15386_s20, 4  ;;  %p15101_p2 = scmp.ne.s32.totalorder %s15928_s5, %s15100_s25  ;;  %s86_s21 = int_to_ptr.vmem [resolvable:$true] %s85_s21 }
  0x2b   :  { %p15104_p3 = scmp.lt.u32.totalorder %s15100_s25, %s15928_s5 }
  0x2d   :  { %p15106_p4 = pnand %p15104_p3, %p15101_p2 }
  0x2f   :  { %15109 = shalt.err (!%p15106_p4)
}
  0x30   :  { %s15110_s14 = scalar_lea.vmem %s86_s21, 8192  ;;  %p15115_p6 = scmp.lt.s32.totalorder %s86_s21, %s86_s21 }
  0x31   :  { %p15111_p5 = scmp.ne.s32.totalorder %s86_s21, %s15110_s14  ;;  %p15116_p7 = scmp.lt.s32.totalorder %s15110_s14, %s15110_s14 }
  0x33   :  { %p15117_p8 = por %p15116_p7, %p15115_p6 }
  0x35   :  { %p15118_p9 = pnand %p15117_p8, %p15111_p5 }
  0x37   :  { %15121 = shalt.err (!%p15118_p9)
}
  0x38   :  { %s15387_s3 = smov 128   ;;  %s15388_s23 = smov 8  }
  0x39   :  { %91 = dma.hbm_to_vmem [thread:$0]  %s15928_s5, 8192, %s86_s21, [#allocation12], %s15387_s3, %s15387_s3, %s15388_s23  }
  0x3a   :  { %s15389_s17 = smov [#allocation14]   ;;  %s15390_s22 = smov [#allocation17]  }
  0x3b   :  { %s107_s20 = sshll.u32 %s15389_s17, 4  ;;  %s129_s24 = sshll.u32 %s15390_s22, 4  ;;  %s108_s20 = int_to_ptr.vmem [resolvable:$true] %s107_s20  ;;  %s130_s24 = int_to_ptr.vmem [resolvable:$true] %s129_s24 }
  0x3c   :  { %s15122_s28 = scalar_lea.hbm %s15930_s7, 8192 }
  0x3d   :  { %p15123_p10 = scmp.ne.s32.totalorder %s15930_s7, %s15122_s28  ;;  %p15126_p11 = scmp.lt.u32.totalorder %s15122_s28, %s15930_s7 }
  0x3f   :  { %p15128_p12 = pnand %p15126_p11, %p15123_p10 }
  0x41   :  { %15131 = shalt.err (!%p15128_p12)
}
  0x42   :  { %s15132_s5 = scalar_lea.vmem %s108_s20, 8192  ;;  %p15137_p0 = scmp.lt.s32.totalorder %s108_s20, %s108_s20 }
  0x43   :  { %p15133_p13 = scmp.ne.s32.totalorder %s108_s20, %s15132_s5  ;;  %p15138_p1 = scmp.lt.s32.totalorder %s15132_s5, %s15132_s5 }
  0x45   :  { %p15139_p2 = por %p15138_p1, %p15137_p0 }
  0x47   :  { %p15140_p3 = pnand %p15139_p2, %p15133_p13 }
  0x49   :  { %15143 = shalt.err (!%p15140_p3)
}
  0x4a   :  { %113 = dma.hbm_to_vmem [thread:$0]  %s15930_s7, 8192, %s108_s20, [#allocation15], %s15384_s1, %s15384_s1, %s15385_s26  }
  0x4b   :  { %s15144_s15 = scalar_lea.hbm %s15932_s9, 32768 }
  0x4c   :  { %p15145_p4 = scmp.ne.s32.totalorder %s15932_s9, %s15144_s15  ;;  %p15148_p5 = scmp.lt.u32.totalorder %s15144_s15, %s15932_s9 }
  0x4e   :  { %p15150_p6 = pnand %p15148_p5, %p15145_p4 }
  0x50   :  { %15153 = shalt.err (!%p15150_p6)
}
  0x51   :  { %s15154_s27 = scalar_lea.vmem %s130_s24, 32768  ;;  %p15159_p8 = scmp.lt.s32.totalorder %s130_s24, %s130_s24 }
  0x52   :  { %p15155_p7 = scmp.ne.s32.totalorder %s130_s24, %s15154_s27  ;;  %p15160_p9 = scmp.lt.s32.totalorder %s15154_s27, %s15154_s27 }
  0x54   :  { %p15161_p10 = por %p15160_p9, %p15159_p8 }
  0x56   :  { %p15162_p11 = pnand %p15161_p10, %p15155_p7 }
  0x58   :  { %15165 = shalt.err (!%p15162_p11)
}
  0x59   :  { %s15939_s7 = smov 512   ;;  %s15391_s20 = smov [#allocation20]  }
  0x5a   :  { %135 = dma.hbm_to_vmem [thread:$0]  %s15932_s9, 32768, %s130_s24, [#allocation18], %s15939_s7, %s15939_s7, %s15382_s19  }
  0x5b   :  { %s151_s28 = sshll.u32 %s15391_s20, 4  ;;  %s15392_s29 = smov [#allocation2]   ;;  %s152_s28 = int_to_ptr.vmem [resolvable:$true] %s151_s28 }
  0x5c   :  { %s32_s30 = sshll.u32 %s15392_s29, 4  ;;  %s15166_s21 = scalar_lea.hbm %s15934_s11, 65536  ;;  %s33_s30 = int_to_ptr.vmem [resolvable:$true] %s32_s30 }
  0x5d   :  { %p15167_p12 = scmp.ne.s32.totalorder %s15934_s11, %s15166_s21  ;;  %p15170_p13 = scmp.lt.u32.totalorder %s15166_s21, %s15934_s11 }
  0x5f   :  { %p15172_p0 = pnand %p15170_p13, %p15167_p12 }
  0x61   :  { %15175 = shalt.err (!%p15172_p0)
}
  0x62   :  { %s15176_s9 = scalar_lea.vmem %s152_s28, 65536  ;;  %p15181_p2 = scmp.lt.s32.totalorder %s152_s28, %s152_s28 }
  0x63   :  { %p15177_p1 = scmp.ne.s32.totalorder %s152_s28, %s15176_s9  ;;  %p15182_p3 = scmp.lt.s32.totalorder %s15176_s9, %s15176_s9 }
  0x65   :  { %p15183_p4 = por %p15182_p3, %p15181_p2 }
  0x67   :  { %p15184_p5 = pnand %p15183_p4, %p15177_p1 }
  0x69   :  { %15187 = shalt.err (!%p15184_p5)
}
  0x6a   :  { %157 = dma.hbm_to_vmem [thread:$0]  %s15934_s11, 65536, %s152_s28, [#allocation21], %s15939_s7, %s15939_s7, %s15382_s19  }
  0x6b   :  { %s15188_s25 = scalar_lea.hbm %s15923_s0, 1024 }
  0x6c   :  { %p15189_p6 = scmp.ne.s32.totalorder %s15923_s0, %s15188_s25  ;;  %p15192_p7 = scmp.lt.u32.totalorder %s15188_s25, %s15923_s0 }
  0x6e   :  { %p15194_p8 = pnand %p15192_p7, %p15189_p6 }
  0x70   :  { %15197 = shalt.err (!%p15194_p8)
}
  0x71   :  { %s15198_s29 = scalar_lea.vmem %s33_s30, 1024  ;;  %p15203_p10 = scmp.lt.s32.totalorder %s33_s30, %s33_s30 }
  0x72   :  { %p15199_p9 = scmp.ne.s32.totalorder %s33_s30, %s15198_s29  ;;  %p15204_p11 = scmp.lt.s32.totalorder %s15198_s29, %s15198_s29 }
  0x74   :  { %p15205_p12 = por %p15204_p11, %p15203_p10 }
  0x76   :  { %p15206_p13 = pnand %p15205_p12, %p15199_p9 }
  0x78   :  { %15209 = shalt.err (!%p15206_p13)
}
  0x79   :  { %35 = dma.hbm_to_vmem [thread:$0]  %s15923_s0, 1024, %s33_s30, [#allocation3]  }
  0x7a   :  { %s15393_s7 = smov [#allocation7]   ;;  %s15394_s14 = smov [#allocation10]  }
  0x7b   :  { %s54_s28 = sshll.u32 %s15393_s7, 4  ;;  %s76_s5 = sshll.u32 %s15394_s14, 4  ;;  %s55_s28 = int_to_ptr.vmem [resolvable:$true] %s54_s28  ;;  %s77_s5 = int_to_ptr.vmem [resolvable:$true] %s76_s5 }
  0x7c   :  { %s15210_s23 = scalar_lea.hbm %s15925_s2, 128 }
  0x7d   :  { %p15211_p0 = scmp.ne.s32.totalorder %s15925_s2, %s15210_s23  ;;  %p15214_p1 = scmp.lt.u32.totalorder %s15210_s23, %s15925_s2 }
  0x7f   :  { %p15216_p2 = pnand %p15214_p1, %p15211_p0 }
  0x81   :  { %15219 = shalt.err (!%p15216_p2)
}
  0x82   :  { %s15220_s0 = scalar_lea.vmem %s55_s28, 128  ;;  %p15225_p4 = scmp.lt.s32.totalorder %s55_s28, %s55_s28 }
  0x83   :  { %p15221_p3 = scmp.ne.s32.totalorder %s55_s28, %s15220_s0  ;;  %p15226_p5 = scmp.lt.s32.totalorder %s15220_s0, %s15220_s0 }
  0x85   :  { %p15227_p6 = por %p15226_p5, %p15225_p4 }
  0x87   :  { %p15228_p7 = pnand %p15227_p6, %p15221_p3 }
  0x89   :  { %15231 = shalt.err (!%p15228_p7)
}
  0x8a   :  { %57 = dma.hbm_to_vmem [thread:$0]  %s15925_s2, 128, %s55_s28, [#allocation6]  }
  0x8b   :  { %s15232_s25 = scalar_lea.hbm %s15927_s4, 64 }
  0x8c   :  { %p15233_p8 = scmp.ne.s32.totalorder %s15927_s4, %s15232_s25  ;;  %p15236_p9 = scmp.lt.u32.totalorder %s15232_s25, %s15927_s4 }
  0x8e   :  { %p15238_p10 = pnand %p15236_p9, %p15233_p8 }
  0x90   :  { %15241 = shalt.err (!%p15238_p10)
}
  0x91   :  { %s15242_s29 = scalar_lea.vmem %s77_s5, 64  ;;  %p15247_p12 = scmp.lt.s32.totalorder %s77_s5, %s77_s5 }
  0x92   :  { %p15243_p11 = scmp.ne.s32.totalorder %s77_s5, %s15242_s29  ;;  %p15248_p13 = scmp.lt.s32.totalorder %s15242_s29, %s15242_s29 }
  0x94   :  { %p15249_p0 = por %p15248_p13, %p15247_p12 }
  0x96   :  { %p15250_p1 = pnand %p15249_p0, %p15243_p11 }
  0x98   :  { %15253 = shalt.err (!%p15250_p1)
}
  0x99   :  { %79 = dma.hbm_to_vmem [thread:$0]  %s15927_s4, 64, %s77_s5, [#allocation9]  }
  0x9a   :  { %s15395_s19 = smov [#allocation13]   ;;  %s15396_s28 = smov [#allocation16]  }
  0x9b   :  { %s98_s7 = sshll.u32 %s15395_s19, 4  ;;  %s120_s14 = sshll.u32 %s15396_s28, 4  ;;  %s99_s7 = int_to_ptr.vmem [resolvable:$true] %s98_s7  ;;  %s121_s14 = int_to_ptr.vmem [resolvable:$true] %s120_s14 }
  0x9c   :  { %s15254_s23 = scalar_lea.hbm %s15929_s6, 32 }
  0x9d   :  { %p15255_p2 = scmp.ne.s32.totalorder %s15929_s6, %s15254_s23  ;;  %p15258_p3 = scmp.lt.u32.totalorder %s15254_s23, %s15929_s6 }
  0x9f   :  { %p15260_p4 = pnand %p15258_p3, %p15255_p2 }
  0xa1   :  { %15263 = shalt.err (!%p15260_p4)
}
  0xa2   :  { %s15264_s4 = scalar_lea.vmem %s99_s7, 32  ;;  %p15269_p6 = scmp.lt.s32.totalorder %s99_s7, %s99_s7 }
  0xa3   :  { %p15265_p5 = scmp.ne.s32.totalorder %s99_s7, %s15264_s4  ;;  %p15270_p7 = scmp.lt.s32.totalorder %s15264_s4, %s15264_s4 }
  0xa5   :  { %p15271_p8 = por %p15270_p7, %p15269_p6 }
  0xa7   :  { %p15272_p9 = pnand %p15271_p8, %p15265_p5 }
  0xa9   :  { %15275 = shalt.err (!%p15272_p9)
}
  0xaa   :  { %101 = dma.hbm_to_vmem [thread:$0]  %s15929_s6, 32, %s99_s7, [#allocation12]  }
  0xab   :  { %s15276_s17 = scalar_lea.hbm %s15931_s8, 64 }
  0xac   :  { %p15277_p10 = scmp.ne.s32.totalorder %s15931_s8, %s15276_s17  ;;  %p15280_p11 = scmp.lt.u32.totalorder %s15276_s17, %s15931_s8 }
  0xae   :  { %p15282_p12 = pnand %p15280_p11, %p15277_p10 }
  0xb0   :  { %15285 = shalt.err (!%p15282_p12)
}
  0xb1   :  { %s15286_s26 = scalar_lea.vmem %s121_s14, 64  ;;  %p15291_p0 = scmp.lt.s32.totalorder %s121_s14, %s121_s14 }
  0xb2   :  { %p15287_p13 = scmp.ne.s32.totalorder %s121_s14, %s15286_s26  ;;  %p15292_p1 = scmp.lt.s32.totalorder %s15286_s26, %s15286_s26 }
  0xb4   :  { %p15293_p2 = por %p15292_p1, %p15291_p0 }
  0xb6   :  { %p15294_p3 = pnand %p15293_p2, %p15287_p13 }
  0xb8   :  { %15297 = shalt.err (!%p15294_p3)
}
  0xb9   :  { %123 = dma.hbm_to_vmem [thread:$0]  %s15931_s8, 64, %s121_s14, [#allocation15]  }
  0xba   :  { %s15397_s29 = smov [#allocation19]   ;;  %s15398_s11 = smov [#allocation22]  }
  0xbb   :  { %s142_s2 = sshll.u32 %s15397_s29, 4  ;;  %s164_s19 = sshll.u32 %s15398_s11, 4  ;;  %s143_s2 = int_to_ptr.vmem [resolvable:$true] %s142_s2  ;;  %s165_s19 = int_to_ptr.vmem [resolvable:$true] %s164_s19 }
  0xbc   :  { %s15298_s21 = scalar_lea.hbm %s15933_s10, 128 }
  0xbd   :  { %p15299_p4 = scmp.ne.s32.totalorder %s15933_s10, %s15298_s21  ;;  %p15302_p5 = scmp.lt.u32.totalorder %s15298_s21, %s15933_s10 }
  0xbf   :  { %p15304_p6 = pnand %p15302_p5, %p15299_p4 }
  0xc1   :  { %15307 = shalt.err (!%p15304_p6)
}
  0xc2   :  { %s15308_s8 = scalar_lea.vmem %s143_s2, 128  ;;  %p15313_p8 = scmp.lt.s32.totalorder %s143_s2, %s143_s2 }
  0xc3   :  { %p15309_p7 = scmp.ne.s32.totalorder %s143_s2, %s15308_s8  ;;  %p15314_p9 = scmp.lt.s32.totalorder %s15308_s8, %s15308_s8 }
  0xc5   :  { %p15315_p10 = por %p15314_p9, %p15313_p8 }
  0xc7   :  { %p15316_p11 = pnand %p15315_p10, %p15309_p7 }
  0xc9   :  { %15319 = shalt.err (!%p15316_p11)
}
  0xca   :  { %145 = dma.hbm_to_vmem [thread:$0]  %s15933_s10, 128, %s143_s2, [#allocation18]  }
  0xcb   :  { %s15320_s5 = scalar_lea.hbm %s15935_s12, 128 }
  0xcc   :  { %p15321_p12 = scmp.ne.s32.totalorder %s15935_s12, %s15320_s5  ;;  %p15324_p13 = scmp.lt.u32.totalorder %s15320_s5, %s15935_s12 }
  0xce   :  { %p15326_p0 = pnand %p15324_p13, %p15321_p12 }
  0xd0   :  { %15329 = shalt.err (!%p15326_p0)
}
  0xd1   :  { %s15330_s22 = scalar_lea.vmem %s165_s19, 128  ;;  %p15335_p2 = scmp.lt.s32.totalorder %s165_s19, %s165_s19 }
  0xd2   :  { %p15331_p1 = scmp.ne.s32.totalorder %s165_s19, %s15330_s22  ;;  %p15336_p3 = scmp.lt.s32.totalorder %s15330_s22, %s15330_s22 }
  0xd4   :  { %p15337_p4 = por %p15336_p3, %p15335_p2 }
  0xd6   :  { %p15338_p5 = pnand %p15337_p4, %p15331_p1 }
  0xd8   :  { %15341 = shalt.err (!%p15338_p5)
}
  0xd9   :  { %167 = dma.hbm_to_vmem [thread:$0]  %s15935_s12, 128, %s165_s19, [#allocation21]  }
  0xda   :  { %15364 = dma.done.wait [#allocation3], 1024  }
  0xdb   :  { %15365 = vsyncadd [#allocation3], 4294966272 }
  0xdc   :  { %15366 = dma.done.wait [#allocation6], 65664  }
  0xdd   :  { %15367 = vsyncadd [#allocation6], 4294901632 }
  0xde   :  { %15368 = dma.done.wait [#allocation9], 32832  }
  0xdf   :  { %15369 = vsyncadd [#allocation9], 4294934464 }
  0xe0   :  { %15370 = dma.done.wait [#allocation12], 8224  }
  0xe1   :  { %15371 = vsyncadd [#allocation12], 4294959072 }
  0xe2   :  { %15372 = dma.done.wait [#allocation15], 8256  }
  0xe3   :  { %15373 = vsyncadd [#allocation15], 4294959040 }
  0xe4   :  { %15374 = dma.done.wait [#allocation18], 32896  }
  0xe5   :  { %15375 = vsyncadd [#allocation18], 4294934400 }
  0xe6   :  { %15376 = dma.done.wait [#allocation21], 65664  }
  0xe7   :  { %15377 = vsyncadd [#allocation21], 4294901632  ;;  %v223_v0 = vld [vmem:[#allocation5] sm:$0xff]  ;;  %v224_v2 = vld [vmem:[#allocation5 + $0x8] sm:$0xff]  ;;  %s15399_s12 = smov [#allocation23]  }
  0xe8   :  { %v227_v1 = vld [vmem:[#allocation5 + $0x20] sm:$0xff]  ;;  %v228_v4 = vld [vmem:[#allocation5 + $0x28] sm:$0xff]  ;;  %s12593_s27 = sshll.u32 %s15399_s12, 4  ;;  %s12594_s27 = int_to_ptr.vmem [resolvable:$true] %s12593_s27 }
  0xe9   :  { %v12609_v3 = vcombine.high %v223_v0, %v227_v1  ;;  %v12608_v5 = vcombine.low %v223_v0, %v227_v1  ;;  %v231_v6 = vld [vmem:[#allocation5 + $0x40] sm:$0xff]  ;;  %v12611_v8 = vcombine.high %v224_v2, %v228_v4  ;;  %v12610_v9 = vcombine.low %v224_v2, %v228_v4  ;;  %v232_v11 = vld [vmem:[#allocation5 + $0x48] sm:$0xff]  ;;  %s15342_s1 = scalar_lea.vmem %s12594_s27, 1024  ;;  %p15347_p7 = scmp.lt.s32.totalorder %s12594_s27, %s12594_s27 }
  0xea   :  { %v235_v7 = vld [vmem:[#allocation5 + $0x60] sm:$0xff]  ;;  %v236_v12 = vld [vmem:[#allocation5 + $0x68] sm:$0xff]  ;;  %p15343_p6 = scmp.ne.s32.totalorder %s12594_s27, %s15342_s1  ;;  %p15348_p8 = scmp.lt.s32.totalorder %s15342_s1, %s15342_s1 }
  0xeb   :  { %v12617_v10 = vcombine.high %v231_v6, %v235_v7  ;;  %v239_v13 = vld [vmem:[#allocation5 + $0x80] sm:$0xff]  ;;  %3337 = vmatprep.subr.bf16.mxu0 %v12609_v3  ;;  %v12619_v14 = vcombine.high %v232_v11, %v236_v12  ;;  %v240_v16 = vld [vmem:[#allocation5 + $0x88] sm:$0xff]  ;;  %3501 = vmatprep.subr.bf16.mxu1 %v12611_v8  ;;  %v12616_v18 = vcombine.low %v231_v6, %v235_v7 }
  0xec   :  { %v243_v15 = vld [vmem:[#allocation5 + $0xa0] sm:$0xff]  ;;  %v244_v17 = vld [vmem:[#allocation5 + $0xa8] sm:$0xff]  ;;  %3338 = vmatpush1.bf16.msra.mxu0 %v12608_v5  ;;  %3502 = vmatpush1.bf16.msra.mxu1 %v12610_v9  ;;  %v12618_v19 = vcombine.low %v232_v11, %v236_v12  ;;  %p15349_p9 = por %p15348_p8, %p15347_p7 }
  0xed   :  { %3339 = vmatprep.subr.bf16.mxu0 %v12617_v10  ;;  %v12625_v20 = vcombine.high %v239_v13, %v243_v15  ;;  %3503 = vmatprep.subr.bf16.mxu1 %v12619_v14  ;;  %v12627_v21 = vcombine.high %v240_v16, %v244_v17  ;;  %v247_v22 = vld [vmem:[#allocation5 + $0xc0] sm:$0xff]  ;;  %v248_v24 = vld [vmem:[#allocation5 + $0xc8] sm:$0xff]  ;;  %v12624_v26 = vcombine.low %v239_v13, %v243_v15 }
  0xee   :  { %v251_v23 = vld [vmem:[#allocation5 + $0xe0] sm:$0xff]  ;;  %v252_v25 = vld [vmem:[#allocation5 + $0xe8] sm:$0xff]  ;;  %v12626_v27 = vcombine.low %v240_v16, %v244_v17  ;;  %p15350_p10 = pnand %p15349_p9, %p15343_p6 }
  0xef   :  { %v12633_v28 = vcombine.high %v247_v22, %v251_v23  ;;  %v12635_v29 = vcombine.high %v248_v24, %v252_v25  ;;  %v255_v30 = vld [vmem:[#allocation5 + $0x100] sm:$0xff]  ;;  %v256_v32 = vld [vmem:[#allocation5 + $0x108] sm:$0xff]  ;;  %v12632_v34 = vcombine.low %v247_v22, %v251_v23  ;;  %v12634_v35 = vcombine.low %v248_v24, %v252_v25 }
  0xf0   :  { %3340 = vmatpush1.bf16.msra.mxu0 %v12616_v18  ;;  %3504 = vmatpush1.bf16.msra.mxu1 %v12618_v19  ;;  %v259_v31 = vld [vmem:[#allocation5 + $0x120] sm:$0xff]  ;;  %v260_v33 = vld [vmem:[#allocation5 + $0x128] sm:$0xff] }
  0xf1   :  { %3341 = vmatprep.subr.bf16.mxu0 %v12625_v20  ;;  %3505 = vmatprep.subr.bf16.mxu1 %v12627_v21  ;;  %v12641_v36 = vcombine.high %v255_v30, %v259_v31  ;;  %v12643_v37 = vcombine.high %v256_v32, %v260_v33  ;;  %v263_v38 = vld [vmem:[#allocation5 + $0x140] sm:$0xff]  ;;  %v264_v40 = vld [vmem:[#allocation5 + $0x148] sm:$0xff]  ;;  %v12640_v42 = vcombine.low %v255_v30, %v259_v31 }
  0xf2   :  { %v267_v39 = vld [vmem:[#allocation5 + $0x160] sm:$0xff]  ;;  %v268_v41 = vld [vmem:[#allocation5 + $0x168] sm:$0xff]  ;;  %v12642_v43 = vcombine.low %v256_v32, %v260_v33 }
  0xf3   :  { %v12649_v44 = vcombine.high %v263_v38, %v267_v39  ;;  %v12651_v45 = vcombine.high %v264_v40, %v268_v41  ;;  %v271_v46 = vld [vmem:[#allocation5 + $0x180] sm:$0xff]  ;;  %v272_v48 = vld [vmem:[#allocation5 + $0x188] sm:$0xff]  ;;  %v12648_v50 = vcombine.low %v263_v38, %v267_v39  ;;  %v12650_v51 = vcombine.low %v264_v40, %v268_v41 }
  0xf4   :  { %3342 = vmatpush1.bf16.msra.mxu0 %v12624_v26  ;;  %3506 = vmatpush1.bf16.msra.mxu1 %v12626_v27  ;;  %v275_v47 = vld [vmem:[#allocation5 + $0x1a0] sm:$0xff]  ;;  %v276_v49 = vld [vmem:[#allocation5 + $0x1a8] sm:$0xff] }
  0xf5   :  { %3343 = vmatprep.subr.bf16.mxu0 %v12633_v28  ;;  %3507 = vmatprep.subr.bf16.mxu1 %v12635_v29  ;;  %v12657_v52 = vcombine.high %v271_v46, %v275_v47  ;;  %v208_v53 = vld [vmem:[#allocation2 + $0x8] sm:$0xff]  ;;  %v12659_v54 = vcombine.high %v272_v48, %v276_v49  ;;  %v279_v55 = vld [vmem:[#allocation5 + $0x1c0] sm:$0xff]  ;;  %v12656_v60 = vcombine.low %v271_v46, %v275_v47 }
  0xf6   :  { %v283_v56 = vld [vmem:[#allocation5 + $0x1e0] sm:$0xff]  ;;  %v15641_v57 = vpack.c.bf16 %v208_v53, %v208_v53  ;;  %v280_v58 = vld [vmem:[#allocation5 + $0x1c8] sm:$0xff]  ;;  %v12658_v61 = vcombine.low %v272_v48, %v276_v49 }
  0xf7   :  { %v284_v59 = vld [vmem:[#allocation5 + $0x1e8] sm:$0xff]  ;;  %v12665_v62 = vcombine.high %v279_v55, %v283_v56  ;;  %v287_v0 = vld [vmem:[#allocation5 + $0x200] sm:$0xff]  ;;  %v12664_v4 = vcombine.low %v279_v55, %v283_v56 }
  0xf8   :  { %3344 = vmatpush1.bf16.msra.mxu0 %v12632_v34  ;;  %3508 = vmatpush1.bf16.msra.mxu1 %v12634_v35  ;;  %v12667_v63 = vcombine.high %v280_v58, %v284_v59  ;;  %v291_v1 = vld [vmem:[#allocation5 + $0x220] sm:$0xff]  ;;  %v288_v2 = vld [vmem:[#allocation5 + $0x208] sm:$0xff]  ;;  %v12666_v5 = vcombine.low %v280_v58, %v284_v59 }
  0xf9   :  { %3345 = vmatprep.subr.bf16.mxu0 %v12641_v36  ;;  %3509 = vmatprep.subr.bf16.mxu1 %v12643_v37  ;;  %v292_v3 = vld [vmem:[#allocation5 + $0x228] sm:$0xff]  ;;  %v12673_v6 = vcombine.high %v287_v0, %v291_v1  ;;  %v295_v8 = vld [vmem:[#allocation5 + $0x240] sm:$0xff]  ;;  %v12672_v12 = vcombine.low %v287_v0, %v291_v1 }
  0xfa   :  { %3369 = vmatprep.mubr.bf16.mxu0 %v15641_v57  ;;  %3533 = vmatprep.mubr.bf16.mxu1 %v15641_v57  ;;  %v12675_v7 = vcombine.high %v288_v2, %v292_v3  ;;  %v299_v9 = vld [vmem:[#allocation5 + $0x260] sm:$0xff]  ;;  %v296_v10 = vld [vmem:[#allocation5 + $0x248] sm:$0xff]  ;;  %v12674_v13 = vcombine.low %v288_v2, %v292_v3 }
  0xfb   :  { %v300_v11 = vld [vmem:[#allocation5 + $0x268] sm:$0xff]  ;;  %v12681_v14 = vcombine.high %v295_v8, %v299_v9  ;;  %v303_v16 = vld [vmem:[#allocation5 + $0x280] sm:$0xff]  ;;  %v12680_v20 = vcombine.low %v295_v8, %v299_v9 }
  0xfc   :  { %3346 = vmatpush1.bf16.msra.mxu0 %v12640_v42  ;;  %3510 = vmatpush1.bf16.msra.mxu1 %v12642_v43  ;;  %v12683_v15 = vcombine.high %v296_v10, %v300_v11  ;;  %v307_v17 = vld [vmem:[#allocation5 + $0x2a0] sm:$0xff]  ;;  %v304_v18 = vld [vmem:[#allocation5 + $0x288] sm:$0xff]  ;;  %v12682_v21 = vcombine.low %v296_v10, %v300_v11 }
  0xfd   :  { %3347 = vmatprep.subr.bf16.mxu0 %v12649_v44  ;;  %3511 = vmatprep.subr.bf16.mxu1 %v12651_v45  ;;  %v308_v19 = vld [vmem:[#allocation5 + $0x2a8] sm:$0xff]  ;;  %v12689_v22 = vcombine.high %v303_v16, %v307_v17  ;;  %v311_v24 = vld [vmem:[#allocation5 + $0x2c0] sm:$0xff]  ;;  %v12688_v28 = vcombine.low %v303_v16, %v307_v17 }
  0xfe   :  { %v12691_v23 = vcombine.high %v304_v18, %v308_v19  ;;  %v315_v25 = vld [vmem:[#allocation5 + $0x2e0] sm:$0xff]  ;;  %v312_v26 = vld [vmem:[#allocation5 + $0x2c8] sm:$0xff]  ;;  %v12690_v29 = vcombine.low %v304_v18, %v308_v19 }
  0xff   :  { %v316_v27 = vld [vmem:[#allocation5 + $0x2e8] sm:$0xff]  ;;  %v12697_v30 = vcombine.high %v311_v24, %v315_v25  ;;  %v319_v32 = vld [vmem:[#allocation5 + $0x300] sm:$0xff]  ;;  %v12696_v36 = vcombine.low %v311_v24, %v315_v25 }
 0x100   :  { %3348 = vmatpush1.bf16.msra.mxu0 %v12648_v50  ;;  %3512 = vmatpush1.bf16.msra.mxu1 %v12650_v51  ;;  %v12699_v31 = vcombine.high %v312_v26, %v316_v27  ;;  %v323_v33 = vld [vmem:[#allocation5 + $0x320] sm:$0xff]  ;;  %v320_v34 = vld [vmem:[#allocation5 + $0x308] sm:$0xff]  ;;  %v12698_v37 = vcombine.low %v312_v26, %v316_v27 }
 0x101   :  { %3349 = vmatprep.subr.bf16.mxu0 %v12657_v52  ;;  %3513 = vmatprep.subr.bf16.mxu1 %v12659_v54  ;;  %v324_v35 = vld [vmem:[#allocation5 + $0x328] sm:$0xff]  ;;  %v12705_v38 = vcombine.high %v319_v32, %v323_v33  ;;  %v327_v40 = vld [vmem:[#allocation5 + $0x340] sm:$0xff]  ;;  %v12704_v44 = vcombine.low %v319_v32, %v323_v33 }
 0x102   :  { %v12707_v39 = vcombine.high %v320_v34, %v324_v35  ;;  %v331_v41 = vld [vmem:[#allocation5 + $0x360] sm:$0xff]  ;;  %v328_v42 = vld [vmem:[#allocation5 + $0x348] sm:$0xff]  ;;  %v12706_v45 = vcombine.low %v320_v34, %v324_v35 }
 0x103   :  { %v332_v43 = vld [vmem:[#allocation5 + $0x368] sm:$0xff]  ;;  %v12713_v46 = vcombine.high %v327_v40, %v331_v41  ;;  %v335_v48 = vld [vmem:[#allocation5 + $0x380] sm:$0xff]  ;;  %v12712_v52 = vcombine.low %v327_v40, %v331_v41 }
 0x104   :  { %3350 = vmatpush1.bf16.msra.mxu0 %v12656_v60  ;;  %3514 = vmatpush1.bf16.msra.mxu1 %v12658_v61  ;;  %v12715_v47 = vcombine.high %v328_v42, %v332_v43  ;;  %v339_v49 = vld [vmem:[#allocation5 + $0x3a0] sm:$0xff]  ;;  %v336_v50 = vld [vmem:[#allocation5 + $0x388] sm:$0xff]  ;;  %v12714_v53 = vcombine.low %v328_v42, %v332_v43 }
 0x105   :  { %3351 = vmatprep.subr.bf16.mxu0 %v12665_v62  ;;  %3515 = vmatprep.subr.bf16.mxu1 %v12667_v63  ;;  %v340_v51 = vld [vmem:[#allocation5 + $0x3a8] sm:$0xff]  ;;  %v12721_v54 = vcombine.high %v335_v48, %v339_v49  ;;  %v343_v56 = vld [vmem:[#allocation5 + $0x3c0] sm:$0xff]  ;;  %v12720_v61 = vcombine.low %v335_v48, %v339_v49 }
 0x106   :  { %v12723_v55 = vcombine.high %v336_v50, %v340_v51  ;;  %v347_v58 = vld [vmem:[#allocation5 + $0x3e0] sm:$0xff]  ;;  %v344_v59 = vld [vmem:[#allocation5 + $0x3c8] sm:$0xff]  ;;  %v12722_v62 = vcombine.low %v336_v50, %v340_v51 }
 0x107   :  { %v348_v60 = vld [vmem:[#allocation5 + $0x3e8] sm:$0xff]  ;;  %v12729_v63 = vcombine.high %v343_v56, %v347_v58  ;;  %v351_v1 = vld [vmem:[#allocation5 + $0x400] sm:$0xff] }
 0x108   :  { %3352 = vmatpush1.bf16.msra.mxu0 %v12664_v4  ;;  %3516 = vmatpush1.bf16.msra.mxu1 %v12666_v5  ;;  %v12731_v0 = vcombine.high %v344_v59, %v348_v60  ;;  %v355_v2 = vld [vmem:[#allocation5 + $0x420] sm:$0xff]  ;;  %v352_v3 = vld [vmem:[#allocation5 + $0x408] sm:$0xff]  ;;  %v12728_v5 = vcombine.low %v343_v56, %v347_v58 }
 0x109   :  { %3353 = vmatprep.subr.bf16.mxu0 %v12673_v6  ;;  %3517 = vmatprep.subr.bf16.mxu1 %v12675_v7  ;;  %v356_v4 = vld [vmem:[#allocation5 + $0x428] sm:$0xff]  ;;  %v207_v6 = vld [vmem:[#allocation2] sm:$0xff]  ;;  %v12730_v7 = vcombine.low %v344_v59, %v348_v60  ;;  %v12737_v8 = vcombine.high %v351_v1, %v355_v2  ;;  %v12736_v16 = vcombine.low %v351_v1, %v355_v2 }
 0x10a   :  { %v12739_v9 = vcombine.high %v352_v3, %v356_v4  ;;  %v359_v10 = vld [vmem:[#allocation5 + $0x440] sm:$0xff]  ;;  %v12738_v17 = vcombine.low %v352_v3, %v356_v4  ;;  %v372_v24 = vld [vmem:[#allocation5 + $0x4a8] sm:$0xff] }
 0x10b   :  { %v363_v11 = vld [vmem:[#allocation5 + $0x460] sm:$0xff]  ;;  %v380_v32 = vld [vmem:[#allocation5 + $0x4e8] sm:$0xff] }
 0x10c   :  { %3354 = vmatpush1.bf16.msra.mxu0 %v12672_v12  ;;  %3518 = vmatpush1.bf16.msra.mxu1 %v12674_v13  ;;  %v15645_v12 = vpack.c.bf16 %v207_v6, %v207_v6  ;;  %v360_v13 = vld [vmem:[#allocation5 + $0x448] sm:$0xff]  ;;  %v12745_v18 = vcombine.high %v359_v10, %v363_v11  ;;  %v12744_v25 = vcombine.low %v359_v10, %v363_v11  ;;  %v419_v6 = vld [vmem:[#allocation5 + $0x620] sm:$0xff] }
 0x10d   :  { %3355 = vmatprep.subr.bf16.mxu0 %v12681_v14  ;;  %3519 = vmatprep.subr.bf16.mxu1 %v12683_v15  ;;  %v364_v14 = vld [vmem:[#allocation5 + $0x468] sm:$0xff]  ;;  %v210_v15 = vld [vmem:[#allocation2 + $0x18] sm:$0xff] }
 0x10e   :  { %v12747_v19 = vcombine.high %v360_v13, %v364_v14  ;;  %v12746_v26 = vcombine.low %v360_v13, %v364_v14  ;;  %v388_v40 = vld [vmem:[#allocation5 + $0x528] sm:$0xff]  ;;  %v423_v14 = vld [vmem:[#allocation5 + $0x640] sm:$0xff] }
 0x10f   :  { %v396_v48 = vld [vmem:[#allocation5 + $0x568] sm:$0xff] }
 0x110   :  { %3356 = vmatpush1.bf16.msra.mxu0 %v12680_v20  ;;  %3520 = vmatpush1.bf16.msra.mxu1 %v12682_v21  ;;  %v367_v20 = vld [vmem:[#allocation5 + $0x480] sm:$0xff]  ;;  %v404_v56 = vld [vmem:[#allocation5 + $0x5a8] sm:$0xff] }
 0x111   :  { %3357 = vmatprep.subr.bf16.mxu0 %v12689_v22  ;;  %3521 = vmatprep.subr.bf16.mxu1 %v12691_v23  ;;  %v371_v21 = vld [vmem:[#allocation5 + $0x4a0] sm:$0xff]  ;;  %v368_v22 = vld [vmem:[#allocation5 + $0x488] sm:$0xff]  ;;  %v15647_v23 = vpack.c.bf16 %v210_v15, %v210_v15 }
 0x112   :  { %v12753_v27 = vcombine.high %v367_v20, %v371_v21  ;;  %v12752_v33 = vcombine.low %v367_v20, %v371_v21  ;;  %v12754_v34 = vcombine.low %v368_v22, %v372_v24  ;;  %v412_v1 = vld [vmem:[#allocation5 + $0x5e8] sm:$0xff]  ;;  %v427_v15 = vld [vmem:[#allocation5 + $0x660] sm:$0xff] }
 0x113   :  { %v12809_v21 = vcombine.high %v423_v14, %v427_v15 }
 0x114   :  { %3358 = vmatpush1.bf16.msra.mxu0 %v12688_v28  ;;  %3522 = vmatpush1.bf16.msra.mxu1 %v12690_v29  ;;  %v375_v28 = vld [vmem:[#allocation5 + $0x4c0] sm:$0xff] }
 0x115   :  { %3359 = vmatprep.subr.bf16.mxu0 %v12697_v30  ;;  %3523 = vmatprep.subr.bf16.mxu1 %v12699_v31  ;;  %v379_v29 = vld [vmem:[#allocation5 + $0x4e0] sm:$0xff]  ;;  %v376_v30 = vld [vmem:[#allocation5 + $0x4c8] sm:$0xff]  ;;  %v12755_v31 = vcombine.high %v368_v22, %v372_v24 }
 0x116   :  { %v12761_v35 = vcombine.high %v375_v28, %v379_v29  ;;  %v12760_v41 = vcombine.low %v375_v28, %v379_v29  ;;  %v12762_v42 = vcombine.low %v376_v30, %v380_v32  ;;  %v431_v22 = vld [vmem:[#allocation5 + $0x680] sm:$0xff]  ;;  %v12808_v28 = vcombine.low %v423_v14, %v427_v15  ;;  %v209_v14 = vld [vmem:[#allocation2 + $0x10] sm:$0xff] }
 0x117   :  { %v435_v24 = vld [vmem:[#allocation5 + $0x6a0] sm:$0xff] }
 0x118   :  { %3360 = vmatpush1.bf16.msra.mxu0 %v12696_v36  ;;  %3524 = vmatpush1.bf16.msra.mxu1 %v12698_v37  ;;  %v383_v36 = vld [vmem:[#allocation5 + $0x500] sm:$0xff] }
 0x119   :  { %3361 = vmatprep.subr.bf16.mxu0 %v12705_v38  ;;  %3525 = vmatprep.subr.bf16.mxu1 %v12707_v39  ;;  %v387_v37 = vld [vmem:[#allocation5 + $0x520] sm:$0xff]  ;;  %v384_v38 = vld [vmem:[#allocation5 + $0x508] sm:$0xff]  ;;  %v12763_v39 = vcombine.high %v376_v30, %v380_v32  ;;  %v12817_v30 = vcombine.high %v431_v22, %v435_v24 }
 0x11a   :  { %v12769_v43 = vcombine.high %v383_v36, %v387_v37  ;;  %v12768_v49 = vcombine.low %v383_v36, %v387_v37  ;;  %v12770_v50 = vcombine.low %v384_v38, %v388_v40  ;;  %v443_v32 = vld [vmem:[#allocation5 + $0x6e0] sm:$0xff]  ;;  %v12816_v36 = vcombine.low %v431_v22, %v435_v24  ;;  %v212_v24 = vld [vmem:[#allocation2 + $0x28] sm:$0xff] }
 0x11c   :  { %3362 = vmatpush1.bf16.msra.mxu0 %v12704_v44  ;;  %3526 = vmatpush1.bf16.msra.mxu1 %v12706_v45  ;;  %v391_v44 = vld [vmem:[#allocation5 + $0x540] sm:$0xff] }
 0x11d   :  { %3363 = vmatprep.subr.bf16.mxu0 %v12713_v46  ;;  %3527 = vmatprep.subr.bf16.mxu1 %v12715_v47  ;;  %v395_v45 = vld [vmem:[#allocation5 + $0x560] sm:$0xff]  ;;  %v392_v46 = vld [vmem:[#allocation5 + $0x548] sm:$0xff]  ;;  %v12771_v47 = vcombine.high %v384_v38, %v388_v40 }
 0x11e   :  { %v12777_v51 = vcombine.high %v391_v44, %v395_v45  ;;  %v12776_v58 = vcombine.low %v391_v44, %v395_v45  ;;  %v12778_v59 = vcombine.low %v392_v46, %v396_v48  ;;  %v451_v40 = vld [vmem:[#allocation5 + $0x720] sm:$0xff] }
 0x120   :  { %3364 = vmatpush1.bf16.msra.mxu0 %v12712_v52  ;;  %3528 = vmatpush1.bf16.msra.mxu1 %v12714_v53  ;;  %v399_v52 = vld [vmem:[#allocation5 + $0x580] sm:$0xff] }
 0x121   :  { %3365 = vmatprep.subr.bf16.mxu0 %v12721_v54  ;;  %3529 = vmatprep.subr.bf16.mxu1 %v12723_v55  ;;  %v403_v53 = vld [vmem:[#allocation5 + $0x5a0] sm:$0xff]  ;;  %v400_v54 = vld [vmem:[#allocation5 + $0x588] sm:$0xff]  ;;  %v12779_v55 = vcombine.high %v392_v46, %v396_v48 }
 0x122   :  { %v12785_v60 = vcombine.high %v399_v52, %v403_v53  ;;  %v12784_v2 = vcombine.low %v399_v52, %v403_v53  ;;  %v12786_v3 = vcombine.low %v400_v54, %v404_v56  ;;  %v459_v48 = vld [vmem:[#allocation5 + $0x760] sm:$0xff] }
 0x124   :  { %3366 = vmatpush1.bf16.msra.mxu0 %v12720_v61  ;;  %3530 = vmatpush1.bf16.msra.mxu1 %v12722_v62  ;;  %v407_v61 = vld [vmem:[#allocation5 + $0x5c0] sm:$0xff] }
 0x125   :  { %3367 = vmatprep.subr.bf16.mxu0 %v12729_v63  ;;  %3531 = vmatprep.subr.bf16.mxu1 %v12731_v0  ;;  %v411_v62 = vld [vmem:[#allocation5 + $0x5e0] sm:$0xff]  ;;  %v408_v63 = vld [vmem:[#allocation5 + $0x5c8] sm:$0xff]  ;;  %v12787_v0 = vcombine.high %v400_v54, %v404_v56 }
 0x126   :  { %v12793_v4 = vcombine.high %v407_v61, %v411_v62  ;;  %v12792_v10 = vcombine.low %v407_v61, %v411_v62  ;;  %v12794_v11 = vcombine.low %v408_v63, %v412_v1  ;;  %v467_v56 = vld [vmem:[#allocation5 + $0x7a0] sm:$0xff] }
 0x128   :  { %3368 = vmatpush1.bf16.msra.mxu0 %v12728_v5  ;;  %3532 = vmatpush1.bf16.msra.mxu1 %v12730_v7  ;;  %v415_v5 = vld [vmem:[#allocation5 + $0x600] sm:$0xff]  ;;  %v416_v7 = vld [vmem:[#allocation5 + $0x608] sm:$0xff] }
 0x129   :  { %3378 = vmatprep.subr.bf16.mxu0 %v12737_v8  ;;  %3542 = vmatprep.subr.bf16.mxu1 %v12739_v9  ;;  %v12795_v8 = vcombine.high %v408_v63, %v412_v1  ;;  %v420_v9 = vld [vmem:[#allocation5 + $0x628] sm:$0xff]  ;;  %v12801_v13 = vcombine.high %v415_v5, %v419_v6  ;;  %v475_v1 = vld [vmem:[#allocation5 + $0x7e0] sm:$0xff] }
 0x12a   :  { %v12802_v20 = vcombine.low %v416_v7, %v420_v9 }
 0x12b   :  { %3370 = vmatmul.mubr.bf16.vlgmr.msra.gmra.mrb[0].mxu0 %v15645_v12  ;;  %3534 = vmatmul.mubr.bf16.vlgmr.msra.gmra.mrb[0].mxu1 %v15645_v12 }
 0x12c   :  { %3379 = vmatpush1.bf16.msra.mxu0 %v12736_v16  ;;  %3543 = vmatpush1.bf16.msra.mxu1 %v12738_v17  ;;  %v424_v16 = vld [vmem:[#allocation5 + $0x648] sm:$0xff]  ;;  %v12803_v17 = vcombine.high %v416_v7, %v420_v9  ;;  %v483_v9 = vld [vmem:[#allocation5 + $0x820] sm:$0xff] }
 0x12d   :  { %3380 = vmatprep.subr.bf16.mxu0 %v12745_v18  ;;  %3544 = vmatprep.subr.bf16.mxu1 %v12747_v19  ;;  %v428_v18 = vld [vmem:[#allocation5 + $0x668] sm:$0xff]  ;;  %v12800_v19 = vcombine.low %v415_v5, %v419_v6  ;;  %v479_v6 = vld [vmem:[#allocation5 + $0x800] sm:$0xff] }
 0x12e   :  { %3410 = vmatprep.mubr.bf16.mxu0 %v15647_v23  ;;  %3574 = vmatprep.mubr.bf16.mxu1 %v15647_v23  ;;  %v12810_v29 = vcombine.low %v424_v16, %v428_v18 }
 0x130   :  { %3381 = vmatpush1.bf16.msra.mxu0 %v12744_v25  ;;  %3545 = vmatpush1.bf16.msra.mxu1 %v12746_v26  ;;  %v432_v25 = vld [vmem:[#allocation5 + $0x688] sm:$0xff]  ;;  %v12811_v26 = vcombine.high %v424_v16, %v428_v18  ;;  %v487_v16 = vld [vmem:[#allocation5 + $0x840] sm:$0xff]  ;;  %v12865_v18 = vcombine.high %v479_v6, %v483_v9 }
 0x131   :  { %3382 = vmatprep.subr.bf16.mxu0 %v12753_v27  ;;  %3546 = vmatprep.subr.bf16.mxu1 %v12755_v31  ;;  %v436_v27 = vld [vmem:[#allocation5 + $0x6a8] sm:$0xff]  ;;  %v439_v31 = vld [vmem:[#allocation5 + $0x6c0] sm:$0xff] }
 0x132   :  { %v12818_v37 = vcombine.low %v432_v25, %v436_v27  ;;  %v12825_v38 = vcombine.high %v439_v31, %v443_v32  ;;  %v12824_v44 = vcombine.low %v439_v31, %v443_v32  ;;  %v496_v32 = vld [vmem:[#allocation5 + $0x888] sm:$0xff] }
 0x134   :  { %3383 = vmatpush1.bf16.msra.mxu0 %v12752_v33  ;;  %3547 = vmatpush1.bf16.msra.mxu1 %v12754_v34  ;;  %v440_v33 = vld [vmem:[#allocation5 + $0x6c8] sm:$0xff]  ;;  %v12819_v34 = vcombine.high %v432_v25, %v436_v27  ;;  %v15653_v25 = vpack.c.bf16 %v209_v14, %v209_v14 }
 0x135   :  { %3384 = vmatprep.subr.bf16.mxu0 %v12761_v35  ;;  %3548 = vmatprep.subr.bf16.mxu1 %v12763_v39  ;;  %v444_v35 = vld [vmem:[#allocation5 + $0x6e8] sm:$0xff]  ;;  %v447_v39 = vld [vmem:[#allocation5 + $0x700] sm:$0xff] }
 0x136   :  { %v12826_v45 = vcombine.low %v440_v33, %v444_v35  ;;  %v12833_v46 = vcombine.high %v447_v39, %v451_v40  ;;  %v12832_v52 = vcombine.low %v447_v39, %v451_v40  ;;  %v507_v39 = vld [vmem:[#allocation5 + $0x8e0] sm:$0xff]  ;;  %v504_v40 = vld [vmem:[#allocation5 + $0x8c8] sm:$0xff] }
 0x138   :  { %3385 = vmatpush1.bf16.msra.mxu0 %v12760_v41  ;;  %3549 = vmatpush1.bf16.msra.mxu1 %v12762_v42  ;;  %v448_v41 = vld [vmem:[#allocation5 + $0x708] sm:$0xff]  ;;  %v12827_v42 = vcombine.high %v440_v33, %v444_v35 }
 0x139   :  { %3386 = vmatprep.subr.bf16.mxu0 %v12769_v43  ;;  %3550 = vmatprep.subr.bf16.mxu1 %v12771_v47  ;;  %v452_v43 = vld [vmem:[#allocation5 + $0x728] sm:$0xff]  ;;  %v455_v47 = vld [vmem:[#allocation5 + $0x740] sm:$0xff] }
 0x13a   :  { %v12834_v53 = vcombine.low %v448_v41, %v452_v43  ;;  %v12841_v54 = vcombine.high %v455_v47, %v459_v48  ;;  %v12840_v61 = vcombine.low %v455_v47, %v459_v48  ;;  %v500_v33 = vld [vmem:[#allocation5 + $0x8a8] sm:$0xff]  ;;  %v515_v47 = vld [vmem:[#allocation5 + $0x920] sm:$0xff] }
 0x13b   :  { %v512_v48 = vld [vmem:[#allocation5 + $0x908] sm:$0xff] }
 0x13c   :  { %3387 = vmatpush1.bf16.msra.mxu0 %v12768_v49  ;;  %3551 = vmatpush1.bf16.msra.mxu1 %v12770_v50  ;;  %v456_v49 = vld [vmem:[#allocation5 + $0x748] sm:$0xff]  ;;  %v12835_v50 = vcombine.high %v448_v41, %v452_v43  ;;  %v12883_v41 = vcombine.high %v496_v32, %v500_v33 }
 0x13d   :  { %3388 = vmatprep.subr.bf16.mxu0 %v12777_v51  ;;  %3552 = vmatprep.subr.bf16.mxu1 %v12779_v55  ;;  %v460_v51 = vld [vmem:[#allocation5 + $0x768] sm:$0xff]  ;;  %v463_v55 = vld [vmem:[#allocation5 + $0x780] sm:$0xff] }
 0x13e   :  { %v12842_v62 = vcombine.low %v456_v49, %v460_v51  ;;  %v12849_v63 = vcombine.high %v463_v55, %v467_v56  ;;  %v12848_v5 = vcombine.low %v463_v55, %v467_v56  ;;  %v523_v55 = vld [vmem:[#allocation5 + $0x960] sm:$0xff]  ;;  %v520_v56 = vld [vmem:[#allocation5 + $0x948] sm:$0xff] }
 0x140   :  { %3389 = vmatpush1.bf16.msra.mxu0 %v12776_v58  ;;  %3553 = vmatpush1.bf16.msra.mxu1 %v12778_v59  ;;  %v464_v58 = vld [vmem:[#allocation5 + $0x788] sm:$0xff]  ;;  %v12843_v59 = vcombine.high %v456_v49, %v460_v51 }
 0x141   :  { %3390 = vmatprep.subr.bf16.mxu0 %v12785_v60  ;;  %3554 = vmatprep.subr.bf16.mxu1 %v12787_v0  ;;  %v468_v60 = vld [vmem:[#allocation5 + $0x7a8] sm:$0xff]  ;;  %v471_v0 = vld [vmem:[#allocation5 + $0x7c0] sm:$0xff] }
 0x142   :  { %v12850_v7 = vcombine.low %v464_v58, %v468_v60  ;;  %v12856_v15 = vcombine.low %v471_v0, %v475_v1 }
 0x144   :  { %3391 = vmatpush1.bf16.msra.mxu0 %v12784_v2  ;;  %3555 = vmatpush1.bf16.msra.mxu1 %v12786_v3  ;;  %v472_v2 = vld [vmem:[#allocation5 + $0x7c8] sm:$0xff]  ;;  %v12851_v3 = vcombine.high %v464_v58, %v468_v60 }
 0x145   :  { %3392 = vmatprep.subr.bf16.mxu0 %v12793_v4  ;;  %3556 = vmatprep.subr.bf16.mxu1 %v12795_v8  ;;  %v476_v4 = vld [vmem:[#allocation5 + $0x7e8] sm:$0xff]  ;;  %v12857_v8 = vcombine.high %v471_v0, %v475_v1  ;;  %v531_v0 = vld [vmem:[#allocation5 + $0x9a0] sm:$0xff] }
 0x146   :  { %v528_v1 = vld [vmem:[#allocation5 + $0x988] sm:$0xff] }
 0x148   :  { %3393 = vmatpush1.bf16.msra.mxu0 %v12792_v10  ;;  %3557 = vmatpush1.bf16.msra.mxu1 %v12794_v11  ;;  %v480_v10 = vld [vmem:[#allocation5 + $0x808] sm:$0xff] }
 0x149   :  { %3394 = vmatprep.subr.bf16.mxu0 %v12801_v13  ;;  %3558 = vmatprep.subr.bf16.mxu1 %v12803_v17  ;;  %v484_v11 = vld [vmem:[#allocation5 + $0x828] sm:$0xff]  ;;  %v12859_v13 = vcombine.high %v472_v2, %v476_v4  ;;  %v12858_v17 = vcombine.low %v472_v2, %v476_v4 }
 0x14a   :  { %v12867_v22 = vcombine.high %v480_v10, %v484_v11  ;;  %v12866_v27 = vcombine.low %v480_v10, %v484_v11  ;;  %v540_v11 = vld [vmem:[#allocation5 + $0x9e8] sm:$0xff] }
 0x14c   :  { %3395 = vmatpush1.bf16.msra.mxu0 %v12800_v19  ;;  %3559 = vmatpush1.bf16.msra.mxu1 %v12802_v20  ;;  %v491_v19 = vld [vmem:[#allocation5 + $0x860] sm:$0xff]  ;;  %v488_v20 = vld [vmem:[#allocation5 + $0x848] sm:$0xff] }
 0x14d   :  { %3396 = vmatprep.subr.bf16.mxu0 %v12809_v21  ;;  %3560 = vmatprep.subr.bf16.mxu1 %v12811_v26  ;;  %v492_v21 = vld [vmem:[#allocation5 + $0x868] sm:$0xff]  ;;  %v12864_v26 = vcombine.low %v479_v6, %v483_v9  ;;  %v12872_v35 = vcombine.low %v487_v16, %v491_v19 }
 0x14e   :  { %v12875_v31 = vcombine.high %v488_v20, %v492_v21  ;;  %v536_v9 = vld [vmem:[#allocation5 + $0x9c8] sm:$0xff] }
 0x150   :  { %3397 = vmatpush1.bf16.msra.mxu0 %v12808_v28  ;;  %3561 = vmatpush1.bf16.msra.mxu1 %v12810_v29  ;;  %v12873_v28 = vcombine.high %v487_v16, %v491_v19  ;;  %v495_v29 = vld [vmem:[#allocation5 + $0x880] sm:$0xff]  ;;  %v12923_v19 = vcombine.high %v536_v9, %v540_v11 }
 0x151   :  { %3398 = vmatprep.subr.bf16.mxu0 %v12817_v30  ;;  %3562 = vmatprep.subr.bf16.mxu1 %v12819_v34  ;;  %v499_v30 = vld [vmem:[#allocation5 + $0x8a0] sm:$0xff]  ;;  %v15655_v34 = vpack.c.bf16 %v212_v24, %v212_v24 }
 0x152   :  { %v12880_v43 = vcombine.low %v495_v29, %v499_v30  ;;  %v543_v16 = vld [vmem:[#allocation5 + $0xa00] sm:$0xff] }
 0x154   :  { %3399 = vmatpush1.bf16.msra.mxu0 %v12816_v36  ;;  %3563 = vmatpush1.bf16.msra.mxu1 %v12818_v37  ;;  %v12874_v36 = vcombine.low %v488_v20, %v492_v21  ;;  %v12881_v37 = vcombine.high %v495_v29, %v499_v30  ;;  %v548_v20 = vld [vmem:[#allocation5 + $0xa28] sm:$0xff] }
 0x155   :  { %3400 = vmatprep.subr.bf16.mxu0 %v12825_v38  ;;  %3564 = vmatprep.subr.bf16.mxu1 %v12827_v42  ;;  %v503_v38 = vld [vmem:[#allocation5 + $0x8c0] sm:$0xff]  ;;  %v508_v42 = vld [vmem:[#allocation5 + $0x8e8] sm:$0xff] }
 0x156   :  { %v12891_v49 = vcombine.high %v504_v40, %v508_v42  ;;  %v12888_v51 = vcombine.low %v503_v38, %v507_v39  ;;  %v556_v30 = vld [vmem:[#allocation5 + $0xa68] sm:$0xff] }
 0x158   :  { %3401 = vmatpush1.bf16.msra.mxu0 %v12824_v44  ;;  %3565 = vmatpush1.bf16.msra.mxu1 %v12826_v45  ;;  %v12882_v44 = vcombine.low %v496_v32, %v500_v33  ;;  %v12889_v45 = vcombine.high %v503_v38, %v507_v39  ;;  %v564_v39 = vld [vmem:[#allocation5 + $0xaa8] sm:$0xff] }
 0x159   :  { %3402 = vmatprep.subr.bf16.mxu0 %v12833_v46  ;;  %3566 = vmatprep.subr.bf16.mxu1 %v12835_v50  ;;  %v511_v46 = vld [vmem:[#allocation5 + $0x900] sm:$0xff]  ;;  %v516_v50 = vld [vmem:[#allocation5 + $0x928] sm:$0xff] }
 0x15a   :  { %v12899_v58 = vcombine.high %v512_v48, %v516_v50  ;;  %v12896_v60 = vcombine.low %v511_v46, %v515_v47 }
 0x15c   :  { %3403 = vmatpush1.bf16.msra.mxu0 %v12832_v52  ;;  %3567 = vmatpush1.bf16.msra.mxu1 %v12834_v53  ;;  %v12890_v52 = vcombine.low %v504_v40, %v508_v42  ;;  %v12897_v53 = vcombine.high %v511_v46, %v515_v47  ;;  %v572_v47 = vld [vmem:[#allocation5 + $0xae8] sm:$0xff] }
 0x15d   :  { %3404 = vmatprep.subr.bf16.mxu0 %v12841_v54  ;;  %3568 = vmatprep.subr.bf16.mxu1 %v12843_v59  ;;  %v519_v54 = vld [vmem:[#allocation5 + $0x940] sm:$0xff]  ;;  %v524_v59 = vld [vmem:[#allocation5 + $0x968] sm:$0xff] }
 0x15e   :  { %v12907_v2 = vcombine.high %v520_v56, %v524_v59  ;;  %v12904_v4 = vcombine.low %v519_v54, %v523_v55 }
 0x160   :  { %3405 = vmatpush1.bf16.msra.mxu0 %v12840_v61  ;;  %3569 = vmatpush1.bf16.msra.mxu1 %v12842_v62  ;;  %v12898_v61 = vcombine.low %v512_v48, %v516_v50  ;;  %v12905_v62 = vcombine.high %v519_v54, %v523_v55  ;;  %v580_v55 = vld [vmem:[#allocation5 + $0xb28] sm:$0xff] }
 0x161   :  { %3406 = vmatprep.subr.bf16.mxu0 %v12849_v63  ;;  %3570 = vmatprep.subr.bf16.mxu1 %v12851_v3  ;;  %v527_v63 = vld [vmem:[#allocation5 + $0x980] sm:$0xff]  ;;  %v532_v3 = vld [vmem:[#allocation5 + $0x9a8] sm:$0xff] }
 0x162   :  { %v12913_v6 = vcombine.high %v527_v63, %v531_v0  ;;  %v12915_v10 = vcombine.high %v528_v1, %v532_v3  ;;  %v12914_v14 = vcombine.low %v528_v1, %v532_v3 }
 0x164   :  { %3407 = vmatpush1.bf16.msra.mxu0 %v12848_v5  ;;  %3571 = vmatpush1.bf16.msra.mxu1 %v12850_v7  ;;  %v12906_v5 = vcombine.low %v520_v56, %v524_v59  ;;  %v535_v7 = vld [vmem:[#allocation5 + $0x9c0] sm:$0xff] }
 0x165   :  { %3408 = vmatprep.subr.bf16.mxu0 %v12857_v8  ;;  %3572 = vmatprep.subr.bf16.mxu1 %v12859_v13  ;;  %v539_v8 = vld [vmem:[#allocation5 + $0x9e0] sm:$0xff]  ;;  %v12912_v13 = vcombine.low %v527_v63, %v531_v0  ;;  %v588_v0 = vld [vmem:[#allocation5 + $0xb68] sm:$0xff] }
 0x166   :  { %v12920_v21 = vcombine.low %v535_v7, %v539_v8 }
 0x168   :  { %3409 = vmatpush1.bf16.msra.mxu0 %v12856_v15  ;;  %3573 = vmatpush1.bf16.msra.mxu1 %v12858_v17  ;;  %v12921_v15 = vcombine.high %v535_v7, %v539_v8  ;;  %v547_v17 = vld [vmem:[#allocation5 + $0xa20] sm:$0xff]  ;;  %v596_v8 = vld [vmem:[#allocation5 + $0xba8] sm:$0xff] }
 0x169   :  { %3419 = vmatprep.subr.bf16.mxu0 %v12865_v18  ;;  %3583 = vmatprep.subr.bf16.mxu1 %v12867_v22  ;;  %v544_v18 = vld [vmem:[#allocation5 + $0xa08] sm:$0xff]  ;;  %v12922_v22 = vcombine.low %v536_v9, %v540_v11  ;;  %v12929_v24 = vcombine.high %v543_v16, %v547_v17 }
 0x16a   :  { %v12931_v29 = vcombine.high %v544_v18, %v548_v20  ;;  %v12930_v32 = vcombine.low %v544_v18, %v548_v20 }
 0x16b   :  { %3411 = vmatmul.mubr.bf16.vlgmr.msra.gmra.mrb[0].mxu0 %v15653_v25  ;;  %3575 = vmatmul.mubr.bf16.vlgmr.msra.gmra.mrb[0].mxu1 %v15653_v25 }
 0x16c   :  { %3420 = vmatpush1.bf16.msra.mxu0 %v12864_v26  ;;  %3584 = vmatpush1.bf16.msra.mxu1 %v12866_v27  ;;  %v551_v26 = vld [vmem:[#allocation5 + $0xa40] sm:$0xff] }
 0x16d   :  { %3421 = vmatprep.subr.bf16.mxu0 %v12873_v28  ;;  %3585 = vmatprep.subr.bf16.mxu1 %v12875_v31  ;;  %v555_v27 = vld [vmem:[#allocation5 + $0xa60] sm:$0xff]  ;;  %v552_v28 = vld [vmem:[#allocation5 + $0xa48] sm:$0xff]  ;;  %v12928_v31 = vcombine.low %v543_v16, %v547_v17 }
 0x16e   :  { %3451 = vmatprep.mubr.bf16.mxu0 %v15655_v34  ;;  %3615 = vmatprep.mubr.bf16.mxu1 %v15655_v34  ;;  %v12937_v33 = vcombine.high %v551_v26, %v555_v27  ;;  %v12939_v38 = vcombine.high %v552_v28, %v556_v30  ;;  %v12936_v40 = vcombine.low %v551_v26, %v555_v27  ;;  %v604_v17 = vld [vmem:[#allocation5 + $0xbe8] sm:$0xff] }
 0x16f   :  { %v612_v26 = vld [vmem:[#allocation5 + $0xc28] sm:$0xff] }
 0x170   :  { %3422 = vmatpush1.bf16.msra.mxu0 %v12872_v35  ;;  %3586 = vmatpush1.bf16.msra.mxu1 %v12874_v36  ;;  %v559_v35 = vld [vmem:[#allocation5 + $0xa80] sm:$0xff] }
 0x171   :  { %3423 = vmatprep.subr.bf16.mxu0 %v12881_v37  ;;  %3587 = vmatprep.subr.bf16.mxu1 %v12883_v41  ;;  %v563_v36 = vld [vmem:[#allocation5 + $0xaa0] sm:$0xff]  ;;  %v560_v37 = vld [vmem:[#allocation5 + $0xa88] sm:$0xff]  ;;  %v12938_v41 = vcombine.low %v552_v28, %v556_v30 }
 0x172   :  { %v12945_v42 = vcombine.high %v559_v35, %v563_v36  ;;  %v12947_v46 = vcombine.high %v560_v37, %v564_v39  ;;  %v12944_v48 = vcombine.low %v559_v35, %v563_v36  ;;  %v211_v28 = vld [vmem:[#allocation2 + $0x20] sm:$0xff]  ;;  %v616_v35 = vld [vmem:[#allocation5 + $0xc48] sm:$0xff] }
 0x173   :  { %v615_v30 = vld [vmem:[#allocation5 + $0xc40] sm:$0xff]  ;;  %v620_v36 = vld [vmem:[#allocation5 + $0xc68] sm:$0xff] }
 0x174   :  { %3424 = vmatpush1.bf16.msra.mxu0 %v12880_v43  ;;  %3588 = vmatpush1.bf16.msra.mxu1 %v12882_v44  ;;  %v567_v43 = vld [vmem:[#allocation5 + $0xac0] sm:$0xff] }
 0x175   :  { %3425 = vmatprep.subr.bf16.mxu0 %v12889_v45  ;;  %3589 = vmatprep.subr.bf16.mxu1 %v12891_v49  ;;  %v571_v44 = vld [vmem:[#allocation5 + $0xae0] sm:$0xff]  ;;  %v568_v45 = vld [vmem:[#allocation5 + $0xac8] sm:$0xff]  ;;  %v12946_v49 = vcombine.low %v560_v37, %v564_v39  ;;  %v15661_v39 = vpack.c.bf16 %v211_v28, %v211_v28 }
 0x176   :  { %v12953_v50 = vcombine.high %v567_v43, %v571_v44  ;;  %v12955_v54 = vcombine.high %v568_v45, %v572_v47  ;;  %v12952_v56 = vcombine.low %v567_v43, %v571_v44  ;;  %v623_v43 = vld [vmem:[#allocation5 + $0xc80] sm:$0xff]  ;;  %v668_v28 = vld [vmem:[#allocation5 + $0xde8] sm:$0xff] }
 0x177   :  { %v627_v44 = vld [vmem:[#allocation5 + $0xca0] sm:$0xff] }
 0x178   :  { %3426 = vmatpush1.bf16.msra.mxu0 %v12888_v51  ;;  %3590 = vmatpush1.bf16.msra.mxu1 %v12890_v52  ;;  %v575_v51 = vld [vmem:[#allocation5 + $0xb00] sm:$0xff] }
 0x179   :  { %3427 = vmatprep.subr.bf16.mxu0 %v12897_v53  ;;  %3591 = vmatprep.subr.bf16.mxu1 %v12899_v58  ;;  %v579_v52 = vld [vmem:[#allocation5 + $0xb20] sm:$0xff]  ;;  %v576_v53 = vld [vmem:[#allocation5 + $0xb08] sm:$0xff]  ;;  %v12954_v58 = vcombine.low %v568_v45, %v572_v47 }
 0x17a   :  { %v12961_v59 = vcombine.high %v575_v51, %v579_v52  ;;  %v12963_v63 = vcombine.high %v576_v53, %v580_v55  ;;  %v12960_v1 = vcombine.low %v575_v51, %v579_v52  ;;  %v624_v45 = vld [vmem:[#allocation5 + $0xc88] sm:$0xff]  ;;  %v13009_v51 = vcombine.high %v623_v43, %v627_v44  ;;  %v631_v52 = vld [vmem:[#allocation5 + $0xcc0] sm:$0xff] }
 0x17b   :  { %v628_v47 = vld [vmem:[#allocation5 + $0xca8] sm:$0xff] }
 0x17c   :  { %3428 = vmatpush1.bf16.msra.mxu0 %v12896_v60  ;;  %3592 = vmatpush1.bf16.msra.mxu1 %v12898_v61  ;;  %v583_v60 = vld [vmem:[#allocation5 + $0xb40] sm:$0xff] }
 0x17d   :  { %3429 = vmatprep.subr.bf16.mxu0 %v12905_v62  ;;  %3593 = vmatprep.subr.bf16.mxu1 %v12907_v2  ;;  %v587_v61 = vld [vmem:[#allocation5 + $0xb60] sm:$0xff]  ;;  %v584_v62 = vld [vmem:[#allocation5 + $0xb48] sm:$0xff]  ;;  %v12962_v2 = vcombine.low %v576_v53, %v580_v55  ;;  %v13011_v55 = vcombine.high %v624_v45, %v628_v47 }
 0x17e   :  { %v12969_v3 = vcombine.high %v583_v60, %v587_v61  ;;  %v12971_v7 = vcombine.high %v584_v62, %v588_v0  ;;  %v12968_v9 = vcombine.low %v583_v60, %v587_v61  ;;  %v635_v53 = vld [vmem:[#allocation5 + $0xce0] sm:$0xff] }
 0x17f   :  { %v13017_v60 = vcombine.high %v631_v52, %v635_v53  ;;  %v639_v61 = vld [vmem:[#allocation5 + $0xd00] sm:$0xff] }
 0x180   :  { %3430 = vmatpush1.bf16.msra.mxu0 %v12904_v4  ;;  %3594 = vmatpush1.bf16.msra.mxu1 %v12906_v5  ;;  %v591_v4 = vld [vmem:[#allocation5 + $0xb80] sm:$0xff] }
 0x181   :  { %3431 = vmatprep.subr.bf16.mxu0 %v12913_v6  ;;  %3595 = vmatprep.subr.bf16.mxu1 %v12915_v10  ;;  %v595_v5 = vld [vmem:[#allocation5 + $0xba0] sm:$0xff]  ;;  %v592_v6 = vld [vmem:[#allocation5 + $0xb88] sm:$0xff]  ;;  %v12970_v10 = vcombine.low %v584_v62, %v588_v0 }
 0x182   :  { %v12977_v11 = vcombine.high %v591_v4, %v595_v5  ;;  %v12979_v16 = vcombine.high %v592_v6, %v596_v8  ;;  %v12976_v18 = vcombine.low %v591_v4, %v595_v5  ;;  %v12978_v20 = vcombine.low %v592_v6, %v596_v8  ;;  %v643_v62 = vld [vmem:[#allocation5 + $0xd20] sm:$0xff] }
 0x183   :  { %v13025_v4 = vcombine.high %v639_v61, %v643_v62  ;;  %v647_v5 = vld [vmem:[#allocation5 + $0xd40] sm:$0xff] }
 0x184   :  { %3432 = vmatpush1.bf16.msra.mxu0 %v12912_v13  ;;  %3596 = vmatpush1.bf16.msra.mxu1 %v12914_v14  ;;  %v599_v13 = vld [vmem:[#allocation5 + $0xbc0] sm:$0xff] }
 0x185   :  { %3433 = vmatprep.subr.bf16.mxu0 %v12921_v15  ;;  %3597 = vmatprep.subr.bf16.mxu1 %v12923_v19  ;;  %v603_v14 = vld [vmem:[#allocation5 + $0xbe0] sm:$0xff]  ;;  %v600_v15 = vld [vmem:[#allocation5 + $0xbc8] sm:$0xff] }
 0x186   :  { %v607_v19 = vld [vmem:[#allocation5 + $0xc00] sm:$0xff]  ;;  %v12987_v27 = vcombine.high %v600_v15, %v604_v17 }
 0x187   :  { %v651_v6 = vld [vmem:[#allocation5 + $0xd60] sm:$0xff] }
 0x188   :  { %3434 = vmatpush1.bf16.msra.mxu0 %v12920_v21  ;;  %3598 = vmatpush1.bf16.msra.mxu1 %v12922_v22  ;;  %v12985_v21 = vcombine.high %v599_v13, %v603_v14  ;;  %v611_v22 = vld [vmem:[#allocation5 + $0xc20] sm:$0xff] }
 0x189   :  { %3435 = vmatprep.subr.bf16.mxu0 %v12929_v24  ;;  %3599 = vmatprep.subr.bf16.mxu1 %v12931_v29  ;;  %v608_v24 = vld [vmem:[#allocation5 + $0xc08] sm:$0xff]  ;;  %v12984_v29 = vcombine.low %v599_v13, %v603_v14  ;;  %v13033_v13 = vcombine.high %v647_v5, %v651_v6  ;;  %v655_v14 = vld [vmem:[#allocation5 + $0xd80] sm:$0xff] }
 0x18a   :  { %v12995_v37 = vcombine.high %v608_v24, %v612_v26 }
 0x18c   :  { %3436 = vmatpush1.bf16.msra.mxu0 %v12928_v31  ;;  %3600 = vmatpush1.bf16.msra.mxu1 %v12930_v32  ;;  %v12986_v31 = vcombine.low %v600_v15, %v604_v17  ;;  %v12993_v32 = vcombine.high %v607_v19, %v611_v22  ;;  %v659_v15 = vld [vmem:[#allocation5 + $0xda0] sm:$0xff] }
 0x18d   :  { %3437 = vmatprep.subr.bf16.mxu0 %v12937_v33  ;;  %3601 = vmatprep.subr.bf16.mxu1 %v12939_v38  ;;  %v619_v33 = vld [vmem:[#allocation5 + $0xc60] sm:$0xff]  ;;  %v214_v38 = vld [vmem:[#allocation2 + $0x38] sm:$0xff] }
 0x190   :  { %3438 = vmatpush1.bf16.msra.mxu0 %v12936_v40  ;;  %3602 = vmatpush1.bf16.msra.mxu1 %v12938_v41  ;;  %v12992_v40 = vcombine.low %v607_v19, %v611_v22  ;;  %v12994_v41 = vcombine.low %v608_v24, %v612_v26  ;;  %v13032_v19 = vcombine.low %v647_v5, %v651_v6  ;;  %v663_v22 = vld [vmem:[#allocation5 + $0xdc0] sm:$0xff]  ;;  %v664_v26 = vld [vmem:[#allocation5 + $0xdc8] sm:$0xff] }
 0x191   :  { %3439 = vmatprep.subr.bf16.mxu0 %v12945_v42  ;;  %3603 = vmatprep.subr.bf16.mxu1 %v12947_v46  ;;  %v13001_v42 = vcombine.high %v615_v30, %v619_v33  ;;  %v13003_v46 = vcombine.high %v616_v35, %v620_v36  ;;  %v667_v24 = vld [vmem:[#allocation5 + $0xde0] sm:$0xff]  ;;  %v704_v6 = vld [vmem:[#allocation5 + $0xf08] sm:$0xff] }
 0x192   :  { %v707_v5 = vld [vmem:[#allocation5 + $0xf20] sm:$0xff] }
 0x194   :  { %3440 = vmatpush1.bf16.msra.mxu0 %v12944_v48  ;;  %3604 = vmatpush1.bf16.msra.mxu1 %v12946_v49  ;;  %v15663_v48 = vpack.c.bf16 %v214_v38, %v214_v38  ;;  %v13000_v49 = vcombine.low %v615_v30, %v619_v33  ;;  %v675_v33 = vld [vmem:[#allocation5 + $0xe20] sm:$0xff]  ;;  %v13048_v38 = vcombine.low %v663_v22, %v667_v24 }
 0x195   :  { %3441 = vmatprep.subr.bf16.mxu0 %v12953_v50  ;;  %3605 = vmatprep.subr.bf16.mxu1 %v12955_v54  ;;  %v13002_v50 = vcombine.low %v616_v35, %v620_v36  ;;  %v632_v54 = vld [vmem:[#allocation5 + $0xcc8] sm:$0xff]  ;;  %v13051_v36 = vcombine.high %v664_v26, %v668_v28 }
 0x196   :  { %v672_v35 = vld [vmem:[#allocation5 + $0xe08] sm:$0xff] }
 0x198   :  { %3442 = vmatpush1.bf16.msra.mxu0 %v12952_v56  ;;  %3606 = vmatpush1.bf16.msra.mxu1 %v12954_v58  ;;  %v636_v56 = vld [vmem:[#allocation5 + $0xce8] sm:$0xff]  ;;  %v13008_v58 = vcombine.low %v623_v43, %v627_v44  ;;  %v683_v43 = vld [vmem:[#allocation5 + $0xe60] sm:$0xff] }
 0x199   :  { %3443 = vmatprep.subr.bf16.mxu0 %v12961_v59  ;;  %3607 = vmatprep.subr.bf16.mxu1 %v12963_v63  ;;  %v13010_v59 = vcombine.low %v624_v45, %v628_v47  ;;  %v640_v63 = vld [vmem:[#allocation5 + $0xd08] sm:$0xff]  ;;  %v13019_v0 = vcombine.high %v632_v54, %v636_v56 }
 0x19a   :  { %v680_v44 = vld [vmem:[#allocation5 + $0xe48] sm:$0xff] }
 0x19c   :  { %3444 = vmatpush1.bf16.msra.mxu0 %v12960_v1  ;;  %3608 = vmatpush1.bf16.msra.mxu1 %v12962_v2  ;;  %v644_v1 = vld [vmem:[#allocation5 + $0xd28] sm:$0xff]  ;;  %v13016_v2 = vcombine.low %v631_v52, %v635_v53  ;;  %v691_v52 = vld [vmem:[#allocation5 + $0xea0] sm:$0xff] }
 0x19d   :  { %3445 = vmatprep.subr.bf16.mxu0 %v12969_v3  ;;  %3609 = vmatprep.subr.bf16.mxu1 %v12971_v7  ;;  %v13018_v3 = vcombine.low %v632_v54, %v636_v56  ;;  %v648_v7 = vld [vmem:[#allocation5 + $0xd48] sm:$0xff]  ;;  %v13027_v8 = vcombine.high %v640_v63, %v644_v1 }
 0x19e   :  { %v688_v53 = vld [vmem:[#allocation5 + $0xe88] sm:$0xff] }
 0x1a0   :  { %3446 = vmatpush1.bf16.msra.mxu0 %v12968_v9  ;;  %3610 = vmatpush1.bf16.msra.mxu1 %v12970_v10  ;;  %v652_v9 = vld [vmem:[#allocation5 + $0xd68] sm:$0xff]  ;;  %v13024_v10 = vcombine.low %v639_v61, %v643_v62  ;;  %v699_v61 = vld [vmem:[#allocation5 + $0xee0] sm:$0xff] }
 0x1a1   :  { %3447 = vmatprep.subr.bf16.mxu0 %v12977_v11  ;;  %3611 = vmatprep.subr.bf16.mxu1 %v12979_v16  ;;  %v13026_v11 = vcombine.low %v640_v63, %v644_v1  ;;  %v656_v16 = vld [vmem:[#allocation5 + $0xd88] sm:$0xff]  ;;  %v13035_v17 = vcombine.high %v648_v7, %v652_v9 }
 0x1a2   :  { %v696_v62 = vld [vmem:[#allocation5 + $0xec8] sm:$0xff] }
 0x1a4   :  { %3448 = vmatpush1.bf16.msra.mxu0 %v12976_v18  ;;  %3612 = vmatpush1.bf16.msra.mxu1 %v12978_v20  ;;  %v660_v18 = vld [vmem:[#allocation5 + $0xda8] sm:$0xff]  ;;  %v13034_v20 = vcombine.low %v648_v7, %v652_v9 }
 0x1a5   :  { %3449 = vmatprep.subr.bf16.mxu0 %v12985_v21  ;;  %3613 = vmatprep.subr.bf16.mxu1 %v12987_v27  ;;  %v13041_v21 = vcombine.high %v655_v14, %v659_v15  ;;  %v13043_v27 = vcombine.high %v656_v16, %v660_v18  ;;  %v13042_v30 = vcombine.low %v656_v16, %v660_v18 }
 0x1a8   :  { %3450 = vmatpush1.bf16.msra.mxu0 %v12984_v29  ;;  %3614 = vmatpush1.bf16.msra.mxu1 %v12986_v31  ;;  %v13040_v29 = vcombine.low %v655_v14, %v659_v15  ;;  %v13049_v31 = vcombine.high %v663_v22, %v667_v24  ;;  %v715_v14 = vld [vmem:[#allocation5 + $0xf60] sm:$0xff]  ;;  %v712_v15 = vld [vmem:[#allocation5 + $0xf48] sm:$0xff] }
 0x1a9   :  { %3460 = vmatprep.subr.bf16.mxu0 %v12993_v32  ;;  %3624 = vmatprep.subr.bf16.mxu1 %v12995_v37  ;;  %v671_v32 = vld [vmem:[#allocation5 + $0xe00] sm:$0xff]  ;;  %v676_v37 = vld [vmem:[#allocation5 + $0xe28] sm:$0xff] }
 0x1aa   :  { %v13059_v45 = vcombine.high %v672_v35, %v676_v37  ;;  %v13056_v47 = vcombine.low %v671_v32, %v675_v33  ;;  %v723_v22 = vld [vmem:[#allocation5 + $0xfa0] sm:$0xff]  ;;  %v720_v24 = vld [vmem:[#allocation5 + $0xf88] sm:$0xff] }
 0x1ab   :  { %3452 = vmatmul.mubr.bf16.vlgmr.msra.gmra.mrb[0].mxu0 %v15661_v39  ;;  %3616 = vmatmul.mubr.bf16.vlgmr.msra.gmra.mrb[0].mxu1 %v15661_v39 }
 0x1ac   :  { %3461 = vmatpush1.bf16.msra.mxu0 %v12992_v40  ;;  %3625 = vmatpush1.bf16.msra.mxu1 %v12994_v41  ;;  %v13050_v40 = vcombine.low %v664_v26, %v668_v28  ;;  %v13057_v41 = vcombine.high %v671_v32, %v675_v33  ;;  %v731_v32 = vld [vmem:[#allocation5 + $0xfe0] sm:$0xff]  ;;  %v728_v33 = vld [vmem:[#allocation5 + $0xfc8] sm:$0xff] }
 0x1ad   :  { %3462 = vmatprep.subr.bf16.mxu0 %v13001_v42  ;;  %3626 = vmatprep.subr.bf16.mxu1 %v13003_v46  ;;  %v679_v42 = vld [vmem:[#allocation5 + $0xe40] sm:$0xff]  ;;  %v684_v46 = vld [vmem:[#allocation5 + $0xe68] sm:$0xff] }
 0x1ae   :  { %3492 = vmatprep.mubr.bf16.mxu0 %v15663_v48  ;;  %3656 = vmatprep.mubr.bf16.mxu1 %v15663_v48  ;;  %v13067_v54 = vcombine.high %v680_v44, %v684_v46  ;;  %v13064_v56 = vcombine.low %v679_v42, %v683_v43 }
 0x1b0   :  { %3463 = vmatpush1.bf16.msra.mxu0 %v13000_v49  ;;  %3627 = vmatpush1.bf16.msra.mxu1 %v13002_v50  ;;  %v13058_v49 = vcombine.low %v672_v35, %v676_v37  ;;  %v13065_v50 = vcombine.high %v679_v42, %v683_v43  ;;  %v229_v42 = vld [vmem:[#allocation5 + $0x30] sm:$0xff]  ;;  %v226_v43 = vld [vmem:[#allocation5 + $0x18] sm:$0xff] }
 0x1b1   :  { %3464 = vmatprep.subr.bf16.mxu0 %v13009_v51  ;;  %3628 = vmatprep.subr.bf16.mxu1 %v13011_v55  ;;  %v687_v51 = vld [vmem:[#allocation5 + $0xe80] sm:$0xff]  ;;  %v692_v55 = vld [vmem:[#allocation5 + $0xea8] sm:$0xff] }
 0x1b2   :  { %v13075_v63 = vcombine.high %v688_v53, %v692_v55  ;;  %v13072_v1 = vcombine.low %v687_v51, %v691_v52 }
 0x1b4   :  { %3465 = vmatpush1.bf16.msra.mxu0 %v13008_v58  ;;  %3629 = vmatpush1.bf16.msra.mxu1 %v13010_v59  ;;  %v13066_v58 = vcombine.low %v680_v44, %v684_v46  ;;  %v13073_v59 = vcombine.high %v687_v51, %v691_v52  ;;  %v230_v46 = vld [vmem:[#allocation5 + $0x38] sm:$0xff]  ;;  %v233_v51 = vld [vmem:[#allocation5 + $0x50] sm:$0xff] }
 0x1b5   :  { %3466 = vmatprep.subr.bf16.mxu0 %v13017_v60  ;;  %3630 = vmatprep.subr.bf16.mxu1 %v13019_v0  ;;  %v695_v60 = vld [vmem:[#allocation5 + $0xec0] sm:$0xff]  ;;  %v700_v0 = vld [vmem:[#allocation5 + $0xee8] sm:$0xff]  ;;  %v237_v52 = vld [vmem:[#allocation5 + $0x70] sm:$0xff] }
 0x1b6   :  { %v13083_v7 = vcombine.high %v696_v62, %v700_v0  ;;  %v13080_v9 = vcombine.low %v695_v60, %v699_v61 }
 0x1b8   :  { %3467 = vmatpush1.bf16.msra.mxu0 %v13016_v2  ;;  %3631 = vmatpush1.bf16.msra.mxu1 %v13018_v3  ;;  %v13074_v2 = vcombine.low %v688_v53, %v692_v55  ;;  %v13081_v3 = vcombine.high %v695_v60, %v699_v61  ;;  %v234_v53 = vld [vmem:[#allocation5 + $0x58] sm:$0xff]  ;;  %v12621_v60 = vcombine.high %v233_v51, %v237_v52  ;;  %v241_v61 = vld [vmem:[#allocation5 + $0x90] sm:$0xff] }
 0x1b9   :  { %3468 = vmatprep.subr.bf16.mxu0 %v13025_v4  ;;  %3632 = vmatprep.subr.bf16.mxu1 %v13027_v8  ;;  %v703_v4 = vld [vmem:[#allocation5 + $0xf00] sm:$0xff]  ;;  %v708_v8 = vld [vmem:[#allocation5 + $0xf28] sm:$0xff]  ;;  %v238_v55 = vld [vmem:[#allocation5 + $0x78] sm:$0xff] }
 0x1ba   :  { %v13091_v16 = vcombine.high %v704_v6, %v708_v8  ;;  %v13088_v18 = vcombine.low %v703_v4, %v707_v5 }
 0x1bc   :  { %3469 = vmatpush1.bf16.msra.mxu0 %v13024_v10  ;;  %3633 = vmatpush1.bf16.msra.mxu1 %v13026_v11  ;;  %v13082_v10 = vcombine.low %v696_v62, %v700_v0  ;;  %v13089_v11 = vcombine.high %v703_v4, %v707_v5  ;;  %v245_v62 = vld [vmem:[#allocation5 + $0xb0] sm:$0xff]  ;;  %v12623_v0 = vcombine.high %v234_v53, %v238_v55 }
 0x1bd   :  { %3470 = vmatprep.subr.bf16.mxu0 %v13033_v13  ;;  %3634 = vmatprep.subr.bf16.mxu1 %v13035_v17  ;;  %v711_v13 = vld [vmem:[#allocation5 + $0xf40] sm:$0xff]  ;;  %v716_v17 = vld [vmem:[#allocation5 + $0xf68] sm:$0xff]  ;;  %v12629_v4 = vcombine.high %v241_v61, %v245_v62 }
 0x1be   :  { %v13099_v26 = vcombine.high %v712_v15, %v716_v17  ;;  %v13096_v28 = vcombine.low %v711_v13, %v715_v14 }
 0x1c0   :  { %3471 = vmatpush1.bf16.msra.mxu0 %v13032_v19  ;;  %3635 = vmatpush1.bf16.msra.mxu1 %v13034_v20  ;;  %v13090_v19 = vcombine.low %v704_v6, %v708_v8  ;;  %v13097_v20 = vcombine.high %v711_v13, %v715_v14  ;;  %v249_v6 = vld [vmem:[#allocation5 + $0xd0] sm:$0xff]  ;;  %v250_v8 = vld [vmem:[#allocation5 + $0xd8] sm:$0xff] }
 0x1c1   :  { %3472 = vmatprep.subr.bf16.mxu0 %v13041_v21  ;;  %3636 = vmatprep.subr.bf16.mxu1 %v13043_v27  ;;  %v719_v21 = vld [vmem:[#allocation5 + $0xf80] sm:$0xff]  ;;  %v724_v27 = vld [vmem:[#allocation5 + $0xfa8] sm:$0xff] }
 0x1c2   :  { %v13107_v35 = vcombine.high %v720_v24, %v724_v27  ;;  %v13104_v37 = vcombine.low %v719_v21, %v723_v22 }
 0x1c4   :  { %3473 = vmatpush1.bf16.msra.mxu0 %v13040_v29  ;;  %3637 = vmatpush1.bf16.msra.mxu1 %v13042_v30  ;;  %v13098_v29 = vcombine.low %v712_v15, %v716_v17  ;;  %v13105_v30 = vcombine.high %v719_v21, %v723_v22  ;;  %v257_v15 = vld [vmem:[#allocation5 + $0x110] sm:$0xff]  ;;  %v258_v17 = vld [vmem:[#allocation5 + $0x118] sm:$0xff] }
 0x1c5   :  { %3474 = vmatprep.subr.bf16.mxu0 %v13049_v31  ;;  %3638 = vmatprep.subr.bf16.mxu1 %v13051_v36  ;;  %v727_v31 = vld [vmem:[#allocation5 + $0xfc0] sm:$0xff]  ;;  %v732_v36 = vld [vmem:[#allocation5 + $0xfe8] sm:$0xff]  ;;  %v265_v22 = vld [vmem:[#allocation5 + $0x150] sm:$0xff] }
 0x1c6   :  { %v13115_v44 = vcombine.high %v728_v33, %v732_v36 }
 0x1c8   :  { %3475 = vmatpush1.bf16.msra.mxu0 %v13048_v38  ;;  %3639 = vmatpush1.bf16.msra.mxu1 %v13050_v40  ;;  %v13106_v38 = vcombine.low %v720_v24, %v724_v27  ;;  %v13113_v40 = vcombine.high %v727_v31, %v731_v32  ;;  %v269_v24 = vld [vmem:[#allocation5 + $0x170] sm:$0xff]  ;;  %v270_v27 = vld [vmem:[#allocation5 + $0x178] sm:$0xff] }
 0x1c9   :  { %3476 = vmatprep.subr.bf16.mxu0 %v13057_v41  ;;  %3640 = vmatprep.subr.bf16.mxu1 %v13059_v45  ;;  %v225_v41 = vld [vmem:[#allocation5 + $0x10] sm:$0xff] }
 0x1ca   :  { %v213_v45 = vld [vmem:[#allocation2 + $0x30] sm:$0xff] }
 0x1cc   :  { %3477 = vmatpush1.bf16.msra.mxu0 %v13056_v47  ;;  %3641 = vmatpush1.bf16.msra.mxu1 %v13058_v49  ;;  %v13112_v47 = vcombine.low %v727_v31, %v731_v32  ;;  %v13114_v49 = vcombine.low %v728_v33, %v732_v36  ;;  %v273_v32 = vld [vmem:[#allocation5 + $0x190] sm:$0xff]  ;;  %v278_v36 = vld [vmem:[#allocation5 + $0x1b8] sm:$0xff] }
 0x1cd   :  { %3478 = vmatprep.subr.bf16.mxu0 %v13065_v50  ;;  %3642 = vmatprep.subr.bf16.mxu1 %v13067_v54  ;;  %v12613_v50 = vcombine.high %v225_v41, %v229_v42  ;;  %v12615_v54 = vcombine.high %v226_v43, %v230_v46  ;;  %v277_v33 = vld [vmem:[#allocation5 + $0x1b0] sm:$0xff] }
 0x1d0   :  { %3479 = vmatpush1.bf16.msra.mxu0 %v13064_v56  ;;  %3643 = vmatpush1.bf16.msra.mxu1 %v13066_v58  ;;  %v15669_v56 = vpack.c.bf16 %v213_v45, %v213_v45  ;;  %v12612_v58 = vcombine.low %v225_v41, %v229_v42  ;;  %v281_v42 = vld [vmem:[#allocation5 + $0x1d0] sm:$0xff]  ;;  %v286_v45 = vld [vmem:[#allocation5 + $0x1f8] sm:$0xff] }
 0x1d1   :  { %3480 = vmatprep.subr.bf16.mxu0 %v13073_v59  ;;  %3644 = vmatprep.subr.bf16.mxu1 %v13075_v63  ;;  %v12614_v59 = vcombine.low %v226_v43, %v230_v46  ;;  %v242_v63 = vld [vmem:[#allocation5 + $0x98] sm:$0xff]  ;;  %v285_v43 = vld [vmem:[#allocation5 + $0x1f0] sm:$0xff]  ;;  %v12660_v46 = vcombine.low %v273_v32, %v277_v33 }
 0x1d4   :  { %3481 = vmatpush1.bf16.msra.mxu0 %v13072_v1  ;;  %3645 = vmatpush1.bf16.msra.mxu1 %v13074_v2  ;;  %v246_v1 = vld [vmem:[#allocation5 + $0xb8] sm:$0xff]  ;;  %v12620_v2 = vcombine.low %v233_v51, %v237_v52  ;;  %v289_v51 = vld [vmem:[#allocation5 + $0x210] sm:$0xff] }
 0x1d5   :  { %3482 = vmatprep.subr.bf16.mxu0 %v13081_v3  ;;  %3646 = vmatprep.subr.bf16.mxu1 %v13083_v7  ;;  %v12622_v3 = vcombine.low %v234_v53, %v238_v55  ;;  %v12631_v5 = vcombine.high %v242_v63, %v246_v1  ;;  %v253_v7 = vld [vmem:[#allocation5 + $0xf0] sm:$0xff]  ;;  %v290_v53 = vld [vmem:[#allocation5 + $0x218] sm:$0xff]  ;;  %v12668_v55 = vcombine.low %v281_v42, %v285_v43 }
 0x1d6   :  { %v12637_v13 = vcombine.high %v249_v6, %v253_v7  ;;  %v293_v52 = vld [vmem:[#allocation5 + $0x230] sm:$0xff] }
 0x1d8   :  { %3483 = vmatpush1.bf16.msra.mxu0 %v13080_v9  ;;  %3647 = vmatpush1.bf16.msra.mxu1 %v13082_v10  ;;  %v254_v9 = vld [vmem:[#allocation5 + $0xf8] sm:$0xff]  ;;  %v12628_v10 = vcombine.low %v241_v61, %v245_v62  ;;  %v297_v61 = vld [vmem:[#allocation5 + $0x250] sm:$0xff] }
 0x1d9   :  { %3484 = vmatprep.subr.bf16.mxu0 %v13089_v11  ;;  %3648 = vmatprep.subr.bf16.mxu1 %v13091_v16  ;;  %v12630_v11 = vcombine.low %v242_v63, %v246_v1  ;;  %v12639_v14 = vcombine.high %v250_v8, %v254_v9  ;;  %v261_v16 = vld [vmem:[#allocation5 + $0x130] sm:$0xff]  ;;  %v298_v63 = vld [vmem:[#allocation5 + $0x258] sm:$0xff]  ;;  %v12676_v1 = vcombine.low %v289_v51, %v293_v52 }
 0x1da   :  { %v12645_v21 = vcombine.high %v257_v15, %v261_v16  ;;  %v301_v62 = vld [vmem:[#allocation5 + $0x270] sm:$0xff] }
 0x1dc   :  { %3485 = vmatpush1.bf16.msra.mxu0 %v13088_v18  ;;  %3649 = vmatpush1.bf16.msra.mxu1 %v13090_v19  ;;  %v262_v18 = vld [vmem:[#allocation5 + $0x138] sm:$0xff]  ;;  %v12636_v19 = vcombine.low %v249_v6, %v253_v7  ;;  %v309_v6 = vld [vmem:[#allocation5 + $0x2b0] sm:$0xff] }
 0x1dd   :  { %3486 = vmatprep.subr.bf16.mxu0 %v13097_v20  ;;  %3650 = vmatprep.subr.bf16.mxu1 %v13099_v26  ;;  %v12638_v20 = vcombine.low %v250_v8, %v254_v9  ;;  %v266_v26 = vld [vmem:[#allocation5 + $0x158] sm:$0xff]  ;;  %v12684_v9 = vcombine.low %v297_v61, %v301_v62 }
 0x1de   :  { %v12655_v31 = vcombine.high %v266_v26, %v270_v27  ;;  %v306_v7 = vld [vmem:[#allocation5 + $0x298] sm:$0xff] }
 0x1df   :  { %v310_v8 = vld [vmem:[#allocation5 + $0x2b8] sm:$0xff] }
 0x1e0   :  { %3487 = vmatpush1.bf16.msra.mxu0 %v13096_v28  ;;  %3651 = vmatpush1.bf16.msra.mxu1 %v13098_v29  ;;  %v12644_v28 = vcombine.low %v257_v15, %v261_v16  ;;  %v12646_v29 = vcombine.low %v258_v17, %v262_v18  ;;  %v317_v15 = vld [vmem:[#allocation5 + $0x2f0] sm:$0xff]  ;;  %v314_v16 = vld [vmem:[#allocation5 + $0x2d8] sm:$0xff] }
 0x1e1   :  { %3488 = vmatprep.subr.bf16.mxu0 %v13105_v30  ;;  %3652 = vmatprep.subr.bf16.mxu1 %v13107_v35  ;;  %v12653_v30 = vcombine.high %v265_v22, %v269_v24  ;;  %v274_v35 = vld [vmem:[#allocation5 + $0x198] sm:$0xff] }
 0x1e2   :  { %v12663_v41 = vcombine.high %v274_v35, %v278_v36 }
 0x1e4   :  { %3489 = vmatpush1.bf16.msra.mxu0 %v13104_v37  ;;  %3653 = vmatpush1.bf16.msra.mxu1 %v13106_v38  ;;  %v12652_v37 = vcombine.low %v265_v22, %v269_v24  ;;  %v12654_v38 = vcombine.low %v266_v26, %v270_v27  ;;  %v325_v22 = vld [vmem:[#allocation5 + $0x330] sm:$0xff]  ;;  %v322_v24 = vld [vmem:[#allocation5 + $0x318] sm:$0xff] }
 0x1e5   :  { %3490 = vmatprep.subr.bf16.mxu0 %v13113_v40  ;;  %3654 = vmatprep.subr.bf16.mxu1 %v13115_v44  ;;  %v12661_v40 = vcombine.high %v273_v32, %v277_v33  ;;  %v282_v44 = vld [vmem:[#allocation5 + $0x1d8] sm:$0xff]  ;;  %v333_v32 = vld [vmem:[#allocation5 + $0x370] sm:$0xff] }
 0x1e6   :  { %v326_v26 = vld [vmem:[#allocation5 + $0x338] sm:$0xff] }
 0x1e7   :  { %v330_v33 = vld [vmem:[#allocation5 + $0x358] sm:$0xff] }
 0x1e8   :  { %3491 = vmatpush1.bf16.msra.mxu0 %v13112_v47  ;;  %3655 = vmatpush1.bf16.msra.mxu1 %v13114_v49  ;;  %v12662_v47 = vcombine.low %v274_v35, %v278_v36  ;;  %v12669_v49 = vcombine.high %v281_v42, %v285_v43  ;;  %v334_v35 = vld [vmem:[#allocation5 + $0x378] sm:$0xff]  ;;  %v341_v42 = vld [vmem:[#allocation5 + $0x3b0] sm:$0xff] }
 0x1e9   :  { %3665 = vmatprep.subr.bf16.mxu0 %v12613_v50  ;;  %3829 = vmatprep.subr.bf16.mxu1 %v12615_v54  ;;  %v12671_v50 = vcombine.high %v282_v44, %v286_v45  ;;  %v294_v54 = vld [vmem:[#allocation5 + $0x238] sm:$0xff] }
 0x1ea   :  { %v338_v43 = vld [vmem:[#allocation5 + $0x398] sm:$0xff] }
 0x1eb   :  { %3493 = vmatmul.mubr.bf16.vlgmr.msra.gmra.mrb[0].mxu0 %v15669_v56  ;;  %3657 = vmatmul.mubr.bf16.vlgmr.msra.gmra.mrb[0].mxu1 %v15669_v56 }
 0x1ec   :  { %3666 = vmatpush1.bf16.msra.mxu0 %v12612_v58  ;;  %3830 = vmatpush1.bf16.msra.mxu1 %v12614_v59  ;;  %v12670_v58 = vcombine.low %v282_v44, %v286_v45  ;;  %v12677_v59 = vcombine.high %v289_v51, %v293_v52  ;;  %v342_v44 = vld [vmem:[#allocation5 + $0x3b8] sm:$0xff]  ;;  %v349_v51 = vld [vmem:[#allocation5 + $0x3f0] sm:$0xff] }
 0x1ed   :  { %3667 = vmatprep.subr.bf16.mxu0 %v12621_v60  ;;  %3831 = vmatprep.subr.bf16.mxu1 %v12623_v0  ;;  %v12679_v60 = vcombine.high %v290_v53, %v294_v54  ;;  %v302_v0 = vld [vmem:[#allocation5 + $0x278] sm:$0xff] }
 0x1ee   :  { %3697 = vmatprep.mubr.bf16.mxu0 %v15641_v57  ;;  %3861 = vmatprep.mubr.bf16.mxu1 %v15641_v57  ;;  %v12647_v57 = vcombine.high %v258_v17, %v262_v18  ;;  %v318_v17 = vld [vmem:[#allocation5 + $0x2f8] sm:$0xff] }
 0x1ef   :  { %v346_v52 = vld [vmem:[#allocation5 + $0x3d8] sm:$0xff] }
 0x1f0   :  { %3668 = vmatpush1.bf16.msra.mxu0 %v12620_v2  ;;  %3832 = vmatpush1.bf16.msra.mxu1 %v12622_v3  ;;  %v12678_v2 = vcombine.low %v290_v53, %v294_v54  ;;  %v12685_v3 = vcombine.high %v297_v61, %v301_v62  ;;  %v350_v53 = vld [vmem:[#allocation5 + $0x3f8] sm:$0xff]  ;;  %v357_v61 = vld [vmem:[#allocation5 + $0x430] sm:$0xff] }
 0x1f1   :  { %3669 = vmatprep.subr.bf16.mxu0 %v12629_v4  ;;  %3833 = vmatprep.subr.bf16.mxu1 %v12631_v5  ;;  %v12687_v4 = vcombine.high %v298_v63, %v302_v0  ;;  %v305_v5 = vld [vmem:[#allocation5 + $0x290] sm:$0xff]  ;;  %v354_v62 = vld [vmem:[#allocation5 + $0x418] sm:$0xff] }
 0x1f2   :  { %v12692_v18 = vcombine.low %v305_v5, %v309_v6 }
 0x1f4   :  { %3670 = vmatpush1.bf16.msra.mxu0 %v12628_v10  ;;  %3834 = vmatpush1.bf16.msra.mxu1 %v12630_v11  ;;  %v12686_v10 = vcombine.low %v298_v63, %v302_v0  ;;  %v12693_v11 = vcombine.high %v305_v5, %v309_v6  ;;  %v358_v63 = vld [vmem:[#allocation5 + $0x438] sm:$0xff]  ;;  %v365_v5 = vld [vmem:[#allocation5 + $0x470] sm:$0xff] }
 0x1f5   :  { %3671 = vmatprep.subr.bf16.mxu0 %v12637_v13  ;;  %3835 = vmatprep.subr.bf16.mxu1 %v12639_v14  ;;  %v12695_v13 = vcombine.high %v306_v7, %v310_v8  ;;  %v313_v14 = vld [vmem:[#allocation5 + $0x2d0] sm:$0xff]  ;;  %v362_v6 = vld [vmem:[#allocation5 + $0x458] sm:$0xff] }
 0x1f6   :  { %v12700_v27 = vcombine.low %v313_v14, %v317_v15 }
 0x1f8   :  { %3672 = vmatpush1.bf16.msra.mxu0 %v12636_v19  ;;  %3836 = vmatpush1.bf16.msra.mxu1 %v12638_v20  ;;  %v12694_v19 = vcombine.low %v306_v7, %v310_v8  ;;  %v12701_v20 = vcombine.high %v313_v14, %v317_v15  ;;  %v366_v7 = vld [vmem:[#allocation5 + $0x478] sm:$0xff]  ;;  %v373_v14 = vld [vmem:[#allocation5 + $0x4b0] sm:$0xff] }
 0x1f9   :  { %3673 = vmatprep.subr.bf16.mxu0 %v12645_v21  ;;  %3837 = vmatprep.subr.bf16.mxu1 %v12647_v57  ;;  %v12703_v21 = vcombine.high %v314_v16, %v318_v17  ;;  %v321_v57 = vld [vmem:[#allocation5 + $0x310] sm:$0xff]  ;;  %v370_v15 = vld [vmem:[#allocation5 + $0x498] sm:$0xff] }
 0x1fa   :  { %v12708_v36 = vcombine.low %v321_v57, %v325_v22 }
 0x1fc   :  { %3674 = vmatpush1.bf16.msra.mxu0 %v12644_v28  ;;  %3838 = vmatpush1.bf16.msra.mxu1 %v12646_v29  ;;  %v12702_v28 = vcombine.low %v314_v16, %v318_v17  ;;  %v12709_v29 = vcombine.high %v321_v57, %v325_v22  ;;  %v374_v16 = vld [vmem:[#allocation5 + $0x4b8] sm:$0xff]  ;;  %v381_v57 = vld [vmem:[#allocation5 + $0x4f0] sm:$0xff] }
 0x1fd   :  { %3675 = vmatprep.subr.bf16.mxu0 %v12653_v30  ;;  %3839 = vmatprep.subr.bf16.mxu1 %v12655_v31  ;;  %v12711_v30 = vcombine.high %v322_v24, %v326_v26  ;;  %v329_v31 = vld [vmem:[#allocation5 + $0x350] sm:$0xff]  ;;  %v378_v22 = vld [vmem:[#allocation5 + $0x4d8] sm:$0xff] }
 0x1fe   :  { %v12716_v45 = vcombine.low %v329_v31, %v333_v32 }
 0x200   :  { %3676 = vmatpush1.bf16.msra.mxu0 %v12652_v37  ;;  %3840 = vmatpush1.bf16.msra.mxu1 %v12654_v38  ;;  %v12710_v37 = vcombine.low %v322_v24, %v326_v26  ;;  %v12717_v38 = vcombine.high %v329_v31, %v333_v32  ;;  %v382_v24 = vld [vmem:[#allocation5 + $0x4f8] sm:$0xff] }
 0x201   :  { %3677 = vmatprep.subr.bf16.mxu0 %v12661_v40  ;;  %3841 = vmatprep.subr.bf16.mxu1 %v12663_v41  ;;  %v12719_v40 = vcombine.high %v330_v33, %v334_v35  ;;  %v337_v41 = vld [vmem:[#allocation5 + $0x390] sm:$0xff]  ;;  %v386_v31 = vld [vmem:[#allocation5 + $0x518] sm:$0xff] }
 0x202   :  { %v12724_v54 = vcombine.low %v337_v41, %v341_v42  ;;  %v390_v32 = vld [vmem:[#allocation5 + $0x538] sm:$0xff] }
 0x204   :  { %3678 = vmatpush1.bf16.msra.mxu0 %v12660_v46  ;;  %3842 = vmatpush1.bf16.msra.mxu1 %v12662_v47  ;;  %v12718_v46 = vcombine.low %v330_v33, %v334_v35  ;;  %v12725_v47 = vcombine.high %v337_v41, %v341_v42  ;;  %v12766_v35 = vcombine.low %v378_v22, %v382_v24  ;;  %v398_v41 = vld [vmem:[#allocation5 + $0x578] sm:$0xff] }
 0x205   :  { %3679 = vmatprep.subr.bf16.mxu0 %v12669_v49  ;;  %3843 = vmatprep.subr.bf16.mxu1 %v12671_v50  ;;  %v12727_v49 = vcombine.high %v338_v43, %v342_v44  ;;  %v345_v50 = vld [vmem:[#allocation5 + $0x3d0] sm:$0xff] }
 0x206   :  { %v12732_v0 = vcombine.low %v345_v50, %v349_v51 }
 0x208   :  { %3680 = vmatpush1.bf16.msra.mxu0 %v12668_v55  ;;  %3844 = vmatpush1.bf16.msra.mxu1 %v12670_v58  ;;  %v12726_v55 = vcombine.low %v338_v43, %v342_v44  ;;  %v12733_v58 = vcombine.high %v345_v50, %v349_v51  ;;  %v12774_v43 = vcombine.low %v386_v31, %v390_v32  ;;  %v406_v50 = vld [vmem:[#allocation5 + $0x5b8] sm:$0xff] }
 0x209   :  { %3681 = vmatprep.subr.bf16.mxu0 %v12677_v59  ;;  %3845 = vmatprep.subr.bf16.mxu1 %v12679_v60  ;;  %v12735_v59 = vcombine.high %v346_v52, %v350_v53  ;;  %v353_v60 = vld [vmem:[#allocation5 + $0x410] sm:$0xff] }
 0x20a   :  { %v12740_v8 = vcombine.low %v353_v60, %v357_v61 }
 0x20c   :  { %3682 = vmatpush1.bf16.msra.mxu0 %v12676_v1  ;;  %3846 = vmatpush1.bf16.msra.mxu1 %v12678_v2  ;;  %v12734_v1 = vcombine.low %v346_v52, %v350_v53  ;;  %v12741_v2 = vcombine.high %v353_v60, %v357_v61  ;;  %v414_v60 = vld [vmem:[#allocation5 + $0x5f8] sm:$0xff] }
 0x20d   :  { %3683 = vmatprep.subr.bf16.mxu0 %v12685_v3  ;;  %3847 = vmatprep.subr.bf16.mxu1 %v12687_v4  ;;  %v12743_v3 = vcombine.high %v354_v62, %v358_v63  ;;  %v361_v4 = vld [vmem:[#allocation5 + $0x450] sm:$0xff] }
 0x20e   :  { %v12748_v17 = vcombine.low %v361_v4, %v365_v5 }
 0x210   :  { %3684 = vmatpush1.bf16.msra.mxu0 %v12684_v9  ;;  %3848 = vmatpush1.bf16.msra.mxu1 %v12686_v10  ;;  %v12742_v9 = vcombine.low %v354_v62, %v358_v63  ;;  %v12749_v10 = vcombine.high %v361_v4, %v365_v5  ;;  %v422_v4 = vld [vmem:[#allocation5 + $0x638] sm:$0xff] }
 0x211   :  { %3685 = vmatprep.subr.bf16.mxu0 %v12693_v11  ;;  %3849 = vmatprep.subr.bf16.mxu1 %v12695_v13  ;;  %v12751_v11 = vcombine.high %v362_v6, %v366_v7  ;;  %v369_v13 = vld [vmem:[#allocation5 + $0x490] sm:$0xff] }
 0x212   :  { %v12756_v26 = vcombine.low %v369_v13, %v373_v14 }
 0x214   :  { %3686 = vmatpush1.bf16.msra.mxu0 %v12692_v18  ;;  %3850 = vmatpush1.bf16.msra.mxu1 %v12694_v19  ;;  %v12750_v18 = vcombine.low %v362_v6, %v366_v7  ;;  %v12757_v19 = vcombine.high %v369_v13, %v373_v14  ;;  %v430_v13 = vld [vmem:[#allocation5 + $0x678] sm:$0xff] }
 0x215   :  { %3687 = vmatprep.subr.bf16.mxu0 %v12701_v20  ;;  %3851 = vmatprep.subr.bf16.mxu1 %v12703_v21  ;;  %v12759_v20 = vcombine.high %v370_v15, %v374_v16  ;;  %v377_v21 = vld [vmem:[#allocation5 + $0x4d0] sm:$0xff] }
 0x216   :  { %v12764_v33 = vcombine.low %v377_v21, %v381_v57 }
 0x218   :  { %3688 = vmatpush1.bf16.msra.mxu0 %v12700_v27  ;;  %3852 = vmatpush1.bf16.msra.mxu1 %v12702_v28  ;;  %v12765_v27 = vcombine.high %v377_v21, %v381_v57  ;;  %v12767_v28 = vcombine.high %v378_v22, %v382_v24  ;;  %v438_v21 = vld [vmem:[#allocation5 + $0x6b8] sm:$0xff] }
 0x219   :  { %3689 = vmatprep.subr.bf16.mxu0 %v12709_v29  ;;  %3853 = vmatprep.subr.bf16.mxu1 %v12711_v30  ;;  %v385_v29 = vld [vmem:[#allocation5 + $0x510] sm:$0xff] }
 0x21a   :  { %v389_v30 = vld [vmem:[#allocation5 + $0x530] sm:$0xff] }
 0x21b   :  { %v12772_v42 = vcombine.low %v385_v29, %v389_v30 }
 0x21c   :  { %3690 = vmatpush1.bf16.msra.mxu0 %v12708_v36  ;;  %3854 = vmatpush1.bf16.msra.mxu1 %v12710_v37  ;;  %v12773_v36 = vcombine.high %v385_v29, %v389_v30  ;;  %v393_v37 = vld [vmem:[#allocation5 + $0x550] sm:$0xff]  ;;  %v446_v29 = vld [vmem:[#allocation5 + $0x6f8] sm:$0xff] }
 0x21d   :  { %3691 = vmatprep.subr.bf16.mxu0 %v12717_v38  ;;  %3855 = vmatprep.subr.bf16.mxu1 %v12719_v40  ;;  %v397_v38 = vld [vmem:[#allocation5 + $0x570] sm:$0xff]  ;;  %v394_v40 = vld [vmem:[#allocation5 + $0x558] sm:$0xff] }
 0x21e   :  { %v12781_v44 = vcombine.high %v393_v37, %v397_v38  ;;  %v12780_v51 = vcombine.low %v393_v37, %v397_v38  ;;  %v12782_v52 = vcombine.low %v394_v40, %v398_v41  ;;  %v454_v37 = vld [vmem:[#allocation5 + $0x738] sm:$0xff] }
 0x220   :  { %3692 = vmatpush1.bf16.msra.mxu0 %v12716_v45  ;;  %3856 = vmatpush1.bf16.msra.mxu1 %v12718_v46  ;;  %v12783_v45 = vcombine.high %v394_v40, %v398_v41  ;;  %v401_v46 = vld [vmem:[#allocation5 + $0x590] sm:$0xff] }
 0x221   :  { %3693 = vmatprep.subr.bf16.mxu0 %v12725_v47  ;;  %3857 = vmatprep.subr.bf16.mxu1 %v12727_v49  ;;  %v405_v47 = vld [vmem:[#allocation5 + $0x5b0] sm:$0xff]  ;;  %v402_v49 = vld [vmem:[#allocation5 + $0x598] sm:$0xff] }
 0x222   :  { %v12789_v53 = vcombine.high %v401_v46, %v405_v47  ;;  %v12788_v61 = vcombine.low %v401_v46, %v405_v47  ;;  %v12790_v62 = vcombine.low %v402_v49, %v406_v50  ;;  %v462_v46 = vld [vmem:[#allocation5 + $0x778] sm:$0xff] }
 0x224   :  { %3694 = vmatpush1.bf16.msra.mxu0 %v12724_v54  ;;  %3858 = vmatpush1.bf16.msra.mxu1 %v12726_v55  ;;  %v12791_v54 = vcombine.high %v402_v49, %v406_v50  ;;  %v409_v55 = vld [vmem:[#allocation5 + $0x5d0] sm:$0xff] }
 0x225   :  { %3695 = vmatprep.subr.bf16.mxu0 %v12733_v58  ;;  %3859 = vmatprep.subr.bf16.mxu1 %v12735_v59  ;;  %v413_v58 = vld [vmem:[#allocation5 + $0x5f0] sm:$0xff]  ;;  %v410_v59 = vld [vmem:[#allocation5 + $0x5d8] sm:$0xff] }
 0x226   :  { %v12797_v63 = vcombine.high %v409_v55, %v413_v58  ;;  %v12796_v5 = vcombine.low %v409_v55, %v413_v58  ;;  %v12798_v6 = vcombine.low %v410_v59, %v414_v60  ;;  %v470_v55 = vld [vmem:[#allocation5 + $0x7b8] sm:$0xff] }
 0x228   :  { %3696 = vmatpush1.bf16.msra.mxu0 %v12732_v0  ;;  %3860 = vmatpush1.bf16.msra.mxu1 %v12734_v1  ;;  %v12799_v0 = vcombine.high %v410_v59, %v414_v60  ;;  %v417_v1 = vld [vmem:[#allocation5 + $0x610] sm:$0xff] }
 0x229   :  { %3706 = vmatprep.subr.bf16.mxu0 %v12741_v2  ;;  %3870 = vmatprep.subr.bf16.mxu1 %v12743_v3  ;;  %v421_v2 = vld [vmem:[#allocation5 + $0x630] sm:$0xff]  ;;  %v418_v3 = vld [vmem:[#allocation5 + $0x618] sm:$0xff] }
 0x22a   :  { %v12805_v7 = vcombine.high %v417_v1, %v421_v2  ;;  %v12804_v14 = vcombine.low %v417_v1, %v421_v2  ;;  %v478_v1 = vld [vmem:[#allocation5 + $0x7f8] sm:$0xff] }
 0x22b   :  { %3698 = vmatmul.mubr.bf16.vlgmr.msra.gmra.mrb[4].mxu0 %v15645_v12  ;;  %3862 = vmatmul.mubr.bf16.vlgmr.msra.gmra.mrb[4].mxu1 %v15645_v12  ;;  %v12758_v12 = vcombine.low %v370_v15, %v374_v16  ;;  %v12806_v15 = vcombine.low %v418_v3, %v422_v4 }
 0x22c   :  { %3707 = vmatpush1.bf16.msra.mxu0 %v12740_v8  ;;  %3871 = vmatpush1.bf16.msra.mxu1 %v12742_v9  ;;  %v12807_v8 = vcombine.high %v418_v3, %v422_v4  ;;  %v425_v9 = vld [vmem:[#allocation5 + $0x650] sm:$0xff] }
 0x22d   :  { %3708 = vmatprep.subr.bf16.mxu0 %v12749_v10  ;;  %3872 = vmatprep.subr.bf16.mxu1 %v12751_v11  ;;  %v429_v10 = vld [vmem:[#allocation5 + $0x670] sm:$0xff]  ;;  %v426_v11 = vld [vmem:[#allocation5 + $0x658] sm:$0xff] }
 0x22e   :  { %3738 = vmatprep.mubr.bf16.mxu0 %v15647_v23  ;;  %3902 = vmatprep.mubr.bf16.mxu1 %v15647_v23  ;;  %v12775_v23 = vcombine.high %v386_v31, %v390_v32  ;;  %v12813_v16 = vcombine.high %v425_v9, %v429_v10  ;;  %v12812_v57 = vcombine.low %v425_v9, %v429_v10  ;;  %v486_v9 = vld [vmem:[#allocation5 + $0x838] sm:$0xff] }
 0x22f   :  { %v12814_v22 = vcombine.low %v426_v11, %v430_v13 }
 0x230   :  { %3709 = vmatpush1.bf16.msra.mxu0 %v12748_v17  ;;  %3873 = vmatpush1.bf16.msra.mxu1 %v12750_v18  ;;  %v12815_v17 = vcombine.high %v426_v11, %v430_v13  ;;  %v433_v18 = vld [vmem:[#allocation5 + $0x690] sm:$0xff] }
 0x231   :  { %3710 = vmatprep.subr.bf16.mxu0 %v12757_v19  ;;  %3874 = vmatprep.subr.bf16.mxu1 %v12759_v20  ;;  %v437_v19 = vld [vmem:[#allocation5 + $0x6b0] sm:$0xff]  ;;  %v434_v20 = vld [vmem:[#allocation5 + $0x698] sm:$0xff] }
 0x232   :  { %v12821_v24 = vcombine.high %v433_v18, %v437_v19  ;;  %v12820_v30 = vcombine.low %v433_v18, %v437_v19  ;;  %v12822_v31 = vcombine.low %v434_v20, %v438_v21  ;;  %v494_v18 = vld [vmem:[#allocation5 + $0x878] sm:$0xff] }
 0x234   :  { %3711 = vmatpush1.bf16.msra.mxu0 %v12756_v26  ;;  %3875 = vmatpush1.bf16.msra.mxu1 %v12758_v12  ;;  %v12823_v26 = vcombine.high %v434_v20, %v438_v21  ;;  %v441_v12 = vld [vmem:[#allocation5 + $0x6d0] sm:$0xff] }
 0x235   :  { %3712 = vmatprep.subr.bf16.mxu0 %v12765_v27  ;;  %3876 = vmatprep.subr.bf16.mxu1 %v12767_v28  ;;  %v445_v27 = vld [vmem:[#allocation5 + $0x6f0] sm:$0xff]  ;;  %v442_v28 = vld [vmem:[#allocation5 + $0x6d8] sm:$0xff] }
 0x236   :  { %v12829_v32 = vcombine.high %v441_v12, %v445_v27  ;;  %v12828_v38 = vcombine.low %v441_v12, %v445_v27  ;;  %v12830_v40 = vcombine.low %v442_v28, %v446_v29  ;;  %v502_v12 = vld [vmem:[#allocation5 + $0x8b8] sm:$0xff] }
 0x238   :  { %3713 = vmatpush1.bf16.msra.mxu0 %v12764_v33  ;;  %3877 = vmatpush1.bf16.msra.mxu1 %v12766_v35  ;;  %v12831_v33 = vcombine.high %v442_v28, %v446_v29  ;;  %v449_v35 = vld [vmem:[#allocation5 + $0x710] sm:$0xff] }
 0x239   :  { %3714 = vmatprep.subr.bf16.mxu0 %v12773_v36  ;;  %3878 = vmatprep.subr.bf16.mxu1 %v12775_v23  ;;  %v453_v36 = vld [vmem:[#allocation5 + $0x730] sm:$0xff]  ;;  %v450_v23 = vld [vmem:[#allocation5 + $0x718] sm:$0xff] }
 0x23a   :  { %v12837_v41 = vcombine.high %v449_v35, %v453_v36  ;;  %v12836_v47 = vcombine.low %v449_v35, %v453_v36  ;;  %v12838_v49 = vcombine.low %v450_v23, %v454_v37  ;;  %v510_v35 = vld [vmem:[#allocation5 + $0x8f8] sm:$0xff] }
 0x23c   :  { %3715 = vmatpush1.bf16.msra.mxu0 %v12772_v42  ;;  %3879 = vmatpush1.bf16.msra.mxu1 %v12774_v43  ;;  %v12839_v42 = vcombine.high %v450_v23, %v454_v37  ;;  %v457_v43 = vld [vmem:[#allocation5 + $0x750] sm:$0xff] }
 0x23d   :  { %3716 = vmatprep.subr.bf16.mxu0 %v12781_v44  ;;  %3880 = vmatprep.subr.bf16.mxu1 %v12783_v45  ;;  %v461_v44 = vld [vmem:[#allocation5 + $0x770] sm:$0xff]  ;;  %v458_v45 = vld [vmem:[#allocation5 + $0x758] sm:$0xff] }
 0x23e   :  { %v12845_v50 = vcombine.high %v457_v43, %v461_v44  ;;  %v12844_v58 = vcombine.low %v457_v43, %v461_v44  ;;  %v12846_v59 = vcombine.low %v458_v45, %v462_v46 }
 0x240   :  { %3717 = vmatpush1.bf16.msra.mxu0 %v12780_v51  ;;  %3881 = vmatpush1.bf16.msra.mxu1 %v12782_v52  ;;  %v12847_v51 = vcombine.high %v458_v45, %v462_v46  ;;  %v465_v52 = vld [vmem:[#allocation5 + $0x790] sm:$0xff] }
 0x241   :  { %3718 = vmatprep.subr.bf16.mxu0 %v12789_v53  ;;  %3882 = vmatprep.subr.bf16.mxu1 %v12791_v54  ;;  %v469_v53 = vld [vmem:[#allocation5 + $0x7b0] sm:$0xff]  ;;  %v466_v54 = vld [vmem:[#allocation5 + $0x798] sm:$0xff] }
 0x242   :  { %v12853_v60 = vcombine.high %v465_v52, %v469_v53  ;;  %v12852_v2 = vcombine.low %v465_v52, %v469_v53  ;;  %v12854_v3 = vcombine.low %v466_v54, %v470_v55  ;;  %v521_v46 = vld [vmem:[#allocation5 + $0x950] sm:$0xff] }
 0x244   :  { %3719 = vmatpush1.bf16.msra.mxu0 %v12788_v61  ;;  %3883 = vmatpush1.bf16.msra.mxu1 %v12790_v62  ;;  %v12855_v61 = vcombine.high %v466_v54, %v470_v55  ;;  %v473_v62 = vld [vmem:[#allocation5 + $0x7d0] sm:$0xff] }
 0x245   :  { %3720 = vmatprep.subr.bf16.mxu0 %v12797_v63  ;;  %3884 = vmatprep.subr.bf16.mxu1 %v12799_v0  ;;  %v477_v63 = vld [vmem:[#allocation5 + $0x7f0] sm:$0xff]  ;;  %v474_v0 = vld [vmem:[#allocation5 + $0x7d8] sm:$0xff] }
 0x246   :  { %v12861_v4 = vcombine.high %v473_v62, %v477_v63  ;;  %v12860_v10 = vcombine.low %v473_v62, %v477_v63  ;;  %v12862_v11 = vcombine.low %v474_v0, %v478_v1  ;;  %v529_v55 = vld [vmem:[#allocation5 + $0x990] sm:$0xff] }
 0x248   :  { %3721 = vmatpush1.bf16.msra.mxu0 %v12796_v5  ;;  %3885 = vmatpush1.bf16.msra.mxu1 %v12798_v6  ;;  %v12863_v5 = vcombine.high %v474_v0, %v478_v1  ;;  %v481_v6 = vld [vmem:[#allocation5 + $0x810] sm:$0xff] }
 0x249   :  { %3722 = vmatprep.subr.bf16.mxu0 %v12805_v7  ;;  %3886 = vmatprep.subr.bf16.mxu1 %v12807_v8  ;;  %v485_v7 = vld [vmem:[#allocation5 + $0x830] sm:$0xff]  ;;  %v482_v8 = vld [vmem:[#allocation5 + $0x818] sm:$0xff] }
 0x24a   :  { %v12869_v13 = vcombine.high %v481_v6, %v485_v7  ;;  %v12868_v19 = vcombine.low %v481_v6, %v485_v7  ;;  %v12870_v20 = vcombine.low %v482_v8, %v486_v9  ;;  %v537_v1 = vld [vmem:[#allocation5 + $0x9d0] sm:$0xff] }
 0x24c   :  { %3723 = vmatpush1.bf16.msra.mxu0 %v12804_v14  ;;  %3887 = vmatpush1.bf16.msra.mxu1 %v12806_v15  ;;  %v12871_v14 = vcombine.high %v482_v8, %v486_v9  ;;  %v489_v15 = vld [vmem:[#allocation5 + $0x850] sm:$0xff] }
 0x24d   :  { %3724 = vmatprep.subr.bf16.mxu0 %v12813_v16  ;;  %3888 = vmatprep.subr.bf16.mxu1 %v12815_v17  ;;  %v493_v16 = vld [vmem:[#allocation5 + $0x870] sm:$0xff]  ;;  %v490_v17 = vld [vmem:[#allocation5 + $0x858] sm:$0xff] }
 0x24e   :  { %v12877_v21 = vcombine.high %v489_v15, %v493_v16  ;;  %v12876_v27 = vcombine.low %v489_v15, %v493_v16  ;;  %v12878_v28 = vcombine.low %v490_v17, %v494_v18  ;;  %v545_v9 = vld [vmem:[#allocation5 + $0xa10] sm:$0xff] }
 0x250   :  { %3725 = vmatpush1.bf16.msra.mxu0 %v12812_v57  ;;  %3889 = vmatpush1.bf16.msra.mxu1 %v12814_v22  ;;  %v12879_v57 = vcombine.high %v490_v17, %v494_v18  ;;  %v497_v22 = vld [vmem:[#allocation5 + $0x890] sm:$0xff] }
 0x251   :  { %3726 = vmatprep.subr.bf16.mxu0 %v12821_v24  ;;  %3890 = vmatprep.subr.bf16.mxu1 %v12823_v26  ;;  %v501_v24 = vld [vmem:[#allocation5 + $0x8b0] sm:$0xff]  ;;  %v498_v26 = vld [vmem:[#allocation5 + $0x898] sm:$0xff] }
 0x252   :  { %v12885_v29 = vcombine.high %v497_v22, %v501_v24  ;;  %v12884_v36 = vcombine.low %v497_v22, %v501_v24  ;;  %v553_v18 = vld [vmem:[#allocation5 + $0xa50] sm:$0xff] }
 0x254   :  { %3727 = vmatpush1.bf16.msra.mxu0 %v12820_v30  ;;  %3891 = vmatpush1.bf16.msra.mxu1 %v12822_v31  ;;  %v12887_v30 = vcombine.high %v498_v26, %v502_v12  ;;  %v505_v31 = vld [vmem:[#allocation5 + $0x8d0] sm:$0xff] }
 0x255   :  { %3728 = vmatprep.subr.bf16.mxu0 %v12829_v32  ;;  %3892 = vmatprep.subr.bf16.mxu1 %v12831_v33  ;;  %v509_v32 = vld [vmem:[#allocation5 + $0x8f0] sm:$0xff]  ;;  %v506_v33 = vld [vmem:[#allocation5 + $0x8d8] sm:$0xff] }
 0x256   :  { %v12893_v23 = vcombine.high %v505_v31, %v509_v32  ;;  %v12895_v37 = vcombine.high %v506_v33, %v510_v35  ;;  %v12892_v43 = vcombine.low %v505_v31, %v509_v32  ;;  %v12894_v44 = vcombine.low %v506_v33, %v510_v35  ;;  %v569_v35 = vld [vmem:[#allocation5 + $0xad0] sm:$0xff] }
 0x258   :  { %3729 = vmatpush1.bf16.msra.mxu0 %v12828_v38  ;;  %3893 = vmatpush1.bf16.msra.mxu1 %v12830_v40  ;;  %v513_v38 = vld [vmem:[#allocation5 + $0x910] sm:$0xff] }
 0x259   :  { %3730 = vmatprep.subr.bf16.mxu0 %v12837_v41  ;;  %3894 = vmatprep.subr.bf16.mxu1 %v12839_v42  ;;  %v517_v40 = vld [vmem:[#allocation5 + $0x930] sm:$0xff]  ;;  %v514_v41 = vld [vmem:[#allocation5 + $0x918] sm:$0xff] }
 0x25a   :  { %v518_v42 = vld [vmem:[#allocation5 + $0x938] sm:$0xff]  ;;  %v12901_v45 = vcombine.high %v513_v38, %v517_v40 }
 0x25b   :  { %v12902_v52 = vcombine.low %v514_v41, %v518_v42 }
 0x25c   :  { %3731 = vmatpush1.bf16.msra.mxu0 %v12836_v47  ;;  %3895 = vmatpush1.bf16.msra.mxu1 %v12838_v49  ;;  %v525_v47 = vld [vmem:[#allocation5 + $0x970] sm:$0xff]  ;;  %v522_v49 = vld [vmem:[#allocation5 + $0x958] sm:$0xff] }
 0x25d   :  { %3732 = vmatprep.subr.bf16.mxu0 %v12845_v50  ;;  %3896 = vmatprep.subr.bf16.mxu1 %v12847_v51  ;;  %v526_v50 = vld [vmem:[#allocation5 + $0x978] sm:$0xff]  ;;  %v12900_v51 = vcombine.low %v513_v38, %v517_v40  ;;  %v12909_v53 = vcombine.high %v521_v46, %v525_v47 }
 0x25e   :  { %v12911_v54 = vcombine.high %v522_v49, %v526_v50  ;;  %v12910_v62 = vcombine.low %v522_v49, %v526_v50  ;;  %v585_v50 = vld [vmem:[#allocation5 + $0xb50] sm:$0xff] }
 0x260   :  { %3733 = vmatpush1.bf16.msra.mxu0 %v12844_v58  ;;  %3897 = vmatpush1.bf16.msra.mxu1 %v12846_v59  ;;  %v533_v58 = vld [vmem:[#allocation5 + $0x9b0] sm:$0xff]  ;;  %v530_v59 = vld [vmem:[#allocation5 + $0x998] sm:$0xff] }
 0x261   :  { %3734 = vmatprep.subr.bf16.mxu0 %v12853_v60  ;;  %3898 = vmatprep.subr.bf16.mxu1 %v12855_v61  ;;  %v534_v60 = vld [vmem:[#allocation5 + $0x9b8] sm:$0xff]  ;;  %v12908_v61 = vcombine.low %v521_v46, %v525_v47  ;;  %v12917_v63 = vcombine.high %v529_v55, %v533_v58 }
 0x262   :  { %v12919_v0 = vcombine.high %v530_v59, %v534_v60  ;;  %v12918_v6 = vcombine.low %v530_v59, %v534_v60  ;;  %v593_v60 = vld [vmem:[#allocation5 + $0xb90] sm:$0xff] }
 0x264   :  { %3735 = vmatpush1.bf16.msra.mxu0 %v12852_v2  ;;  %3899 = vmatpush1.bf16.msra.mxu1 %v12854_v3  ;;  %v541_v2 = vld [vmem:[#allocation5 + $0x9f0] sm:$0xff]  ;;  %v538_v3 = vld [vmem:[#allocation5 + $0x9d8] sm:$0xff] }
 0x265   :  { %3736 = vmatprep.subr.bf16.mxu0 %v12861_v4  ;;  %3900 = vmatprep.subr.bf16.mxu1 %v12863_v5  ;;  %v542_v4 = vld [vmem:[#allocation5 + $0x9f8] sm:$0xff]  ;;  %v12916_v5 = vcombine.low %v529_v55, %v533_v58  ;;  %v12925_v7 = vcombine.high %v537_v1, %v541_v2 }
 0x266   :  { %v12927_v8 = vcombine.high %v538_v3, %v542_v4  ;;  %v12926_v15 = vcombine.low %v538_v3, %v542_v4  ;;  %v601_v4 = vld [vmem:[#allocation5 + $0xbd0] sm:$0xff] }
 0x268   :  { %3737 = vmatpush1.bf16.msra.mxu0 %v12860_v10  ;;  %3901 = vmatpush1.bf16.msra.mxu1 %v12862_v11  ;;  %v549_v10 = vld [vmem:[#allocation5 + $0xa30] sm:$0xff]  ;;  %v546_v11 = vld [vmem:[#allocation5 + $0xa18] sm:$0xff] }
 0x269   :  { %3747 = vmatprep.subr.bf16.mxu0 %v12869_v13  ;;  %3911 = vmatprep.subr.bf16.mxu1 %v12871_v14  ;;  %v550_v13 = vld [vmem:[#allocation5 + $0xa38] sm:$0xff]  ;;  %v12924_v14 = vcombine.low %v537_v1, %v541_v2  ;;  %v12933_v16 = vcombine.high %v545_v9, %v549_v10 }
 0x26a   :  { %v12935_v17 = vcombine.high %v546_v11, %v550_v13  ;;  %v12934_v22 = vcombine.low %v546_v11, %v550_v13  ;;  %v609_v13 = vld [vmem:[#allocation5 + $0xc10] sm:$0xff] }
 0x26b   :  { %3739 = vmatmul.mubr.bf16.vlgmr.msra.gmra.mrb[4].mxu0 %v15653_v25  ;;  %3903 = vmatmul.mubr.bf16.vlgmr.msra.gmra.mrb[4].mxu1 %v15653_v25  ;;  %v12886_v25 = vcombine.low %v498_v26, %v502_v12  ;;  %v561_v12 = vld [vmem:[#allocation5 + $0xa90] sm:$0xff] }
 0x26c   :  { %3748 = vmatpush1.bf16.msra.mxu0 %v12868_v19  ;;  %3912 = vmatpush1.bf16.msra.mxu1 %v12870_v20  ;;  %v557_v19 = vld [vmem:[#allocation5 + $0xa70] sm:$0xff]  ;;  %v554_v20 = vld [vmem:[#allocation5 + $0xa58] sm:$0xff] }
 0x26d   :  { %3749 = vmatprep.subr.bf16.mxu0 %v12877_v21  ;;  %3913 = vmatprep.subr.bf16.mxu1 %v12879_v57  ;;  %v558_v21 = vld [vmem:[#allocation5 + $0xa78] sm:$0xff]  ;;  %v12932_v57 = vcombine.low %v545_v9, %v549_v10  ;;  %v12941_v24 = vcombine.high %v553_v18, %v557_v19 }
 0x26e   :  { %3779 = vmatprep.mubr.bf16.mxu0 %v15655_v34  ;;  %3943 = vmatprep.mubr.bf16.mxu1 %v15655_v34  ;;  %v12903_v34 = vcombine.high %v514_v41, %v518_v42  ;;  %v12943_v26 = vcombine.high %v554_v20, %v558_v21  ;;  %v12942_v31 = vcombine.low %v554_v20, %v558_v21  ;;  %v577_v42 = vld [vmem:[#allocation5 + $0xb10] sm:$0xff] }
 0x26f   :  { %v617_v21 = vld [vmem:[#allocation5 + $0xc50] sm:$0xff] }
 0x270   :  { %3750 = vmatpush1.bf16.msra.mxu0 %v12876_v27  ;;  %3914 = vmatpush1.bf16.msra.mxu1 %v12878_v28  ;;  %v565_v27 = vld [vmem:[#allocation5 + $0xab0] sm:$0xff]  ;;  %v562_v28 = vld [vmem:[#allocation5 + $0xa98] sm:$0xff] }
 0x271   :  { %3751 = vmatprep.subr.bf16.mxu0 %v12885_v29  ;;  %3915 = vmatprep.subr.bf16.mxu1 %v12887_v30  ;;  %v566_v29 = vld [vmem:[#allocation5 + $0xab8] sm:$0xff]  ;;  %v12940_v30 = vcombine.low %v553_v18, %v557_v19  ;;  %v12949_v32 = vcombine.high %v561_v12, %v565_v27 }
 0x272   :  { %v12951_v33 = vcombine.high %v562_v28, %v566_v29  ;;  %v12950_v38 = vcombine.low %v562_v28, %v566_v29  ;;  %v625_v29 = vld [vmem:[#allocation5 + $0xc90] sm:$0xff] }
 0x274   :  { %3752 = vmatpush1.bf16.msra.mxu0 %v12884_v36  ;;  %3916 = vmatpush1.bf16.msra.mxu1 %v12886_v25  ;;  %v573_v36 = vld [vmem:[#allocation5 + $0xaf0] sm:$0xff]  ;;  %v570_v25 = vld [vmem:[#allocation5 + $0xad8] sm:$0xff] }
 0x275   :  { %3753 = vmatprep.subr.bf16.mxu0 %v12893_v23  ;;  %3917 = vmatprep.subr.bf16.mxu1 %v12895_v37  ;;  %v574_v23 = vld [vmem:[#allocation5 + $0xaf8] sm:$0xff]  ;;  %v12948_v37 = vcombine.low %v561_v12, %v565_v27  ;;  %v12957_v40 = vcombine.high %v569_v35, %v573_v36 }
 0x276   :  { %v12959_v41 = vcombine.high %v570_v25, %v574_v23  ;;  %v12958_v46 = vcombine.low %v570_v25, %v574_v23  ;;  %v633_v23 = vld [vmem:[#allocation5 + $0xcd0] sm:$0xff] }
 0x278   :  { %3754 = vmatpush1.bf16.msra.mxu0 %v12892_v43  ;;  %3918 = vmatpush1.bf16.msra.mxu1 %v12894_v44  ;;  %v581_v43 = vld [vmem:[#allocation5 + $0xb30] sm:$0xff]  ;;  %v578_v44 = vld [vmem:[#allocation5 + $0xb18] sm:$0xff] }
 0x279   :  { %3755 = vmatprep.subr.bf16.mxu0 %v12901_v45  ;;  %3919 = vmatprep.subr.bf16.mxu1 %v12903_v34  ;;  %v582_v45 = vld [vmem:[#allocation5 + $0xb38] sm:$0xff]  ;;  %v12956_v34 = vcombine.low %v569_v35, %v573_v36  ;;  %v12965_v47 = vcombine.high %v577_v42, %v581_v43 }
 0x27a   :  { %v12967_v49 = vcombine.high %v578_v44, %v582_v45  ;;  %v12966_v55 = vcombine.low %v578_v44, %v582_v45  ;;  %v641_v44 = vld [vmem:[#allocation5 + $0xd10] sm:$0xff] }
 0x27b   :  { %v645_v45 = vld [vmem:[#allocation5 + $0xd30] sm:$0xff] }
 0x27c   :  { %3756 = vmatpush1.bf16.msra.mxu0 %v12900_v51  ;;  %3920 = vmatpush1.bf16.msra.mxu1 %v12902_v52  ;;  %v589_v51 = vld [vmem:[#allocation5 + $0xb70] sm:$0xff]  ;;  %v586_v52 = vld [vmem:[#allocation5 + $0xb58] sm:$0xff] }
 0x27d   :  { %3757 = vmatprep.subr.bf16.mxu0 %v12909_v53  ;;  %3921 = vmatprep.subr.bf16.mxu1 %v12911_v54  ;;  %v590_v53 = vld [vmem:[#allocation5 + $0xb78] sm:$0xff]  ;;  %v12964_v54 = vcombine.low %v577_v42, %v581_v43  ;;  %v12973_v58 = vcombine.high %v585_v50, %v589_v51 }
 0x27e   :  { %v12975_v59 = vcombine.high %v586_v52, %v590_v53  ;;  %v12974_v1 = vcombine.low %v586_v52, %v590_v53  ;;  %v653_v52 = vld [vmem:[#allocation5 + $0xd70] sm:$0xff]  ;;  %v650_v53 = vld [vmem:[#allocation5 + $0xd58] sm:$0xff] }
 0x280   :  { %3758 = vmatpush1.bf16.msra.mxu0 %v12908_v61  ;;  %3922 = vmatpush1.bf16.msra.mxu1 %v12910_v62  ;;  %v597_v61 = vld [vmem:[#allocation5 + $0xbb0] sm:$0xff]  ;;  %v594_v62 = vld [vmem:[#allocation5 + $0xb98] sm:$0xff] }
 0x281   :  { %3759 = vmatprep.subr.bf16.mxu0 %v12917_v63  ;;  %3923 = vmatprep.subr.bf16.mxu1 %v12919_v0  ;;  %v598_v63 = vld [vmem:[#allocation5 + $0xbb8] sm:$0xff]  ;;  %v12972_v0 = vcombine.low %v585_v50, %v589_v51  ;;  %v12981_v2 = vcombine.high %v593_v60, %v597_v61  ;;  %v13029_v50 = vcombine.high %v641_v44, %v645_v45  ;;  %v649_v51 = vld [vmem:[#allocation5 + $0xd50] sm:$0xff] }
 0x282   :  { %v12983_v3 = vcombine.high %v594_v62, %v598_v63  ;;  %v12982_v9 = vcombine.low %v594_v62, %v598_v63  ;;  %v661_v62 = vld [vmem:[#allocation5 + $0xdb0] sm:$0xff]  ;;  %v658_v63 = vld [vmem:[#allocation5 + $0xd98] sm:$0xff] }
 0x284   :  { %3760 = vmatpush1.bf16.msra.mxu0 %v12916_v5  ;;  %3924 = vmatpush1.bf16.msra.mxu1 %v12918_v6  ;;  %v605_v5 = vld [vmem:[#allocation5 + $0xbf0] sm:$0xff]  ;;  %v602_v6 = vld [vmem:[#allocation5 + $0xbd8] sm:$0xff] }
 0x285   :  { %3761 = vmatprep.subr.bf16.mxu0 %v12925_v7  ;;  %3925 = vmatprep.subr.bf16.mxu1 %v12927_v8  ;;  %v606_v7 = vld [vmem:[#allocation5 + $0xbf8] sm:$0xff]  ;;  %v12980_v8 = vcombine.low %v593_v60, %v597_v61  ;;  %v12989_v10 = vcombine.high %v601_v4, %v605_v5  ;;  %v657_v61 = vld [vmem:[#allocation5 + $0xd90] sm:$0xff] }
 0x286   :  { %v12991_v11 = vcombine.high %v602_v6, %v606_v7  ;;  %v12990_v18 = vcombine.low %v602_v6, %v606_v7  ;;  %v665_v6 = vld [vmem:[#allocation5 + $0xdd0] sm:$0xff] }
 0x287   :  { %v669_v7 = vld [vmem:[#allocation5 + $0xdf0] sm:$0xff] }
 0x288   :  { %3762 = vmatpush1.bf16.msra.mxu0 %v12924_v14  ;;  %3926 = vmatpush1.bf16.msra.mxu1 %v12926_v15  ;;  %v613_v14 = vld [vmem:[#allocation5 + $0xc30] sm:$0xff]  ;;  %v610_v15 = vld [vmem:[#allocation5 + $0xc18] sm:$0xff] }
 0x289   :  { %3763 = vmatprep.subr.bf16.mxu0 %v12933_v16  ;;  %3927 = vmatprep.subr.bf16.mxu1 %v12935_v17  ;;  %v614_v16 = vld [vmem:[#allocation5 + $0xc38] sm:$0xff]  ;;  %v12988_v17 = vcombine.low %v601_v4, %v605_v5  ;;  %v12997_v19 = vcombine.high %v609_v13, %v613_v14 }
 0x28a   :  { %v12999_v20 = vcombine.high %v610_v15, %v614_v16  ;;  %v12998_v12 = vcombine.low %v610_v15, %v614_v16  ;;  %v13044_v15 = vcombine.low %v657_v61, %v661_v62 }
 0x28c   :  { %3764 = vmatpush1.bf16.msra.mxu0 %v12932_v57  ;;  %3928 = vmatpush1.bf16.msra.mxu1 %v12934_v22  ;;  %v621_v57 = vld [vmem:[#allocation5 + $0xc70] sm:$0xff]  ;;  %v618_v22 = vld [vmem:[#allocation5 + $0xc58] sm:$0xff] }
 0x28d   :  { %3765 = vmatprep.subr.bf16.mxu0 %v12941_v24  ;;  %3929 = vmatprep.subr.bf16.mxu1 %v12943_v26  ;;  %v622_v24 = vld [vmem:[#allocation5 + $0xc78] sm:$0xff]  ;;  %v12996_v26 = vcombine.low %v609_v13, %v613_v14  ;;  %v13005_v27 = vcombine.high %v617_v21, %v621_v57 }
 0x28e   :  { %v13007_v28 = vcombine.high %v618_v22, %v622_v24  ;;  %v13006_v35 = vcombine.low %v618_v22, %v622_v24  ;;  %v677_v22 = vld [vmem:[#allocation5 + $0xe30] sm:$0xff]  ;;  %v674_v24 = vld [vmem:[#allocation5 + $0xe18] sm:$0xff] }
 0x290   :  { %3766 = vmatpush1.bf16.msra.mxu0 %v12940_v30  ;;  %3930 = vmatpush1.bf16.msra.mxu1 %v12942_v31  ;;  %v629_v30 = vld [vmem:[#allocation5 + $0xcb0] sm:$0xff]  ;;  %v626_v31 = vld [vmem:[#allocation5 + $0xc98] sm:$0xff] }
 0x291   :  { %3767 = vmatprep.subr.bf16.mxu0 %v12949_v32  ;;  %3931 = vmatprep.subr.bf16.mxu1 %v12951_v33  ;;  %v630_v32 = vld [vmem:[#allocation5 + $0xcb8] sm:$0xff]  ;;  %v13004_v33 = vcombine.low %v617_v21, %v621_v57  ;;  %v13013_v36 = vcombine.high %v625_v29, %v629_v30  ;;  %v673_v57 = vld [vmem:[#allocation5 + $0xe10] sm:$0xff] }
 0x292   :  { %v13015_v25 = vcombine.high %v626_v31, %v630_v32 }
 0x294   :  { %3768 = vmatpush1.bf16.msra.mxu0 %v12948_v37  ;;  %3932 = vmatpush1.bf16.msra.mxu1 %v12950_v38  ;;  %v637_v37 = vld [vmem:[#allocation5 + $0xcf0] sm:$0xff]  ;;  %v634_v38 = vld [vmem:[#allocation5 + $0xcd8] sm:$0xff] }
 0x295   :  { %3769 = vmatprep.subr.bf16.mxu0 %v12957_v40  ;;  %3933 = vmatprep.subr.bf16.mxu1 %v12959_v41  ;;  %v638_v40 = vld [vmem:[#allocation5 + $0xcf8] sm:$0xff]  ;;  %v13012_v41 = vcombine.low %v625_v29, %v629_v30  ;;  %v13021_v42 = vcombine.high %v633_v23, %v637_v37  ;;  %v681_v30 = vld [vmem:[#allocation5 + $0xe50] sm:$0xff] }
 0x296   :  { %v13023_v43 = vcombine.high %v634_v38, %v638_v40 }
 0x298   :  { %3770 = vmatpush1.bf16.msra.mxu0 %v12956_v34  ;;  %3934 = vmatpush1.bf16.msra.mxu1 %v12958_v46  ;;  %v642_v34 = vld [vmem:[#allocation5 + $0xd18] sm:$0xff] }
 0x299   :  { %3771 = vmatprep.subr.bf16.mxu0 %v12965_v47  ;;  %3935 = vmatprep.subr.bf16.mxu1 %v12967_v49  ;;  %v646_v46 = vld [vmem:[#allocation5 + $0xd38] sm:$0xff]  ;;  %v13020_v47 = vcombine.low %v633_v23, %v637_v37  ;;  %v13022_v49 = vcombine.low %v634_v38, %v638_v40  ;;  %v689_v37 = vld [vmem:[#allocation5 + $0xe90] sm:$0xff] }
 0x29a   :  { %v693_v38 = vld [vmem:[#allocation5 + $0xeb0] sm:$0xff]  ;;  %v690_v40 = vld [vmem:[#allocation5 + $0xe98] sm:$0xff] }
 0x29c   :  { %3772 = vmatpush1.bf16.msra.mxu0 %v12964_v54  ;;  %3936 = vmatpush1.bf16.msra.mxu1 %v12966_v55  ;;  %v654_v54 = vld [vmem:[#allocation5 + $0xd78] sm:$0xff]  ;;  %v13028_v55 = vcombine.low %v641_v44, %v645_v45  ;;  %v697_v45 = vld [vmem:[#allocation5 + $0xed0] sm:$0xff] }
 0x29d   :  { %3773 = vmatprep.subr.bf16.mxu0 %v12973_v58  ;;  %3937 = vmatprep.subr.bf16.mxu1 %v12975_v59  ;;  %v13030_v58 = vcombine.low %v642_v34, %v646_v46  ;;  %v13037_v59 = vcombine.high %v649_v51, %v653_v52  ;;  %v13039_v60 = vcombine.high %v650_v53, %v654_v54 }
 0x2a0   :  { %3774 = vmatpush1.bf16.msra.mxu0 %v12972_v0  ;;  %3938 = vmatpush1.bf16.msra.mxu1 %v12974_v1  ;;  %v662_v0 = vld [vmem:[#allocation5 + $0xdb8] sm:$0xff]  ;;  %v13036_v1 = vcombine.low %v649_v51, %v653_v52  ;;  %v705_v52 = vld [vmem:[#allocation5 + $0xf10] sm:$0xff] }
 0x2a1   :  { %3775 = vmatprep.subr.bf16.mxu0 %v12981_v2  ;;  %3939 = vmatprep.subr.bf16.mxu1 %v12983_v3  ;;  %v13038_v2 = vcombine.low %v650_v53, %v654_v54  ;;  %v13045_v3 = vcombine.high %v657_v61, %v661_v62  ;;  %v13047_v5 = vcombine.high %v658_v63, %v662_v0  ;;  %v709_v53 = vld [vmem:[#allocation5 + $0xf30] sm:$0xff]  ;;  %v737_v54 = vlaneseq }
 0x2a2   :  { %v13093_v61 = vcombine.high %v705_v52, %v709_v53 }
 0x2a4   :  { %3776 = vmatpush1.bf16.msra.mxu0 %v12980_v8  ;;  %3940 = vmatpush1.bf16.msra.mxu1 %v12982_v9 }
 0x2a5   :  { %3777 = vmatprep.subr.bf16.mxu0 %v12989_v10  ;;  %3941 = vmatprep.subr.bf16.mxu1 %v12991_v11  ;;  %v666_v10 = vld [vmem:[#allocation5 + $0xdd8] sm:$0xff] }
 0x2a6   :  { %v670_v11 = vld [vmem:[#allocation5 + $0xdf8] sm:$0xff] }
 0x2a7   :  { %v13055_v21 = vcombine.high %v666_v10, %v670_v11 }
 0x2a8   :  { %3778 = vmatpush1.bf16.msra.mxu0 %v12988_v17  ;;  %3942 = vmatpush1.bf16.msra.mxu1 %v12990_v18  ;;  %v13046_v18 = vcombine.low %v658_v63, %v662_v0  ;;  %v713_v63 = vld [vmem:[#allocation5 + $0xf50] sm:$0xff] }
 0x2a9   :  { %3788 = vmatprep.subr.bf16.mxu0 %v12997_v19  ;;  %3952 = vmatprep.subr.bf16.mxu1 %v12999_v20  ;;  %v13053_v19 = vcombine.high %v665_v6, %v669_v7  ;;  %v717_v0 = vld [vmem:[#allocation5 + $0xf70] sm:$0xff] }
 0x2ab   :  { %3780 = vmatmul.mubr.bf16.vlgmr.msra.gmra.mrb[4].mxu0 %v15661_v39  ;;  %3944 = vmatmul.mubr.bf16.vlgmr.msra.gmra.mrb[4].mxu1 %v15661_v39  ;;  %v13014_v39 = vcombine.low %v626_v31, %v630_v32  ;;  %v685_v31 = vld [vmem:[#allocation5 + $0xe70] sm:$0xff]  ;;  %v682_v32 = vld [vmem:[#allocation5 + $0xe58] sm:$0xff] }
 0x2ac   :  { %3789 = vmatpush1.bf16.msra.mxu0 %v12996_v26  ;;  %3953 = vmatpush1.bf16.msra.mxu1 %v12998_v12  ;;  %v678_v26 = vld [vmem:[#allocation5 + $0xe38] sm:$0xff]  ;;  %v13052_v12 = vcombine.low %v665_v6, %v669_v7  ;;  %v13101_v7 = vcombine.high %v713_v63, %v717_v0 }
 0x2ad   :  { %3790 = vmatprep.subr.bf16.mxu0 %v13005_v27  ;;  %3954 = vmatprep.subr.bf16.mxu1 %v13007_v28  ;;  %v13054_v27 = vcombine.low %v666_v10, %v670_v11  ;;  %v13061_v28 = vcombine.high %v673_v57, %v677_v22  ;;  %v13063_v29 = vcombine.high %v674_v24, %v678_v26  ;;  %v721_v11 = vld [vmem:[#allocation5 + $0xf90] sm:$0xff] }
 0x2ae   :  { %3820 = vmatprep.mubr.bf16.mxu0 %v15663_v48  ;;  %3984 = vmatprep.mubr.bf16.mxu1 %v15663_v48  ;;  %v13031_v48 = vcombine.high %v642_v34, %v646_v46  ;;  %v701_v34 = vld [vmem:[#allocation5 + $0xef0] sm:$0xff]  ;;  %v698_v46 = vld [vmem:[#allocation5 + $0xed8] sm:$0xff] }
 0x2b0   :  { %3791 = vmatpush1.bf16.msra.mxu0 %v13004_v33  ;;  %3955 = vmatpush1.bf16.msra.mxu1 %v13006_v35  ;;  %v686_v33 = vld [vmem:[#allocation5 + $0xe78] sm:$0xff]  ;;  %v13060_v35 = vcombine.low %v673_v57, %v677_v22  ;;  %v729_v22 = vld [vmem:[#allocation5 + $0xfd0] sm:$0xff] }
 0x2b1   :  { %3792 = vmatprep.subr.bf16.mxu0 %v13013_v36  ;;  %3956 = vmatprep.subr.bf16.mxu1 %v13015_v25  ;;  %v13062_v36 = vcombine.low %v674_v24, %v678_v26  ;;  %v13069_v25 = vcombine.high %v681_v30, %v685_v31  ;;  %v13071_v23 = vcombine.high %v682_v32, %v686_v33  ;;  %v733_v24 = vld [vmem:[#allocation5 + $0xff0] sm:$0xff] }
 0x2b4   :  { %3793 = vmatpush1.bf16.msra.mxu0 %v13012_v41  ;;  %3957 = vmatpush1.bf16.msra.mxu1 %v13014_v39  ;;  %v694_v41 = vld [vmem:[#allocation5 + $0xeb8] sm:$0xff]  ;;  %v13068_v39 = vcombine.low %v681_v30, %v685_v31  ;;  %v13117_v30 = vcombine.high %v729_v22, %v733_v24 }
 0x2b5   :  { %3794 = vmatprep.subr.bf16.mxu0 %v13021_v42  ;;  %3958 = vmatprep.subr.bf16.mxu1 %v13023_v43  ;;  %v13070_v42 = vcombine.low %v682_v32, %v686_v33  ;;  %v13077_v43 = vcombine.high %v689_v37, %v693_v38  ;;  %v13079_v44 = vcombine.high %v690_v40, %v694_v41 }
 0x2b6   :  { %v13116_v33 = vcombine.low %v729_v22, %v733_v24  ;;  %v14530_v22 = vld [vmem:[#allocation8 + $0x164] ss:$16 sps:$4 sm:$0xff]   ;;  %v14533_v24 = vld [vmem:[#allocation8 + $0x16c] ss:$16 sps:$4 sm:$0xff]  }
 0x2b8   :  { %3795 = vmatpush1.bf16.msra.mxu0 %v13020_v47  ;;  %3959 = vmatpush1.bf16.msra.mxu1 %v13022_v49  ;;  %v702_v47 = vld [vmem:[#allocation5 + $0xef8] sm:$0xff]  ;;  %v13076_v49 = vcombine.low %v689_v37, %v693_v38  ;;  %v14465_v38 = vld [vmem:[#allocation8 + $0x8] ss:$16 sps:$4 sm:$0xff]  }
 0x2b9   :  { %3796 = vmatprep.subr.bf16.mxu0 %v13029_v50  ;;  %3960 = vmatprep.subr.bf16.mxu1 %v13031_v48  ;;  %v13078_v50 = vcombine.low %v690_v40, %v694_v41  ;;  %v13085_v48 = vcombine.high %v697_v45, %v701_v34  ;;  %v13087_v51 = vcombine.high %v698_v46, %v702_v47  ;;  %v14462_v37 = vld [vmem:[#allocation8] ss:$16 sps:$4 sm:$0xff]   ;;  %v14470_v40 = vld [vmem:[#allocation8 + $0x24] ss:$16 sps:$4 sm:$0xff]  }
 0x2bc   :  { %3797 = vmatpush1.bf16.msra.mxu0 %v13028_v55  ;;  %3961 = vmatpush1.bf16.msra.mxu1 %v13030_v58  ;;  %v706_v55 = vld [vmem:[#allocation5 + $0xf18] sm:$0xff] }
 0x2bd   :  { %3798 = vmatprep.subr.bf16.mxu0 %v13037_v59  ;;  %3962 = vmatprep.subr.bf16.mxu1 %v13039_v60  ;;  %v710_v58 = vld [vmem:[#allocation5 + $0xf38] sm:$0xff]  ;;  %v13084_v59 = vcombine.low %v697_v45, %v701_v34  ;;  %v13086_v60 = vcombine.low %v698_v46, %v702_v47  ;;  %v14477_v34 = vld [vmem:[#allocation8 + $0x48] ss:$16 sps:$4 sm:$0xff]   ;;  %v14485_v47 = vld [vmem:[#allocation8 + $0x6c] ss:$16 sps:$4 sm:$0xff]  }
 0x2be   :  { %v15687_v4 = vpop.f32.mrb[0].mxu0  ;;  %v15689_v8 = vpop.f32.mrb[0].mxu1  ;;  %v13095_v62 = vcombine.high %v706_v55, %v710_v58  ;;  %v13094_v6 = vcombine.low %v706_v55, %v710_v58  ;;  %v14474_v45 = vld [vmem:[#allocation8 + $0x40] ss:$16 sps:$4 sm:$0xff]   ;;  %v14482_v46 = vld [vmem:[#allocation8 + $0x64] ss:$16 sps:$4 sm:$0xff]  }
 0x2bf   :  { %v15691_v9 = vpop.f32.mrb[1].mxu0  ;;  %v15693_v13 = vpop.f32.mrb[1].mxu1  ;;  %v14492_v55 = vld [vmem:[#allocation8 + $0xa0] ss:$16 sps:$4 sm:$0xff]   ;;  %v14495_v58 = vld [vmem:[#allocation8 + $0xa8] ss:$16 sps:$4 sm:$0xff]  }
 0x2c0   :  { %v3498_v14 = vpop.f32.mrb[2].mxu0  ;;  %3799 = vmatpush1.bf16.msra.mxu0 %v13036_v1  ;;  %v3662_v16 = vpop.f32.mrb[2].mxu1  ;;  %3963 = vmatpush1.bf16.msra.mxu1 %v13038_v2  ;;  %v15695_v1 = vshrl.u32 %v737_v54, 7  ;;  %v714_v2 = vld [vmem:[#allocation5 + $0xf58] sm:$0xff]  ;;  %v14497_v54 = vld [vmem:[#allocation8 + $0xac] ss:$16 sps:$4 sm:$0xff]  }
 0x2c1   :  { %v3499_v17 = vpop.f32.mrb[3].mxu0  ;;  %3800 = vmatprep.subr.bf16.mxu0 %v13045_v3  ;;  %v3663_v20 = vpop.f32.mrb[3].mxu1  ;;  %3964 = vmatprep.subr.bf16.mxu1 %v13047_v5  ;;  %v718_v3 = vld [vmem:[#allocation5 + $0xf78] sm:$0xff]  ;;  %v13092_v5 = vcombine.low %v705_v52, %v709_v53  ;;  %v725_v14 = vld [vmem:[#allocation5 + $0xfb0] sm:$0xff] }
 0x2c2   :  { %v13103_v10 = vcombine.high %v714_v2, %v718_v3  ;;  %v722_v16 = vld [vmem:[#allocation5 + $0xf98] sm:$0xff]  ;;  %v13102_v20 = vcombine.low %v714_v2, %v718_v3  ;;  %v14489_v52 = vld [vmem:[#allocation8 + $0x88] ss:$16 sps:$4 sm:$0xff]  }
 0x2c3   :  { %v726_v17 = vld [vmem:[#allocation5 + $0xfb8] sm:$0xff]  ;;  %v14507_v3 = vld [vmem:[#allocation8 + $0xe8] ss:$16 sps:$4 sm:$0xff]  }
 0x2c4   :  { %3801 = vmatpush1.bf16.msra.mxu0 %v13044_v15  ;;  %3965 = vmatpush1.bf16.msra.mxu1 %v13046_v18  ;;  %v15698_v15 = vsub.s32 1, %v15695_v1  ;;  %v15700_v18 = vld [vmem:[#allocation7] sm:$0xff]  ;;  %v13111_v57 = vcombine.high %v722_v16, %v726_v17  ;;  %v14494_v53 = vld [vmem:[#allocation8 + $0xa4] ss:$16 sps:$4 sm:$0xff]   ;;  %v14504_v2 = vld [vmem:[#allocation8 + $0xe0] ss:$16 sps:$4 sm:$0xff]  }
 0x2c5   :  { %3802 = vmatprep.subr.bf16.mxu0 %v13053_v19  ;;  %3966 = vmatprep.subr.bf16.mxu1 %v13055_v21  ;;  %v13100_v19 = vcombine.low %v713_v63, %v717_v0  ;;  %v13109_v21 = vcombine.high %v721_v11, %v725_v14  ;;  %v14506_v63 = vld [vmem:[#allocation8 + $0xe4] ss:$16 sps:$4 sm:$0xff]   ;;  %v14509_v0 = vld [vmem:[#allocation8 + $0xec] ss:$16 sps:$4 sm:$0xff]  }
 0x2c6   :  { %v744_v26 = vrot.slane %v15700_v18, %v15698_v15 }
 0x2c8   :  { %3803 = vmatpush1.bf16.msra.mxu0 %v13052_v12  ;;  %3967 = vmatpush1.bf16.msra.mxu1 %v13054_v27  ;;  %v730_v12 = vld [vmem:[#allocation5 + $0xfd8] sm:$0xff]  ;;  %v14273_v32 = vadd.f32 %v15691_v9, %v744_v26  ;;  %v14473_v9 = vld [vmem:[#allocation8 + $0x2c] ss:$16 sps:$4 sm:$0xff]  }
 0x2c9   :  { %3804 = vmatprep.subr.bf16.mxu0 %v13061_v28  ;;  %3968 = vmatprep.subr.bf16.mxu1 %v13063_v29  ;;  %v734_v27 = vld [vmem:[#allocation5 + $0xff8] sm:$0xff]  ;;  %v13108_v28 = vcombine.low %v721_v11, %v725_v14  ;;  %v13110_v29 = vcombine.low %v722_v16, %v726_v17  ;;  %v14521_v14 = vld [vmem:[#allocation8 + $0x12c] ss:$16 sps:$4 sm:$0xff]   ;;  %v14519_v17 = vld [vmem:[#allocation8 + $0x128] ss:$16 sps:$4 sm:$0xff]  }
 0x2ca   :  { %v13119_v31 = vcombine.high %v730_v12, %v734_v27  ;;  %v14518_v11 = vld [vmem:[#allocation8 + $0x124] ss:$16 sps:$4 sm:$0xff]   ;;  %v14516_v16 = vld [vmem:[#allocation8 + $0x120] ss:$16 sps:$4 sm:$0xff]  }
 0x2cb   :  { %v14528_v26 = vld [vmem:[#allocation8 + $0x160] ss:$16 sps:$4 sm:$0xff]  }
 0x2cc   :  { %3805 = vmatpush1.bf16.msra.mxu0 %v13060_v35  ;;  %3969 = vmatpush1.bf16.msra.mxu1 %v13062_v36  ;;  %v13118_v35 = vcombine.low %v730_v12, %v734_v27  ;;  %v14464_v36 = vld [vmem:[#allocation8 + $0x4] ss:$16 sps:$4 sm:$0xff]   ;;  %v14531_v12 = vld [vmem:[#allocation8 + $0x168] ss:$16 sps:$4 sm:$0xff]  }
 0x2cd   :  { %3806 = vmatprep.subr.bf16.mxu0 %v13069_v25  ;;  %3970 = vmatprep.subr.bf16.mxu1 %v13071_v23  ;;  %v14467_v25 = vld [vmem:[#allocation8 + $0xc] ss:$16 sps:$4 sm:$0xff]   ;;  %v3994_v23 = vmax.f32 %v14273_v32, 0.0  ;;  %v14536_v27 = vld [vmem:[#allocation8 + $0x184] ss:$16 sps:$4 sm:$0xff]  }
 0x2ce   :  { %v14542_v32 = vld [vmem:[#allocation8 + $0x1a4] ss:$16 sps:$4 sm:$0xff]  }
 0x2cf   :  { %v4002_v41 = vpack.c.bf16 %v3994_v23, %v3994_v23  ;;  %v14543_v23 = vld [vmem:[#allocation8 + $0x1a8] ss:$16 sps:$4 sm:$0xff]  }
 0x2d0   :  { %3807 = vmatpush1.bf16.msra.mxu0 %v13068_v39  ;;  %3971 = vmatpush1.bf16.msra.mxu1 %v13070_v42  ;;  %v14468_v39 = vld [vmem:[#allocation8 + $0x20] ss:$16 sps:$4 sm:$0xff]   ;;  %v14471_v42 = vld [vmem:[#allocation8 + $0x28] ss:$16 sps:$4 sm:$0xff]  }
 0x2d1   :  { %3808 = vmatprep.subr.bf16.mxu0 %v13077_v43  ;;  %3972 = vmatprep.subr.bf16.mxu1 %v13079_v44  ;;  %v14476_v43 = vld [vmem:[#allocation8 + $0x44] ss:$16 sps:$4 sm:$0xff]   ;;  %v14479_v44 = vld [vmem:[#allocation8 + $0x4c] ss:$16 sps:$4 sm:$0xff]  }
 0x2d4   :  { %3809 = vmatpush1.bf16.msra.mxu0 %v13076_v49  ;;  %3973 = vmatpush1.bf16.msra.mxu1 %v13078_v50  ;;  %v14483_v49 = vld [vmem:[#allocation8 + $0x68] ss:$16 sps:$4 sm:$0xff]   ;;  %v14488_v50 = vld [vmem:[#allocation8 + $0x84] ss:$16 sps:$4 sm:$0xff]  }
 0x2d5   :  { %3810 = vmatprep.subr.bf16.mxu0 %v13085_v48  ;;  %3974 = vmatprep.subr.bf16.mxu1 %v13087_v51  ;;  %v14491_v48 = vld [vmem:[#allocation8 + $0x8c] ss:$16 sps:$4 sm:$0xff]   ;;  %v14486_v51 = vld [vmem:[#allocation8 + $0x80] ss:$16 sps:$4 sm:$0xff]  }
 0x2d8   :  { %3811 = vmatpush1.bf16.msra.mxu0 %v13084_v59  ;;  %3975 = vmatpush1.bf16.msra.mxu1 %v13086_v60  ;;  %v14500_v59 = vld [vmem:[#allocation8 + $0xc4] ss:$16 sps:$4 sm:$0xff]   ;;  %v14503_v60 = vld [vmem:[#allocation8 + $0xcc] ss:$16 sps:$4 sm:$0xff]  }
 0x2d9   :  { %3812 = vmatprep.subr.bf16.mxu0 %v13093_v61  ;;  %3976 = vmatprep.subr.bf16.mxu1 %v13095_v62  ;;  %v14498_v61 = vld [vmem:[#allocation8 + $0xc0] ss:$16 sps:$4 sm:$0xff]   ;;  %v14501_v62 = vld [vmem:[#allocation8 + $0xc8] ss:$16 sps:$4 sm:$0xff]  }
 0x2dc   :  { %3813 = vmatpush1.bf16.msra.mxu0 %v13092_v5  ;;  %3977 = vmatpush1.bf16.msra.mxu1 %v13094_v6  ;;  %v14512_v5 = vld [vmem:[#allocation8 + $0x104] ss:$16 sps:$4 sm:$0xff]   ;;  %v14515_v6 = vld [vmem:[#allocation8 + $0x10c] ss:$16 sps:$4 sm:$0xff]  }
 0x2dd   :  { %3814 = vmatprep.subr.bf16.mxu0 %v13101_v7  ;;  %3978 = vmatprep.subr.bf16.mxu1 %v13103_v10  ;;  %v14510_v7 = vld [vmem:[#allocation8 + $0x100] ss:$16 sps:$4 sm:$0xff]   ;;  %v14513_v10 = vld [vmem:[#allocation8 + $0x108] ss:$16 sps:$4 sm:$0xff]  }
 0x2e0   :  { %3815 = vmatpush1.bf16.msra.mxu0 %v13100_v19  ;;  %3979 = vmatpush1.bf16.msra.mxu1 %v13102_v20  ;;  %v14524_v19 = vld [vmem:[#allocation8 + $0x144] ss:$16 sps:$4 sm:$0xff]   ;;  %v14527_v20 = vld [vmem:[#allocation8 + $0x14c] ss:$16 sps:$4 sm:$0xff]  }
 0x2e1   :  { %3816 = vmatprep.subr.bf16.mxu0 %v13109_v21  ;;  %3980 = vmatprep.subr.bf16.mxu1 %v13111_v57  ;;  %v14522_v21 = vld [vmem:[#allocation8 + $0x140] ss:$16 sps:$4 sm:$0xff]   ;;  %v14525_v57 = vld [vmem:[#allocation8 + $0x148] ss:$16 sps:$4 sm:$0xff]  }
 0x2e4   :  { %3817 = vmatpush1.bf16.msra.mxu0 %v13108_v28  ;;  %3981 = vmatpush1.bf16.msra.mxu1 %v13110_v29  ;;  %v14539_v28 = vld [vmem:[#allocation8 + $0x18c] ss:$16 sps:$4 sm:$0xff]   ;;  %v14534_v29 = vld [vmem:[#allocation8 + $0x180] ss:$16 sps:$4 sm:$0xff]  }
 0x2e5   :  { %3818 = vmatprep.subr.bf16.mxu0 %v13117_v30  ;;  %3982 = vmatprep.subr.bf16.mxu1 %v13119_v31  ;;  %v15708_v30 = vsub.s32 0, %v15695_v1  ;;  %v14537_v31 = vld [vmem:[#allocation8 + $0x188] ss:$16 sps:$4 sm:$0xff]  }
 0x2e8   :  { %3819 = vmatpush1.bf16.msra.mxu0 %v13116_v33  ;;  %3983 = vmatpush1.bf16.msra.mxu1 %v13118_v35  ;;  %v14545_v33 = vld [vmem:[#allocation8 + $0x1ac] ss:$16 sps:$4 sm:$0xff]   ;;  %v15711_v35 = vsub.s32 3, %v15695_v1 }
 0x2e9   :  { %5567 = vmatprep.subr.bf16.mxu0 %v14464_v36  ;;  %5731 = vmatprep.subr.bf16.mxu1 %v14467_v25  ;;  %v14540_v36 = vld [vmem:[#allocation8 + $0x1a0] ss:$16 sps:$4 sm:$0xff]   ;;  %v740_v25 = vrot.slane %v15700_v18, %v15708_v30 }
 0x2eb   :  { %3821 = vmatmul.mubr.bf16.vlgmr.msra.gmra.mrb[4].mxu0 %v15669_v56  ;;  %3985 = vmatmul.mubr.bf16.vlgmr.msra.gmra.mrb[4].mxu1 %v15669_v56  ;;  %v14480_v56 = vld [vmem:[#allocation8 + $0x60] ss:$16 sps:$4 sm:$0xff]  }
 0x2ec   :  { %5568 = vmatpush1.bf16.msra.mxu0 %v14462_v37  ;;  %5599 = vmatprep.mubr.bf16.mxu0 %v4002_v41  ;;  %v14548_v37 = vld [vmem:[#allocation8 + $0x1c4] ss:$16 sps:$4 sm:$0xff]  }
 0x2ed   :  { %5732 = vmatpush1.bf16.msra.mxu1 %v14465_v38  ;;  %5763 = vmatprep.mubr.bf16.mxu1 %v4002_v41  ;;  %v14551_v38 = vld [vmem:[#allocation8 + $0x1cc] ss:$16 sps:$4 sm:$0xff]   ;;  %v14546_v41 = vld [vmem:[#allocation8 + $0x1c0] ss:$16 sps:$4 sm:$0xff]  }
 0x2ee   :  { %5569 = vmatprep.subr.bf16.mxu0 %v14470_v40  ;;  %5733 = vmatprep.subr.bf16.mxu1 %v14473_v9  ;;  %v752_v40 = vrot.slane %v15700_v18, %v15711_v35  ;;  %v14272_v9 = vadd.f32 %v15687_v4, %v740_v25  ;;  %v14558_v4 = vld [vmem:[#allocation8 + $0x200] ss:$16 sps:$4 sm:$0xff]   ;;  %v14623_v25 = vld [vmem:[#allocation8 + $0x34c] ss:$16 sps:$4 sm:$0xff]  }
 0x2f0   :  { %5570 = vmatpush1.bf16.msra.mxu0 %v14468_v39  ;;  %v14549_v39 = vld [vmem:[#allocation8 + $0x1c8] ss:$16 sps:$4 sm:$0xff]  }
 0x2f1   :  { %5734 = vmatpush1.bf16.msra.mxu1 %v14471_v42  ;;  %5571 = vmatprep.subr.bf16.mxu0 %v14476_v43  ;;  %v14554_v42 = vld [vmem:[#allocation8 + $0x1e4] ss:$16 sps:$4 sm:$0xff]   ;;  %v14557_v43 = vld [vmem:[#allocation8 + $0x1ec] ss:$16 sps:$4 sm:$0xff]  }
 0x2f2   :  { %5735 = vmatprep.subr.bf16.mxu1 %v14479_v44  ;;  %v14275_v44 = vadd.f32 %v15693_v13, %v752_v40  ;;  %v14569_v13 = vld [vmem:[#allocation8 + $0x22c] ss:$16 sps:$4 sm:$0xff]  }
 0x2f3   :  { %v14629_v40 = vld [vmem:[#allocation8 + $0x36c] ss:$16 sps:$4 sm:$0xff]  }
 0x2f4   :  { %5572 = vmatpush1.bf16.msra.mxu0 %v14474_v45  ;;  %v14552_v45 = vld [vmem:[#allocation8 + $0x1e0] ss:$16 sps:$4 sm:$0xff]  }
 0x2f5   :  { %5736 = vmatpush1.bf16.msra.mxu1 %v14477_v34  ;;  %5573 = vmatprep.subr.bf16.mxu0 %v14482_v46  ;;  %v3993_v34 = vmax.f32 %v14272_v9, 0.0  ;;  %v14555_v46 = vld [vmem:[#allocation8 + $0x1e8] ss:$16 sps:$4 sm:$0xff]  }
 0x2f6   :  { %5737 = vmatprep.subr.bf16.mxu1 %v14485_v47  ;;  %v14560_v47 = vld [vmem:[#allocation8 + $0x204] ss:$16 sps:$4 sm:$0xff]   ;;  %v14627_v9 = vld [vmem:[#allocation8 + $0x368] ss:$16 sps:$4 sm:$0xff]  }
 0x2f8   :  { %5574 = vmatpush1.bf16.msra.mxu0 %v14480_v56  ;;  %v14563_v56 = vld [vmem:[#allocation8 + $0x20c] ss:$16 sps:$4 sm:$0xff]  }
 0x2f9   :  { %5738 = vmatpush1.bf16.msra.mxu1 %v14483_v49  ;;  %5575 = vmatprep.subr.bf16.mxu0 %v14488_v50  ;;  %v3996_v49 = vmax.f32 %v14275_v44, 0.0  ;;  %v4001_v50 = vpack.c.bf16 %v3993_v34, %v3993_v34  ;;  %v15720_v44 = vsub.s32 2, %v15695_v1  ;;  %v14638_v34 = vld [vmem:[#allocation8 + $0x3a4] ss:$16 sps:$4 sm:$0xff]  }
 0x2fa   :  { %5739 = vmatprep.subr.bf16.mxu1 %v14491_v48  ;;  %v14561_v48 = vld [vmem:[#allocation8 + $0x208] ss:$16 sps:$4 sm:$0xff]  }
 0x2fc   :  { %5576 = vmatpush1.bf16.msra.mxu0 %v14486_v51  ;;  %v14566_v51 = vld [vmem:[#allocation8 + $0x224] ss:$16 sps:$4 sm:$0xff]  }
 0x2fd   :  { %5740 = vmatpush1.bf16.msra.mxu1 %v14489_v52  ;;  %5577 = vmatprep.subr.bf16.mxu0 %v14494_v53  ;;  %v4004_v52 = vpack.c.bf16 %v3996_v49, %v3996_v49  ;;  %v14564_v53 = vld [vmem:[#allocation8 + $0x220] ss:$16 sps:$4 sm:$0xff]   ;;  %v14639_v49 = vld [vmem:[#allocation8 + $0x3a8] ss:$16 sps:$4 sm:$0xff]  }
 0x2fe   :  { %5741 = vmatprep.subr.bf16.mxu1 %v14497_v54  ;;  %v14567_v54 = vld [vmem:[#allocation8 + $0x228] ss:$16 sps:$4 sm:$0xff]  }
 0x300   :  { %5578 = vmatpush1.bf16.msra.mxu0 %v14492_v55  ;;  %v14572_v55 = vld [vmem:[#allocation8 + $0x244] ss:$16 sps:$4 sm:$0xff]  }
 0x301   :  { %5742 = vmatpush1.bf16.msra.mxu1 %v14495_v58  ;;  %5579 = vmatprep.subr.bf16.mxu0 %v14500_v59  ;;  %v14575_v58 = vld [vmem:[#allocation8 + $0x24c] ss:$16 sps:$4 sm:$0xff]   ;;  %v14570_v59 = vld [vmem:[#allocation8 + $0x240] ss:$16 sps:$4 sm:$0xff]  }
 0x302   :  { %5743 = vmatprep.subr.bf16.mxu1 %v14503_v60  ;;  %v14573_v60 = vld [vmem:[#allocation8 + $0x248] ss:$16 sps:$4 sm:$0xff]  }
 0x304   :  { %5580 = vmatpush1.bf16.msra.mxu0 %v14498_v61  ;;  %v14578_v61 = vld [vmem:[#allocation8 + $0x264] ss:$16 sps:$4 sm:$0xff]  }
 0x305   :  { %5744 = vmatpush1.bf16.msra.mxu1 %v14501_v62  ;;  %5581 = vmatprep.subr.bf16.mxu0 %v14506_v63  ;;  %v14581_v62 = vld [vmem:[#allocation8 + $0x26c] ss:$16 sps:$4 sm:$0xff]   ;;  %v14576_v63 = vld [vmem:[#allocation8 + $0x260] ss:$16 sps:$4 sm:$0xff]  }
 0x306   :  { %5745 = vmatprep.subr.bf16.mxu1 %v14509_v0  ;;  %v14579_v0 = vld [vmem:[#allocation8 + $0x268] ss:$16 sps:$4 sm:$0xff]  }
 0x308   :  { %5582 = vmatpush1.bf16.msra.mxu0 %v14504_v2  ;;  %v14584_v2 = vld [vmem:[#allocation8 + $0x284] ss:$16 sps:$4 sm:$0xff]  }
 0x309   :  { %5746 = vmatpush1.bf16.msra.mxu1 %v14507_v3  ;;  %5583 = vmatprep.subr.bf16.mxu0 %v14512_v5  ;;  %v14587_v3 = vld [vmem:[#allocation8 + $0x28c] ss:$16 sps:$4 sm:$0xff]   ;;  %v14582_v5 = vld [vmem:[#allocation8 + $0x280] ss:$16 sps:$4 sm:$0xff]  }
 0x30a   :  { %5747 = vmatprep.subr.bf16.mxu1 %v14515_v6  ;;  %v14585_v6 = vld [vmem:[#allocation8 + $0x288] ss:$16 sps:$4 sm:$0xff]  }
 0x30c   :  { %5584 = vmatpush1.bf16.msra.mxu0 %v14510_v7  ;;  %v14590_v7 = vld [vmem:[#allocation8 + $0x2a4] ss:$16 sps:$4 sm:$0xff]  }
 0x30d   :  { %5748 = vmatpush1.bf16.msra.mxu1 %v14513_v10  ;;  %5585 = vmatprep.subr.bf16.mxu0 %v14518_v11  ;;  %v14593_v10 = vld [vmem:[#allocation8 + $0x2ac] ss:$16 sps:$4 sm:$0xff]   ;;  %v14588_v11 = vld [vmem:[#allocation8 + $0x2a0] ss:$16 sps:$4 sm:$0xff]  }
 0x30e   :  { %5749 = vmatprep.subr.bf16.mxu1 %v14521_v14  ;;  %v14591_v14 = vld [vmem:[#allocation8 + $0x2a8] ss:$16 sps:$4 sm:$0xff]  }
 0x310   :  { %5586 = vmatpush1.bf16.msra.mxu0 %v14516_v16  ;;  %v14596_v16 = vld [vmem:[#allocation8 + $0x2c4] ss:$16 sps:$4 sm:$0xff]  }
 0x311   :  { %5750 = vmatpush1.bf16.msra.mxu1 %v14519_v17  ;;  %5587 = vmatprep.subr.bf16.mxu0 %v14524_v19  ;;  %v14599_v17 = vld [vmem:[#allocation8 + $0x2cc] ss:$16 sps:$4 sm:$0xff]   ;;  %v14594_v19 = vld [vmem:[#allocation8 + $0x2c0] ss:$16 sps:$4 sm:$0xff]  }
 0x312   :  { %5751 = vmatprep.subr.bf16.mxu1 %v14527_v20  ;;  %v14597_v20 = vld [vmem:[#allocation8 + $0x2c8] ss:$16 sps:$4 sm:$0xff]  }
 0x314   :  { %5588 = vmatpush1.bf16.msra.mxu0 %v14522_v21  ;;  %v14602_v21 = vld [vmem:[#allocation8 + $0x2e4] ss:$16 sps:$4 sm:$0xff]  }
 0x315   :  { %5752 = vmatpush1.bf16.msra.mxu1 %v14525_v57  ;;  %5589 = vmatprep.subr.bf16.mxu0 %v14530_v22  ;;  %v14605_v57 = vld [vmem:[#allocation8 + $0x2ec] ss:$16 sps:$4 sm:$0xff]   ;;  %v14600_v22 = vld [vmem:[#allocation8 + $0x2e0] ss:$16 sps:$4 sm:$0xff]  }
 0x316   :  { %5753 = vmatprep.subr.bf16.mxu1 %v14533_v24  ;;  %v14603_v24 = vld [vmem:[#allocation8 + $0x2e8] ss:$16 sps:$4 sm:$0xff]  }
 0x318   :  { %5590 = vmatpush1.bf16.msra.mxu0 %v14528_v26  ;;  %v14608_v26 = vld [vmem:[#allocation8 + $0x304] ss:$16 sps:$4 sm:$0xff]  }
 0x319   :  { %5754 = vmatpush1.bf16.msra.mxu1 %v14531_v12  ;;  %5591 = vmatprep.subr.bf16.mxu0 %v14536_v27  ;;  %v14611_v12 = vld [vmem:[#allocation8 + $0x30c] ss:$16 sps:$4 sm:$0xff]   ;;  %v14606_v27 = vld [vmem:[#allocation8 + $0x300] ss:$16 sps:$4 sm:$0xff]  }
 0x31a   :  { %5755 = vmatprep.subr.bf16.mxu1 %v14539_v28  ;;  %v14609_v28 = vld [vmem:[#allocation8 + $0x308] ss:$16 sps:$4 sm:$0xff]  }
 0x31c   :  { %5592 = vmatpush1.bf16.msra.mxu0 %v14534_v29  ;;  %v14614_v29 = vld [vmem:[#allocation8 + $0x324] ss:$16 sps:$4 sm:$0xff]  }
 0x31d   :  { %5756 = vmatpush1.bf16.msra.mxu1 %v14537_v31  ;;  %5593 = vmatprep.subr.bf16.mxu0 %v14542_v32  ;;  %v14617_v31 = vld [vmem:[#allocation8 + $0x32c] ss:$16 sps:$4 sm:$0xff]   ;;  %v14612_v32 = vld [vmem:[#allocation8 + $0x320] ss:$16 sps:$4 sm:$0xff]  }
 0x31e   :  { %5757 = vmatprep.subr.bf16.mxu1 %v14545_v33  ;;  %v14615_v33 = vld [vmem:[#allocation8 + $0x328] ss:$16 sps:$4 sm:$0xff]  }
 0x320   :  { %5594 = vmatpush1.bf16.msra.mxu0 %v14540_v36  ;;  %v14620_v36 = vld [vmem:[#allocation8 + $0x344] ss:$16 sps:$4 sm:$0xff]  }
 0x321   :  { %5758 = vmatpush1.bf16.msra.mxu1 %v14543_v23  ;;  %5595 = vmatprep.subr.bf16.mxu0 %v14548_v37  ;;  %v14618_v23 = vld [vmem:[#allocation8 + $0x340] ss:$16 sps:$4 sm:$0xff]   ;;  %v14621_v37 = vld [vmem:[#allocation8 + $0x348] ss:$16 sps:$4 sm:$0xff]  }
 0x322   :  { %5759 = vmatprep.subr.bf16.mxu1 %v14551_v38  ;;  %v14626_v38 = vld [vmem:[#allocation8 + $0x364] ss:$16 sps:$4 sm:$0xff]  }
 0x324   :  { %5596 = vmatpush1.bf16.msra.mxu0 %v14546_v41  ;;  %v14624_v41 = vld [vmem:[#allocation8 + $0x360] ss:$16 sps:$4 sm:$0xff]  }
 0x325   :  { %5760 = vmatpush1.bf16.msra.mxu1 %v14549_v39  ;;  %5597 = vmatprep.subr.bf16.mxu0 %v14554_v42  ;;  %v14632_v39 = vld [vmem:[#allocation8 + $0x384] ss:$16 sps:$4 sm:$0xff]   ;;  %v14635_v42 = vld [vmem:[#allocation8 + $0x38c] ss:$16 sps:$4 sm:$0xff]  }
 0x326   :  { %5761 = vmatprep.subr.bf16.mxu1 %v14557_v43  ;;  %v14630_v43 = vld [vmem:[#allocation8 + $0x380] ss:$16 sps:$4 sm:$0xff]  }
 0x328   :  { %5598 = vmatpush1.bf16.msra.mxu0 %v14552_v45  ;;  %v14633_v45 = vld [vmem:[#allocation8 + $0x388] ss:$16 sps:$4 sm:$0xff]  }
 0x329   :  { %5762 = vmatpush1.bf16.msra.mxu1 %v14555_v46  ;;  %5608 = vmatprep.subr.bf16.mxu0 %v14560_v47  ;;  %v14641_v46 = vld [vmem:[#allocation8 + $0x3ac] ss:$16 sps:$4 sm:$0xff]   ;;  %v14636_v47 = vld [vmem:[#allocation8 + $0x3a0] ss:$16 sps:$4 sm:$0xff]  }
 0x32a   :  { %5772 = vmatprep.subr.bf16.mxu1 %v14563_v56  ;;  %v748_v56 = vrot.slane %v15700_v18, %v15720_v44 }
 0x32b   :  { %5600 = vmatmul.mubr.bf16.vlgmr.msra.gmra.mrb[8].mxu0 %v4001_v50 }
 0x32c   :  { %5764 = vmatmul.mubr.bf16.vlgmr.msra.gmra.mrb[8].mxu1 %v4001_v50  ;;  %5609 = vmatpush1.bf16.msra.mxu0 %v14558_v4  ;;  %v14644_v4 = vld [vmem:[#allocation8 + $0x3c4] ss:$16 sps:$4 sm:$0xff]   ;;  %v14647_v50 = vld [vmem:[#allocation8 + $0x3cc] ss:$16 sps:$4 sm:$0xff]  }
 0x32d   :  { %5640 = vmatprep.mubr.bf16.mxu0 %v4004_v52  ;;  %5773 = vmatpush1.bf16.msra.mxu1 %v14561_v48  ;;  %v14642_v48 = vld [vmem:[#allocation8 + $0x3c0] ss:$16 sps:$4 sm:$0xff]  }
 0x32e   :  { %5804 = vmatprep.mubr.bf16.mxu1 %v4004_v52  ;;  %5610 = vmatprep.subr.bf16.mxu0 %v14566_v51  ;;  %v14274_v51 = vadd.f32 %v15689_v8, %v748_v56  ;;  %v14645_v52 = vld [vmem:[#allocation8 + $0x3c8] ss:$16 sps:$4 sm:$0xff]   ;;  %v14725_v56 = vld [vmem:[#allocation8 + $0x56c] ss:$16 sps:$4 sm:$0xff]  }
 0x32f   :  { %5774 = vmatprep.subr.bf16.mxu1 %v14569_v13  ;;  %v14650_v13 = vld [vmem:[#allocation8 + $0x3e4] ss:$16 sps:$4 sm:$0xff]   ;;  %v14657_v8 = vld [vmem:[#allocation8 + $0x408] ss:$16 sps:$4 sm:$0xff]  }
 0x330   :  { %5611 = vmatpush1.bf16.msra.mxu0 %v14564_v53  ;;  %v14653_v53 = vld [vmem:[#allocation8 + $0x3ec] ss:$16 sps:$4 sm:$0xff]  }
 0x331   :  { %5775 = vmatpush1.bf16.msra.mxu1 %v14567_v54  ;;  %5612 = vmatprep.subr.bf16.mxu0 %v14572_v55  ;;  %v14648_v54 = vld [vmem:[#allocation8 + $0x3e0] ss:$16 sps:$4 sm:$0xff]   ;;  %v3995_v55 = vmax.f32 %v14274_v51, 0.0 }
 0x332   :  { %5776 = vmatprep.subr.bf16.mxu1 %v14575_v58  ;;  %v14651_v58 = vld [vmem:[#allocation8 + $0x3e8] ss:$16 sps:$4 sm:$0xff]   ;;  %v14726_v51 = vld [vmem:[#allocation8 + $0x580] ss:$16 sps:$4 sm:$0xff]  }
 0x334   :  { %5613 = vmatpush1.bf16.msra.mxu0 %v14570_v59  ;;  %v14656_v59 = vld [vmem:[#allocation8 + $0x404] ss:$16 sps:$4 sm:$0xff]  }
 0x335   :  { %5777 = vmatpush1.bf16.msra.mxu1 %v14573_v60  ;;  %5614 = vmatprep.subr.bf16.mxu0 %v14578_v61  ;;  %v14659_v60 = vld [vmem:[#allocation8 + $0x40c] ss:$16 sps:$4 sm:$0xff]   ;;  %v14654_v61 = vld [vmem:[#allocation8 + $0x400] ss:$16 sps:$4 sm:$0xff]  }
 0x336   :  { %5778 = vmatprep.subr.bf16.mxu1 %v14581_v62  ;;  %v4003_v62 = vpack.c.bf16 %v3995_v55, %v3995_v55  ;;  %v14735_v55 = vld [vmem:[#allocation8 + $0x5a8] ss:$16 sps:$4 sm:$0xff]  }
 0x338   :  { %5615 = vmatpush1.bf16.msra.mxu0 %v14576_v63  ;;  %v14662_v63 = vld [vmem:[#allocation8 + $0x424] ss:$16 sps:$4 sm:$0xff]  }
 0x339   :  { %5779 = vmatpush1.bf16.msra.mxu1 %v14579_v0  ;;  %5616 = vmatprep.subr.bf16.mxu0 %v14584_v2  ;;  %v14665_v0 = vld [vmem:[#allocation8 + $0x42c] ss:$16 sps:$4 sm:$0xff]   ;;  %v14660_v2 = vld [vmem:[#allocation8 + $0x420] ss:$16 sps:$4 sm:$0xff]  }
 0x33a   :  { %5780 = vmatprep.subr.bf16.mxu1 %v14587_v3  ;;  %v14663_v3 = vld [vmem:[#allocation8 + $0x428] ss:$16 sps:$4 sm:$0xff]  }
 0x33c   :  { %5617 = vmatpush1.bf16.msra.mxu0 %v14582_v5  ;;  %v14668_v5 = vld [vmem:[#allocation8 + $0x444] ss:$16 sps:$4 sm:$0xff]  }
 0x33d   :  { %5781 = vmatpush1.bf16.msra.mxu1 %v14585_v6  ;;  %5618 = vmatprep.subr.bf16.mxu0 %v14590_v7  ;;  %v14671_v6 = vld [vmem:[#allocation8 + $0x44c] ss:$16 sps:$4 sm:$0xff]   ;;  %v14666_v7 = vld [vmem:[#allocation8 + $0x440] ss:$16 sps:$4 sm:$0xff]  }
 0x33e   :  { %5782 = vmatprep.subr.bf16.mxu1 %v14593_v10  ;;  %v14669_v10 = vld [vmem:[#allocation8 + $0x448] ss:$16 sps:$4 sm:$0xff]  }
 0x340   :  { %5619 = vmatpush1.bf16.msra.mxu0 %v14588_v11  ;;  %v14674_v11 = vld [vmem:[#allocation8 + $0x464] ss:$16 sps:$4 sm:$0xff]  }
 0x341   :  { %5783 = vmatpush1.bf16.msra.mxu1 %v14591_v14  ;;  %5620 = vmatprep.subr.bf16.mxu0 %v14596_v16  ;;  %v14677_v14 = vld [vmem:[#allocation8 + $0x46c] ss:$16 sps:$4 sm:$0xff]   ;;  %v14672_v16 = vld [vmem:[#allocation8 + $0x460] ss:$16 sps:$4 sm:$0xff]  }
 0x342   :  { %5784 = vmatprep.subr.bf16.mxu1 %v14599_v17  ;;  %v14675_v17 = vld [vmem:[#allocation8 + $0x468] ss:$16 sps:$4 sm:$0xff]  }
 0x344   :  { %5621 = vmatpush1.bf16.msra.mxu0 %v14594_v19  ;;  %v14680_v19 = vld [vmem:[#allocation8 + $0x484] ss:$16 sps:$4 sm:$0xff]  }
 0x345   :  { %5785 = vmatpush1.bf16.msra.mxu1 %v14597_v20  ;;  %5622 = vmatprep.subr.bf16.mxu0 %v14602_v21  ;;  %v14683_v20 = vld [vmem:[#allocation8 + $0x48c] ss:$16 sps:$4 sm:$0xff]   ;;  %v14678_v21 = vld [vmem:[#allocation8 + $0x480] ss:$16 sps:$4 sm:$0xff]  }
 0x346   :  { %5786 = vmatprep.subr.bf16.mxu1 %v14605_v57  ;;  %v14681_v57 = vld [vmem:[#allocation8 + $0x488] ss:$16 sps:$4 sm:$0xff]  }
 0x348   :  { %5623 = vmatpush1.bf16.msra.mxu0 %v14600_v22  ;;  %v14686_v22 = vld [vmem:[#allocation8 + $0x4a4] ss:$16 sps:$4 sm:$0xff]  }
 0x349   :  { %5787 = vmatpush1.bf16.msra.mxu1 %v14603_v24  ;;  %5624 = vmatprep.subr.bf16.mxu0 %v14608_v26  ;;  %v14689_v24 = vld [vmem:[#allocation8 + $0x4ac] ss:$16 sps:$4 sm:$0xff]   ;;  %v14684_v26 = vld [vmem:[#allocation8 + $0x4a0] ss:$16 sps:$4 sm:$0xff]  }
 0x34a   :  { %5788 = vmatprep.subr.bf16.mxu1 %v14611_v12  ;;  %v14687_v12 = vld [vmem:[#allocation8 + $0x4a8] ss:$16 sps:$4 sm:$0xff]  }
 0x34c   :  { %5625 = vmatpush1.bf16.msra.mxu0 %v14606_v27  ;;  %v14692_v27 = vld [vmem:[#allocation8 + $0x4c4] ss:$16 sps:$4 sm:$0xff]  }
 0x34d   :  { %5789 = vmatpush1.bf16.msra.mxu1 %v14609_v28  ;;  %5626 = vmatprep.subr.bf16.mxu0 %v14614_v29  ;;  %v14695_v28 = vld [vmem:[#allocation8 + $0x4cc] ss:$16 sps:$4 sm:$0xff]   ;;  %v14690_v29 = vld [vmem:[#allocation8 + $0x4c0] ss:$16 sps:$4 sm:$0xff]  }
 0x34e   :  { %5790 = vmatprep.subr.bf16.mxu1 %v14617_v31  ;;  %v14693_v31 = vld [vmem:[#allocation8 + $0x4c8] ss:$16 sps:$4 sm:$0xff]  }
 0x350   :  { %5627 = vmatpush1.bf16.msra.mxu0 %v14612_v32  ;;  %v14698_v32 = vld [vmem:[#allocation8 + $0x4e4] ss:$16 sps:$4 sm:$0xff]  }
 0x351   :  { %5791 = vmatpush1.bf16.msra.mxu1 %v14615_v33  ;;  %5628 = vmatprep.subr.bf16.mxu0 %v14620_v36  ;;  %v14701_v33 = vld [vmem:[#allocation8 + $0x4ec] ss:$16 sps:$4 sm:$0xff]   ;;  %v14696_v36 = vld [vmem:[#allocation8 + $0x4e0] ss:$16 sps:$4 sm:$0xff]  }
 0x352   :  { %5792 = vmatprep.subr.bf16.mxu1 %v14623_v25  ;;  %v14699_v25 = vld [vmem:[#allocation8 + $0x4e8] ss:$16 sps:$4 sm:$0xff]  }
 0x354   :  { %5629 = vmatpush1.bf16.msra.mxu0 %v14618_v23  ;;  %v14704_v23 = vld [vmem:[#allocation8 + $0x504] ss:$16 sps:$4 sm:$0xff]  }
 0x355   :  { %5793 = vmatpush1.bf16.msra.mxu1 %v14621_v37  ;;  %5630 = vmatprep.subr.bf16.mxu0 %v14626_v38  ;;  %v14707_v37 = vld [vmem:[#allocation8 + $0x50c] ss:$16 sps:$4 sm:$0xff]   ;;  %v14702_v38 = vld [vmem:[#allocation8 + $0x500] ss:$16 sps:$4 sm:$0xff]  }
 0x356   :  { %5794 = vmatprep.subr.bf16.mxu1 %v14629_v40  ;;  %v14705_v40 = vld [vmem:[#allocation8 + $0x508] ss:$16 sps:$4 sm:$0xff]  }
 0x358   :  { %5631 = vmatpush1.bf16.msra.mxu0 %v14624_v41  ;;  %v14710_v41 = vld [vmem:[#allocation8 + $0x524] ss:$16 sps:$4 sm:$0xff]  }
 0x359   :  { %5795 = vmatpush1.bf16.msra.mxu1 %v14627_v9  ;;  %5632 = vmatprep.subr.bf16.mxu0 %v14632_v39  ;;  %v14713_v9 = vld [vmem:[#allocation8 + $0x52c] ss:$16 sps:$4 sm:$0xff]   ;;  %v14708_v39 = vld [vmem:[#allocation8 + $0x520] ss:$16 sps:$4 sm:$0xff]  }
 0x35a   :  { %5796 = vmatprep.subr.bf16.mxu1 %v14635_v42  ;;  %v14711_v42 = vld [vmem:[#allocation8 + $0x528] ss:$16 sps:$4 sm:$0xff]  }
 0x35c   :  { %5633 = vmatpush1.bf16.msra.mxu0 %v14630_v43  ;;  %v14716_v43 = vld [vmem:[#allocation8 + $0x544] ss:$16 sps:$4 sm:$0xff]  }
 0x35d   :  { %5797 = vmatpush1.bf16.msra.mxu1 %v14633_v45  ;;  %5634 = vmatprep.subr.bf16.mxu0 %v14638_v34  ;;  %v14719_v45 = vld [vmem:[#allocation8 + $0x54c] ss:$16 sps:$4 sm:$0xff]   ;;  %v14714_v34 = vld [vmem:[#allocation8 + $0x540] ss:$16 sps:$4 sm:$0xff]  }
 0x35e   :  { %5798 = vmatprep.subr.bf16.mxu1 %v14641_v46  ;;  %v14717_v46 = vld [vmem:[#allocation8 + $0x548] ss:$16 sps:$4 sm:$0xff]  }
 0x360   :  { %5635 = vmatpush1.bf16.msra.mxu0 %v14636_v47  ;;  %v14722_v47 = vld [vmem:[#allocation8 + $0x564] ss:$16 sps:$4 sm:$0xff]  }
 0x361   :  { %5799 = vmatpush1.bf16.msra.mxu1 %v14639_v49  ;;  %5636 = vmatprep.subr.bf16.mxu0 %v14644_v4  ;;  %v14720_v49 = vld [vmem:[#allocation8 + $0x560] ss:$16 sps:$4 sm:$0xff]   ;;  %v14723_v4 = vld [vmem:[#allocation8 + $0x568] ss:$16 sps:$4 sm:$0xff]  }
 0x362   :  { %5800 = vmatprep.subr.bf16.mxu1 %v14647_v50  ;;  %v14728_v50 = vld [vmem:[#allocation8 + $0x584] ss:$16 sps:$4 sm:$0xff]  }
 0x364   :  { %5637 = vmatpush1.bf16.msra.mxu0 %v14642_v48  ;;  %v14731_v48 = vld [vmem:[#allocation8 + $0x58c] ss:$16 sps:$4 sm:$0xff]  }
 0x365   :  { %5801 = vmatpush1.bf16.msra.mxu1 %v14645_v52  ;;  %5638 = vmatprep.subr.bf16.mxu0 %v14650_v13  ;;  %v14729_v52 = vld [vmem:[#allocation8 + $0x588] ss:$16 sps:$4 sm:$0xff]   ;;  %v14734_v13 = vld [vmem:[#allocation8 + $0x5a4] ss:$16 sps:$4 sm:$0xff]  }
 0x366   :  { %5802 = vmatprep.subr.bf16.mxu1 %v14653_v53  ;;  %v14737_v53 = vld [vmem:[#allocation8 + $0x5ac] ss:$16 sps:$4 sm:$0xff]  }
 0x368   :  { %5639 = vmatpush1.bf16.msra.mxu0 %v14648_v54  ;;  %v14732_v54 = vld [vmem:[#allocation8 + $0x5a0] ss:$16 sps:$4 sm:$0xff]  }
 0x369   :  { %5803 = vmatpush1.bf16.msra.mxu1 %v14651_v58  ;;  %5649 = vmatprep.subr.bf16.mxu0 %v14656_v59  ;;  %v14740_v58 = vld [vmem:[#allocation8 + $0x5c4] ss:$16 sps:$4 sm:$0xff]   ;;  %v14743_v59 = vld [vmem:[#allocation8 + $0x5cc] ss:$16 sps:$4 sm:$0xff]  }
 0x36a   :  { %5813 = vmatprep.subr.bf16.mxu1 %v14659_v60  ;;  %v14738_v60 = vld [vmem:[#allocation8 + $0x5c0] ss:$16 sps:$4 sm:$0xff]  }
 0x36b   :  { %5641 = vmatmul.mubr.bf16.vlgmr.msra.gmra.mrb[8].mxu0 %v4003_v62 }
 0x36c   :  { %5805 = vmatmul.mubr.bf16.vlgmr.msra.gmra.mrb[8].mxu1 %v4003_v62  ;;  %5650 = vmatpush1.bf16.msra.mxu0 %v14654_v61  ;;  %v14741_v61 = vld [vmem:[#allocation8 + $0x5c8] ss:$16 sps:$4 sm:$0xff]   ;;  %v14746_v62 = vld [vmem:[#allocation8 + $0x5e4] ss:$16 sps:$4 sm:$0xff]  }
 0x36d   :  { %5814 = vmatpush1.bf16.msra.mxu1 %v14657_v8  ;;  %5651 = vmatprep.subr.bf16.mxu0 %v14662_v63  ;;  %v14749_v8 = vld [vmem:[#allocation8 + $0x5ec] ss:$16 sps:$4 sm:$0xff]   ;;  %v14744_v63 = vld [vmem:[#allocation8 + $0x5e0] ss:$16 sps:$4 sm:$0xff]  }
 0x36e   :  { %5815 = vmatprep.subr.bf16.mxu1 %v14665_v0  ;;  %v14747_v0 = vld [vmem:[#allocation8 + $0x5e8] ss:$16 sps:$4 sm:$0xff]  }
 0x370   :  { %5652 = vmatpush1.bf16.msra.mxu0 %v14660_v2  ;;  %v14752_v2 = vld [vmem:[#allocation8 + $0x604] ss:$16 sps:$4 sm:$0xff]  }
 0x371   :  { %5816 = vmatpush1.bf16.msra.mxu1 %v14663_v3  ;;  %5653 = vmatprep.subr.bf16.mxu0 %v14668_v5  ;;  %v14755_v3 = vld [vmem:[#allocation8 + $0x60c] ss:$16 sps:$4 sm:$0xff]   ;;  %v15726_v5 = vsub.s32 4, %v15695_v1 }
 0x372   :  { %5817 = vmatprep.subr.bf16.mxu1 %v14671_v6  ;;  %v15729_v6 = vsub.s32 5, %v15695_v1 }
 0x374   :  { %5654 = vmatpush1.bf16.msra.mxu0 %v14666_v7  ;;  %v15732_v7 = vsub.s32 7, %v15695_v1 }
 0x375   :  { %5818 = vmatpush1.bf16.msra.mxu1 %v14669_v10  ;;  %5655 = vmatprep.subr.bf16.mxu0 %v14674_v11  ;;  %v756_v10 = vrot.slane %v15700_v18, %v15726_v5  ;;  %v760_v11 = vrot.slane %v15700_v18, %v15729_v6 }
 0x376   :  { %5819 = vmatprep.subr.bf16.mxu1 %v14677_v14  ;;  %v768_v14 = vrot.slane %v15700_v18, %v15732_v7  ;;  %v14758_v18 = vld [vmem:[#allocation8 + $0x624] ss:$16 sps:$4 sm:$0xff]  }
 0x378   :  { %5656 = vmatpush1.bf16.msra.mxu0 %v14672_v16 }
 0x379   :  { %5820 = vmatpush1.bf16.msra.mxu1 %v14675_v17  ;;  %5657 = vmatprep.subr.bf16.mxu0 %v14680_v19 }
 0x37a   :  { %5821 = vmatprep.subr.bf16.mxu1 %v14683_v20 }
 0x37c   :  { %5658 = vmatpush1.bf16.msra.mxu0 %v14678_v21 }
 0x37d   :  { %5822 = vmatpush1.bf16.msra.mxu1 %v14681_v57  ;;  %5659 = vmatprep.subr.bf16.mxu0 %v14686_v22 }
 0x37e   :  { %5823 = vmatprep.subr.bf16.mxu1 %v14689_v24 }
 0x380   :  { %5660 = vmatpush1.bf16.msra.mxu0 %v14684_v26 }
 0x381   :  { %5824 = vmatpush1.bf16.msra.mxu1 %v14687_v12  ;;  %5661 = vmatprep.subr.bf16.mxu0 %v14692_v27 }
 0x382   :  { %5825 = vmatprep.subr.bf16.mxu1 %v14695_v28 }
 0x384   :  { %5662 = vmatpush1.bf16.msra.mxu0 %v14690_v29 }
 0x385   :  { %5826 = vmatpush1.bf16.msra.mxu1 %v14693_v31  ;;  %5663 = vmatprep.subr.bf16.mxu0 %v14698_v32 }
 0x386   :  { %5827 = vmatprep.subr.bf16.mxu1 %v14701_v33  ;;  %v14750_v33 = vld [vmem:[#allocation8 + $0x600] ss:$16 sps:$4 sm:$0xff]  }
 0x388   :  { %5664 = vmatpush1.bf16.msra.mxu0 %v14696_v36  ;;  %v14753_v36 = vld [vmem:[#allocation8 + $0x608] ss:$16 sps:$4 sm:$0xff]  }
 0x389   :  { %5828 = vmatpush1.bf16.msra.mxu1 %v14699_v25  ;;  %5665 = vmatprep.subr.bf16.mxu0 %v14704_v23  ;;  %v14761_v23 = vld [vmem:[#allocation8 + $0x62c] ss:$16 sps:$4 sm:$0xff]  }
 0x38a   :  { %5829 = vmatprep.subr.bf16.mxu1 %v14707_v37 }
 0x38c   :  { %5666 = vmatpush1.bf16.msra.mxu0 %v14702_v38  ;;  %v14756_v38 = vld [vmem:[#allocation8 + $0x620] ss:$16 sps:$4 sm:$0xff]  }
 0x38d   :  { %5830 = vmatpush1.bf16.msra.mxu1 %v14705_v40  ;;  %5667 = vmatprep.subr.bf16.mxu0 %v14710_v41  ;;  %v14759_v40 = vld [vmem:[#allocation8 + $0x628] ss:$16 sps:$4 sm:$0xff]   ;;  %v14764_v41 = vld [vmem:[#allocation8 + $0x644] ss:$16 sps:$4 sm:$0xff]  }
 0x38e   :  { %5831 = vmatprep.subr.bf16.mxu1 %v14713_v9  ;;  %v14767_v9 = vld [vmem:[#allocation8 + $0x64c] ss:$16 sps:$4 sm:$0xff]  }
 0x390   :  { %5668 = vmatpush1.bf16.msra.mxu0 %v14708_v39  ;;  %v14762_v39 = vld [vmem:[#allocation8 + $0x640] ss:$16 sps:$4 sm:$0xff]  }
 0x391   :  { %5832 = vmatpush1.bf16.msra.mxu1 %v14711_v42  ;;  %5669 = vmatprep.subr.bf16.mxu0 %v14716_v43  ;;  %v14765_v42 = vld [vmem:[#allocation8 + $0x648] ss:$16 sps:$4 sm:$0xff]   ;;  %v14770_v43 = vld [vmem:[#allocation8 + $0x664] ss:$16 sps:$4 sm:$0xff]  }
 0x392   :  { %5833 = vmatprep.subr.bf16.mxu1 %v14719_v45  ;;  %v14773_v45 = vld [vmem:[#allocation8 + $0x66c] ss:$16 sps:$4 sm:$0xff]  }
 0x394   :  { %5670 = vmatpush1.bf16.msra.mxu0 %v14714_v34  ;;  %v14768_v34 = vld [vmem:[#allocation8 + $0x660] ss:$16 sps:$4 sm:$0xff]  }
 0x395   :  { %5834 = vmatpush1.bf16.msra.mxu1 %v14717_v46  ;;  %5671 = vmatprep.subr.bf16.mxu0 %v14722_v47  ;;  %v14771_v46 = vld [vmem:[#allocation8 + $0x668] ss:$16 sps:$4 sm:$0xff]   ;;  %v14776_v47 = vld [vmem:[#allocation8 + $0x684] ss:$16 sps:$4 sm:$0xff]  }
 0x396   :  { %5835 = vmatprep.subr.bf16.mxu1 %v14725_v56  ;;  %v14779_v56 = vld [vmem:[#allocation8 + $0x68c] ss:$16 sps:$4 sm:$0xff]  }
 0x398   :  { %5672 = vmatpush1.bf16.msra.mxu0 %v14720_v49  ;;  %v14774_v49 = vld [vmem:[#allocation8 + $0x680] ss:$16 sps:$4 sm:$0xff]  }
 0x399   :  { %5836 = vmatpush1.bf16.msra.mxu1 %v14723_v4  ;;  %5673 = vmatprep.subr.bf16.mxu0 %v14728_v50  ;;  %v14777_v4 = vld [vmem:[#allocation8 + $0x688] ss:$16 sps:$4 sm:$0xff]   ;;  %v14782_v50 = vld [vmem:[#allocation8 + $0x6a4] ss:$16 sps:$4 sm:$0xff]  }
 0x39a   :  { %5837 = vmatprep.subr.bf16.mxu1 %v14731_v48  ;;  %v14785_v48 = vld [vmem:[#allocation8 + $0x6ac] ss:$16 sps:$4 sm:$0xff]  }
 0x39c   :  { %5674 = vmatpush1.bf16.msra.mxu0 %v14726_v51  ;;  %v14780_v51 = vld [vmem:[#allocation8 + $0x6a0] ss:$16 sps:$4 sm:$0xff]  }
 0x39d   :  { %5838 = vmatpush1.bf16.msra.mxu1 %v14729_v52  ;;  %5675 = vmatprep.subr.bf16.mxu0 %v14734_v13  ;;  %v14783_v52 = vld [vmem:[#allocation8 + $0x6a8] ss:$16 sps:$4 sm:$0xff]   ;;  %v14788_v13 = vld [vmem:[#allocation8 + $0x6c4] ss:$16 sps:$4 sm:$0xff]  }
 0x39e   :  { %5839 = vmatprep.subr.bf16.mxu1 %v14737_v53  ;;  %v14791_v53 = vld [vmem:[#allocation8 + $0x6cc] ss:$16 sps:$4 sm:$0xff]  }
 0x3a0   :  { %5676 = vmatpush1.bf16.msra.mxu0 %v14732_v54  ;;  %v14786_v54 = vld [vmem:[#allocation8 + $0x6c0] ss:$16 sps:$4 sm:$0xff]  }
 0x3a1   :  { %5840 = vmatpush1.bf16.msra.mxu1 %v14735_v55  ;;  %5677 = vmatprep.subr.bf16.mxu0 %v14740_v58  ;;  %v14789_v55 = vld [vmem:[#allocation8 + $0x6c8] ss:$16 sps:$4 sm:$0xff]   ;;  %v14794_v58 = vld [vmem:[#allocation8 + $0x6e4] ss:$16 sps:$4 sm:$0xff]  }
 0x3a2   :  { %5841 = vmatprep.subr.bf16.mxu1 %v14743_v59  ;;  %v14797_v59 = vld [vmem:[#allocation8 + $0x6ec] ss:$16 sps:$4 sm:$0xff]  }
 0x3a4   :  { %5678 = vmatpush1.bf16.msra.mxu0 %v14738_v60  ;;  %v14792_v60 = vld [vmem:[#allocation8 + $0x6e0] ss:$16 sps:$4 sm:$0xff]  }
 0x3a5   :  { %5842 = vmatpush1.bf16.msra.mxu1 %v14741_v61  ;;  %5679 = vmatprep.subr.bf16.mxu0 %v14746_v62  ;;  %v14795_v61 = vld [vmem:[#allocation8 + $0x6e8] ss:$16 sps:$4 sm:$0xff]   ;;  %v14800_v62 = vld [vmem:[#allocation8 + $0x704] ss:$16 sps:$4 sm:$0xff]  }
 0x3a6   :  { %5843 = vmatprep.subr.bf16.mxu1 %v14749_v8  ;;  %v14803_v8 = vld [vmem:[#allocation8 + $0x70c] ss:$16 sps:$4 sm:$0xff]  }
 0x3a8   :  { %5680 = vmatpush1.bf16.msra.mxu0 %v14744_v63  ;;  %v14798_v63 = vld [vmem:[#allocation8 + $0x700] ss:$16 sps:$4 sm:$0xff]  }
 0x3a9   :  { %5844 = vmatpush1.bf16.msra.mxu1 %v14747_v0  ;;  %5690 = vmatprep.subr.bf16.mxu0 %v14752_v2  ;;  %v14801_v0 = vld [vmem:[#allocation8 + $0x708] ss:$16 sps:$4 sm:$0xff]   ;;  %v14806_v2 = vld [vmem:[#allocation8 + $0x724] ss:$16 sps:$4 sm:$0xff]  }
 0x3aa   :  { %5854 = vmatprep.subr.bf16.mxu1 %v14755_v3  ;;  %v14809_v3 = vld [vmem:[#allocation8 + $0x72c] ss:$16 sps:$4 sm:$0xff]  }
 0x3be   :  { %v3822_v16 = vpop.f32.mrb[4].mxu0  ;;  %v15740_v19 = vpop.f32.mrb[4].mxu1 }
 0x3bf   :  { %v14276_v17 = vadd.f32 %v3822_v16, %v756_v10  ;;  %v3824_v20 = vpop.f32.mrb[5].mxu0  ;;  %v3988_v57 = vpop.f32.mrb[5].mxu1  ;;  %v14804_v10 = vld [vmem:[#allocation8 + $0x720] ss:$16 sps:$4 sm:$0xff]   ;;  %v14815_v16 = vld [vmem:[#allocation8 + $0x74c] ss:$16 sps:$4 sm:$0xff]  }
 0x3c0   :  { %v14277_v21 = vadd.f32 %v3824_v20, %v760_v11  ;;  %v3826_v22 = vpop.f32.mrb[6].mxu0  ;;  %v14279_v26 = vadd.f32 %v3988_v57, %v768_v14  ;;  %v3990_v12 = vpop.f32.mrb[6].mxu1  ;;  %v14807_v11 = vld [vmem:[#allocation8 + $0x728] ss:$16 sps:$4 sm:$0xff]   ;;  %v14812_v14 = vld [vmem:[#allocation8 + $0x744] ss:$16 sps:$4 sm:$0xff]  }
 0x3c1   :  { %v3997_v24 = vmax.f32 %v14276_v17, 0.0  ;;  %v3827_v27 = vpop.f32.mrb[7].mxu0  ;;  %v3991_v29 = vpop.f32.mrb[7].mxu1  ;;  %v14810_v17 = vld [vmem:[#allocation8 + $0x740] ss:$16 sps:$4 sm:$0xff]  }
 0x3c2   :  { %v3998_v28 = vmax.f32 %v14277_v21, 0.0  ;;  %v4000_v31 = vmax.f32 %v14279_v26, 0.0  ;;  %v14813_v20 = vld [vmem:[#allocation8 + $0x748] ss:$16 sps:$4 sm:$0xff]   ;;  %v14818_v21 = vld [vmem:[#allocation8 + $0x764] ss:$16 sps:$4 sm:$0xff]  }
 0x3c3   :  { %v4005_v25 = vpack.c.bf16 %v3997_v24, %v3997_v24  ;;  %v14821_v57 = vld [vmem:[#allocation8 + $0x76c] ss:$16 sps:$4 sm:$0xff]   ;;  %v14816_v22 = vld [vmem:[#allocation8 + $0x760] ss:$16 sps:$4 sm:$0xff]   ;;  %v14819_v24 = vld [vmem:[#allocation8 + $0x768] ss:$16 sps:$4 sm:$0xff]  }
 0x3c4   :  { %v4006_v32 = vpack.c.bf16 %v3998_v28, %v3998_v28  ;;  %v4008_v37 = vpack.c.bf16 %v4000_v31, %v4000_v31  ;;  %v14824_v26 = vld [vmem:[#allocation8 + $0x784] ss:$16 sps:$4 sm:$0xff]   ;;  %v14827_v12 = vld [vmem:[#allocation8 + $0x78c] ss:$16 sps:$4 sm:$0xff]   ;;  %v14822_v27 = vld [vmem:[#allocation8 + $0x780] ss:$16 sps:$4 sm:$0xff]  }
 0x3c5   :  { %v14825_v28 = vld [vmem:[#allocation8 + $0x788] ss:$16 sps:$4 sm:$0xff]   ;;  %v15743_v29 = vsub.s32 6, %v15695_v1  ;;  %v14830_v31 = vld [vmem:[#allocation8 + $0x7a4] ss:$16 sps:$4 sm:$0xff]  }
 0x3c6   :  { %5681 = vmatprep.mubr.bf16.mxu0 %v4006_v32  ;;  %5845 = vmatprep.mubr.bf16.mxu1 %v4006_v32  ;;  %v14833_v32 = vld [vmem:[#allocation8 + $0x7ac] ss:$16 sps:$4 sm:$0xff]   ;;  %v14837_v1 = vld [vmem:[#allocation8 + $0x7c8] ss:$16 sps:$4 sm:$0xff]  }
 0x3c7   :  { %5682 = vmatmul.mubr.bf16.vlgmr.msra.gmra.mrb[8].mxu0 %v4005_v25  ;;  %5846 = vmatmul.mubr.bf16.vlgmr.msra.gmra.mrb[8].mxu1 %v4005_v25  ;;  %v15054_v25 = vld [vmem:[#allocation7] sm:$0xff] }
 0x3c8   :  { %5691 = vmatpush1.bf16.msra.mxu0 %v14750_v33  ;;  %5855 = vmatpush1.bf16.msra.mxu1 %v14753_v36  ;;  %v14828_v33 = vld [vmem:[#allocation8 + $0x7a0] ss:$16 sps:$4 sm:$0xff]   ;;  %v14831_v36 = vld [vmem:[#allocation8 + $0x7a8] ss:$16 sps:$4 sm:$0xff]  }
 0x3c9   :  { %5722 = vmatprep.mubr.bf16.mxu0 %v4008_v37  ;;  %5886 = vmatprep.mubr.bf16.mxu1 %v4008_v37  ;;  %v14839_v37 = vld [vmem:[#allocation8 + $0x7cc] ss:$16 sps:$4 sm:$0xff]  }
 0x3ca   :  { %5692 = vmatprep.subr.bf16.mxu0 %v14758_v18  ;;  %5856 = vmatprep.subr.bf16.mxu1 %v14761_v23  ;;  %v764_v18 = vrot.slane %v15054_v25, %v15743_v29  ;;  %v14836_v23 = vld [vmem:[#allocation8 + $0x7c4] ss:$16 sps:$4 sm:$0xff]   ;;  %v14959_v25 = vld [vmem:[#allocation14 + $0xa4] ss:$16 sps:$4 sm:$0xff]  }
 0x3cc   :  { %5693 = vmatpush1.bf16.msra.mxu0 %v14756_v38  ;;  %5857 = vmatpush1.bf16.msra.mxu1 %v14759_v40  ;;  %v14834_v38 = vld [vmem:[#allocation8 + $0x7c0] ss:$16 sps:$4 sm:$0xff]   ;;  %v14278_v40 = vadd.f32 %v15740_v19, %v764_v18  ;;  %v14849_v19 = vld [vmem:[#allocation11 + $0x10] ss:$8 sps:$4 sm:$0xff]  }
 0x3cd   :  { %5694 = vmatprep.subr.bf16.mxu0 %v14764_v41  ;;  %5858 = vmatprep.subr.bf16.mxu1 %v14767_v9  ;;  %v14842_v41 = vld [vmem:[#allocation8 + $0x7e4] ss:$16 sps:$4 sm:$0xff]   ;;  %v14845_v9 = vld [vmem:[#allocation8 + $0x7ec] ss:$16 sps:$4 sm:$0xff]  }
 0x3ce   :  { %v14957_v18 = vld [vmem:[#allocation14 + $0xa0] ss:$16 sps:$4 sm:$0xff]  }
 0x3d0   :  { %5695 = vmatpush1.bf16.msra.mxu0 %v14762_v39  ;;  %5859 = vmatpush1.bf16.msra.mxu1 %v14765_v42  ;;  %v14840_v39 = vld [vmem:[#allocation8 + $0x7e0] ss:$16 sps:$4 sm:$0xff]   ;;  %v14843_v42 = vld [vmem:[#allocation8 + $0x7e8] ss:$16 sps:$4 sm:$0xff]  }
 0x3d1   :  { %5696 = vmatprep.subr.bf16.mxu0 %v14770_v43  ;;  %5860 = vmatprep.subr.bf16.mxu1 %v14773_v45  ;;  %v3999_v43 = vmax.f32 %v14278_v40, 0.0  ;;  %v14848_v45 = vld [vmem:[#allocation11 + $0x4] ss:$8 sps:$4 sm:$0xff]  }
 0x3d2   :  { %v14968_v40 = vld [vmem:[#allocation14 + $0x104] ss:$16 sps:$4 sm:$0xff]  }
 0x3d4   :  { %5697 = vmatpush1.bf16.msra.mxu0 %v14768_v34  ;;  %5861 = vmatpush1.bf16.msra.mxu1 %v14771_v46  ;;  %v14846_v34 = vld [vmem:[#allocation11] ss:$8 sps:$4 sm:$0xff]   ;;  %v4007_v46 = vpack.c.bf16 %v3999_v43, %v3999_v43 }
 0x3d5   :  { %5698 = vmatprep.subr.bf16.mxu0 %v14776_v47  ;;  %5862 = vmatprep.subr.bf16.mxu1 %v14779_v56  ;;  %v14851_v47 = vld [vmem:[#allocation11 + $0x14] ss:$8 sps:$4 sm:$0xff]   ;;  %v14854_v56 = vld [vmem:[#allocation11 + $0x24] ss:$8 sps:$4 sm:$0xff]  }
 0x3d6   :  { %v14972_v43 = vld [vmem:[#allocation14 + $0x140] ss:$16 sps:$4 sm:$0xff]  }
 0x3d8   :  { %5699 = vmatpush1.bf16.msra.mxu0 %v14774_v49  ;;  %5863 = vmatpush1.bf16.msra.mxu1 %v14777_v4  ;;  %v14852_v49 = vld [vmem:[#allocation11 + $0x20] ss:$8 sps:$4 sm:$0xff]   ;;  %v14857_v4 = vld [vmem:[#allocation11 + $0x34] ss:$8 sps:$4 sm:$0xff]  }
 0x3d9   :  { %5700 = vmatprep.subr.bf16.mxu0 %v14782_v50  ;;  %5864 = vmatprep.subr.bf16.mxu1 %v14785_v48  ;;  %v14855_v50 = vld [vmem:[#allocation11 + $0x30] ss:$8 sps:$4 sm:$0xff]   ;;  %v14860_v48 = vld [vmem:[#allocation11 + $0x44] ss:$8 sps:$4 sm:$0xff]  }
 0x3dc   :  { %5701 = vmatpush1.bf16.msra.mxu0 %v14780_v51  ;;  %5865 = vmatpush1.bf16.msra.mxu1 %v14783_v52  ;;  %v14858_v51 = vld [vmem:[#allocation11 + $0x40] ss:$8 sps:$4 sm:$0xff]   ;;  %v14863_v52 = vld [vmem:[#allocation11 + $0x54] ss:$8 sps:$4 sm:$0xff]  }
 0x3dd   :  { %5702 = vmatprep.subr.bf16.mxu0 %v14788_v13  ;;  %5866 = vmatprep.subr.bf16.mxu1 %v14791_v53  ;;  %v14861_v13 = vld [vmem:[#allocation11 + $0x50] ss:$8 sps:$4 sm:$0xff]   ;;  %v14866_v53 = vld [vmem:[#allocation11 + $0x64] ss:$8 sps:$4 sm:$0xff]  }
 0x3e0   :  { %5703 = vmatpush1.bf16.msra.mxu0 %v14786_v54  ;;  %5867 = vmatpush1.bf16.msra.mxu1 %v14789_v55  ;;  %v14864_v54 = vld [vmem:[#allocation11 + $0x60] ss:$8 sps:$4 sm:$0xff]   ;;  %v14869_v55 = vld [vmem:[#allocation11 + $0x74] ss:$8 sps:$4 sm:$0xff]  }
 0x3e1   :  { %5704 = vmatprep.subr.bf16.mxu0 %v14794_v58  ;;  %5868 = vmatprep.subr.bf16.mxu1 %v14797_v59  ;;  %v14867_v58 = vld [vmem:[#allocation11 + $0x70] ss:$8 sps:$4 sm:$0xff]   ;;  %v14872_v59 = vld [vmem:[#allocation11 + $0x84] ss:$8 sps:$4 sm:$0xff]  }
 0x3e4   :  { %5705 = vmatpush1.bf16.msra.mxu0 %v14792_v60  ;;  %5869 = vmatpush1.bf16.msra.mxu1 %v14795_v61  ;;  %v14870_v60 = vld [vmem:[#allocation11 + $0x80] ss:$8 sps:$4 sm:$0xff]   ;;  %v14875_v61 = vld [vmem:[#allocation11 + $0x94] ss:$8 sps:$4 sm:$0xff]  }
 0x3e5   :  { %5706 = vmatprep.subr.bf16.mxu0 %v14800_v62  ;;  %5870 = vmatprep.subr.bf16.mxu1 %v14803_v8  ;;  %v14873_v62 = vld [vmem:[#allocation11 + $0x90] ss:$8 sps:$4 sm:$0xff]   ;;  %v14878_v8 = vld [vmem:[#allocation11 + $0xa4] ss:$8 sps:$4 sm:$0xff]  }
 0x3e8   :  { %5707 = vmatpush1.bf16.msra.mxu0 %v14798_v63  ;;  %5871 = vmatpush1.bf16.msra.mxu1 %v14801_v0  ;;  %v14876_v63 = vld [vmem:[#allocation11 + $0xa0] ss:$8 sps:$4 sm:$0xff]   ;;  %v14881_v0 = vld [vmem:[#allocation11 + $0xb4] ss:$8 sps:$4 sm:$0xff]  }
 0x3e9   :  { %5708 = vmatprep.subr.bf16.mxu0 %v14806_v2  ;;  %5872 = vmatprep.subr.bf16.mxu1 %v14809_v3  ;;  %v14879_v2 = vld [vmem:[#allocation11 + $0xb0] ss:$8 sps:$4 sm:$0xff]   ;;  %v14884_v3 = vld [vmem:[#allocation11 + $0xc4] ss:$8 sps:$4 sm:$0xff]  }
 0x3ec   :  { %5709 = vmatpush1.bf16.msra.mxu0 %v14804_v10  ;;  %5873 = vmatpush1.bf16.msra.mxu1 %v14807_v11  ;;  %v14882_v10 = vld [vmem:[#allocation11 + $0xc0] ss:$8 sps:$4 sm:$0xff]   ;;  %v14887_v11 = vld [vmem:[#allocation11 + $0xd4] ss:$8 sps:$4 sm:$0xff]  }
 0x3ed   :  { %5710 = vmatprep.subr.bf16.mxu0 %v14812_v14  ;;  %5874 = vmatprep.subr.bf16.mxu1 %v14815_v16  ;;  %v14885_v14 = vld [vmem:[#allocation11 + $0xd0] ss:$8 sps:$4 sm:$0xff]   ;;  %v14890_v16 = vld [vmem:[#allocation11 + $0xe4] ss:$8 sps:$4 sm:$0xff]  }
 0x3f0   :  { %5711 = vmatpush1.bf16.msra.mxu0 %v14810_v17  ;;  %5875 = vmatpush1.bf16.msra.mxu1 %v14813_v20  ;;  %v14888_v17 = vld [vmem:[#allocation11 + $0xe0] ss:$8 sps:$4 sm:$0xff]   ;;  %v14893_v20 = vld [vmem:[#allocation11 + $0xf4] ss:$8 sps:$4 sm:$0xff]  }
 0x3f1   :  { %5712 = vmatprep.subr.bf16.mxu0 %v14818_v21  ;;  %5876 = vmatprep.subr.bf16.mxu1 %v14821_v57  ;;  %v14891_v21 = vld [vmem:[#allocation11 + $0xf0] ss:$8 sps:$4 sm:$0xff]   ;;  %v14896_v57 = vld [vmem:[#allocation11 + $0x104] ss:$8 sps:$4 sm:$0xff]  }
 0x3f4   :  { %5713 = vmatpush1.bf16.msra.mxu0 %v14816_v22  ;;  %5877 = vmatpush1.bf16.msra.mxu1 %v14819_v24  ;;  %v14942_v22 = vld [vmem:[#allocation14] ss:$16 sps:$4 sm:$0xff]   ;;  %v14944_v24 = vld [vmem:[#allocation14 + $0x4] ss:$16 sps:$4 sm:$0xff]  }
 0x3f5   :  { %5714 = vmatprep.subr.bf16.mxu0 %v14824_v26  ;;  %5878 = vmatprep.subr.bf16.mxu1 %v14827_v12  ;;  %v14947_v26 = vld [vmem:[#allocation14 + $0x24] ss:$16 sps:$4 sm:$0xff]   ;;  %v14945_v12 = vld [vmem:[#allocation14 + $0x20] ss:$16 sps:$4 sm:$0xff]  }
 0x3f8   :  { %5715 = vmatpush1.bf16.msra.mxu0 %v14822_v27  ;;  %5879 = vmatpush1.bf16.msra.mxu1 %v14825_v28  ;;  %v14950_v27 = vld [vmem:[#allocation14 + $0x44] ss:$16 sps:$4 sm:$0xff]   ;;  %v14948_v28 = vld [vmem:[#allocation14 + $0x40] ss:$16 sps:$4 sm:$0xff]  }
 0x3f9   :  { %5716 = vmatprep.subr.bf16.mxu0 %v14830_v31  ;;  %5880 = vmatprep.subr.bf16.mxu1 %v14833_v32  ;;  %v14953_v31 = vld [vmem:[#allocation14 + $0x64] ss:$16 sps:$4 sm:$0xff]   ;;  %v14951_v32 = vld [vmem:[#allocation14 + $0x60] ss:$16 sps:$4 sm:$0xff]  }
 0x3fc   :  { %5717 = vmatpush1.bf16.msra.mxu0 %v14828_v33  ;;  %5881 = vmatpush1.bf16.msra.mxu1 %v14831_v36  ;;  %v14956_v33 = vld [vmem:[#allocation14 + $0x84] ss:$16 sps:$4 sm:$0xff]   ;;  %v14954_v36 = vld [vmem:[#allocation14 + $0x80] ss:$16 sps:$4 sm:$0xff]  }
 0x3fd   :  { %5718 = vmatprep.subr.bf16.mxu0 %v14836_v23  ;;  %5882 = vmatprep.subr.bf16.mxu1 %v14839_v37  ;;  %v14962_v23 = vld [vmem:[#allocation14 + $0xc4] ss:$16 sps:$4 sm:$0xff]   ;;  %v14960_v37 = vld [vmem:[#allocation14 + $0xc0] ss:$16 sps:$4 sm:$0xff]  }
 0x400   :  { %5719 = vmatpush1.bf16.msra.mxu0 %v14834_v38  ;;  %5883 = vmatpush1.bf16.msra.mxu1 %v14837_v1  ;;  %v14965_v38 = vld [vmem:[#allocation14 + $0xe4] ss:$16 sps:$4 sm:$0xff]   ;;  %v14963_v1 = vld [vmem:[#allocation14 + $0xe0] ss:$16 sps:$4 sm:$0xff]  }
 0x401   :  { %5720 = vmatprep.subr.bf16.mxu0 %v14842_v41  ;;  %5884 = vmatprep.subr.bf16.mxu1 %v14845_v9  ;;  %v14966_v41 = vld [vmem:[#allocation14 + $0x100] ss:$16 sps:$4 sm:$0xff]   ;;  %v14971_v9 = vld [vmem:[#allocation14 + $0x124] ss:$16 sps:$4 sm:$0xff]  }
 0x404   :  { %5721 = vmatpush1.bf16.msra.mxu0 %v14840_v39  ;;  %5885 = vmatpush1.bf16.msra.mxu1 %v14843_v42  ;;  %v14969_v39 = vld [vmem:[#allocation14 + $0x120] ss:$16 sps:$4 sm:$0xff]   ;;  %v14974_v42 = vld [vmem:[#allocation14 + $0x144] ss:$16 sps:$4 sm:$0xff]  }
 0x405   :  { %6299 = vmatprep.subr.bf16.mxu0 %v14848_v45  ;;  %6789 = vmatprep.subr.bf16.mxu1 %v14944_v24  ;;  %v14977_v45 = vld [vmem:[#allocation14 + $0x164] ss:$16 sps:$4 sm:$0xff]  }
 0x406   :  { %v14903_v24 = vld [vmem:[#allocation11 + $0x130] ss:$8 sps:$4 sm:$0xff]  }
 0x407   :  { %5723 = vmatmul.mubr.bf16.vlgmr.msra.gmra.mrb[8].mxu0 %v4007_v46  ;;  %5887 = vmatmul.mubr.bf16.vlgmr.msra.gmra.mrb[8].mxu1 %v4007_v46  ;;  %v14980_v46 = vld [vmem:[#allocation14 + $0x184] ss:$16 sps:$4 sm:$0xff]  }
 0x408   :  { %6300 = vmatpush1.bf16.msra.mxu0 %v14846_v34  ;;  %6790 = vmatpush1.bf16.msra.mxu1 %v14942_v22  ;;  %v14975_v34 = vld [vmem:[#allocation14 + $0x160] ss:$16 sps:$4 sm:$0xff]  }
 0x409   :  { %6301 = vmatprep.subr.bf16.mxu0 %v14851_v47  ;;  %6791 = vmatprep.subr.bf16.mxu1 %v14947_v26  ;;  %v14978_v47 = vld [vmem:[#allocation14 + $0x180] ss:$16 sps:$4 sm:$0xff]  }
 0x40a   :  { %v14905_v22 = vld [vmem:[#allocation11 + $0x134] ss:$8 sps:$4 sm:$0xff]   ;;  %v14908_v26 = vld [vmem:[#allocation11 + $0x144] ss:$8 sps:$4 sm:$0xff]  }
 0x40c   :  { %6302 = vmatpush1.bf16.msra.mxu0 %v14849_v19  ;;  %6792 = vmatpush1.bf16.msra.mxu1 %v14945_v12  ;;  %v14983_v19 = vld [vmem:[#allocation14 + $0x1a4] ss:$16 sps:$4 sm:$0xff]  }
 0x40d   :  { %6303 = vmatprep.subr.bf16.mxu0 %v14854_v56  ;;  %6793 = vmatprep.subr.bf16.mxu1 %v14950_v27  ;;  %v15747_v56 = vld [vmem:[#allocation10] sm:$0xf]  ;;  %v14906_v12 = vld [vmem:[#allocation11 + $0x140] ss:$8 sps:$4 sm:$0xff]  }
 0x40e   :  { %v14911_v27 = vld [vmem:[#allocation11 + $0x154] ss:$8 sps:$4 sm:$0xff]  }
 0x410   :  { %6304 = vmatpush1.bf16.msra.mxu0 %v14852_v49  ;;  %6794 = vmatpush1.bf16.msra.mxu1 %v14948_v28  ;;  %v14981_v49 = vld [vmem:[#allocation14 + $0x1a0] ss:$16 sps:$4 sm:$0xff]  }
 0x411   :  { %6305 = vmatprep.subr.bf16.mxu0 %v14857_v4  ;;  %6795 = vmatprep.subr.bf16.mxu1 %v14953_v31  ;;  %v4270_v4 = vrot.slane %v15747_v56, %v15708_v30  ;;  %v14909_v28 = vld [vmem:[#allocation11 + $0x150] ss:$8 sps:$4 sm:$0xff]   ;;  %v14914_v31 = vld [vmem:[#allocation11 + $0x164] ss:$8 sps:$4 sm:$0xff]  }
 0x414   :  { %6306 = vmatpush1.bf16.msra.mxu0 %v14855_v50  ;;  %6796 = vmatpush1.bf16.msra.mxu1 %v14951_v32  ;;  %v14986_v50 = vld [vmem:[#allocation14 + $0x1c4] ss:$16 sps:$4 sm:$0xff]  }
 0x415   :  { %6307 = vmatprep.subr.bf16.mxu0 %v14860_v48  ;;  %6797 = vmatprep.subr.bf16.mxu1 %v14956_v33  ;;  %v4274_v48 = vrot.slane %v15747_v56, %v15698_v15  ;;  %v14912_v32 = vld [vmem:[#allocation11 + $0x160] ss:$8 sps:$4 sm:$0xff]   ;;  %v14917_v33 = vld [vmem:[#allocation11 + $0x174] ss:$8 sps:$4 sm:$0xff]  }
 0x418   :  { %6308 = vmatpush1.bf16.msra.mxu0 %v14858_v51  ;;  %6798 = vmatpush1.bf16.msra.mxu1 %v14954_v36  ;;  %v4282_v51 = vrot.slane %v15747_v56, %v15711_v35  ;;  %v14915_v36 = vld [vmem:[#allocation11 + $0x170] ss:$8 sps:$4 sm:$0xff]  }
 0x419   :  { %6309 = vmatprep.subr.bf16.mxu0 %v14863_v52  ;;  %6799 = vmatprep.subr.bf16.mxu1 %v14959_v25  ;;  %v14920_v25 = vld [vmem:[#allocation11 + $0x184] ss:$8 sps:$4 sm:$0xff]  }
 0x41c   :  { %6310 = vmatpush1.bf16.msra.mxu0 %v14861_v13  ;;  %6800 = vmatpush1.bf16.msra.mxu1 %v14957_v18  ;;  %v14918_v18 = vld [vmem:[#allocation11 + $0x180] ss:$8 sps:$4 sm:$0xff]  }
 0x41d   :  { %6311 = vmatprep.subr.bf16.mxu0 %v14866_v53  ;;  %6801 = vmatprep.subr.bf16.mxu1 %v14962_v23  ;;  %v14984_v53 = vld [vmem:[#allocation14 + $0x1c0] ss:$16 sps:$4 sm:$0xff]  }
 0x41e   :  { %v14923_v23 = vld [vmem:[#allocation11 + $0x194] ss:$8 sps:$4 sm:$0xff]  }
 0x420   :  { %6312 = vmatpush1.bf16.msra.mxu0 %v14864_v54  ;;  %6802 = vmatpush1.bf16.msra.mxu1 %v14960_v37  ;;  %v14921_v37 = vld [vmem:[#allocation11 + $0x190] ss:$8 sps:$4 sm:$0xff]  }
 0x421   :  { %6313 = vmatprep.subr.bf16.mxu0 %v14869_v55  ;;  %6803 = vmatprep.subr.bf16.mxu1 %v14965_v38  ;;  %v14926_v38 = vld [vmem:[#allocation11 + $0x1a4] ss:$8 sps:$4 sm:$0xff]  }
 0x424   :  { %6314 = vmatpush1.bf16.msra.mxu0 %v14867_v58  ;;  %6804 = vmatpush1.bf16.msra.mxu1 %v14963_v1  ;;  %v14924_v1 = vld [vmem:[#allocation11 + $0x1a0] ss:$8 sps:$4 sm:$0xff]  }
 0x425   :  { %6315 = vmatprep.subr.bf16.mxu0 %v14872_v59  ;;  %6805 = vmatprep.subr.bf16.mxu1 %v14968_v40  ;;  %v14929_v40 = vld [vmem:[#allocation11 + $0x1b4] ss:$8 sps:$4 sm:$0xff]  }
 0x428   :  { %6316 = vmatpush1.bf16.msra.mxu0 %v14870_v60  ;;  %6806 = vmatpush1.bf16.msra.mxu1 %v14966_v41  ;;  %v14927_v41 = vld [vmem:[#allocation11 + $0x1b0] ss:$8 sps:$4 sm:$0xff]  }
 0x429   :  { %6317 = vmatprep.subr.bf16.mxu0 %v14875_v61  ;;  %6807 = vmatprep.subr.bf16.mxu1 %v14971_v9  ;;  %v14932_v9 = vld [vmem:[#allocation11 + $0x1c4] ss:$8 sps:$4 sm:$0xff]  }
 0x42c   :  { %6318 = vmatpush1.bf16.msra.mxu0 %v14873_v62  ;;  %6808 = vmatpush1.bf16.msra.mxu1 %v14969_v39  ;;  %v14930_v39 = vld [vmem:[#allocation11 + $0x1c0] ss:$8 sps:$4 sm:$0xff]  }
 0x42d   :  { %6319 = vmatprep.subr.bf16.mxu0 %v14878_v8  ;;  %6809 = vmatprep.subr.bf16.mxu1 %v14974_v42  ;;  %v14935_v42 = vld [vmem:[#allocation11 + $0x1d4] ss:$8 sps:$4 sm:$0xff]  }
 0x430   :  { %6320 = vmatpush1.bf16.msra.mxu0 %v14876_v63  ;;  %6810 = vmatpush1.bf16.msra.mxu1 %v14972_v43  ;;  %v14933_v43 = vld [vmem:[#allocation11 + $0x1d0] ss:$8 sps:$4 sm:$0xff]  }
 0x431   :  { %6321 = vmatprep.subr.bf16.mxu0 %v14881_v0  ;;  %6811 = vmatprep.subr.bf16.mxu1 %v14977_v45  ;;  %v4278_v45 = vrot.slane %v15747_v56, %v15720_v44  ;;  %v14992_v56 = vld [vmem:[#allocation14 + $0xc] ss:$16 sps:$4 sm:$0xff]  }
 0x434   :  { %6322 = vmatpush1.bf16.msra.mxu0 %v14879_v2  ;;  %6812 = vmatpush1.bf16.msra.mxu1 %v14975_v34  ;;  %v14938_v34 = vld [vmem:[#allocation11 + $0x1e4] ss:$8 sps:$4 sm:$0xff]  }
 0x435   :  { %6323 = vmatprep.subr.bf16.mxu0 %v14884_v3  ;;  %6813 = vmatprep.subr.bf16.mxu1 %v14980_v46  ;;  %v14936_v46 = vld [vmem:[#allocation11 + $0x1e0] ss:$8 sps:$4 sm:$0xff]  }
 0x438   :  { %6324 = vmatpush1.bf16.msra.mxu0 %v14882_v10  ;;  %6814 = vmatpush1.bf16.msra.mxu1 %v14978_v47 }
 0x439   :  { %6325 = vmatprep.subr.bf16.mxu0 %v14887_v11  ;;  %6815 = vmatprep.subr.bf16.mxu1 %v14983_v19  ;;  %v14894_v11 = vld [vmem:[#allocation11 + $0x100] ss:$8 sps:$4 sm:$0xff]   ;;  %v14941_v19 = vld [vmem:[#allocation11 + $0x1f4] ss:$8 sps:$4 sm:$0xff]  }
 0x43c   :  { %6326 = vmatpush1.bf16.msra.mxu0 %v14885_v14  ;;  %6816 = vmatpush1.bf16.msra.mxu1 %v14981_v49  ;;  %v14939_v49 = vld [vmem:[#allocation11 + $0x1f0] ss:$8 sps:$4 sm:$0xff]  }
 0x43d   :  { %6327 = vmatprep.subr.bf16.mxu0 %v14890_v16  ;;  %6817 = vmatprep.subr.bf16.mxu1 %v14986_v50  ;;  %v14899_v16 = vld [vmem:[#allocation11 + $0x114] ss:$8 sps:$4 sm:$0xff]  }
 0x440   :  { %6328 = vmatpush1.bf16.msra.mxu0 %v14888_v17  ;;  %6818 = vmatpush1.bf16.msra.mxu1 %v14984_v53  ;;  %v6883_v53 = vld [vmem:[#allocation17 + $0x20] sm:$0xff] }
 0x441   :  { %6329 = vmatprep.subr.bf16.mxu0 %v14893_v20  ;;  %v14897_v20 = vld [vmem:[#allocation11 + $0x110] ss:$8 sps:$4 sm:$0xff]  }
 0x444   :  { %6330 = vmatpush1.bf16.msra.mxu0 %v14891_v21  ;;  %v14902_v21 = vld [vmem:[#allocation11 + $0x124] ss:$8 sps:$4 sm:$0xff]  }
 0x445   :  { %6340 = vmatprep.subr.bf16.mxu0 %v14896_v57  ;;  %v14900_v57 = vld [vmem:[#allocation11 + $0x120] ss:$8 sps:$4 sm:$0xff]  }
 0x4da   :  { %v5724_v52 = vpop.f32.mrb[8].mxu0  ;;  %v15755_v13 = vpop.f32.mrb[8].mxu1 }
 0x4db   :  { %v14280_v54 = vadd.f32 %v5724_v52, %v4270_v4  ;;  %v5726_v55 = vpop.f32.mrb[9].mxu0  ;;  %v5890_v58 = vpop.f32.mrb[9].mxu1  ;;  %v14282_v47 = vadd.f32 %v15755_v13, %v4278_v45  ;;  %v6879_v52 = vld [vmem:[#allocation17] sm:$0xff] }
 0x4dc   :  { %v14281_v59 = vadd.f32 %v5726_v55, %v4274_v48  ;;  %v14283_v60 = vadd.f32 %v5890_v58, %v4282_v51  ;;  %v5728_v61 = vpop.f32.mrb[10].mxu0  ;;  %v5892_v62 = vpop.f32.mrb[10].mxu1  ;;  %v14989_v48 = vld [vmem:[#allocation14 + $0x1e4] ss:$16 sps:$4 sm:$0xff]   ;;  %v14987_v51 = vld [vmem:[#allocation14 + $0x1e0] ss:$16 sps:$4 sm:$0xff]   ;;  %v13505_v55 = vcombine.high %v6879_v52, %v6883_v53 }
 0x4dd   :  { %v5895_v8 = vmax.f32 %v14280_v54, 0.0  ;;  %v5729_v63 = vpop.f32.mrb[11].mxu0  ;;  %v5893_v0 = vpop.f32.mrb[11].mxu1  ;;  %v5897_v4 = vmax.f32 %v14282_v47, 0.0  ;;  %6819 = vmatprep.subr.bf16.mxu1 %v14989_v48  ;;  %v13504_v54 = vcombine.low %v6879_v52, %v6883_v53  ;;  %v6887_v13 = vld [vmem:[#allocation17 + $0x40] sm:$0xff] }
 0x4de   :  { %v5896_v2 = vmax.f32 %v14281_v59, 0.0  ;;  %v5898_v3 = vmax.f32 %v14283_v60, 0.0  ;;  %6820 = vmatpush1.bf16.msra.mxu1 %v14987_v51  ;;  %v6891_v58 = vld [vmem:[#allocation17 + $0x60] sm:$0xff] }
 0x4df   :  { %v5899_v14 = vpack.c.bf16 %v5895_v8, %v5895_v8  ;;  %v5901_v50 = vpack.c.bf16 %v5897_v4, %v5897_v4  ;;  %6830 = vmatprep.subr.bf16.mxu1 %v14992_v56  ;;  %v13513_v59 = vcombine.high %v6887_v13, %v6891_v58  ;;  %v13512_v60 = vcombine.low %v6887_v13, %v6891_v58  ;;  %v6895_v61 = vld [vmem:[#allocation17 + $0x80] sm:$0xff]  ;;  %v5967_v56 = vld [vmem:[#allocation13] sm:$0x3] }
 0x4e0   :  { %v5900_v10 = vpack.c.bf16 %v5896_v2, %v5896_v2  ;;  %v5902_v17 = vpack.c.bf16 %v5898_v3, %v5898_v3  ;;  %v6899_v62 = vld [vmem:[#allocation17 + $0xa0] sm:$0xff]  ;;  %v5972_v53 = vrot.slane %v5967_v56, %v15708_v30 }
 0x4e1   :  { %v13521_v8 = vcombine.high %v6895_v61, %v6899_v62  ;;  %v13520_v63 = vcombine.low %v6895_v61, %v6899_v62  ;;  %v6903_v0 = vld [vmem:[#allocation17 + $0xc0] sm:$0xff] }
 0x4e2   :  { %6331 = vmatprep.mubr.bf16.mxu0 %v5900_v10  ;;  %v6907_v2 = vld [vmem:[#allocation17 + $0xe0] sm:$0xff] }
 0x4e3   :  { %6332 = vmatmul.mubr.bf16.vlgmr.msra.gmra.mrb[12].mxu0 %v5899_v14  ;;  %v13529_v3 = vcombine.high %v6903_v0, %v6907_v2  ;;  %v13528_v10 = vcombine.low %v6903_v0, %v6907_v2  ;;  %v6915_v14 = vld [vmem:[#allocation17 + $0x120] sm:$0xff]  ;;  %v14995_v0 = vld [vmem:[#allocation14 + $0x2c] ss:$16 sps:$4 sm:$0xff]  }
 0x4e4   :  { %6341 = vmatpush1.bf16.msra.mxu0 %v14894_v11  ;;  %6372 = vmatprep.mubr.bf16.mxu0 %v5902_v17  ;;  %v6911_v11 = vld [vmem:[#allocation17 + $0x100] sm:$0xff] }
 0x4e5   :  { %6342 = vmatprep.subr.bf16.mxu0 %v14899_v16  ;;  %v13537_v16 = vcombine.high %v6911_v11, %v6915_v14  ;;  %v13536_v17 = vcombine.low %v6911_v11, %v6915_v14  ;;  %v6971_v45 = vld [vmem:[#allocation17 + $0x2e0] sm:$0xff]  ;;  %v15001_v11 = vld [vmem:[#allocation14 + $0x6c] ss:$16 sps:$4 sm:$0xff]  }
 0x4e6   :  { %v6975_v47 = vld [vmem:[#allocation17 + $0x300] sm:$0xff] }
 0x4e7   :  { %v6987_v48 = vld [vmem:[#allocation17 + $0x360] sm:$0xff] }
 0x4e8   :  { %6343 = vmatpush1.bf16.msra.mxu0 %v14897_v20  ;;  %v6919_v20 = vld [vmem:[#allocation17 + $0x140] sm:$0xff] }
 0x4e9   :  { %6344 = vmatprep.subr.bf16.mxu0 %v14902_v21  ;;  %v6923_v21 = vld [vmem:[#allocation17 + $0x160] sm:$0xff] }
 0x4ea   :  { %v14993_v2 = vld [vmem:[#allocation14 + $0x28] ss:$16 sps:$4 sm:$0xff]  }
 0x4eb   :  { %v14999_v14 = vld [vmem:[#allocation14 + $0x68] ss:$16 sps:$4 sm:$0xff]  }
 0x4ec   :  { %6345 = vmatpush1.bf16.msra.mxu0 %v14900_v57  ;;  %v13545_v57 = vcombine.high %v6919_v20, %v6923_v21 }
 0x4ed   :  { %6346 = vmatprep.subr.bf16.mxu0 %v14905_v22  ;;  %v13544_v22 = vcombine.low %v6919_v20, %v6923_v21  ;;  %v15007_v20 = vld [vmem:[#allocation14 + $0xac] ss:$16 sps:$4 sm:$0xff]   ;;  %v15005_v21 = vld [vmem:[#allocation14 + $0xa8] ss:$16 sps:$4 sm:$0xff]  }
 0x4f0   :  { %6347 = vmatpush1.bf16.msra.mxu0 %v14903_v24  ;;  %v6927_v24 = vld [vmem:[#allocation17 + $0x180] sm:$0xff] }
 0x4f1   :  { %6348 = vmatprep.subr.bf16.mxu0 %v14908_v26  ;;  %v6931_v26 = vld [vmem:[#allocation17 + $0x1a0] sm:$0xff] }
 0x4f4   :  { %6349 = vmatpush1.bf16.msra.mxu0 %v14906_v12  ;;  %v13553_v12 = vcombine.high %v6927_v24, %v6931_v26 }
 0x4f5   :  { %6350 = vmatprep.subr.bf16.mxu0 %v14911_v27  ;;  %v13552_v27 = vcombine.low %v6927_v24, %v6931_v26  ;;  %v15013_v24 = vld [vmem:[#allocation14 + $0xec] ss:$16 sps:$4 sm:$0xff]   ;;  %v15011_v26 = vld [vmem:[#allocation14 + $0xe8] ss:$16 sps:$4 sm:$0xff]  }
 0x4f8   :  { %6351 = vmatpush1.bf16.msra.mxu0 %v14909_v28  ;;  %v6935_v28 = vld [vmem:[#allocation17 + $0x1c0] sm:$0xff] }
 0x4f9   :  { %6352 = vmatprep.subr.bf16.mxu0 %v14914_v31  ;;  %v6939_v31 = vld [vmem:[#allocation17 + $0x1e0] sm:$0xff] }
 0x4fc   :  { %6353 = vmatpush1.bf16.msra.mxu0 %v14912_v32  ;;  %v13561_v32 = vcombine.high %v6935_v28, %v6939_v31 }
 0x4fd   :  { %6354 = vmatprep.subr.bf16.mxu0 %v14917_v33  ;;  %v13560_v33 = vcombine.low %v6935_v28, %v6939_v31  ;;  %v15019_v28 = vld [vmem:[#allocation14 + $0x12c] ss:$16 sps:$4 sm:$0xff]   ;;  %v15017_v31 = vld [vmem:[#allocation14 + $0x128] ss:$16 sps:$4 sm:$0xff]  }
 0x500   :  { %6355 = vmatpush1.bf16.msra.mxu0 %v14915_v36  ;;  %v6943_v36 = vld [vmem:[#allocation17 + $0x200] sm:$0xff] }
 0x501   :  { %6356 = vmatprep.subr.bf16.mxu0 %v14920_v25  ;;  %v6947_v25 = vld [vmem:[#allocation17 + $0x220] sm:$0xff] }
 0x504   :  { %6357 = vmatpush1.bf16.msra.mxu0 %v14918_v18  ;;  %v13569_v18 = vcombine.high %v6943_v36, %v6947_v25 }
 0x505   :  { %6358 = vmatprep.subr.bf16.mxu0 %v14923_v23  ;;  %v13568_v23 = vcombine.low %v6943_v36, %v6947_v25  ;;  %v15025_v36 = vld [vmem:[#allocation14 + $0x16c] ss:$16 sps:$4 sm:$0xff]   ;;  %v15023_v25 = vld [vmem:[#allocation14 + $0x168] ss:$16 sps:$4 sm:$0xff]  }
 0x508   :  { %6359 = vmatpush1.bf16.msra.mxu0 %v14921_v37  ;;  %v6951_v37 = vld [vmem:[#allocation17 + $0x240] sm:$0xff] }
 0x509   :  { %6360 = vmatprep.subr.bf16.mxu0 %v14926_v38  ;;  %v6955_v38 = vld [vmem:[#allocation17 + $0x260] sm:$0xff] }
 0x50c   :  { %6361 = vmatpush1.bf16.msra.mxu0 %v14924_v1  ;;  %v13577_v1 = vcombine.high %v6951_v37, %v6955_v38 }
 0x50d   :  { %6362 = vmatprep.subr.bf16.mxu0 %v14929_v40  ;;  %v13576_v40 = vcombine.low %v6951_v37, %v6955_v38  ;;  %v15031_v37 = vld [vmem:[#allocation14 + $0x1ac] ss:$16 sps:$4 sm:$0xff]   ;;  %v15029_v38 = vld [vmem:[#allocation14 + $0x1a8] ss:$16 sps:$4 sm:$0xff]  }
 0x510   :  { %6363 = vmatpush1.bf16.msra.mxu0 %v14927_v41  ;;  %v6959_v41 = vld [vmem:[#allocation17 + $0x280] sm:$0xff] }
 0x511   :  { %6364 = vmatprep.subr.bf16.mxu0 %v14932_v9  ;;  %v6963_v9 = vld [vmem:[#allocation17 + $0x2a0] sm:$0xff] }
 0x514   :  { %6365 = vmatpush1.bf16.msra.mxu0 %v14930_v39  ;;  %v13585_v39 = vcombine.high %v6959_v41, %v6963_v9 }
 0x515   :  { %6366 = vmatprep.subr.bf16.mxu0 %v14935_v42  ;;  %v13584_v42 = vcombine.low %v6959_v41, %v6963_v9  ;;  %v15037_v41 = vld [vmem:[#allocation14 + $0x1ec] ss:$16 sps:$4 sm:$0xff]  }
 0x516   :  { %v6880_v9 = vld [vmem:[#allocation17 + $0x8] sm:$0xff] }
 0x518   :  { %6367 = vmatpush1.bf16.msra.mxu0 %v14933_v43  ;;  %v6967_v43 = vld [vmem:[#allocation17 + $0x2c0] sm:$0xff] }
 0x519   :  { %6368 = vmatprep.subr.bf16.mxu0 %v14938_v34  ;;  %v13593_v34 = vcombine.high %v6967_v43, %v6971_v45 }
 0x51c   :  { %6369 = vmatpush1.bf16.msra.mxu0 %v14936_v46  ;;  %v13592_v46 = vcombine.low %v6967_v43, %v6971_v45  ;;  %v6888_v45 = vld [vmem:[#allocation17 + $0x48] sm:$0xff] }
 0x51d   :  { %6370 = vmatprep.subr.bf16.mxu0 %v14941_v19  ;;  %v6979_v19 = vld [vmem:[#allocation17 + $0x320] sm:$0xff] }
 0x51e   :  { %v13600_v4 = vcombine.low %v6975_v47, %v6979_v19 }
 0x520   :  { %6371 = vmatpush1.bf16.msra.mxu0 %v14939_v49  ;;  %v13601_v49 = vcombine.high %v6975_v47, %v6979_v19  ;;  %v6896_v19 = vld [vmem:[#allocation17 + $0x88] sm:$0xff] }
 0x521   :  { %8457 = vmatprep.subr.bf16.mxu0 %v13505_v55 }
 0x523   :  { %6373 = vmatmul.mubr.bf16.vlgmr.msra.gmra.mrb[12].mxu0 %v5901_v50  ;;  %v6983_v50 = vld [vmem:[#allocation17 + $0x340] sm:$0xff] }
 0x524   :  { %8458 = vmatpush1.bf16.msra.mxu0 %v13504_v54  ;;  %v13609_v51 = vcombine.high %v6983_v50, %v6987_v48  ;;  %v13608_v52 = vcombine.low %v6983_v50, %v6987_v48  ;;  %v5976_v54 = vrot.slane %v5967_v56, %v15698_v15  ;;  %v6904_v48 = vld [vmem:[#allocation17 + $0xc8] sm:$0xff] }
 0x525   :  { %8459 = vmatprep.subr.bf16.mxu0 %v13513_v59 }
 0x528   :  { %8460 = vmatpush1.bf16.msra.mxu0 %v13512_v60 }
 0x529   :  { %8461 = vmatprep.subr.bf16.mxu0 %v13521_v8  ;;  %v14990_v8 = vld [vmem:[#allocation14 + $0x8] ss:$16 sps:$4 sm:$0xff]  }
 0x52c   :  { %8462 = vmatpush1.bf16.msra.mxu0 %v13520_v63 }
 0x52d   :  { %8463 = vmatprep.subr.bf16.mxu0 %v13529_v3  ;;  %v14998_v3 = vld [vmem:[#allocation14 + $0x4c] ss:$16 sps:$4 sm:$0xff]  }
 0x530   :  { %8464 = vmatpush1.bf16.msra.mxu0 %v13528_v10  ;;  %v14996_v10 = vld [vmem:[#allocation14 + $0x48] ss:$16 sps:$4 sm:$0xff]  }
 0x531   :  { %8465 = vmatprep.subr.bf16.mxu0 %v13537_v16  ;;  %v15004_v16 = vld [vmem:[#allocation14 + $0x8c] ss:$16 sps:$4 sm:$0xff]  }
 0x534   :  { %8466 = vmatpush1.bf16.msra.mxu0 %v13536_v17  ;;  %v15002_v17 = vld [vmem:[#allocation14 + $0x88] ss:$16 sps:$4 sm:$0xff]  }
 0x535   :  { %8467 = vmatprep.subr.bf16.mxu0 %v13545_v57  ;;  %v15010_v57 = vld [vmem:[#allocation14 + $0xcc] ss:$16 sps:$4 sm:$0xff]  }
 0x538   :  { %8468 = vmatpush1.bf16.msra.mxu0 %v13544_v22  ;;  %v15008_v22 = vld [vmem:[#allocation14 + $0xc8] ss:$16 sps:$4 sm:$0xff]  }
 0x539   :  { %8469 = vmatprep.subr.bf16.mxu0 %v13553_v12  ;;  %v15016_v12 = vld [vmem:[#allocation14 + $0x10c] ss:$16 sps:$4 sm:$0xff]  }
 0x53c   :  { %8470 = vmatpush1.bf16.msra.mxu0 %v13552_v27  ;;  %v15014_v27 = vld [vmem:[#allocation14 + $0x108] ss:$16 sps:$4 sm:$0xff]  }
 0x53d   :  { %8471 = vmatprep.subr.bf16.mxu0 %v13561_v32  ;;  %v15022_v32 = vld [vmem:[#allocation14 + $0x14c] ss:$16 sps:$4 sm:$0xff]  }
 0x540   :  { %8472 = vmatpush1.bf16.msra.mxu0 %v13560_v33  ;;  %v15020_v33 = vld [vmem:[#allocation14 + $0x148] ss:$16 sps:$4 sm:$0xff]  }
 0x541   :  { %8473 = vmatprep.subr.bf16.mxu0 %v13569_v18  ;;  %v15028_v18 = vld [vmem:[#allocation14 + $0x18c] ss:$16 sps:$4 sm:$0xff]  }
 0x544   :  { %8474 = vmatpush1.bf16.msra.mxu0 %v13568_v23  ;;  %v15026_v23 = vld [vmem:[#allocation14 + $0x188] ss:$16 sps:$4 sm:$0xff]  }
 0x545   :  { %8475 = vmatprep.subr.bf16.mxu0 %v13577_v1  ;;  %v15034_v1 = vld [vmem:[#allocation14 + $0x1cc] ss:$16 sps:$4 sm:$0xff]  }
 0x548   :  { %8476 = vmatpush1.bf16.msra.mxu0 %v13576_v40  ;;  %v15032_v40 = vld [vmem:[#allocation14 + $0x1c8] ss:$16 sps:$4 sm:$0xff]  }
 0x549   :  { %8477 = vmatprep.subr.bf16.mxu0 %v13585_v39  ;;  %v6884_v39 = vld [vmem:[#allocation17 + $0x28] sm:$0xff] }
 0x54a   :  { %v13507_v43 = vcombine.high %v6880_v9, %v6884_v39 }
 0x54c   :  { %8478 = vmatpush1.bf16.msra.mxu0 %v13584_v42  ;;  %v15035_v42 = vld [vmem:[#allocation14 + $0x1e8] ss:$16 sps:$4 sm:$0xff]  }
 0x54d   :  { %8479 = vmatprep.subr.bf16.mxu0 %v13593_v34  ;;  %v6892_v34 = vld [vmem:[#allocation17 + $0x68] sm:$0xff] }
 0x54e   :  { %v13515_v47 = vcombine.high %v6888_v45, %v6892_v34 }
 0x550   :  { %8480 = vmatpush1.bf16.msra.mxu0 %v13592_v46  ;;  %v13506_v46 = vcombine.low %v6880_v9, %v6884_v39  ;;  %v6964_v9 = vld [vmem:[#allocation17 + $0x2a8] sm:$0xff] }
 0x551   :  { %8481 = vmatprep.subr.bf16.mxu0 %v13601_v49  ;;  %v6900_v49 = vld [vmem:[#allocation17 + $0xa8] sm:$0xff] }
 0x552   :  { %v13523_v50 = vcombine.high %v6896_v19, %v6900_v49  ;;  %v13522_v56 = vcombine.low %v6896_v19, %v6900_v49  ;;  %v6980_v19 = vld [vmem:[#allocation17 + $0x328] sm:$0xff] }
 0x554   :  { %8482 = vmatpush1.bf16.msra.mxu0 %v13600_v4  ;;  %v13514_v4 = vcombine.low %v6888_v45, %v6892_v34  ;;  %v6972_v45 = vld [vmem:[#allocation17 + $0x2e8] sm:$0xff] }
 0x555   :  { %8483 = vmatprep.subr.bf16.mxu0 %v13609_v51  ;;  %v6908_v51 = vld [vmem:[#allocation17 + $0xe8] sm:$0xff] }
 0x558   :  { %8484 = vmatpush1.bf16.msra.mxu0 %v13608_v52  ;;  %v13531_v52 = vcombine.high %v6904_v48, %v6908_v51 }
 0x5f6   :  { %v6374_v55 = vpop.f32.mrb[12].mxu0 }
 0x5f7   :  { %v14284_v13 = vadd.f32 %v6374_v55, %v5972_v53  ;;  %v6376_v58 = vpop.f32.mrb[13].mxu0  ;;  %v6912_v53 = vld [vmem:[#allocation17 + $0x108] sm:$0xff]  ;;  %v13530_v55 = vcombine.low %v6904_v48, %v6908_v51 }
 0x5f8   :  { %v14285_v59 = vadd.f32 %v6376_v58, %v5976_v54  ;;  %v6378_v60 = vpop.f32.mrb[14].mxu0  ;;  %v6916_v54 = vld [vmem:[#allocation17 + $0x128] sm:$0xff] }
 0x5f9   :  { %v6379_v61 = vpop.f32.mrb[15].mxu0  ;;  %v15762_v63 = vpack.c.bf16 %v14284_v13, %v14284_v13  ;;  %v13539_v13 = vcombine.high %v6912_v53, %v6916_v54  ;;  %v6920_v58 = vld [vmem:[#allocation17 + $0x148] sm:$0xff]  ;;  %v13538_v60 = vcombine.low %v6912_v53, %v6916_v54 }
 0x5fa   :  { %v6382_v62 = vpack.c.bf16 %v14285_v59, %v14285_v59  ;;  %v6924_v59 = vld [vmem:[#allocation17 + $0x168] sm:$0xff] }
 0x5fb   :  { %v13547_v61 = vcombine.high %v6920_v58, %v6924_v59  ;;  %v6988_v48 = vld [vmem:[#allocation17 + $0x368] sm:$0xff] }
 0x5fc   :  { %6821 = vmatprep.mubr.bf16.mxu1 %v6382_v62  ;;  %v6996_v53 = vld [vmem:[#allocation17 + $0x3a8] sm:$0xff] }
 0x5fd   :  { %6822 = vmatmul.mubr.bf16.vlgmr.msra.gmra.mrb[12].mxu1 %v15762_v63 }
 0x5fe   :  { %6831 = vmatpush1.bf16.msra.mxu1 %v14990_v8  ;;  %6862 = vmatprep.mubr.bf16.mxu1 %v6382_v62  ;;  %v6928_v62 = vld [vmem:[#allocation17 + $0x188] sm:$0xff] }
 0x5ff   :  { %6832 = vmatprep.subr.bf16.mxu1 %v14995_v0  ;;  %v6932_v8 = vld [vmem:[#allocation17 + $0x1a8] sm:$0xff]  ;;  %v6991_v0 = vld [vmem:[#allocation17 + $0x380] sm:$0xff] }
 0x602   :  { %6833 = vmatpush1.bf16.msra.mxu1 %v14993_v2  ;;  %v6995_v2 = vld [vmem:[#allocation17 + $0x3a0] sm:$0xff] }
 0x603   :  { %6834 = vmatprep.subr.bf16.mxu1 %v14998_v3  ;;  %v13555_v3 = vcombine.high %v6928_v62, %v6932_v8 }
 0x606   :  { %6835 = vmatpush1.bf16.msra.mxu1 %v14996_v10  ;;  %v13617_v10 = vcombine.high %v6991_v0, %v6995_v2 }
 0x607   :  { %6836 = vmatprep.subr.bf16.mxu1 %v15001_v11  ;;  %v6936_v11 = vld [vmem:[#allocation17 + $0x1c8] sm:$0xff] }
 0x608   :  { %8485 = vmatprep.subr.bf16.mxu0 %v13617_v10 }
 0x60a   :  { %6837 = vmatpush1.bf16.msra.mxu1 %v14999_v14  ;;  %v6940_v14 = vld [vmem:[#allocation17 + $0x1e8] sm:$0xff] }
 0x60b   :  { %6838 = vmatprep.subr.bf16.mxu1 %v15004_v16  ;;  %v13616_v16 = vcombine.low %v6991_v0, %v6995_v2 }
 0x60d   :  { %8486 = vmatpush1.bf16.msra.mxu0 %v13616_v16 }
 0x60e   :  { %6839 = vmatpush1.bf16.msra.mxu1 %v15002_v17  ;;  %v13554_v17 = vcombine.low %v6928_v62, %v6932_v8  ;;  %v15782_v8 = vld [vmem:[#allocation16] sm:$0xf] }
 0x60f   :  { %6840 = vmatprep.subr.bf16.mxu1 %v15007_v20  ;;  %v6999_v20 = vld [vmem:[#allocation17 + $0x3c0] sm:$0xff]  ;;  %v6456_v0 = vrot.slane %v15782_v8, %v15698_v15 }
 0x612   :  { %6841 = vmatpush1.bf16.msra.mxu1 %v15005_v21  ;;  %v7003_v21 = vld [vmem:[#allocation17 + $0x3e0] sm:$0xff] }
 0x613   :  { %6842 = vmatprep.subr.bf16.mxu1 %v15010_v57  ;;  %v13563_v57 = vcombine.high %v6936_v11, %v6940_v14 }
 0x616   :  { %6843 = vmatpush1.bf16.msra.mxu1 %v15008_v22  ;;  %v13625_v22 = vcombine.high %v6999_v20, %v7003_v21 }
 0x617   :  { %6844 = vmatprep.subr.bf16.mxu1 %v15013_v24  ;;  %v6944_v24 = vld [vmem:[#allocation17 + $0x208] sm:$0xff] }
 0x618   :  { %8487 = vmatprep.subr.bf16.mxu0 %v13625_v22  ;;  %v7016_v22 = vld [vmem:[#allocation17 + $0x448] sm:$0xff] }
 0x61a   :  { %6845 = vmatpush1.bf16.msra.mxu1 %v15011_v26  ;;  %v6948_v26 = vld [vmem:[#allocation17 + $0x228] sm:$0xff] }
 0x61b   :  { %6846 = vmatprep.subr.bf16.mxu1 %v15016_v12  ;;  %v13624_v12 = vcombine.low %v6999_v20, %v7003_v21  ;;  %v7015_v20 = vld [vmem:[#allocation17 + $0x440] sm:$0xff] }
 0x61d   :  { %8488 = vmatpush1.bf16.msra.mxu0 %v13624_v12 }
 0x61e   :  { %6847 = vmatpush1.bf16.msra.mxu1 %v15014_v27  ;;  %v13562_v27 = vcombine.low %v6936_v11, %v6940_v14 }
 0x61f   :  { %6848 = vmatprep.subr.bf16.mxu1 %v15019_v28  ;;  %v15766_v28 = vld [vmem:[#allocation17 + $0x400] sm:$0xff] }
 0x622   :  { %6849 = vmatpush1.bf16.msra.mxu1 %v15017_v31  ;;  %v15768_v31 = vld [vmem:[#allocation17 + $0x420] sm:$0xff] }
 0x623   :  { %6850 = vmatprep.subr.bf16.mxu1 %v15022_v32  ;;  %v15770_v32 = vld [vmem:[#allocation17 + $0x408] sm:$0xff] }
 0x626   :  { %6851 = vmatpush1.bf16.msra.mxu1 %v15020_v33  ;;  %v13571_v33 = vcombine.high %v6944_v24, %v6948_v26 }
 0x627   :  { %6852 = vmatprep.subr.bf16.mxu1 %v15025_v36  ;;  %v13633_v36 = vcombine.high %v15766_v28, %v15768_v31 }
 0x629   :  { %8498 = vmatprep.subr.bf16.mxu0 %v13633_v36  ;;  %v7023_v36 = vld [vmem:[#allocation17 + $0x480] sm:$0xff] }
 0x62a   :  { %6853 = vmatpush1.bf16.msra.mxu1 %v15023_v25  ;;  %v15774_v25 = vld [vmem:[#allocation17 + $0x428] sm:$0xff] }
 0x62b   :  { %6854 = vmatprep.subr.bf16.mxu1 %v15028_v18  ;;  %v6952_v18 = vld [vmem:[#allocation17 + $0x248] sm:$0xff]  ;;  %v13635_v62 = vcombine.high %v15770_v32, %v15774_v25 }
 0x62e   :  { %6855 = vmatpush1.bf16.msra.mxu1 %v15026_v23  ;;  %v6956_v23 = vld [vmem:[#allocation17 + $0x268] sm:$0xff] }
 0x62f   :  { %6856 = vmatprep.subr.bf16.mxu1 %v15031_v37  ;;  %v13632_v37 = vcombine.low %v15766_v28, %v15768_v31  ;;  %v13578_v39 = vcombine.low %v6952_v18, %v6956_v23 }
 0x632   :  { %6857 = vmatpush1.bf16.msra.mxu1 %v15029_v38  ;;  %v13634_v38 = vcombine.low %v15770_v32, %v15774_v25  ;;  %v7039_v32 = vld [vmem:[#allocation17 + $0x500] sm:$0xff] }
 0x633   :  { %6858 = vmatprep.subr.bf16.mxu1 %v15034_v1  ;;  %v13570_v1 = vcombine.low %v6944_v24, %v6948_v26  ;;  %v7020_v24 = vld [vmem:[#allocation17 + $0x468] sm:$0xff]  ;;  %v7043_v25 = vld [vmem:[#allocation17 + $0x520] sm:$0xff] }
 0x636   :  { %6859 = vmatpush1.bf16.msra.mxu1 %v15032_v40  ;;  %v13579_v40 = vcombine.high %v6952_v18, %v6956_v23  ;;  %v7027_v18 = vld [vmem:[#allocation17 + $0x4a0] sm:$0xff]  ;;  %v7024_v23 = vld [vmem:[#allocation17 + $0x488] sm:$0xff] }
 0x637   :  { %6860 = vmatprep.subr.bf16.mxu1 %v15037_v41  ;;  %v6960_v41 = vld [vmem:[#allocation17 + $0x288] sm:$0xff] }
 0x638   :  { %v13586_v34 = vcombine.low %v6960_v41, %v6964_v9 }
 0x63a   :  { %6861 = vmatpush1.bf16.msra.mxu1 %v15035_v42  ;;  %v13587_v42 = vcombine.high %v6960_v41, %v6964_v9  ;;  %v13642_v41 = vcombine.low %v7016_v22, %v7020_v24  ;;  %v13649_v9 = vcombine.high %v7023_v36, %v7027_v18 }
 0x63b   :  { %8539 = vmatprep.subr.bf16.mxu1 %v13507_v43  ;;  %v6968_v43 = vld [vmem:[#allocation17 + $0x2c8] sm:$0xff] }
 0x63c   :  { %v13594_v49 = vcombine.low %v6968_v43, %v6972_v45 }
 0x63d   :  { %6863 = vmatmul.mubr.bf16.vlgmr.msra.gmra.mrb[16].mxu1 %v15762_v63  ;;  %v13546_v63 = vcombine.low %v6920_v58, %v6924_v59  ;;  %v7004_v58 = vld [vmem:[#allocation17 + $0x3e8] sm:$0xff] }
 0x63e   :  { %8540 = vmatpush1.bf16.msra.mxu1 %v13506_v46  ;;  %v13595_v46 = vcombine.high %v6968_v43, %v6972_v45  ;;  %v7035_v43 = vld [vmem:[#allocation17 + $0x4e0] sm:$0xff]  ;;  %v7032_v45 = vld [vmem:[#allocation17 + $0x4c8] sm:$0xff] }
 0x63f   :  { %8541 = vmatprep.subr.bf16.mxu1 %v13515_v47  ;;  %v6976_v47 = vld [vmem:[#allocation17 + $0x308] sm:$0xff] }
 0x640   :  { %v13602_v51 = vcombine.low %v6976_v47, %v6980_v19 }
 0x642   :  { %8542 = vmatpush1.bf16.msra.mxu1 %v13514_v4  ;;  %v13603_v4 = vcombine.high %v6976_v47, %v6980_v19 }
 0x643   :  { %8543 = vmatprep.subr.bf16.mxu1 %v13523_v50  ;;  %v6984_v50 = vld [vmem:[#allocation17 + $0x348] sm:$0xff] }
 0x644   :  { %v13610_v54 = vcombine.low %v6984_v50, %v6988_v48 }
 0x646   :  { %8544 = vmatpush1.bf16.msra.mxu1 %v13522_v56  ;;  %v13611_v56 = vcombine.high %v6984_v50, %v6988_v48  ;;  %v7047_v48 = vld [vmem:[#allocation17 + $0x540] sm:$0xff] }
 0x647   :  { %8545 = vmatprep.subr.bf16.mxu1 %v13531_v52  ;;  %v6992_v52 = vld [vmem:[#allocation17 + $0x388] sm:$0xff] }
 0x648   :  { %v13618_v59 = vcombine.low %v6992_v52, %v6996_v53 }
 0x64a   :  { %8546 = vmatpush1.bf16.msra.mxu1 %v13530_v55  ;;  %v13619_v55 = vcombine.high %v6992_v52, %v6996_v53  ;;  %v7052_v52 = vld [vmem:[#allocation17 + $0x568] sm:$0xff]  ;;  %v13664_v53 = vcombine.low %v7039_v32, %v7043_v25 }
 0x64b   :  { %8547 = vmatprep.subr.bf16.mxu1 %v13539_v13  ;;  %v7000_v13 = vld [vmem:[#allocation17 + $0x3c8] sm:$0xff] }
 0x64e   :  { %8548 = vmatpush1.bf16.msra.mxu1 %v13538_v60  ;;  %v13627_v60 = vcombine.high %v7000_v13, %v7004_v58 }
 0x64f   :  { %8549 = vmatprep.subr.bf16.mxu1 %v13547_v61  ;;  %v13626_v61 = vcombine.low %v7000_v13, %v7004_v58  ;;  %v7055_v58 = vld [vmem:[#allocation17 + $0x580] sm:$0xff] }
 0x652   :  { %8550 = vmatpush1.bf16.msra.mxu1 %v13546_v63  ;;  %v6452_v63 = vrot.slane %v15782_v8, %v15708_v30 }
 0x653   :  { %8551 = vmatprep.subr.bf16.mxu1 %v13555_v3 }
 0x656   :  { %8552 = vmatpush1.bf16.msra.mxu1 %v13554_v17 }
 0x657   :  { %8553 = vmatprep.subr.bf16.mxu1 %v13563_v57  ;;  %v7019_v57 = vld [vmem:[#allocation17 + $0x460] sm:$0xff] }
 0x65a   :  { %8554 = vmatpush1.bf16.msra.mxu1 %v13562_v27  ;;  %v13641_v27 = vcombine.high %v7015_v20, %v7019_v57 }
 0x65b   :  { %8555 = vmatprep.subr.bf16.mxu1 %v13571_v33  ;;  %v13643_v33 = vcombine.high %v7016_v22, %v7020_v24  ;;  %v7075_v22 = vld [vmem:[#allocation17 + $0x620] sm:$0xff]  ;;  %v7072_v24 = vld [vmem:[#allocation17 + $0x608] sm:$0xff] }
 0x65e   :  { %8556 = vmatpush1.bf16.msra.mxu1 %v13570_v1  ;;  %v7028_v1 = vld [vmem:[#allocation17 + $0x4a8] sm:$0xff] }
 0x65f   :  { %8557 = vmatprep.subr.bf16.mxu1 %v13579_v40  ;;  %v13640_v40 = vcombine.low %v7015_v20, %v7019_v57  ;;  %v13650_v47 = vcombine.low %v7024_v23, %v7028_v1  ;;  %v7071_v57 = vld [vmem:[#allocation17 + $0x600] sm:$0xff] }
 0x662   :  { %8558 = vmatpush1.bf16.msra.mxu1 %v13578_v39  ;;  %v13651_v39 = vcombine.high %v7024_v23, %v7028_v1  ;;  %v7079_v1 = vld [vmem:[#allocation17 + $0x640] sm:$0xff] }
 0x663   :  { %8559 = vmatprep.subr.bf16.mxu1 %v13587_v42  ;;  %v7031_v42 = vld [vmem:[#allocation17 + $0x4c0] sm:$0xff] }
 0x664   :  { %v13657_v28 = vcombine.high %v7031_v42, %v7035_v43  ;;  %v13656_v19 = vcombine.low %v7031_v42, %v7035_v43 }
 0x666   :  { %8560 = vmatpush1.bf16.msra.mxu1 %v13586_v34  ;;  %v7036_v34 = vld [vmem:[#allocation17 + $0x4e8] sm:$0xff] }
 0x667   :  { %8561 = vmatprep.subr.bf16.mxu1 %v13595_v46  ;;  %v13648_v46 = vcombine.low %v7023_v36, %v7027_v18  ;;  %v13659_v31 = vcombine.high %v7032_v45, %v7036_v34  ;;  %v13697_v18 = vcombine.high %v7071_v57, %v7075_v22 }
 0x66a   :  { %8562 = vmatpush1.bf16.msra.mxu1 %v13594_v49  ;;  %v13658_v49 = vcombine.low %v7032_v45, %v7036_v34  ;;  %v7087_v34 = vld [vmem:[#allocation17 + $0x680] sm:$0xff] }
 0x66b   :  { %8563 = vmatprep.subr.bf16.mxu1 %v13603_v4  ;;  %v13665_v4 = vcombine.high %v7039_v32, %v7043_v25 }
 0x66e   :  { %8564 = vmatpush1.bf16.msra.mxu1 %v13602_v51  ;;  %v7051_v51 = vld [vmem:[#allocation17 + $0x560] sm:$0xff] }
 0x66f   :  { %8565 = vmatprep.subr.bf16.mxu1 %v13611_v56  ;;  %v7048_v56 = vld [vmem:[#allocation17 + $0x548] sm:$0xff] }
 0x670   :  { %v13675_v13 = vcombine.high %v7048_v56, %v7052_v52 }
 0x672   :  { %8566 = vmatpush1.bf16.msra.mxu1 %v13610_v54 }
 0x673   :  { %8567 = vmatprep.subr.bf16.mxu1 %v13619_v55  ;;  %v13673_v55 = vcombine.high %v7047_v48, %v7051_v51 }
 0x676   :  { %8568 = vmatpush1.bf16.msra.mxu1 %v13618_v59  ;;  %v7059_v59 = vld [vmem:[#allocation17 + $0x5a0] sm:$0xff] }
 0x677   :  { %8569 = vmatprep.subr.bf16.mxu1 %v13627_v60  ;;  %v7056_v60 = vld [vmem:[#allocation17 + $0x588] sm:$0xff] }
 0x67a   :  { %8570 = vmatpush1.bf16.msra.mxu1 %v13626_v61  ;;  %v7060_v61 = vld [vmem:[#allocation17 + $0x5a8] sm:$0xff] }
 0x67b   :  { %8580 = vmatprep.subr.bf16.mxu1 %v13635_v62  ;;  %v13672_v62 = vcombine.low %v7047_v48, %v7051_v51 }
 0x6d0   :  { %v6823_v2 = vpop.f32.mrb[12].mxu1 }
 0x6d1   :  { %v6824_v3 = vadd.f32 %v6823_v2, %v6452_v63  ;;  %v6825_v10 = vpop.f32.mrb[13].mxu1  ;;  %v13674_v63 = vcombine.low %v7048_v56, %v7052_v52  ;;  %v13683_v2 = vcombine.high %v7056_v60, %v7060_v61  ;;  %v7103_v52 = vld [vmem:[#allocation17 + $0x700] sm:$0xff] }
 0x6d2   :  { %v6826_v11 = vadd.f32 %v6825_v10, %v6456_v0  ;;  %v6827_v14 = vpop.f32.mrb[14].mxu1  ;;  %v13681_v0 = vcombine.high %v7055_v58, %v7059_v59  ;;  %v7067_v10 = vld [vmem:[#allocation17 + $0x5e0] sm:$0xff] }
 0x6d3   :  { %v6871_v16 = vmax.f32 %v6824_v3, 0.0  ;;  %v6828_v17 = vpop.f32.mrb[15].mxu1  ;;  %v7063_v3 = vld [vmem:[#allocation17 + $0x5c0] sm:$0xff]  ;;  %v7068_v14 = vld [vmem:[#allocation17 + $0x5e8] sm:$0xff] }
 0x6d4   :  { %v6872_v21 = vmax.f32 %v6826_v11, 0.0  ;;  %v7064_v11 = vld [vmem:[#allocation17 + $0x5c8] sm:$0xff]  ;;  %v13682_v17 = vcombine.low %v7056_v60, %v7060_v61  ;;  %v13689_v20 = vcombine.high %v7063_v3, %v7067_v10  ;;  %v7111_v61 = vld [vmem:[#allocation17 + $0x740] sm:$0xff] }
 0x6d5   :  { %v15790_v12 = vpack.c.bf16 %v6871_v16, %v6871_v16  ;;  %v13680_v16 = vcombine.low %v7055_v58, %v7059_v59  ;;  %v13690_v36 = vcombine.low %v7064_v11, %v7068_v14 }
 0x6d6   :  { %v15788_v26 = vpack.c.bf16 %v6872_v21, %v6872_v21  ;;  %v13691_v21 = vcombine.high %v7064_v11, %v7068_v14  ;;  %v7119_v14 = vld [vmem:[#allocation17 + $0x780] sm:$0xff] }
 0x6d8   :  { %8489 = vmatprep.mubr.bf16.mxu0 %v15788_v26  ;;  %8571 = vmatprep.mubr.bf16.mxu1 %v15788_v26 }
 0x6d9   :  { %8490 = vmatmul.mubr.bf16.vlgmr.msra.gmra.mrb[16].mxu0 %v15790_v12  ;;  %8572 = vmatmul.mubr.bf16.vlgmr.msra.gmra.mrb[20].mxu1 %v15790_v12 }
 0x6da   :  { %8499 = vmatpush1.bf16.msra.mxu0 %v13632_v37  ;;  %8581 = vmatpush1.bf16.msra.mxu1 %v13634_v38  ;;  %v7040_v37 = vld [vmem:[#allocation17 + $0x508] sm:$0xff] }
 0x6db   :  { %8500 = vmatprep.subr.bf16.mxu0 %v13641_v27  ;;  %8582 = vmatprep.subr.bf16.mxu1 %v13643_v33  ;;  %v7044_v38 = vld [vmem:[#allocation17 + $0x528] sm:$0xff]  ;;  %v13688_v33 = vcombine.low %v7063_v3, %v7067_v10 }
 0x6dc   :  { %v13667_v50 = vcombine.high %v7040_v37, %v7044_v38  ;;  %v13666_v54 = vcombine.low %v7040_v37, %v7044_v38  ;;  %v7076_v27 = vld [vmem:[#allocation17 + $0x628] sm:$0xff]  ;;  %v7095_v38 = vld [vmem:[#allocation17 + $0x6c0] sm:$0xff] }
 0x6dd   :  { %v13699_v23 = vcombine.high %v7072_v24, %v7076_v27  ;;  %v13698_v42 = vcombine.low %v7072_v24, %v7076_v27  ;;  %v7127_v27 = vld [vmem:[#allocation17 + $0x7c0] sm:$0xff] }
 0x6de   :  { %8501 = vmatpush1.bf16.msra.mxu0 %v13640_v40  ;;  %8583 = vmatpush1.bf16.msra.mxu1 %v13642_v41  ;;  %v7083_v40 = vld [vmem:[#allocation17 + $0x660] sm:$0xff]  ;;  %v7080_v41 = vld [vmem:[#allocation17 + $0x648] sm:$0xff] }
 0x6df   :  { %8502 = vmatprep.subr.bf16.mxu0 %v13649_v9  ;;  %8584 = vmatprep.subr.bf16.mxu1 %v13651_v39  ;;  %v7084_v9 = vld [vmem:[#allocation17 + $0x668] sm:$0xff]  ;;  %v13696_v39 = vcombine.low %v7071_v57, %v7075_v22  ;;  %v13705_v43 = vcombine.high %v7079_v1, %v7083_v40 }
 0x6e0   :  { %v13707_v45 = vcombine.high %v7080_v41, %v7084_v9  ;;  %v13706_v32 = vcombine.low %v7080_v41, %v7084_v9 }
 0x6e2   :  { %8503 = vmatpush1.bf16.msra.mxu0 %v13648_v46  ;;  %8585 = vmatpush1.bf16.msra.mxu1 %v13650_v47  ;;  %v7091_v46 = vld [vmem:[#allocation17 + $0x6a0] sm:$0xff]  ;;  %v7088_v47 = vld [vmem:[#allocation17 + $0x688] sm:$0xff] }
 0x6e3   :  { %8504 = vmatprep.subr.bf16.mxu0 %v13657_v28  ;;  %8586 = vmatprep.subr.bf16.mxu1 %v13659_v31  ;;  %v7092_v28 = vld [vmem:[#allocation17 + $0x6a8] sm:$0xff]  ;;  %v13704_v31 = vcombine.low %v7079_v1, %v7083_v40  ;;  %v13713_v25 = vcombine.high %v7087_v34, %v7091_v46  ;;  %v6464_v1 = vrot.slane %v15782_v8, %v15711_v35 }
 0x6e4   :  { %v13715_v37 = vcombine.high %v7088_v47, %v7092_v28  ;;  %v13714_v48 = vcombine.low %v7088_v47, %v7092_v28 }
 0x6e6   :  { %8505 = vmatpush1.bf16.msra.mxu0 %v13656_v19  ;;  %8587 = vmatpush1.bf16.msra.mxu1 %v13658_v49  ;;  %v7099_v19 = vld [vmem:[#allocation17 + $0x6e0] sm:$0xff]  ;;  %v7096_v49 = vld [vmem:[#allocation17 + $0x6c8] sm:$0xff] }
 0x6e7   :  { %8506 = vmatprep.subr.bf16.mxu0 %v13665_v4  ;;  %8588 = vmatprep.subr.bf16.mxu1 %v13667_v50  ;;  %v7100_v4 = vld [vmem:[#allocation17 + $0x6e8] sm:$0xff]  ;;  %v13712_v50 = vcombine.low %v7087_v34, %v7091_v46  ;;  %v13721_v51 = vcombine.high %v7095_v38, %v7099_v19  ;;  %v6882_v34 = vld [vmem:[#allocation17 + $0x18] sm:$0xff] }
 0x6e8   :  { %v13723_v56 = vcombine.high %v7096_v49, %v7100_v4  ;;  %v13722_v58 = vcombine.low %v7096_v49, %v7100_v4  ;;  %v6886_v46 = vld [vmem:[#allocation17 + $0x38] sm:$0xff] }
 0x6e9   :  { %v13511_v49 = vcombine.high %v6882_v34, %v6886_v46 }
 0x6ea   :  { %8507 = vmatpush1.bf16.msra.mxu0 %v13664_v53  ;;  %8589 = vmatpush1.bf16.msra.mxu1 %v13666_v54  ;;  %v7107_v53 = vld [vmem:[#allocation17 + $0x720] sm:$0xff]  ;;  %v7104_v54 = vld [vmem:[#allocation17 + $0x708] sm:$0xff] }
 0x6eb   :  { %8508 = vmatprep.subr.bf16.mxu0 %v13673_v55  ;;  %8590 = vmatprep.subr.bf16.mxu1 %v13675_v13  ;;  %v7108_v55 = vld [vmem:[#allocation17 + $0x728] sm:$0xff]  ;;  %v13720_v13 = vcombine.low %v7095_v38, %v7099_v19  ;;  %v13729_v59 = vcombine.high %v7103_v52, %v7107_v53 }
 0x6ec   :  { %v13731_v60 = vcombine.high %v7104_v54, %v7108_v55  ;;  %v13730_v3 = vcombine.low %v7104_v54, %v7108_v55  ;;  %v13510_v55 = vcombine.low %v6882_v34, %v6886_v46  ;;  %v6929_v34 = vld [vmem:[#allocation17 + $0x190] sm:$0xff] }
 0x6ed   :  { %v6933_v46 = vld [vmem:[#allocation17 + $0x1b0] sm:$0xff] }
 0x6ee   :  { %8509 = vmatpush1.bf16.msra.mxu0 %v13672_v62  ;;  %8591 = vmatpush1.bf16.msra.mxu1 %v13674_v63  ;;  %v7115_v62 = vld [vmem:[#allocation17 + $0x760] sm:$0xff]  ;;  %v7112_v63 = vld [vmem:[#allocation17 + $0x748] sm:$0xff] }
 0x6ef   :  { %8510 = vmatprep.subr.bf16.mxu0 %v13681_v0  ;;  %8592 = vmatprep.subr.bf16.mxu1 %v13683_v2  ;;  %v7116_v0 = vld [vmem:[#allocation17 + $0x768] sm:$0xff]  ;;  %v13728_v2 = vcombine.low %v7103_v52, %v7107_v53  ;;  %v13737_v10 = vcombine.high %v7111_v61, %v7115_v62 }
 0x6f0   :  { %v13739_v11 = vcombine.high %v7112_v63, %v7116_v0  ;;  %v13738_v57 = vcombine.low %v7112_v63, %v7116_v0 }
 0x6f2   :  { %8511 = vmatpush1.bf16.msra.mxu0 %v13680_v16  ;;  %8593 = vmatpush1.bf16.msra.mxu1 %v13682_v17  ;;  %v7123_v16 = vld [vmem:[#allocation17 + $0x7a0] sm:$0xff]  ;;  %v7120_v17 = vld [vmem:[#allocation17 + $0x788] sm:$0xff] }
 0x6f3   :  { %8512 = vmatprep.subr.bf16.mxu0 %v13689_v20  ;;  %8594 = vmatprep.subr.bf16.mxu1 %v13691_v21  ;;  %v7124_v20 = vld [vmem:[#allocation17 + $0x7a8] sm:$0xff]  ;;  %v13736_v21 = vcombine.low %v7111_v61, %v7115_v62  ;;  %v13745_v22 = vcombine.high %v7119_v14, %v7123_v16  ;;  %v13744_v40 = vcombine.low %v7119_v14, %v7123_v16  ;;  %v6898_v61 = vld [vmem:[#allocation17 + $0x98] sm:$0xff] }
 0x6f4   :  { %v13747_v24 = vcombine.high %v7120_v17, %v7124_v20  ;;  %v13746_v41 = vcombine.low %v7120_v17, %v7124_v20  ;;  %v6902_v62 = vld [vmem:[#allocation17 + $0xb8] sm:$0xff] }
 0x6f5   :  { %v6906_v14 = vld [vmem:[#allocation17 + $0xd8] sm:$0xff]  ;;  %v13526_v20 = vcombine.low %v6898_v61, %v6902_v62 }
 0x6f6   :  { %8513 = vmatpush1.bf16.msra.mxu0 %v13688_v33  ;;  %8595 = vmatpush1.bf16.msra.mxu1 %v13690_v36  ;;  %v7131_v33 = vld [vmem:[#allocation17 + $0x7e0] sm:$0xff]  ;;  %v7128_v36 = vld [vmem:[#allocation17 + $0x7c8] sm:$0xff]  ;;  %v6910_v16 = vld [vmem:[#allocation17 + $0xf8] sm:$0xff] }
 0x6f7   :  { %8514 = vmatprep.subr.bf16.mxu0 %v13697_v18  ;;  %8596 = vmatprep.subr.bf16.mxu1 %v13699_v23  ;;  %v7132_v18 = vld [vmem:[#allocation17 + $0x7e8] sm:$0xff]  ;;  %v6460_v23 = vrot.slane %v15782_v8, %v15720_v44  ;;  %v13753_v9 = vcombine.high %v7127_v27, %v7131_v33 }
 0x6fa   :  { %8515 = vmatpush1.bf16.msra.mxu0 %v13696_v39  ;;  %8597 = vmatpush1.bf16.msra.mxu1 %v13698_v42  ;;  %v13755_v39 = vcombine.high %v7128_v36, %v7132_v18  ;;  %v6881_v42 = vld [vmem:[#allocation17 + $0x10] sm:$0xff] }
 0x6fb   :  { %8516 = vmatprep.subr.bf16.mxu0 %v13705_v43  ;;  %8598 = vmatprep.subr.bf16.mxu1 %v13707_v45  ;;  %v6885_v45 = vld [vmem:[#allocation17 + $0x30] sm:$0xff] }
 0x6fc   :  { %v13509_v19 = vcombine.high %v6881_v42, %v6885_v45  ;;  %v13508_v53 = vcombine.low %v6881_v42, %v6885_v45 }
 0x6fe   :  { %8517 = vmatpush1.bf16.msra.mxu0 %v13704_v31  ;;  %8599 = vmatpush1.bf16.msra.mxu1 %v13706_v32 }
 0x6ff   :  { %8518 = vmatprep.subr.bf16.mxu0 %v13713_v25  ;;  %8600 = vmatprep.subr.bf16.mxu1 %v13715_v37  ;;  %v13752_v25 = vcombine.low %v7127_v27, %v7131_v33  ;;  %v13754_v37 = vcombine.low %v7128_v36, %v7132_v18  ;;  %v6918_v27 = vld [vmem:[#allocation17 + $0x138] sm:$0xff]  ;;  %v13534_v36 = vcombine.low %v6906_v14, %v6910_v16 }
 0x702   :  { %8519 = vmatpush1.bf16.msra.mxu0 %v13712_v50  ;;  %8601 = vmatpush1.bf16.msra.mxu1 %v13714_v48  ;;  %v6889_v50 = vld [vmem:[#allocation17 + $0x50] sm:$0xff] }
 0x703   :  { %8520 = vmatprep.subr.bf16.mxu0 %v13721_v51  ;;  %8602 = vmatprep.subr.bf16.mxu1 %v13723_v56  ;;  %v6893_v48 = vld [vmem:[#allocation17 + $0x70] sm:$0xff]  ;;  %v6890_v51 = vld [vmem:[#allocation17 + $0x58] sm:$0xff] }
 0x704   :  { %v6894_v56 = vld [vmem:[#allocation17 + $0x78] sm:$0xff]  ;;  %v13516_v63 = vcombine.low %v6889_v50, %v6893_v48 }
 0x705   :  { %v13518_v0 = vcombine.low %v6890_v51, %v6894_v56 }
 0x706   :  { %8521 = vmatpush1.bf16.msra.mxu0 %v13720_v13  ;;  %8603 = vmatpush1.bf16.msra.mxu1 %v13722_v58  ;;  %v13517_v13 = vcombine.high %v6889_v50, %v6893_v48  ;;  %v13519_v58 = vcombine.high %v6890_v51, %v6894_v56  ;;  %v6945_v56 = vld [vmem:[#allocation17 + $0x210] sm:$0xff] }
 0x707   :  { %8522 = vmatprep.subr.bf16.mxu0 %v13729_v59  ;;  %8604 = vmatprep.subr.bf16.mxu1 %v13731_v60  ;;  %v6897_v59 = vld [vmem:[#allocation17 + $0x90] sm:$0xff] }
 0x708   :  { %v6901_v60 = vld [vmem:[#allocation17 + $0xb0] sm:$0xff] }
 0x709   :  { %v13524_v17 = vcombine.low %v6897_v59, %v6901_v60 }
 0x70a   :  { %8523 = vmatpush1.bf16.msra.mxu0 %v13728_v2  ;;  %8605 = vmatpush1.bf16.msra.mxu1 %v13730_v3  ;;  %v13525_v2 = vcombine.high %v6897_v59, %v6901_v60  ;;  %v13527_v3 = vcombine.high %v6898_v61, %v6902_v62  ;;  %v6953_v62 = vld [vmem:[#allocation17 + $0x250] sm:$0xff] }
 0x70b   :  { %8524 = vmatprep.subr.bf16.mxu0 %v13737_v10  ;;  %8606 = vmatprep.subr.bf16.mxu1 %v13739_v11  ;;  %v6905_v10 = vld [vmem:[#allocation17 + $0xd0] sm:$0xff] }
 0x70c   :  { %v6909_v11 = vld [vmem:[#allocation17 + $0xf0] sm:$0xff] }
 0x70d   :  { %v13532_v33 = vcombine.low %v6905_v10, %v6909_v11 }
 0x70e   :  { %8525 = vmatpush1.bf16.msra.mxu0 %v13736_v21  ;;  %8607 = vmatpush1.bf16.msra.mxu1 %v13738_v57  ;;  %v13533_v21 = vcombine.high %v6905_v10, %v6909_v11  ;;  %v13535_v57 = vcombine.high %v6906_v14, %v6910_v16  ;;  %v6961_v16 = vld [vmem:[#allocation17 + $0x290] sm:$0xff] }
 0x70f   :  { %8526 = vmatprep.subr.bf16.mxu0 %v13745_v22  ;;  %8608 = vmatprep.subr.bf16.mxu1 %v13747_v24  ;;  %v6913_v22 = vld [vmem:[#allocation17 + $0x110] sm:$0xff] }
 0x710   :  { %v6864_v43 = vpop.f32.mrb[16].mxu1  ;;  %v6917_v24 = vld [vmem:[#allocation17 + $0x130] sm:$0xff] }
 0x711   :  { %v6865_v47 = vadd.f32 %v6864_v43, %v6460_v23  ;;  %v6866_v28 = vpop.f32.mrb[17].mxu1  ;;  %v13541_v18 = vcombine.high %v6913_v22, %v6917_v24 }
 0x712   :  { %v6867_v31 = vadd.f32 %v6866_v28, %v6464_v1  ;;  %v6868_v32 = vpop.f32.mrb[18].mxu1  ;;  %8527 = vmatpush1.bf16.msra.mxu0 %v13744_v40  ;;  %8609 = vmatpush1.bf16.msra.mxu1 %v13746_v41  ;;  %v6921_v1 = vld [vmem:[#allocation17 + $0x150] sm:$0xff]  ;;  %v6922_v41 = vld [vmem:[#allocation17 + $0x158] sm:$0xff] }
 0x713   :  { %v6873_v8 = vmax.f32 %v6865_v47, 0.0  ;;  %v6869_v38 = vpop.f32.mrb[19].mxu1  ;;  %8528 = vmatprep.subr.bf16.mxu0 %v13753_v9  ;;  %8610 = vmatprep.subr.bf16.mxu1 %v13755_v39  ;;  %v6925_v40 = vld [vmem:[#allocation17 + $0x170] sm:$0xff]  ;;  %v6926_v9 = vld [vmem:[#allocation17 + $0x178] sm:$0xff]  ;;  %v13540_v39 = vcombine.low %v6913_v22, %v6917_v24 }
 0x714   :  { %v6874_v4 = vmax.f32 %v6867_v31, 0.0  ;;  %v13549_v43 = vcombine.high %v6921_v1, %v6925_v40  ;;  %v13551_v45 = vcombine.high %v6922_v41, %v6926_v9  ;;  %v6930_v47 = vld [vmem:[#allocation17 + $0x198] sm:$0xff]  ;;  %v13548_v31 = vcombine.low %v6921_v1, %v6925_v40  ;;  %v6941_v38 = vld [vmem:[#allocation17 + $0x1f0] sm:$0xff] }
 0x715   :  { %v15808_v54 = vpack.c.bf16 %v6873_v8, %v6873_v8  ;;  %v6934_v28 = vld [vmem:[#allocation17 + $0x1b8] sm:$0xff]  ;;  %v13550_v32 = vcombine.low %v6922_v41, %v6926_v9  ;;  %v6937_v8 = vld [vmem:[#allocation17 + $0x1d0] sm:$0xff] }
 0x716   :  { %v15806_v52 = vpack.c.bf16 %v6874_v4, %v6874_v4  ;;  %8529 = vmatpush1.bf16.msra.mxu0 %v13752_v25  ;;  %8611 = vmatpush1.bf16.msra.mxu1 %v13754_v37  ;;  %v13557_v25 = vcombine.high %v6929_v34, %v6933_v46  ;;  %v13559_v37 = vcombine.high %v6930_v47, %v6934_v28  ;;  %v6977_v9 = vld [vmem:[#allocation17 + $0x310] sm:$0xff] }
 0x717   :  { %8621 = vmatprep.subr.bf16.mxu0 %v13509_v19  ;;  %8703 = vmatprep.subr.bf16.mxu1 %v13511_v49  ;;  %v6938_v19 = vld [vmem:[#allocation17 + $0x1d8] sm:$0xff]  ;;  %v13556_v4 = vcombine.low %v6929_v34, %v6933_v46  ;;  %v13558_v50 = vcombine.low %v6930_v47, %v6934_v28  ;;  %v13565_v48 = vcombine.high %v6937_v8, %v6941_v38  ;;  %v6985_v28 = vld [vmem:[#allocation17 + $0x350] sm:$0xff] }
 0x718   :  { %8530 = vmatprep.mubr.bf16.mxu0 %v15806_v52  ;;  %8612 = vmatprep.mubr.bf16.mxu1 %v15806_v52  ;;  %v6942_v49 = vld [vmem:[#allocation17 + $0x1f8] sm:$0xff] }
 0x719   :  { %8531 = vmatmul.mubr.bf16.vlgmr.msra.gmra.mrb[16].mxu0 %v15808_v54  ;;  %8613 = vmatmul.mubr.bf16.vlgmr.msra.gmra.mrb[20].mxu1 %v15808_v54  ;;  %v13567_v51 = vcombine.high %v6938_v19, %v6942_v49  ;;  %v13566_v59 = vcombine.low %v6938_v19, %v6942_v49  ;;  %v6993_v49 = vld [vmem:[#allocation17 + $0x390] sm:$0xff] }
 0x71a   :  { %8622 = vmatpush1.bf16.msra.mxu0 %v13508_v53  ;;  %8653 = vmatprep.mubr.bf16.mxu0 %v15788_v26  ;;  %v6949_v53 = vld [vmem:[#allocation17 + $0x230] sm:$0xff] }
 0x71b   :  { %8704 = vmatpush1.bf16.msra.mxu1 %v13510_v55  ;;  %8735 = vmatprep.mubr.bf16.mxu1 %v15788_v26  ;;  %v6914_v26 = vld [vmem:[#allocation17 + $0x118] sm:$0xff]  ;;  %v13573_v60 = vcombine.high %v6945_v56, %v6949_v53 }
 0x71c   :  { %8623 = vmatprep.subr.bf16.mxu0 %v13517_v13  ;;  %8705 = vmatprep.subr.bf16.mxu1 %v13519_v58  ;;  %v13543_v23 = vcombine.high %v6914_v26, %v6918_v27  ;;  %v13542_v42 = vcombine.low %v6914_v26, %v6918_v27  ;;  %v6946_v55 = vld [vmem:[#allocation17 + $0x218] sm:$0xff]  ;;  %v13564_v58 = vcombine.low %v6937_v8, %v6941_v38  ;;  %v6969_v27 = vld [vmem:[#allocation17 + $0x2d0] sm:$0xff] }
 0x71d   :  { %v6950_v13 = vld [vmem:[#allocation17 + $0x238] sm:$0xff] }
 0x71e   :  { %8624 = vmatpush1.bf16.msra.mxu0 %v13516_v63  ;;  %v13575_v61 = vcombine.high %v6946_v55, %v6950_v13  ;;  %v6957_v63 = vld [vmem:[#allocation17 + $0x270] sm:$0xff]  ;;  %v13574_v10 = vcombine.low %v6946_v55, %v6950_v13 }
 0x71f   :  { %8706 = vmatpush1.bf16.msra.mxu1 %v13518_v0  ;;  %8625 = vmatprep.subr.bf16.mxu0 %v13525_v2  ;;  %v6954_v0 = vld [vmem:[#allocation17 + $0x258] sm:$0xff]  ;;  %v13581_v11 = vcombine.high %v6953_v62, %v6957_v63  ;;  %v7001_v13 = vld [vmem:[#allocation17 + $0x3d0] sm:$0xff] }
 0x720   :  { %8707 = vmatprep.subr.bf16.mxu1 %v13527_v3  ;;  %v6958_v2 = vld [vmem:[#allocation17 + $0x278] sm:$0xff]  ;;  %v13572_v3 = vcombine.low %v6945_v56, %v6949_v53 }
 0x721   :  { %v13583_v14 = vcombine.high %v6954_v0, %v6958_v2  ;;  %v13582_v22 = vcombine.low %v6954_v0, %v6958_v2  ;;  %v7009_v2 = vld [vmem:[#allocation17 + $0x410] sm:$0xff] }
 0x722   :  { %8626 = vmatpush1.bf16.msra.mxu0 %v13524_v17  ;;  %v6965_v17 = vld [vmem:[#allocation17 + $0x2b0] sm:$0xff] }
 0x723   :  { %8708 = vmatpush1.bf16.msra.mxu1 %v13526_v20  ;;  %8627 = vmatprep.subr.bf16.mxu0 %v13533_v21  ;;  %v6962_v20 = vld [vmem:[#allocation17 + $0x298] sm:$0xff]  ;;  %v13589_v24 = vcombine.high %v6961_v16, %v6965_v17 }
 0x724   :  { %8709 = vmatprep.subr.bf16.mxu1 %v13535_v57  ;;  %v6966_v21 = vld [vmem:[#allocation17 + $0x2b8] sm:$0xff]  ;;  %v13580_v57 = vcombine.low %v6953_v62, %v6957_v63 }
 0x725   :  { %v13591_v26 = vcombine.high %v6962_v20, %v6966_v21  ;;  %v13590_v1 = vcombine.low %v6962_v20, %v6966_v21  ;;  %v7017_v21 = vld [vmem:[#allocation17 + $0x450] sm:$0xff] }
 0x726   :  { %8628 = vmatpush1.bf16.msra.mxu0 %v13532_v33  ;;  %v6973_v33 = vld [vmem:[#allocation17 + $0x2f0] sm:$0xff] }
 0x727   :  { %8710 = vmatpush1.bf16.msra.mxu1 %v13534_v36  ;;  %8629 = vmatprep.subr.bf16.mxu0 %v13541_v18  ;;  %v6970_v36 = vld [vmem:[#allocation17 + $0x2d8] sm:$0xff]  ;;  %v13597_v40 = vcombine.high %v6969_v27, %v6973_v33 }
 0x728   :  { %8711 = vmatprep.subr.bf16.mxu1 %v13543_v23  ;;  %v6974_v18 = vld [vmem:[#allocation17 + $0x2f8] sm:$0xff]  ;;  %v13588_v23 = vcombine.low %v6961_v16, %v6965_v17 }
 0x729   :  { %v13599_v41 = vcombine.high %v6970_v36, %v6974_v18  ;;  %v13598_v34 = vcombine.low %v6970_v36, %v6974_v18  ;;  %v7025_v36 = vld [vmem:[#allocation17 + $0x490] sm:$0xff] }
 0x72a   :  { %8630 = vmatpush1.bf16.msra.mxu0 %v13540_v39  ;;  %v6981_v39 = vld [vmem:[#allocation17 + $0x330] sm:$0xff] }
 0x72b   :  { %8712 = vmatpush1.bf16.msra.mxu1 %v13542_v42  ;;  %8631 = vmatprep.subr.bf16.mxu0 %v13549_v43  ;;  %v6978_v42 = vld [vmem:[#allocation17 + $0x318] sm:$0xff]  ;;  %v13605_v46 = vcombine.high %v6977_v9, %v6981_v39  ;;  %v7029_v18 = vld [vmem:[#allocation17 + $0x4b0] sm:$0xff] }
 0x72c   :  { %8713 = vmatprep.subr.bf16.mxu1 %v13551_v45  ;;  %v6982_v43 = vld [vmem:[#allocation17 + $0x338] sm:$0xff]  ;;  %v13596_v45 = vcombine.low %v6969_v27, %v6973_v33 }
 0x72d   :  { %v13607_v47 = vcombine.high %v6978_v42, %v6982_v43  ;;  %v13606_v8 = vcombine.low %v6978_v42, %v6982_v43  ;;  %v7033_v43 = vld [vmem:[#allocation17 + $0x4d0] sm:$0xff] }
 0x72e   :  { %8632 = vmatpush1.bf16.msra.mxu0 %v13548_v31  ;;  %v6989_v31 = vld [vmem:[#allocation17 + $0x370] sm:$0xff] }
 0x72f   :  { %8714 = vmatpush1.bf16.msra.mxu1 %v13550_v32  ;;  %8633 = vmatprep.subr.bf16.mxu0 %v13557_v25  ;;  %v6986_v32 = vld [vmem:[#allocation17 + $0x358] sm:$0xff]  ;;  %v13613_v38 = vcombine.high %v6985_v28, %v6989_v31 }
 0x730   :  { %8715 = vmatprep.subr.bf16.mxu1 %v13559_v37  ;;  %v6990_v25 = vld [vmem:[#allocation17 + $0x378] sm:$0xff]  ;;  %v13604_v37 = vcombine.low %v6977_v9, %v6981_v39  ;;  %v13653_v39 = vcombine.high %v7025_v36, %v7029_v18 }
 0x731   :  { %v13615_v19 = vcombine.high %v6986_v32, %v6990_v25  ;;  %v13614_v56 = vcombine.low %v6986_v32, %v6990_v25  ;;  %v7041_v32 = vld [vmem:[#allocation17 + $0x510] sm:$0xff] }
 0x732   :  { %8634 = vmatpush1.bf16.msra.mxu0 %v13556_v4  ;;  %v6997_v4 = vld [vmem:[#allocation17 + $0x3b0] sm:$0xff] }
 0x733   :  { %8716 = vmatpush1.bf16.msra.mxu1 %v13558_v50  ;;  %8635 = vmatprep.subr.bf16.mxu0 %v13565_v48  ;;  %v6994_v50 = vld [vmem:[#allocation17 + $0x398] sm:$0xff]  ;;  %v13621_v53 = vcombine.high %v6993_v49, %v6997_v4  ;;  %v7045_v25 = vld [vmem:[#allocation17 + $0x530] sm:$0xff] }
 0x734   :  { %8717 = vmatprep.subr.bf16.mxu1 %v13567_v51  ;;  %v6998_v48 = vld [vmem:[#allocation17 + $0x3b8] sm:$0xff]  ;;  %v13612_v51 = vcombine.low %v6985_v28, %v6989_v31 }
 0x735   :  { %v13623_v55 = vcombine.high %v6994_v50, %v6998_v48  ;;  %v13622_v62 = vcombine.low %v6994_v50, %v6998_v48  ;;  %v7053_v50 = vld [vmem:[#allocation17 + $0x570] sm:$0xff]  ;;  %v7050_v48 = vld [vmem:[#allocation17 + $0x558] sm:$0xff] }
 0x736   :  { %8636 = vmatpush1.bf16.msra.mxu0 %v13564_v58  ;;  %v7005_v58 = vld [vmem:[#allocation17 + $0x3f0] sm:$0xff] }
 0x737   :  { %8718 = vmatpush1.bf16.msra.mxu1 %v13566_v59  ;;  %8637 = vmatprep.subr.bf16.mxu0 %v13573_v60  ;;  %v7002_v59 = vld [vmem:[#allocation17 + $0x3d8] sm:$0xff]  ;;  %v13629_v63 = vcombine.high %v7001_v13, %v7005_v58 }
 0x738   :  { %8719 = vmatprep.subr.bf16.mxu1 %v13575_v61  ;;  %v7006_v60 = vld [vmem:[#allocation17 + $0x3f8] sm:$0xff]  ;;  %v13620_v61 = vcombine.low %v6993_v49, %v6997_v4  ;;  %v7049_v4 = vld [vmem:[#allocation17 + $0x550] sm:$0xff] }
 0x739   :  { %v13631_v0 = vcombine.high %v7002_v59, %v7006_v60  ;;  %v13630_v16 = vcombine.low %v7002_v59, %v7006_v60  ;;  %v7061_v59 = vld [vmem:[#allocation17 + $0x5b0] sm:$0xff]  ;;  %v7058_v60 = vld [vmem:[#allocation17 + $0x598] sm:$0xff] }
 0x73a   :  { %8638 = vmatpush1.bf16.msra.mxu0 %v13572_v3  ;;  %v7013_v3 = vld [vmem:[#allocation17 + $0x430] sm:$0xff] }
 0x73b   :  { %8720 = vmatpush1.bf16.msra.mxu1 %v13574_v10  ;;  %8639 = vmatprep.subr.bf16.mxu0 %v13581_v11  ;;  %v7010_v10 = vld [vmem:[#allocation17 + $0x418] sm:$0xff]  ;;  %v13637_v17 = vcombine.high %v7009_v2, %v7013_v3 }
 0x73c   :  { %8721 = vmatprep.subr.bf16.mxu1 %v13583_v14  ;;  %v7014_v11 = vld [vmem:[#allocation17 + $0x438] sm:$0xff]  ;;  %v13628_v14 = vcombine.low %v7001_v13, %v7005_v58  ;;  %v7057_v58 = vld [vmem:[#allocation17 + $0x590] sm:$0xff] }
 0x73d   :  { %v13639_v20 = vcombine.high %v7010_v10, %v7014_v11  ;;  %v13638_v27 = vcombine.low %v7010_v10, %v7014_v11  ;;  %v7069_v10 = vld [vmem:[#allocation17 + $0x5f0] sm:$0xff]  ;;  %v7066_v11 = vld [vmem:[#allocation17 + $0x5d8] sm:$0xff] }
 0x73e   :  { %8640 = vmatpush1.bf16.msra.mxu0 %v13580_v57  ;;  %v7021_v57 = vld [vmem:[#allocation17 + $0x470] sm:$0xff] }
 0x73f   :  { %8722 = vmatpush1.bf16.msra.mxu1 %v13582_v22  ;;  %8641 = vmatprep.subr.bf16.mxu0 %v13589_v24  ;;  %v13636_v22 = vcombine.low %v7009_v2, %v7013_v3  ;;  %v7018_v24 = vld [vmem:[#allocation17 + $0x458] sm:$0xff]  ;;  %v13645_v33 = vcombine.high %v7017_v21, %v7021_v57  ;;  %v7065_v3 = vld [vmem:[#allocation17 + $0x5d0] sm:$0xff] }
 0x740   :  { %8723 = vmatprep.subr.bf16.mxu1 %v13591_v26  ;;  %v7022_v26 = vld [vmem:[#allocation17 + $0x478] sm:$0xff] }
 0x741   :  { %v13646_v9 = vcombine.low %v7018_v24, %v7022_v26 }
 0x742   :  { %8642 = vmatpush1.bf16.msra.mxu0 %v13588_v23  ;;  %v13647_v23 = vcombine.high %v7018_v24, %v7022_v26  ;;  %v7074_v24 = vld [vmem:[#allocation17 + $0x618] sm:$0xff] }
 0x743   :  { %8724 = vmatpush1.bf16.msra.mxu1 %v13590_v1  ;;  %8643 = vmatprep.subr.bf16.mxu0 %v13597_v40  ;;  %v7026_v1 = vld [vmem:[#allocation17 + $0x498] sm:$0xff] }
 0x744   :  { %8725 = vmatprep.subr.bf16.mxu1 %v13599_v41  ;;  %v7030_v40 = vld [vmem:[#allocation17 + $0x4b8] sm:$0xff]  ;;  %v13644_v41 = vcombine.low %v7017_v21, %v7021_v57  ;;  %v7073_v57 = vld [vmem:[#allocation17 + $0x610] sm:$0xff] }
 0x745   :  { %v13655_v42 = vcombine.high %v7026_v1, %v7030_v40  ;;  %v7078_v26 = vld [vmem:[#allocation17 + $0x638] sm:$0xff] }
 0x746   :  { %8644 = vmatpush1.bf16.msra.mxu0 %v13596_v45  ;;  %v7037_v45 = vld [vmem:[#allocation17 + $0x4f0] sm:$0xff] }
 0x747   :  { %8726 = vmatpush1.bf16.msra.mxu1 %v13598_v34  ;;  %8645 = vmatprep.subr.bf16.mxu0 %v13605_v46  ;;  %v7034_v34 = vld [vmem:[#allocation17 + $0x4d8] sm:$0xff]  ;;  %v13661_v28 = vcombine.high %v7033_v43, %v7037_v45 }
 0x748   :  { %8727 = vmatprep.subr.bf16.mxu1 %v13607_v47  ;;  %v7038_v46 = vld [vmem:[#allocation17 + $0x4f8] sm:$0xff]  ;;  %v13652_v47 = vcombine.low %v7025_v36, %v7029_v18  ;;  %v13703_v18 = vcombine.high %v7074_v24, %v7078_v26 }
 0x749   :  { %v13663_v31 = vcombine.high %v7034_v34, %v7038_v46 }
 0x74a   :  { %8646 = vmatpush1.bf16.msra.mxu0 %v13604_v37  ;;  %v7042_v37 = vld [vmem:[#allocation17 + $0x518] sm:$0xff] }
 0x74b   :  { %8728 = vmatpush1.bf16.msra.mxu1 %v13606_v8  ;;  %8647 = vmatprep.subr.bf16.mxu0 %v13613_v38  ;;  %v7046_v8 = vld [vmem:[#allocation17 + $0x538] sm:$0xff]  ;;  %v13662_v38 = vcombine.low %v7034_v34, %v7038_v46  ;;  %v7093_v34 = vld [vmem:[#allocation17 + $0x6b0] sm:$0xff] }
 0x74c   :  { %8729 = vmatprep.subr.bf16.mxu1 %v13615_v19  ;;  %v13669_v19 = vcombine.high %v7041_v32, %v7045_v25  ;;  %v13671_v49 = vcombine.high %v7042_v37, %v7046_v8  ;;  %v7090_v46 = vld [vmem:[#allocation17 + $0x698] sm:$0xff] }
 0x74e   :  { %8648 = vmatpush1.bf16.msra.mxu0 %v13612_v51  ;;  %v7054_v51 = vld [vmem:[#allocation17 + $0x578] sm:$0xff] }
 0x74f   :  { %8730 = vmatpush1.bf16.msra.mxu1 %v13614_v56  ;;  %8649 = vmatprep.subr.bf16.mxu0 %v13621_v53  ;;  %v13668_v56 = vcombine.low %v7041_v32, %v7045_v25  ;;  %v13670_v53 = vcombine.low %v7042_v37, %v7046_v8  ;;  %v13679_v13 = vcombine.high %v7050_v48, %v7054_v51  ;;  %v7097_v25 = vld [vmem:[#allocation17 + $0x6d0] sm:$0xff]  ;;  %v7098_v8 = vld [vmem:[#allocation17 + $0x6d8] sm:$0xff] }
 0x750   :  { %8731 = vmatprep.subr.bf16.mxu1 %v13623_v55  ;;  %v13677_v55 = vcombine.high %v7049_v4, %v7053_v50  ;;  %v7101_v37 = vld [vmem:[#allocation17 + $0x6f0] sm:$0xff] }
 0x752   :  { %8650 = vmatpush1.bf16.msra.mxu0 %v13620_v61  ;;  %v7062_v61 = vld [vmem:[#allocation17 + $0x5b8] sm:$0xff] }
 0x753   :  { %8732 = vmatpush1.bf16.msra.mxu1 %v13622_v62  ;;  %8651 = vmatprep.subr.bf16.mxu0 %v13629_v63  ;;  %v13676_v62 = vcombine.low %v7049_v4, %v7053_v50  ;;  %v13678_v63 = vcombine.low %v7050_v48, %v7054_v51  ;;  %v13687_v2 = vcombine.high %v7058_v60, %v7062_v61  ;;  %v7105_v50 = vld [vmem:[#allocation17 + $0x710] sm:$0xff]  ;;  %v7106_v51 = vld [vmem:[#allocation17 + $0x718] sm:$0xff] }
 0x754   :  { %8733 = vmatprep.subr.bf16.mxu1 %v13631_v0  ;;  %v13685_v0 = vcombine.high %v7057_v58, %v7061_v59  ;;  %v7109_v48 = vld [vmem:[#allocation17 + $0x730] sm:$0xff] }
 0x756   :  { %8652 = vmatpush1.bf16.msra.mxu0 %v13628_v14  ;;  %v7070_v14 = vld [vmem:[#allocation17 + $0x5f8] sm:$0xff] }
 0x757   :  { %8734 = vmatpush1.bf16.msra.mxu1 %v13630_v16  ;;  %8662 = vmatprep.subr.bf16.mxu0 %v13637_v17  ;;  %v13684_v16 = vcombine.low %v7057_v58, %v7061_v59  ;;  %v13686_v17 = vcombine.low %v7058_v60, %v7062_v61  ;;  %v13695_v21 = vcombine.high %v7066_v11, %v7070_v14  ;;  %v7113_v59 = vld [vmem:[#allocation17 + $0x750] sm:$0xff]  ;;  %v7114_v61 = vld [vmem:[#allocation17 + $0x758] sm:$0xff] }
 0x758   :  { %8744 = vmatprep.subr.bf16.mxu1 %v13639_v20  ;;  %v13693_v20 = vcombine.high %v7065_v3, %v7069_v10  ;;  %v7117_v60 = vld [vmem:[#allocation17 + $0x770] sm:$0xff] }
 0x759   :  { %8654 = vmatmul.mubr.bf16.vlgmr.msra.gmra.mrb[20].mxu0 %v15790_v12 }
 0x75a   :  { %8736 = vmatmul.mubr.bf16.vlgmr.msra.gmra.mrb[24].mxu1 %v15790_v12  ;;  %8663 = vmatpush1.bf16.msra.mxu0 %v13636_v22  ;;  %v13654_v12 = vcombine.low %v7026_v1, %v7030_v40  ;;  %v7077_v22 = vld [vmem:[#allocation17 + $0x630] sm:$0xff]  ;;  %v7082_v40 = vld [vmem:[#allocation17 + $0x658] sm:$0xff] }
 0x75b   :  { %8694 = vmatprep.mubr.bf16.mxu0 %v15806_v52  ;;  %8745 = vmatpush1.bf16.msra.mxu1 %v13638_v27  ;;  %v13692_v27 = vcombine.low %v7065_v3, %v7069_v10  ;;  %v13701_v36 = vcombine.high %v7073_v57, %v7077_v22  ;;  %v7085_v1 = vld [vmem:[#allocation17 + $0x670] sm:$0xff] }
 0x75c   :  { %8776 = vmatprep.mubr.bf16.mxu1 %v15806_v52  ;;  %8664 = vmatprep.subr.bf16.mxu0 %v13645_v33  ;;  %v13660_v52 = vcombine.low %v7033_v43, %v7037_v45  ;;  %v13694_v33 = vcombine.low %v7066_v11, %v7070_v14  ;;  %v7089_v45 = vld [vmem:[#allocation17 + $0x690] sm:$0xff]  ;;  %v7122_v14 = vld [vmem:[#allocation17 + $0x798] sm:$0xff] }
 0x75d   :  { %8746 = vmatprep.subr.bf16.mxu1 %v13647_v23  ;;  %v7081_v23 = vld [vmem:[#allocation17 + $0x650] sm:$0xff] }
 0x75e   :  { %8665 = vmatpush1.bf16.msra.mxu0 %v13644_v41  ;;  %v7086_v41 = vld [vmem:[#allocation17 + $0x678] sm:$0xff]  ;;  %v7121_v10 = vld [vmem:[#allocation17 + $0x790] sm:$0xff] }
 0x75f   :  { %8747 = vmatpush1.bf16.msra.mxu1 %v13646_v9  ;;  %8666 = vmatprep.subr.bf16.mxu0 %v13653_v39  ;;  %v13700_v9 = vcombine.low %v7073_v57, %v7077_v22  ;;  %v13702_v39 = vcombine.low %v7074_v24, %v7078_v26  ;;  %v13711_v43 = vcombine.high %v7082_v40, %v7086_v41  ;;  %v7125_v11 = vld [vmem:[#allocation17 + $0x7b0] sm:$0xff]  ;;  %v7130_v26 = vld [vmem:[#allocation17 + $0x7d8] sm:$0xff] }
 0x760   :  { %8748 = vmatprep.subr.bf16.mxu1 %v13655_v42  ;;  %v13709_v42 = vcombine.high %v7081_v23, %v7085_v1  ;;  %v7129_v22 = vld [vmem:[#allocation17 + $0x7d0] sm:$0xff] }
 0x761   :  { %v7133_v24 = vld [vmem:[#allocation17 + $0x7f0] sm:$0xff] }
 0x762   :  { %8667 = vmatpush1.bf16.msra.mxu0 %v13652_v47  ;;  %v7094_v47 = vld [vmem:[#allocation17 + $0x6b8] sm:$0xff] }
 0x763   :  { %8749 = vmatpush1.bf16.msra.mxu1 %v13654_v12  ;;  %8668 = vmatprep.subr.bf16.mxu0 %v13661_v28  ;;  %v13708_v12 = vcombine.low %v7081_v23, %v7085_v1  ;;  %v13710_v28 = vcombine.low %v7082_v40, %v7086_v41  ;;  %v13719_v32 = vcombine.high %v7090_v46, %v7094_v47  ;;  %v8801_v1 = vld [vmem:[#allocation20] sm:$0xff]  ;;  %v8802_v41 = vld [vmem:[#allocation20 + $0x8] sm:$0xff] }
 0x764   :  { %8750 = vmatprep.subr.bf16.mxu1 %v13663_v31  ;;  %v13717_v31 = vcombine.high %v7089_v45, %v7093_v34  ;;  %v8805_v40 = vld [vmem:[#allocation20 + $0x20] sm:$0xff] }
 0x766   :  { %8669 = vmatpush1.bf16.msra.mxu0 %v13660_v52  ;;  %v7102_v52 = vld [vmem:[#allocation17 + $0x6f8] sm:$0xff] }
 0x767   :  { %8751 = vmatpush1.bf16.msra.mxu1 %v13662_v38  ;;  %8670 = vmatprep.subr.bf16.mxu0 %v13669_v19  ;;  %v13716_v38 = vcombine.low %v7089_v45, %v7093_v34  ;;  %v13718_v19 = vcombine.low %v7090_v46, %v7094_v47  ;;  %v13727_v4 = vcombine.high %v7098_v8, %v7102_v52  ;;  %v8809_v34 = vld [vmem:[#allocation20 + $0x40] sm:$0xff]  ;;  %v8810_v47 = vld [vmem:[#allocation20 + $0x48] sm:$0xff] }
 0x768   :  { %8752 = vmatprep.subr.bf16.mxu1 %v13671_v49  ;;  %v13725_v49 = vcombine.high %v7097_v25, %v7101_v37  ;;  %v8813_v46 = vld [vmem:[#allocation20 + $0x60] sm:$0xff] }
 0x76a   :  { %8671 = vmatpush1.bf16.msra.mxu0 %v13668_v56  ;;  %v7110_v56 = vld [vmem:[#allocation17 + $0x738] sm:$0xff] }
 0x76b   :  { %8753 = vmatpush1.bf16.msra.mxu1 %v13670_v53  ;;  %8672 = vmatprep.subr.bf16.mxu0 %v13677_v55  ;;  %v13724_v53 = vcombine.low %v7097_v25, %v7101_v37  ;;  %v13726_v55 = vcombine.low %v7098_v8, %v7102_v52  ;;  %v13735_v58 = vcombine.high %v7106_v51, %v7110_v56  ;;  %v8817_v37 = vld [vmem:[#allocation20 + $0x80] sm:$0xff]  ;;  %v8818_v52 = vld [vmem:[#allocation20 + $0x88] sm:$0xff] }
 0x76c   :  { %8754 = vmatprep.subr.bf16.mxu1 %v13679_v13  ;;  %v13733_v13 = vcombine.high %v7105_v50, %v7109_v48  ;;  %v8821_v8 = vld [vmem:[#allocation20 + $0xa0] sm:$0xff] }
 0x76e   :  { %8673 = vmatpush1.bf16.msra.mxu0 %v13676_v62  ;;  %v7118_v62 = vld [vmem:[#allocation17 + $0x778] sm:$0xff] }
 0x76f   :  { %8755 = vmatpush1.bf16.msra.mxu1 %v13678_v63  ;;  %8674 = vmatprep.subr.bf16.mxu0 %v13685_v0  ;;  %v13732_v63 = vcombine.low %v7105_v50, %v7109_v48  ;;  %v13734_v0 = vcombine.low %v7106_v51, %v7110_v56  ;;  %v13743_v3 = vcombine.high %v7114_v61, %v7118_v62  ;;  %v8825_v48 = vld [vmem:[#allocation20 + $0xc0] sm:$0xff]  ;;  %v8826_v56 = vld [vmem:[#allocation20 + $0xc8] sm:$0xff] }
 0x770   :  { %8756 = vmatprep.subr.bf16.mxu1 %v13687_v2  ;;  %v13741_v2 = vcombine.high %v7113_v59, %v7117_v60  ;;  %v8829_v51 = vld [vmem:[#allocation20 + $0xe0] sm:$0xff] }
 0x772   :  { %8675 = vmatpush1.bf16.msra.mxu0 %v13684_v16  ;;  %v7126_v16 = vld [vmem:[#allocation17 + $0x7b8] sm:$0xff] }
 0x773   :  { %8757 = vmatpush1.bf16.msra.mxu1 %v13686_v17  ;;  %8676 = vmatprep.subr.bf16.mxu0 %v13693_v20  ;;  %v13740_v17 = vcombine.low %v7113_v59, %v7117_v60  ;;  %v13742_v20 = vcombine.low %v7114_v61, %v7118_v62  ;;  %v13751_v57 = vcombine.high %v7122_v14, %v7126_v16  ;;  %v8833_v59 = vld [vmem:[#allocation20 + $0x100] sm:$0xff]  ;;  %v8834_v61 = vld [vmem:[#allocation20 + $0x108] sm:$0xff] }
 0x774   :  { %8758 = vmatprep.subr.bf16.mxu1 %v13695_v21  ;;  %v13749_v21 = vcombine.high %v7121_v10, %v7125_v11  ;;  %v8837_v60 = vld [vmem:[#allocation20 + $0x120] sm:$0xff]  ;;  %v8838_v62 = vld [vmem:[#allocation20 + $0x128] sm:$0xff] }
 0x776   :  { %8677 = vmatpush1.bf16.msra.mxu0 %v13692_v27  ;;  %v7134_v27 = vld [vmem:[#allocation17 + $0x7f8] sm:$0xff] }
 0x777   :  { %8759 = vmatpush1.bf16.msra.mxu1 %v13694_v33  ;;  %8678 = vmatprep.subr.bf16.mxu0 %v13701_v36  ;;  %v13748_v33 = vcombine.low %v7121_v10, %v7125_v11  ;;  %v13750_v36 = vcombine.low %v7122_v14, %v7126_v16  ;;  %v13759_v23 = vcombine.high %v7130_v26, %v7134_v27  ;;  %v8841_v10 = vld [vmem:[#allocation20 + $0x140] sm:$0xff]  ;;  %v8842_v14 = vld [vmem:[#allocation20 + $0x148] sm:$0xff] }
 0x778   :  { %8760 = vmatprep.subr.bf16.mxu1 %v13703_v18  ;;  %v13757_v18 = vcombine.high %v7129_v22, %v7133_v24  ;;  %v8845_v11 = vld [vmem:[#allocation20 + $0x160] sm:$0xff]  ;;  %v8846_v16 = vld [vmem:[#allocation20 + $0x168] sm:$0xff] }
 0x77a   :  { %8679 = vmatpush1.bf16.msra.mxu0 %v13700_v9  ;;  %v8806_v9 = vld [vmem:[#allocation20 + $0x28] sm:$0xff] }
 0x77b   :  { %8761 = vmatpush1.bf16.msra.mxu1 %v13702_v39  ;;  %8680 = vmatprep.subr.bf16.mxu0 %v13709_v42  ;;  %v13756_v39 = vcombine.low %v7129_v22, %v7133_v24  ;;  %v13758_v42 = vcombine.low %v7130_v26, %v7134_v27  ;;  %v13763_v45 = vcombine.high %v8802_v41, %v8806_v9  ;;  %v8849_v22 = vld [vmem:[#allocation20 + $0x180] sm:$0xff]  ;;  %v8850_v26 = vld [vmem:[#allocation20 + $0x188] sm:$0xff] }
 0x77c   :  { %8762 = vmatprep.subr.bf16.mxu1 %v13711_v43  ;;  %v13761_v43 = vcombine.high %v8801_v1, %v8805_v40  ;;  %v8853_v24 = vld [vmem:[#allocation20 + $0x1a0] sm:$0xff]  ;;  %v8854_v27 = vld [vmem:[#allocation20 + $0x1a8] sm:$0xff] }
 0x77e   :  { %8681 = vmatpush1.bf16.msra.mxu0 %v13708_v12  ;;  %v8814_v12 = vld [vmem:[#allocation20 + $0x68] sm:$0xff] }
 0x77f   :  { %8763 = vmatpush1.bf16.msra.mxu1 %v13710_v28  ;;  %8682 = vmatprep.subr.bf16.mxu0 %v13717_v31  ;;  %v13760_v28 = vcombine.low %v8801_v1, %v8805_v40  ;;  %v13762_v31 = vcombine.low %v8802_v41, %v8806_v9  ;;  %v13771_v25 = vcombine.high %v8810_v47, %v8814_v12  ;;  %v8857_v1 = vld [vmem:[#allocation20 + $0x1c0] sm:$0xff]  ;;  %v8858_v41 = vld [vmem:[#allocation20 + $0x1c8] sm:$0xff] }
 0x780   :  { %8764 = vmatprep.subr.bf16.mxu1 %v13719_v32  ;;  %v13769_v32 = vcombine.high %v8809_v34, %v8813_v46  ;;  %v8861_v40 = vld [vmem:[#allocation20 + $0x1e0] sm:$0xff]  ;;  %v8862_v9 = vld [vmem:[#allocation20 + $0x1e8] sm:$0xff] }
 0x782   :  { %8683 = vmatpush1.bf16.msra.mxu0 %v13716_v38  ;;  %v8822_v38 = vld [vmem:[#allocation20 + $0xa8] sm:$0xff] }
 0x783   :  { %8765 = vmatpush1.bf16.msra.mxu1 %v13718_v19  ;;  %8684 = vmatprep.subr.bf16.mxu0 %v13725_v49  ;;  %v13768_v19 = vcombine.low %v8809_v34, %v8813_v46  ;;  %v13770_v49 = vcombine.low %v8810_v47, %v8814_v12  ;;  %v13779_v50 = vcombine.high %v8818_v52, %v8822_v38  ;;  %v8865_v34 = vld [vmem:[#allocation20 + $0x200] sm:$0xff]  ;;  %v8866_v47 = vld [vmem:[#allocation20 + $0x208] sm:$0xff] }
 0x784   :  { %8766 = vmatprep.subr.bf16.mxu1 %v13727_v4  ;;  %v13777_v4 = vcombine.high %v8817_v37, %v8821_v8  ;;  %v8869_v46 = vld [vmem:[#allocation20 + $0x220] sm:$0xff]  ;;  %v8870_v12 = vld [vmem:[#allocation20 + $0x228] sm:$0xff] }
 0x786   :  { %8685 = vmatpush1.bf16.msra.mxu0 %v13724_v53  ;;  %v8830_v53 = vld [vmem:[#allocation20 + $0xe8] sm:$0xff] }
 0x787   :  { %8767 = vmatpush1.bf16.msra.mxu1 %v13726_v55  ;;  %8686 = vmatprep.subr.bf16.mxu0 %v13733_v13  ;;  %v13776_v55 = vcombine.low %v8817_v37, %v8821_v8  ;;  %v13778_v13 = vcombine.low %v8818_v52, %v8822_v38  ;;  %v8873_v37 = vld [vmem:[#allocation20 + $0x240] sm:$0xff]  ;;  %v8874_v52 = vld [vmem:[#allocation20 + $0x248] sm:$0xff] }
 0x788   :  { %8768 = vmatprep.subr.bf16.mxu1 %v13735_v58  ;;  %v13785_v58 = vcombine.high %v8825_v48, %v8829_v51  ;;  %v8877_v8 = vld [vmem:[#allocation20 + $0x260] sm:$0xff]  ;;  %v8878_v38 = vld [vmem:[#allocation20 + $0x268] sm:$0xff] }
 0x78a   :  { %8687 = vmatpush1.bf16.msra.mxu0 %v13732_v63  ;;  %v13784_v63 = vcombine.low %v8825_v48, %v8829_v51  ;;  %v8881_v48 = vld [vmem:[#allocation20 + $0x280] sm:$0xff] }
 0x78b   :  { %8769 = vmatpush1.bf16.msra.mxu1 %v13734_v0  ;;  %8688 = vmatprep.subr.bf16.mxu0 %v13741_v2  ;;  %v13786_v0 = vcombine.low %v8826_v56, %v8830_v53  ;;  %v13793_v2 = vcombine.high %v8833_v59, %v8837_v60  ;;  %v8885_v51 = vld [vmem:[#allocation20 + $0x2a0] sm:$0xff] }
 0x78c   :  { %8770 = vmatprep.subr.bf16.mxu1 %v13743_v3  ;;  %v13795_v3 = vcombine.high %v8834_v61, %v8838_v62 }
 0x78e   :  { %8689 = vmatpush1.bf16.msra.mxu0 %v13740_v17  ;;  %v13792_v17 = vcombine.low %v8833_v59, %v8837_v60  ;;  %v8889_v59 = vld [vmem:[#allocation20 + $0x2c0] sm:$0xff] }
 0x78f   :  { %8771 = vmatpush1.bf16.msra.mxu1 %v13742_v20  ;;  %8690 = vmatprep.subr.bf16.mxu0 %v13749_v21  ;;  %v13794_v20 = vcombine.low %v8834_v61, %v8838_v62  ;;  %v13801_v21 = vcombine.high %v8841_v10, %v8845_v11  ;;  %v8893_v60 = vld [vmem:[#allocation20 + $0x2e0] sm:$0xff]  ;;  %v8890_v61 = vld [vmem:[#allocation20 + $0x2c8] sm:$0xff] }
 0x790   :  { %8772 = vmatprep.subr.bf16.mxu1 %v13751_v57  ;;  %v13803_v57 = vcombine.high %v8842_v14, %v8846_v16  ;;  %v8894_v62 = vld [vmem:[#allocation20 + $0x2e8] sm:$0xff] }
 0x792   :  { %8691 = vmatpush1.bf16.msra.mxu0 %v13748_v33  ;;  %v13800_v33 = vcombine.low %v8841_v10, %v8845_v11  ;;  %v8897_v10 = vld [vmem:[#allocation20 + $0x300] sm:$0xff] }
 0x793   :  { %8773 = vmatpush1.bf16.msra.mxu1 %v13750_v36  ;;  %8692 = vmatprep.subr.bf16.mxu0 %v13757_v18  ;;  %v13802_v36 = vcombine.low %v8842_v14, %v8846_v16  ;;  %v13809_v18 = vcombine.high %v8849_v22, %v8853_v24  ;;  %v8901_v11 = vld [vmem:[#allocation20 + $0x320] sm:$0xff]  ;;  %v8898_v14 = vld [vmem:[#allocation20 + $0x308] sm:$0xff] }
 0x794   :  { %8774 = vmatprep.subr.bf16.mxu1 %v13759_v23  ;;  %v13811_v23 = vcombine.high %v8850_v26, %v8854_v27  ;;  %v8902_v16 = vld [vmem:[#allocation20 + $0x328] sm:$0xff] }
 0x796   :  { %8693 = vmatpush1.bf16.msra.mxu0 %v13756_v39  ;;  %v13808_v39 = vcombine.low %v8849_v22, %v8853_v24  ;;  %v8905_v22 = vld [vmem:[#allocation20 + $0x340] sm:$0xff] }
 0x797   :  { %8775 = vmatpush1.bf16.msra.mxu1 %v13758_v42  ;;  %11915 = vmatprep.subr.bf16.mxu0 %v13761_v43  ;;  %v13810_v42 = vcombine.low %v8850_v26, %v8854_v27  ;;  %v13817_v43 = vcombine.high %v8857_v1, %v8861_v40  ;;  %v8909_v24 = vld [vmem:[#allocation20 + $0x360] sm:$0xff]  ;;  %v8906_v26 = vld [vmem:[#allocation20 + $0x348] sm:$0xff] }
 0x798   :  { %12079 = vmatprep.subr.bf16.mxu1 %v13763_v45  ;;  %v13819_v45 = vcombine.high %v8858_v41, %v8862_v9  ;;  %v8910_v27 = vld [vmem:[#allocation20 + $0x368] sm:$0xff] }
 0x799   :  { %8695 = vmatmul.mubr.bf16.vlgmr.msra.gmra.mrb[20].mxu0 %v15808_v54 }
 0x79a   :  { %8777 = vmatmul.mubr.bf16.vlgmr.msra.gmra.mrb[24].mxu1 %v15808_v54  ;;  %11916 = vmatpush1.bf16.msra.mxu0 %v13760_v28  ;;  %v13787_v54 = vcombine.high %v8826_v56, %v8830_v53  ;;  %v13816_v28 = vcombine.low %v8857_v1, %v8861_v40  ;;  %v8882_v56 = vld [vmem:[#allocation20 + $0x288] sm:$0xff]  ;;  %v8913_v1 = vld [vmem:[#allocation20 + $0x380] sm:$0xff] }
 0x79b   :  { %12080 = vmatpush1.bf16.msra.mxu1 %v13762_v31  ;;  %11917 = vmatprep.subr.bf16.mxu0 %v13769_v32  ;;  %v13818_v31 = vcombine.low %v8858_v41, %v8862_v9  ;;  %v13825_v32 = vcombine.high %v8865_v34, %v8869_v46  ;;  %v8886_v53 = vld [vmem:[#allocation20 + $0x2a8] sm:$0xff]  ;;  %v8917_v40 = vld [vmem:[#allocation20 + $0x3a0] sm:$0xff] }
 0x79c   :  { %12081 = vmatprep.subr.bf16.mxu1 %v13771_v25  ;;  %v13827_v25 = vcombine.high %v8866_v47, %v8870_v12  ;;  %v8914_v41 = vld [vmem:[#allocation20 + $0x388] sm:$0xff] }
 0x79d   :  { %v8918_v9 = vld [vmem:[#allocation20 + $0x3a8] sm:$0xff] }
 0x79e   :  { %11918 = vmatpush1.bf16.msra.mxu0 %v13768_v19  ;;  %v13824_v19 = vcombine.low %v8865_v34, %v8869_v46  ;;  %v8921_v34 = vld [vmem:[#allocation20 + $0x3c0] sm:$0xff] }
 0x79f   :  { %12082 = vmatpush1.bf16.msra.mxu1 %v13770_v49  ;;  %11919 = vmatprep.subr.bf16.mxu0 %v13777_v4  ;;  %v13826_v49 = vcombine.low %v8866_v47, %v8870_v12  ;;  %v13833_v4 = vcombine.high %v8873_v37, %v8877_v8  ;;  %v8925_v46 = vld [vmem:[#allocation20 + $0x3e0] sm:$0xff]  ;;  %v8922_v47 = vld [vmem:[#allocation20 + $0x3c8] sm:$0xff] }
 0x7a0   :  { %12083 = vmatprep.subr.bf16.mxu1 %v13779_v50  ;;  %v13835_v50 = vcombine.high %v8874_v52, %v8878_v38  ;;  %v8926_v12 = vld [vmem:[#allocation20 + $0x3e8] sm:$0xff] }
 0x7a2   :  { %11920 = vmatpush1.bf16.msra.mxu0 %v13776_v55  ;;  %v13832_v55 = vcombine.low %v8873_v37, %v8877_v8  ;;  %v8929_v37 = vld [vmem:[#allocation20 + $0x400] sm:$0xff] }
 0x7a3   :  { %12084 = vmatpush1.bf16.msra.mxu1 %v13778_v13  ;;  %11921 = vmatprep.subr.bf16.mxu0 %v13785_v58  ;;  %v13834_v13 = vcombine.low %v8874_v52, %v8878_v38  ;;  %v13841_v58 = vcombine.high %v8881_v48, %v8885_v51  ;;  %v8933_v8 = vld [vmem:[#allocation20 + $0x420] sm:$0xff]  ;;  %v8930_v52 = vld [vmem:[#allocation20 + $0x408] sm:$0xff] }
 0x7a4   :  { %12085 = vmatprep.subr.bf16.mxu1 %v13787_v54  ;;  %v13843_v54 = vcombine.high %v8882_v56, %v8886_v53  ;;  %v8934_v38 = vld [vmem:[#allocation20 + $0x428] sm:$0xff] }
 0x7a6   :  { %11922 = vmatpush1.bf16.msra.mxu0 %v13784_v63  ;;  %v13840_v63 = vcombine.low %v8881_v48, %v8885_v51  ;;  %v15822_v48 = vld [vmem:[#allocation19] sm:$0xff] }
 0x7a7   :  { %12086 = vmatpush1.bf16.msra.mxu1 %v13786_v0  ;;  %11923 = vmatprep.subr.bf16.mxu0 %v13793_v2  ;;  %v13842_v0 = vcombine.low %v8882_v56, %v8886_v53  ;;  %v13849_v2 = vcombine.high %v8889_v59, %v8893_v60  ;;  %v7140_v51 = vrot.slane %v15822_v48, %v15708_v30 }
 0x7a8   :  { %12087 = vmatprep.subr.bf16.mxu1 %v13795_v3  ;;  %v13851_v3 = vcombine.high %v8890_v61, %v8894_v62  ;;  %v7144_v56 = vrot.slane %v15822_v48, %v15698_v15  ;;  %v7152_v53 = vrot.slane %v15822_v48, %v15711_v35 }
 0x7aa   :  { %11924 = vmatpush1.bf16.msra.mxu0 %v13792_v17  ;;  %v13848_v17 = vcombine.low %v8889_v59, %v8893_v60 }
 0x7ab   :  { %12088 = vmatpush1.bf16.msra.mxu1 %v13794_v20  ;;  %11925 = vmatprep.subr.bf16.mxu0 %v13801_v21  ;;  %v13850_v20 = vcombine.low %v8890_v61, %v8894_v62  ;;  %v13857_v21 = vcombine.high %v8897_v10, %v8901_v11 }
 0x7ac   :  { %12089 = vmatprep.subr.bf16.mxu1 %v13803_v57  ;;  %v13859_v57 = vcombine.high %v8898_v14, %v8902_v16 }
 0x7ae   :  { %11926 = vmatpush1.bf16.msra.mxu0 %v13800_v33  ;;  %v13856_v33 = vcombine.low %v8897_v10, %v8901_v11  ;;  %v8937_v11 = vld [vmem:[#allocation20 + $0x440] sm:$0xff] }
 0x7af   :  { %12090 = vmatpush1.bf16.msra.mxu1 %v13802_v36  ;;  %11927 = vmatprep.subr.bf16.mxu0 %v13809_v18  ;;  %v13858_v36 = vcombine.low %v8898_v14, %v8902_v16  ;;  %v13865_v18 = vcombine.high %v8905_v22, %v8909_v24  ;;  %v8941_v16 = vld [vmem:[#allocation20 + $0x460] sm:$0xff] }
 0x7b0   :  { %12091 = vmatprep.subr.bf16.mxu1 %v13811_v23  ;;  %v13867_v23 = vcombine.high %v8906_v26, %v8910_v27 }
 0x7b2   :  { %11928 = vmatpush1.bf16.msra.mxu0 %v13808_v39  ;;  %v13864_v39 = vcombine.low %v8905_v22, %v8909_v24  ;;  %v13890_v22 = vcombine.low %v8930_v52, %v8934_v38 }
 0x7b3   :  { %12092 = vmatpush1.bf16.msra.mxu1 %v13810_v42  ;;  %11929 = vmatprep.subr.bf16.mxu0 %v13817_v43  ;;  %v13866_v42 = vcombine.low %v8906_v26, %v8910_v27  ;;  %v13873_v43 = vcombine.high %v8913_v1, %v8917_v40  ;;  %v8945_v26 = vld [vmem:[#allocation20 + $0x480] sm:$0xff]  ;;  %v13897_v27 = vcombine.high %v8937_v11, %v8941_v16 }
 0x7b4   :  { %12093 = vmatprep.subr.bf16.mxu1 %v13819_v45  ;;  %v13875_v45 = vcombine.high %v8914_v41, %v8918_v9 }
 0x7b6   :  { %11930 = vmatpush1.bf16.msra.mxu0 %v13816_v28  ;;  %v13872_v28 = vcombine.low %v8913_v1, %v8917_v40  ;;  %v13896_v40 = vcombine.low %v8937_v11, %v8941_v16  ;;  %v8986_v11 = vld [vmem:[#allocation20 + $0x5c8] sm:$0xff] }
 0x7b7   :  { %12094 = vmatpush1.bf16.msra.mxu1 %v13818_v31  ;;  %11931 = vmatprep.subr.bf16.mxu0 %v13825_v32  ;;  %v13874_v31 = vcombine.low %v8914_v41, %v8918_v9  ;;  %v13881_v32 = vcombine.high %v8921_v34, %v8925_v46 }
 0x7b8   :  { %12095 = vmatprep.subr.bf16.mxu1 %v13827_v25  ;;  %v13883_v25 = vcombine.high %v8922_v47, %v8926_v12 }
 0x7ba   :  { %11932 = vmatpush1.bf16.msra.mxu0 %v13824_v19  ;;  %v13880_v19 = vcombine.low %v8921_v34, %v8925_v46  ;;  %v8958_v34 = vld [vmem:[#allocation20 + $0x4e8] sm:$0xff] }
 0x7bb   :  { %12096 = vmatpush1.bf16.msra.mxu1 %v13826_v49  ;;  %11933 = vmatprep.subr.bf16.mxu0 %v13833_v4  ;;  %v13882_v49 = vcombine.low %v8922_v47, %v8926_v12  ;;  %v13889_v4 = vcombine.high %v8929_v37, %v8933_v8 }
 0x7bc   :  { %12097 = vmatprep.subr.bf16.mxu1 %v13835_v50  ;;  %v13891_v50 = vcombine.high %v8930_v52, %v8934_v38 }
 0x7be   :  { %11934 = vmatpush1.bf16.msra.mxu0 %v13832_v55 }
 0x7bf   :  { %12098 = vmatpush1.bf16.msra.mxu1 %v13834_v13  ;;  %11935 = vmatprep.subr.bf16.mxu0 %v13841_v58 }
 0x7c0   :  { %12099 = vmatprep.subr.bf16.mxu1 %v13843_v54 }
 0x7c2   :  { %11936 = vmatpush1.bf16.msra.mxu0 %v13840_v63 }
 0x7c3   :  { %12100 = vmatpush1.bf16.msra.mxu1 %v13842_v0  ;;  %11937 = vmatprep.subr.bf16.mxu0 %v13849_v2 }
 0x7c4   :  { %12101 = vmatprep.subr.bf16.mxu1 %v13851_v3 }
 0x7c6   :  { %11938 = vmatpush1.bf16.msra.mxu0 %v13848_v17  ;;  %v8938_v17 = vld [vmem:[#allocation20 + $0x448] sm:$0xff] }
 0x7c7   :  { %12102 = vmatpush1.bf16.msra.mxu1 %v13850_v20  ;;  %11939 = vmatprep.subr.bf16.mxu0 %v13857_v21  ;;  %v8942_v20 = vld [vmem:[#allocation20 + $0x468] sm:$0xff] }
 0x7c8   :  { %12103 = vmatprep.subr.bf16.mxu1 %v13859_v57  ;;  %v13888_v57 = vcombine.low %v8929_v37, %v8933_v8  ;;  %v13898_v41 = vcombine.low %v8938_v17, %v8942_v20  ;;  %v8966_v37 = vld [vmem:[#allocation20 + $0x528] sm:$0xff] }
 0x7ca   :  { %11940 = vmatpush1.bf16.msra.mxu0 %v13856_v33  ;;  %v13899_v33 = vcombine.high %v8938_v17, %v8942_v20 }
 0x7cb   :  { %12104 = vmatpush1.bf16.msra.mxu1 %v13858_v36  ;;  %11941 = vmatprep.subr.bf16.mxu0 %v13865_v18  ;;  %v8949_v36 = vld [vmem:[#allocation20 + $0x4a0] sm:$0xff]  ;;  %v8946_v18 = vld [vmem:[#allocation20 + $0x488] sm:$0xff] }
 0x7cc   :  { %12105 = vmatprep.subr.bf16.mxu1 %v13867_v23  ;;  %v8950_v23 = vld [vmem:[#allocation20 + $0x4a8] sm:$0xff]  ;;  %v13905_v9 = vcombine.high %v8945_v26, %v8949_v36  ;;  %v13904_v46 = vcombine.low %v8945_v26, %v8949_v36  ;;  %v8997_v26 = vld [vmem:[#allocation20 + $0x620] sm:$0xff] }
 0x7cd   :  { %v13906_v47 = vcombine.low %v8946_v18, %v8950_v23 }
 0x7ce   :  { %11942 = vmatpush1.bf16.msra.mxu0 %v13864_v39  ;;  %v13907_v39 = vcombine.high %v8946_v18, %v8950_v23 }
 0x7cf   :  { %12106 = vmatpush1.bf16.msra.mxu1 %v13866_v42  ;;  %11943 = vmatprep.subr.bf16.mxu0 %v13873_v43  ;;  %v8953_v42 = vld [vmem:[#allocation20 + $0x4c0] sm:$0xff] }
 0x7d0   :  { %12107 = vmatprep.subr.bf16.mxu1 %v13875_v45  ;;  %v8957_v43 = vld [vmem:[#allocation20 + $0x4e0] sm:$0xff]  ;;  %v8954_v45 = vld [vmem:[#allocation20 + $0x4c8] sm:$0xff] }
 0x7d1   :  { %v13913_v12 = vcombine.high %v8953_v42, %v8957_v43  ;;  %v13912_v8 = vcombine.low %v8953_v42, %v8957_v43  ;;  %v13914_v52 = vcombine.low %v8954_v45, %v8958_v34  ;;  %v9006_v42 = vld [vmem:[#allocation20 + $0x668] sm:$0xff] }
 0x7d2   :  { %11944 = vmatpush1.bf16.msra.mxu0 %v13872_v28  ;;  %v13915_v28 = vcombine.high %v8954_v45, %v8958_v34 }
 0x7d3   :  { %12108 = vmatpush1.bf16.msra.mxu1 %v13874_v31  ;;  %11945 = vmatprep.subr.bf16.mxu0 %v13881_v32  ;;  %v8961_v31 = vld [vmem:[#allocation20 + $0x500] sm:$0xff] }
 0x7d4   :  { %12109 = vmatprep.subr.bf16.mxu1 %v13883_v25  ;;  %v8965_v32 = vld [vmem:[#allocation20 + $0x520] sm:$0xff]  ;;  %v8962_v25 = vld [vmem:[#allocation20 + $0x508] sm:$0xff] }
 0x7d5   :  { %v13921_v38 = vcombine.high %v8961_v31, %v8965_v32 }
 0x7d6   :  { %11946 = vmatpush1.bf16.msra.mxu0 %v13880_v19  ;;  %v13923_v19 = vcombine.high %v8962_v25, %v8966_v37 }
 0x7d7   :  { %12110 = vmatpush1.bf16.msra.mxu1 %v13882_v49  ;;  %11956 = vmatprep.subr.bf16.mxu0 %v13889_v4  ;;  %v8969_v49 = vld [vmem:[#allocation20 + $0x540] sm:$0xff] }
 0x7d8   :  { %12120 = vmatprep.subr.bf16.mxu1 %v13891_v50  ;;  %v8973_v4 = vld [vmem:[#allocation20 + $0x560] sm:$0xff]  ;;  %v8970_v50 = vld [vmem:[#allocation20 + $0x548] sm:$0xff] }
 0x7ec   :  { %v8532_v55 = vpop.f32.mrb[16].mxu0  ;;  %v15830_v13 = vpop.f32.mrb[20].mxu1 }
 0x7ed   :  { %v14286_v58 = vadd.f32 %v8532_v55, %v7140_v51  ;;  %v8534_v54 = vpop.f32.mrb[17].mxu0  ;;  %v8616_v59 = vpop.f32.mrb[21].mxu1  ;;  %v8974_v51 = vld [vmem:[#allocation20 + $0x568] sm:$0xff]  ;;  %v13929_v55 = vcombine.high %v8969_v49, %v8973_v4 }
 0x7ee   :  { %v14287_v60 = vadd.f32 %v8534_v54, %v7144_v56  ;;  %v14289_v61 = vadd.f32 %v8616_v59, %v7152_v53  ;;  %v8536_v62 = vpop.f32.mrb[18].mxu0  ;;  %v8618_v63 = vpop.f32.mrb[22].mxu1  ;;  %v13920_v56 = vcombine.low %v8961_v31, %v8965_v32  ;;  %v13922_v53 = vcombine.low %v8962_v25, %v8966_v37  ;;  %v8977_v54 = vld [vmem:[#allocation20 + $0x580] sm:$0xff]  ;;  %v9014_v31 = vld [vmem:[#allocation20 + $0x6a8] sm:$0xff] }
 0x7ef   :  { %v8785_v0 = vmax.f32 %v14286_v58, 0.0  ;;  %v8537_v2 = vpop.f32.mrb[19].mxu0  ;;  %v8619_v3 = vpop.f32.mrb[23].mxu1  ;;  %v13931_v58 = vcombine.high %v8970_v50, %v8974_v51  ;;  %v8981_v59 = vld [vmem:[#allocation20 + $0x5a0] sm:$0xff]  ;;  %v13928_v62 = vcombine.low %v8969_v49, %v8973_v4  ;;  %v13930_v63 = vcombine.low %v8970_v50, %v8974_v51  ;;  %v9022_v49 = vld [vmem:[#allocation20 + $0x6e8] sm:$0xff] }
 0x7f0   :  { %v8786_v10 = vmax.f32 %v14287_v60, 0.0  ;;  %v8788_v14 = vmax.f32 %v14289_v61, 0.0  ;;  %v8978_v60 = vld [vmem:[#allocation20 + $0x588] sm:$0xff]  ;;  %v8985_v3 = vld [vmem:[#allocation20 + $0x5c0] sm:$0xff]  ;;  %v13936_v16 = vcombine.low %v8977_v54, %v8981_v59 }
 0x7f1   :  { %v15834_v24 = vpack.c.bf16 %v8785_v0, %v8785_v0  ;;  %v8982_v61 = vld [vmem:[#allocation20 + $0x5a8] sm:$0xff]  ;;  %v13937_v0 = vcombine.high %v8977_v54, %v8981_v59 }
 0x7f2   :  { %v15832_v21 = vpack.c.bf16 %v8786_v10, %v8786_v10  ;;  %v15838_v1 = vpack.c.bf16 %v8788_v14, %v8788_v14  ;;  %v13939_v2 = vcombine.high %v8978_v60, %v8982_v61  ;;  %v8989_v10 = vld [vmem:[#allocation20 + $0x5e0] sm:$0xff]  ;;  %v8990_v14 = vld [vmem:[#allocation20 + $0x5e8] sm:$0xff]  ;;  %v13938_v17 = vcombine.low %v8978_v60, %v8982_v61 }
 0x7f3   :  { %v13945_v20 = vcombine.high %v8985_v3, %v8989_v10  ;;  %v13944_v36 = vcombine.low %v8985_v3, %v8989_v10  ;;  %v13946_v18 = vcombine.low %v8986_v11, %v8990_v14  ;;  %v9030_v54 = vld [vmem:[#allocation20 + $0x728] sm:$0xff] }
 0x7f4   :  { %11947 = vmatprep.mubr.bf16.mxu0 %v15832_v21  ;;  %12111 = vmatprep.mubr.bf16.mxu1 %v15832_v21  ;;  %v9038_v3 = vld [vmem:[#allocation20 + $0x768] sm:$0xff] }
 0x7f5   :  { %11948 = vmatmul.mubr.bf16.vlgmr.msra.gmra.mrb[24].mxu0 %v15834_v24  ;;  %12112 = vmatmul.mubr.bf16.vlgmr.msra.gmra.mrb[28].mxu1 %v15834_v24 }
 0x7f6   :  { %11957 = vmatpush1.bf16.msra.mxu0 %v13888_v57  ;;  %12121 = vmatpush1.bf16.msra.mxu1 %v13890_v22  ;;  %v13947_v57 = vcombine.high %v8986_v11, %v8990_v14  ;;  %v8993_v22 = vld [vmem:[#allocation20 + $0x600] sm:$0xff] }
 0x7f7   :  { %11988 = vmatprep.mubr.bf16.mxu0 %v15838_v1  ;;  %12152 = vmatprep.mubr.bf16.mxu1 %v15838_v1  ;;  %v13953_v23 = vcombine.high %v8993_v22, %v8997_v26  ;;  %v13952_v43 = vcombine.low %v8993_v22, %v8997_v26  ;;  %v9046_v22 = vld [vmem:[#allocation20 + $0x7a8] sm:$0xff] }
 0x7f8   :  { %11958 = vmatprep.subr.bf16.mxu0 %v13897_v27  ;;  %12122 = vmatprep.subr.bf16.mxu1 %v13899_v33  ;;  %v8994_v27 = vld [vmem:[#allocation20 + $0x608] sm:$0xff] }
 0x7f9   :  { %v8998_v33 = vld [vmem:[#allocation20 + $0x628] sm:$0xff] }
 0x7fa   :  { %11959 = vmatpush1.bf16.msra.mxu0 %v13896_v40  ;;  %12123 = vmatpush1.bf16.msra.mxu1 %v13898_v41  ;;  %v13955_v40 = vcombine.high %v8994_v27, %v8998_v33  ;;  %v9001_v41 = vld [vmem:[#allocation20 + $0x640] sm:$0xff]  ;;  %v13954_v45 = vcombine.low %v8994_v27, %v8998_v33  ;;  %v7148_v33 = vrot.slane %v15822_v48, %v15720_v44 }
 0x7fb   :  { %11960 = vmatprep.subr.bf16.mxu0 %v13905_v9  ;;  %12124 = vmatprep.subr.bf16.mxu1 %v13907_v39  ;;  %v9005_v9 = vld [vmem:[#allocation20 + $0x660] sm:$0xff]  ;;  %v9002_v39 = vld [vmem:[#allocation20 + $0x648] sm:$0xff] }
 0x7fc   :  { %v13961_v34 = vcombine.high %v9001_v41, %v9005_v9  ;;  %v13960_v32 = vcombine.low %v9001_v41, %v9005_v9  ;;  %v13962_v25 = vcombine.low %v9002_v39, %v9006_v42  ;;  %v9050_v41 = vld [vmem:[#allocation20 + $0x7c8] sm:$0xff] }
 0x7fd   :  { %v9054_v9 = vld [vmem:[#allocation20 + $0x7e8] sm:$0xff] }
 0x7fe   :  { %11961 = vmatpush1.bf16.msra.mxu0 %v13904_v46  ;;  %12125 = vmatpush1.bf16.msra.mxu1 %v13906_v47  ;;  %v13963_v46 = vcombine.high %v9002_v39, %v9006_v42  ;;  %v9009_v47 = vld [vmem:[#allocation20 + $0x680] sm:$0xff] }
 0x7ff   :  { %11962 = vmatprep.subr.bf16.mxu0 %v13913_v12  ;;  %12126 = vmatprep.subr.bf16.mxu1 %v13915_v28  ;;  %v9013_v12 = vld [vmem:[#allocation20 + $0x6a0] sm:$0xff]  ;;  %v9010_v28 = vld [vmem:[#allocation20 + $0x688] sm:$0xff] }
 0x800   :  { %v13969_v37 = vcombine.high %v9009_v47, %v9013_v12  ;;  %v13968_v4 = vcombine.low %v9009_v47, %v9013_v12  ;;  %v13970_v50 = vcombine.low %v9010_v28, %v9014_v31  ;;  %v9061_v47 = vld [vmem:[#allocation20 + $0x820] sm:$0xff]  ;;  %v9058_v12 = vld [vmem:[#allocation20 + $0x808] sm:$0xff] }
 0x802   :  { %11963 = vmatpush1.bf16.msra.mxu0 %v13912_v8  ;;  %12127 = vmatpush1.bf16.msra.mxu1 %v13914_v52  ;;  %v13971_v8 = vcombine.high %v9010_v28, %v9014_v31  ;;  %v9017_v52 = vld [vmem:[#allocation20 + $0x6c0] sm:$0xff]  ;;  %v9062_v28 = vld [vmem:[#allocation20 + $0x828] sm:$0xff] }
 0x803   :  { %11964 = vmatprep.subr.bf16.mxu0 %v13921_v38  ;;  %12128 = vmatprep.subr.bf16.mxu1 %v13923_v19  ;;  %v9021_v38 = vld [vmem:[#allocation20 + $0x6e0] sm:$0xff]  ;;  %v9018_v19 = vld [vmem:[#allocation20 + $0x6c8] sm:$0xff] }
 0x804   :  { %v13977_v51 = vcombine.high %v9017_v52, %v9021_v38  ;;  %v13976_v59 = vcombine.low %v9017_v52, %v9021_v38  ;;  %v13978_v60 = vcombine.low %v9018_v19, %v9022_v49  ;;  %v9065_v52 = vld [vmem:[#allocation20 + $0x840] sm:$0xff] }
 0x805   :  { %v9069_v38 = vld [vmem:[#allocation20 + $0x860] sm:$0xff] }
 0x806   :  { %11965 = vmatpush1.bf16.msra.mxu0 %v13920_v56  ;;  %12129 = vmatpush1.bf16.msra.mxu1 %v13922_v53  ;;  %v13979_v56 = vcombine.high %v9018_v19, %v9022_v49  ;;  %v9025_v53 = vld [vmem:[#allocation20 + $0x700] sm:$0xff]  ;;  %v9070_v19 = vld [vmem:[#allocation20 + $0x868] sm:$0xff] }
 0x807   :  { %11966 = vmatprep.subr.bf16.mxu0 %v13929_v55  ;;  %12130 = vmatprep.subr.bf16.mxu1 %v13931_v58  ;;  %v9029_v55 = vld [vmem:[#allocation20 + $0x720] sm:$0xff]  ;;  %v9026_v58 = vld [vmem:[#allocation20 + $0x708] sm:$0xff] }
 0x808   :  { %v13985_v61 = vcombine.high %v9025_v53, %v9029_v55  ;;  %v13984_v10 = vcombine.low %v9025_v53, %v9029_v55  ;;  %v13986_v11 = vcombine.low %v9026_v58, %v9030_v54  ;;  %v9073_v53 = vld [vmem:[#allocation20 + $0x880] sm:$0xff] }
 0x809   :  { %v9077_v55 = vld [vmem:[#allocation20 + $0x8a0] sm:$0xff] }
 0x80a   :  { %11967 = vmatpush1.bf16.msra.mxu0 %v13928_v62  ;;  %12131 = vmatpush1.bf16.msra.mxu1 %v13930_v63  ;;  %v13987_v62 = vcombine.high %v9026_v58, %v9030_v54  ;;  %v9033_v63 = vld [vmem:[#allocation20 + $0x740] sm:$0xff]  ;;  %v9074_v58 = vld [vmem:[#allocation20 + $0x888] sm:$0xff] }
 0x80b   :  { %11968 = vmatprep.subr.bf16.mxu0 %v13937_v0  ;;  %12132 = vmatprep.subr.bf16.mxu1 %v13939_v2  ;;  %v9037_v0 = vld [vmem:[#allocation20 + $0x760] sm:$0xff]  ;;  %v9034_v2 = vld [vmem:[#allocation20 + $0x748] sm:$0xff] }
 0x80c   :  { %v13993_v14 = vcombine.high %v9033_v63, %v9037_v0  ;;  %v13992_v26 = vcombine.low %v9033_v63, %v9037_v0  ;;  %v13994_v27 = vcombine.low %v9034_v2, %v9038_v3  ;;  %v9078_v54 = vld [vmem:[#allocation20 + $0x8a8] sm:$0xff]  ;;  %v9081_v63 = vld [vmem:[#allocation20 + $0x8c0] sm:$0xff] }
 0x80d   :  { %v9085_v0 = vld [vmem:[#allocation20 + $0x8e0] sm:$0xff] }
 0x80e   :  { %11969 = vmatpush1.bf16.msra.mxu0 %v13936_v16  ;;  %12133 = vmatpush1.bf16.msra.mxu1 %v13938_v17  ;;  %v13995_v16 = vcombine.high %v9034_v2, %v9038_v3  ;;  %v9041_v17 = vld [vmem:[#allocation20 + $0x780] sm:$0xff]  ;;  %v9082_v2 = vld [vmem:[#allocation20 + $0x8c8] sm:$0xff] }
 0x80f   :  { %11970 = vmatprep.subr.bf16.mxu0 %v13945_v20  ;;  %12134 = vmatprep.subr.bf16.mxu1 %v13947_v57  ;;  %v9045_v20 = vld [vmem:[#allocation20 + $0x7a0] sm:$0xff]  ;;  %v9042_v57 = vld [vmem:[#allocation20 + $0x788] sm:$0xff] }
 0x810   :  { %v14000_v39 = vcombine.low %v9041_v17, %v9045_v20  ;;  %v14002_v42 = vcombine.low %v9042_v57, %v9046_v22  ;;  %v9086_v3 = vld [vmem:[#allocation20 + $0x8e8] sm:$0xff] }
 0x812   :  { %11971 = vmatpush1.bf16.msra.mxu0 %v13944_v36  ;;  %12135 = vmatpush1.bf16.msra.mxu1 %v13946_v18  ;;  %v14001_v36 = vcombine.high %v9041_v17, %v9045_v20  ;;  %v14003_v18 = vcombine.high %v9042_v57, %v9046_v22  ;;  %v9089_v17 = vld [vmem:[#allocation20 + $0x900] sm:$0xff]  ;;  %v9090_v57 = vld [vmem:[#allocation20 + $0x908] sm:$0xff] }
 0x813   :  { %11972 = vmatprep.subr.bf16.mxu0 %v13953_v23  ;;  %12136 = vmatprep.subr.bf16.mxu1 %v13955_v40  ;;  %v9049_v23 = vld [vmem:[#allocation20 + $0x7c0] sm:$0xff]  ;;  %v9094_v22 = vld [vmem:[#allocation20 + $0x928] sm:$0xff] }
 0x814   :  { %v9053_v40 = vld [vmem:[#allocation20 + $0x7e0] sm:$0xff] }
 0x815   :  { %v14008_v31 = vcombine.low %v9049_v23, %v9053_v40  ;;  %v9093_v20 = vld [vmem:[#allocation20 + $0x920] sm:$0xff] }
 0x816   :  { %11973 = vmatpush1.bf16.msra.mxu0 %v13952_v43  ;;  %12137 = vmatpush1.bf16.msra.mxu1 %v13954_v45  ;;  %v14288_v43 = vadd.f32 %v15830_v13, %v7148_v33  ;;  %v14009_v45 = vcombine.high %v9049_v23, %v9053_v40  ;;  %v9066_v13 = vld [vmem:[#allocation20 + $0x848] sm:$0xff]  ;;  %v14049_v33 = vcombine.high %v9089_v17, %v9093_v20  ;;  %v9101_v23 = vld [vmem:[#allocation20 + $0x960] sm:$0xff] }
 0x817   :  { %11974 = vmatprep.subr.bf16.mxu0 %v13961_v34  ;;  %12138 = vmatprep.subr.bf16.mxu1 %v13963_v46  ;;  %v14011_v34 = vcombine.high %v9050_v41, %v9054_v9  ;;  %v9057_v46 = vld [vmem:[#allocation20 + $0x800] sm:$0xff]  ;;  %v9098_v40 = vld [vmem:[#allocation20 + $0x948] sm:$0xff] }
 0x818   :  { %v14016_v49 = vcombine.low %v9057_v46, %v9061_v47 }
 0x81a   :  { %11975 = vmatpush1.bf16.msra.mxu0 %v13960_v32  ;;  %12139 = vmatpush1.bf16.msra.mxu1 %v13962_v25  ;;  %v14010_v32 = vcombine.low %v9050_v41, %v9054_v9  ;;  %v8787_v25 = vmax.f32 %v14288_v43, 0.0  ;;  %v9102_v41 = vld [vmem:[#allocation20 + $0x968] sm:$0xff]  ;;  %v14048_v9 = vcombine.low %v9089_v17, %v9093_v20 }
 0x81b   :  { %11976 = vmatprep.subr.bf16.mxu0 %v13969_v37  ;;  %12140 = vmatprep.subr.bf16.mxu1 %v13971_v8  ;;  %v14017_v37 = vcombine.high %v9057_v46, %v9061_v47  ;;  %v14019_v8 = vcombine.high %v9058_v12, %v9062_v28  ;;  %v14059_v43 = vcombine.high %v9098_v40, %v9102_v41  ;;  %v9106_v46 = vld [vmem:[#allocation20 + $0x988] sm:$0xff] }
 0x81c   :  { %v9110_v47 = vld [vmem:[#allocation20 + $0x9a8] sm:$0xff] }
 0x81d   :  { %v9142_v17 = vld [vmem:[#allocation20 + $0xaa8] sm:$0xff] }
 0x81e   :  { %11977 = vmatpush1.bf16.msra.mxu0 %v13968_v4  ;;  %12141 = vmatpush1.bf16.msra.mxu1 %v13970_v50  ;;  %v14018_v4 = vcombine.low %v9058_v12, %v9062_v28  ;;  %v15847_v50 = vpack.c.bf16 %v8787_v25, %v8787_v25  ;;  %v14058_v28 = vcombine.low %v9098_v40, %v9102_v41  ;;  %v9113_v25 = vld [vmem:[#allocation20 + $0x9c0] sm:$0xff] }
 0x81f   :  { %11978 = vmatprep.subr.bf16.mxu0 %v13977_v51  ;;  %12142 = vmatprep.subr.bf16.mxu1 %v13979_v56  ;;  %v14025_v51 = vcombine.high %v9065_v52, %v9069_v38  ;;  %v14027_v56 = vcombine.high %v9066_v13, %v9070_v19 }
 0x822   :  { %11979 = vmatpush1.bf16.msra.mxu0 %v13976_v59  ;;  %12143 = vmatpush1.bf16.msra.mxu1 %v13978_v60  ;;  %v14024_v59 = vcombine.low %v9065_v52, %v9069_v38  ;;  %v14026_v60 = vcombine.low %v9066_v13, %v9070_v19  ;;  %v9118_v52 = vld [vmem:[#allocation20 + $0x9e8] sm:$0xff]  ;;  %v14066_v13 = vcombine.low %v9106_v46, %v9110_v47 }
 0x823   :  { %11980 = vmatprep.subr.bf16.mxu0 %v13985_v61  ;;  %12144 = vmatprep.subr.bf16.mxu1 %v13987_v62  ;;  %v14033_v61 = vcombine.high %v9073_v53, %v9077_v55  ;;  %v14035_v62 = vcombine.high %v9074_v58, %v9078_v54 }
 0x826   :  { %11981 = vmatpush1.bf16.msra.mxu0 %v13984_v10  ;;  %12145 = vmatpush1.bf16.msra.mxu1 %v13986_v11  ;;  %v14032_v10 = vcombine.low %v9073_v53, %v9077_v55  ;;  %v14034_v11 = vcombine.low %v9074_v58, %v9078_v54  ;;  %v9126_v53 = vld [vmem:[#allocation20 + $0xa28] sm:$0xff] }
 0x827   :  { %11982 = vmatprep.subr.bf16.mxu0 %v13993_v14  ;;  %12146 = vmatprep.subr.bf16.mxu1 %v13995_v16  ;;  %v14041_v14 = vcombine.high %v9081_v63, %v9085_v0  ;;  %v14043_v16 = vcombine.high %v9082_v2, %v9086_v3 }
 0x82a   :  { %11983 = vmatpush1.bf16.msra.mxu0 %v13992_v26  ;;  %12147 = vmatpush1.bf16.msra.mxu1 %v13994_v27  ;;  %v14040_v26 = vcombine.low %v9081_v63, %v9085_v0  ;;  %v14042_v27 = vcombine.low %v9082_v2, %v9086_v3  ;;  %v9134_v63 = vld [vmem:[#allocation20 + $0xa68] sm:$0xff] }
 0x82b   :  { %11984 = vmatprep.subr.bf16.mxu0 %v14001_v36  ;;  %12148 = vmatprep.subr.bf16.mxu1 %v14003_v18  ;;  %v14051_v36 = vcombine.high %v9090_v57, %v9094_v22  ;;  %v9097_v18 = vld [vmem:[#allocation20 + $0x940] sm:$0xff] }
 0x82c   :  { %v14056_v12 = vcombine.low %v9097_v18, %v9101_v23 }
 0x82e   :  { %11985 = vmatpush1.bf16.msra.mxu0 %v14000_v39  ;;  %12149 = vmatpush1.bf16.msra.mxu1 %v14002_v42  ;;  %v14050_v39 = vcombine.low %v9090_v57, %v9094_v22  ;;  %v14057_v42 = vcombine.high %v9097_v18, %v9101_v23  ;;  %v9150_v18 = vld [vmem:[#allocation20 + $0xae8] sm:$0xff] }
 0x82f   :  { %11986 = vmatprep.subr.bf16.mxu0 %v14009_v45  ;;  %12150 = vmatprep.subr.bf16.mxu1 %v14011_v34  ;;  %v9105_v45 = vld [vmem:[#allocation20 + $0x980] sm:$0xff] }
 0x830   :  { %v9109_v34 = vld [vmem:[#allocation20 + $0x9a0] sm:$0xff] }
 0x831   :  { %v14064_v38 = vcombine.low %v9105_v45, %v9109_v34 }
 0x832   :  { %11987 = vmatpush1.bf16.msra.mxu0 %v14008_v31  ;;  %12151 = vmatpush1.bf16.msra.mxu1 %v14010_v32  ;;  %v14065_v31 = vcombine.high %v9105_v45, %v9109_v34  ;;  %v14067_v32 = vcombine.high %v9106_v46, %v9110_v47  ;;  %v9158_v45 = vld [vmem:[#allocation20 + $0xb28] sm:$0xff] }
 0x833   :  { %11997 = vmatprep.subr.bf16.mxu0 %v14017_v37  ;;  %12161 = vmatprep.subr.bf16.mxu1 %v14019_v8  ;;  %v9117_v37 = vld [vmem:[#allocation20 + $0x9e0] sm:$0xff]  ;;  %v9114_v8 = vld [vmem:[#allocation20 + $0x9c8] sm:$0xff] }
 0x834   :  { %v14073_v19 = vcombine.high %v9113_v25, %v9117_v37  ;;  %v14072_v55 = vcombine.low %v9113_v25, %v9117_v37  ;;  %v14074_v58 = vcombine.low %v9114_v8, %v9118_v52  ;;  %v9166_v25 = vld [vmem:[#allocation20 + $0xb68] sm:$0xff] }
 0x835   :  { %11989 = vmatmul.mubr.bf16.vlgmr.msra.gmra.mrb[24].mxu0 %v15847_v50  ;;  %12153 = vmatmul.mubr.bf16.vlgmr.msra.gmra.mrb[28].mxu1 %v15847_v50 }
 0x836   :  { %11998 = vmatpush1.bf16.msra.mxu0 %v14016_v49  ;;  %12162 = vmatpush1.bf16.msra.mxu1 %v14018_v4  ;;  %v14075_v49 = vcombine.high %v9114_v8, %v9118_v52  ;;  %v9121_v4 = vld [vmem:[#allocation20 + $0xa00] sm:$0xff] }
 0x837   :  { %11999 = vmatprep.subr.bf16.mxu0 %v14025_v51  ;;  %12163 = vmatprep.subr.bf16.mxu1 %v14027_v56  ;;  %v9125_v51 = vld [vmem:[#allocation20 + $0xa20] sm:$0xff]  ;;  %v9122_v56 = vld [vmem:[#allocation20 + $0xa08] sm:$0xff] }
 0x838   :  { %v14081_v54 = vcombine.high %v9121_v4, %v9125_v51  ;;  %v14080_v0 = vcombine.low %v9121_v4, %v9125_v51  ;;  %v14082_v2 = vcombine.low %v9122_v56, %v9126_v53  ;;  %v9174_v4 = vld [vmem:[#allocation20 + $0xba8] sm:$0xff] }
 0x83a   :  { %12000 = vmatpush1.bf16.msra.mxu0 %v14024_v59  ;;  %12164 = vmatpush1.bf16.msra.mxu1 %v14026_v60  ;;  %v14083_v59 = vcombine.high %v9122_v56, %v9126_v53  ;;  %v9129_v60 = vld [vmem:[#allocation20 + $0xa40] sm:$0xff] }
 0x83b   :  { %12001 = vmatprep.subr.bf16.mxu0 %v14033_v61  ;;  %12165 = vmatprep.subr.bf16.mxu1 %v14035_v62  ;;  %v9133_v61 = vld [vmem:[#allocation20 + $0xa60] sm:$0xff]  ;;  %v9130_v62 = vld [vmem:[#allocation20 + $0xa48] sm:$0xff] }
 0x83c   :  { %v14089_v3 = vcombine.high %v9129_v60, %v9133_v61  ;;  %v14088_v20 = vcombine.low %v9129_v60, %v9133_v61  ;;  %v14090_v57 = vcombine.low %v9130_v62, %v9134_v63  ;;  %v9182_v60 = vld [vmem:[#allocation20 + $0xbe8] sm:$0xff]  ;;  %v7156_v61 = vrot.slane %v15822_v48, %v15726_v5 }
 0x83e   :  { %12002 = vmatpush1.bf16.msra.mxu0 %v14032_v10  ;;  %12166 = vmatpush1.bf16.msra.mxu1 %v14034_v11  ;;  %v14091_v10 = vcombine.high %v9130_v62, %v9134_v63  ;;  %v9137_v11 = vld [vmem:[#allocation20 + $0xa80] sm:$0xff] }
 0x83f   :  { %12003 = vmatprep.subr.bf16.mxu0 %v14041_v14  ;;  %12167 = vmatprep.subr.bf16.mxu1 %v14043_v16  ;;  %v9141_v14 = vld [vmem:[#allocation20 + $0xaa0] sm:$0xff]  ;;  %v9138_v16 = vld [vmem:[#allocation20 + $0xa88] sm:$0xff] }
 0x840   :  { %v14097_v22 = vcombine.high %v9137_v11, %v9141_v14  ;;  %v14096_v23 = vcombine.low %v9137_v11, %v9141_v14  ;;  %v14098_v40 = vcombine.low %v9138_v16, %v9142_v17  ;;  %v9185_v11 = vld [vmem:[#allocation20 + $0xc00] sm:$0xff] }
 0x842   :  { %12004 = vmatpush1.bf16.msra.mxu0 %v14040_v26  ;;  %12168 = vmatpush1.bf16.msra.mxu1 %v14042_v27  ;;  %v14099_v26 = vcombine.high %v9138_v16, %v9142_v17  ;;  %v9145_v27 = vld [vmem:[#allocation20 + $0xac0] sm:$0xff]  ;;  %v9186_v17 = vld [vmem:[#allocation20 + $0xc08] sm:$0xff] }
 0x843   :  { %12005 = vmatprep.subr.bf16.mxu0 %v14049_v33  ;;  %12169 = vmatprep.subr.bf16.mxu1 %v14051_v36  ;;  %v9149_v33 = vld [vmem:[#allocation20 + $0xae0] sm:$0xff]  ;;  %v9146_v36 = vld [vmem:[#allocation20 + $0xac8] sm:$0xff] }
 0x844   :  { %v14105_v41 = vcombine.high %v9145_v27, %v9149_v33  ;;  %v14104_v34 = vcombine.low %v9145_v27, %v9149_v33  ;;  %v14106_v46 = vcombine.low %v9146_v36, %v9150_v18  ;;  %v9189_v16 = vld [vmem:[#allocation20 + $0xc20] sm:$0xff] }
 0x846   :  { %12006 = vmatpush1.bf16.msra.mxu0 %v14048_v9  ;;  %12170 = vmatpush1.bf16.msra.mxu1 %v14050_v39  ;;  %v14107_v9 = vcombine.high %v9146_v36, %v9150_v18  ;;  %v9153_v39 = vld [vmem:[#allocation20 + $0xb00] sm:$0xff] }
 0x847   :  { %12007 = vmatprep.subr.bf16.mxu0 %v14057_v42  ;;  %12171 = vmatprep.subr.bf16.mxu1 %v14059_v43  ;;  %v9157_v42 = vld [vmem:[#allocation20 + $0xb20] sm:$0xff]  ;;  %v9154_v43 = vld [vmem:[#allocation20 + $0xb08] sm:$0xff] }
 0x848   :  { %v14113_v47 = vcombine.high %v9153_v39, %v9157_v42  ;;  %v14112_v37 = vcombine.low %v9153_v39, %v9157_v42  ;;  %v14114_v8 = vcombine.low %v9154_v43, %v9158_v45  ;;  %v14145_v39 = vcombine.high %v9185_v11, %v9189_v16 }
 0x84a   :  { %12008 = vmatpush1.bf16.msra.mxu0 %v14056_v12  ;;  %12172 = vmatpush1.bf16.msra.mxu1 %v14058_v28  ;;  %v14115_v12 = vcombine.high %v9154_v43, %v9158_v45  ;;  %v9161_v28 = vld [vmem:[#allocation20 + $0xb40] sm:$0xff] }
 0x84b   :  { %12009 = vmatprep.subr.bf16.mxu0 %v14065_v31  ;;  %12173 = vmatprep.subr.bf16.mxu1 %v14067_v32  ;;  %v9165_v31 = vld [vmem:[#allocation20 + $0xb60] sm:$0xff]  ;;  %v9162_v32 = vld [vmem:[#allocation20 + $0xb48] sm:$0xff] }
 0x84c   :  { %v14121_v52 = vcombine.high %v9161_v28, %v9165_v31  ;;  %v14120_v51 = vcombine.low %v9161_v28, %v9165_v31  ;;  %v14122_v56 = vcombine.low %v9162_v32, %v9166_v25  ;;  %v9198_v28 = vld [vmem:[#allocation20 + $0xc68] sm:$0xff] }
 0x84e   :  { %12010 = vmatpush1.bf16.msra.mxu0 %v14064_v38  ;;  %12174 = vmatpush1.bf16.msra.mxu1 %v14066_v13  ;;  %v14123_v38 = vcombine.high %v9162_v32, %v9166_v25  ;;  %v9169_v13 = vld [vmem:[#allocation20 + $0xb80] sm:$0xff]  ;;  %v14144_v32 = vcombine.low %v9185_v11, %v9189_v16  ;;  %v9222_v11 = vld [vmem:[#allocation20 + $0xd28] sm:$0xff] }
 0x84f   :  { %12011 = vmatprep.subr.bf16.mxu0 %v14073_v19  ;;  %12175 = vmatprep.subr.bf16.mxu1 %v14075_v49  ;;  %v9173_v19 = vld [vmem:[#allocation20 + $0xba0] sm:$0xff]  ;;  %v9170_v49 = vld [vmem:[#allocation20 + $0xb88] sm:$0xff] }
 0x850   :  { %v14129_v53 = vcombine.high %v9169_v13, %v9173_v19  ;;  %v14128_v62 = vcombine.low %v9169_v13, %v9173_v19  ;;  %v14130_v63 = vcombine.low %v9170_v49, %v9174_v4  ;;  %v9205_v13 = vld [vmem:[#allocation20 + $0xca0] sm:$0xff]  ;;  %v9202_v19 = vld [vmem:[#allocation20 + $0xc88] sm:$0xff] }
 0x852   :  { %12012 = vmatpush1.bf16.msra.mxu0 %v14072_v55  ;;  %12176 = vmatpush1.bf16.msra.mxu1 %v14074_v58  ;;  %v14131_v55 = vcombine.high %v9170_v49, %v9174_v4  ;;  %v9177_v58 = vld [vmem:[#allocation20 + $0xbc0] sm:$0xff]  ;;  %v9206_v49 = vld [vmem:[#allocation20 + $0xca8] sm:$0xff] }
 0x853   :  { %12013 = vmatprep.subr.bf16.mxu0 %v14081_v54  ;;  %12177 = vmatprep.subr.bf16.mxu1 %v14083_v59  ;;  %v9181_v54 = vld [vmem:[#allocation20 + $0xbe0] sm:$0xff]  ;;  %v9178_v59 = vld [vmem:[#allocation20 + $0xbc8] sm:$0xff] }
 0x854   :  { %v14136_v18 = vcombine.low %v9177_v58, %v9181_v54 }
 0x856   :  { %12014 = vmatpush1.bf16.msra.mxu0 %v14080_v0  ;;  %12178 = vmatpush1.bf16.msra.mxu1 %v14082_v2  ;;  %v7160_v0 = vrot.slane %v15822_v48, %v15729_v6  ;;  %v7168_v2 = vrot.slane %v15822_v48, %v15732_v7 }
 0x857   :  { %12015 = vmatprep.subr.bf16.mxu0 %v14089_v3  ;;  %12179 = vmatprep.subr.bf16.mxu1 %v14091_v10  ;;  %v14137_v3 = vcombine.high %v9177_v58, %v9181_v54  ;;  %v14139_v10 = vcombine.high %v9178_v59, %v9182_v60  ;;  %v9209_v58 = vld [vmem:[#allocation20 + $0xcc0] sm:$0xff] }
 0x858   :  { %v9213_v54 = vld [vmem:[#allocation20 + $0xce0] sm:$0xff] }
 0x85a   :  { %12016 = vmatpush1.bf16.msra.mxu0 %v14088_v20  ;;  %12180 = vmatpush1.bf16.msra.mxu1 %v14090_v57  ;;  %v9190_v20 = vld [vmem:[#allocation20 + $0xc28] sm:$0xff] }
 0x85b   :  { %12017 = vmatprep.subr.bf16.mxu0 %v14097_v22  ;;  %12181 = vmatprep.subr.bf16.mxu1 %v14099_v26  ;;  %v14147_v42 = vcombine.high %v9186_v17, %v9190_v20  ;;  %v14146_v25 = vcombine.low %v9186_v17, %v9190_v20 }
 0x85e   :  { %12018 = vmatpush1.bf16.msra.mxu0 %v14096_v23  ;;  %12182 = vmatpush1.bf16.msra.mxu1 %v14098_v40  ;;  %v14138_v23 = vcombine.low %v9178_v59, %v9182_v60  ;;  %v9210_v59 = vld [vmem:[#allocation20 + $0xcc8] sm:$0xff] }
 0x85f   :  { %12019 = vmatprep.subr.bf16.mxu0 %v14105_v41  ;;  %12183 = vmatprep.subr.bf16.mxu1 %v14107_v9  ;;  %v9214_v60 = vld [vmem:[#allocation20 + $0xce8] sm:$0xff] }
 0x860   :  { %v14170_v16 = vcombine.low %v9210_v59, %v9214_v60 }
 0x862   :  { %12020 = vmatpush1.bf16.msra.mxu0 %v14104_v34  ;;  %12184 = vmatpush1.bf16.msra.mxu1 %v14106_v46  ;;  %v9193_v34 = vld [vmem:[#allocation20 + $0xc40] sm:$0xff] }
 0x863   :  { %12021 = vmatprep.subr.bf16.mxu0 %v14113_v47  ;;  %12185 = vmatprep.subr.bf16.mxu1 %v14115_v12  ;;  %v9197_v47 = vld [vmem:[#allocation20 + $0xc60] sm:$0xff]  ;;  %v9194_v12 = vld [vmem:[#allocation20 + $0xc48] sm:$0xff] }
 0x866   :  { %12022 = vmatpush1.bf16.msra.mxu0 %v14112_v37  ;;  %12186 = vmatpush1.bf16.msra.mxu1 %v14114_v8  ;;  %v9201_v8 = vld [vmem:[#allocation20 + $0xc80] sm:$0xff] }
 0x867   :  { %12023 = vmatprep.subr.bf16.mxu0 %v14121_v52  ;;  %12187 = vmatprep.subr.bf16.mxu1 %v14123_v38  ;;  %v14153_v52 = vcombine.high %v9193_v34, %v9197_v47  ;;  %v14155_v38 = vcombine.high %v9194_v12, %v9198_v28 }
 0x86a   :  { %12024 = vmatpush1.bf16.msra.mxu0 %v14120_v51  ;;  %12188 = vmatpush1.bf16.msra.mxu1 %v14122_v56  ;;  %v14152_v51 = vcombine.low %v9193_v34, %v9197_v47  ;;  %v14154_v56 = vcombine.low %v9194_v12, %v9198_v28  ;;  %v9245_v47 = vld [vmem:[#allocation20 + $0xde0] sm:$0xff]  ;;  %v9242_v12 = vld [vmem:[#allocation20 + $0xdc8] sm:$0xff] }
 0x86b   :  { %12025 = vmatprep.subr.bf16.mxu0 %v14129_v53  ;;  %12189 = vmatprep.subr.bf16.mxu1 %v14131_v55  ;;  %v14161_v53 = vcombine.high %v9201_v8, %v9205_v13  ;;  %v14163_v55 = vcombine.high %v9202_v19, %v9206_v49  ;;  %v9246_v28 = vld [vmem:[#allocation20 + $0xde8] sm:$0xff] }
 0x86c   :  { %v8696_v14 = vpop.f32.mrb[20].mxu0 }
 0x86d   :  { %v14290_v57 = vadd.f32 %v8696_v14, %v7156_v61  ;;  %v15857_v22 = vpop.f32.mrb[24].mxu1  ;;  %v8698_v26 = vpop.f32.mrb[21].mxu0  ;;  %v14160_v61 = vcombine.low %v9201_v8, %v9205_v13  ;;  %v14168_v14 = vcombine.low %v9209_v58, %v9213_v54  ;;  %v9253_v13 = vld [vmem:[#allocation20 + $0xe20] sm:$0xff] }
 0x86e   :  { %v14291_v27 = vadd.f32 %v8698_v26, %v7160_v0  ;;  %v8780_v33 = vpop.f32.mrb[25].mxu1  ;;  %12026 = vmatpush1.bf16.msra.mxu0 %v14128_v62  ;;  %12190 = vmatpush1.bf16.msra.mxu1 %v14130_v63  ;;  %v8700_v36 = vpop.f32.mrb[22].mxu0  ;;  %v14162_v62 = vcombine.low %v9202_v19, %v9206_v49  ;;  %v14169_v63 = vcombine.high %v9209_v58, %v9213_v54  ;;  %v9229_v26 = vld [vmem:[#allocation20 + $0xd60] sm:$0xff]  ;;  %v9250_v19 = vld [vmem:[#allocation20 + $0xe08] sm:$0xff] }
 0x86f   :  { %v8789_v40 = vmax.f32 %v14290_v57, 0.0  ;;  %v14293_v48 = vadd.f32 %v8780_v33, %v7168_v2  ;;  %v8782_v41 = vpop.f32.mrb[26].mxu1  ;;  %v8701_v9 = vpop.f32.mrb[23].mxu0  ;;  %12027 = vmatprep.subr.bf16.mxu0 %v14137_v3  ;;  %12191 = vmatprep.subr.bf16.mxu1 %v14139_v10  ;;  %v14171_v0 = vcombine.high %v9210_v59, %v9214_v60  ;;  %v9217_v2 = vld [vmem:[#allocation20 + $0xd00] sm:$0xff]  ;;  %v9218_v10 = vld [vmem:[#allocation20 + $0xd08] sm:$0xff] }
 0x870   :  { %v8790_v43 = vmax.f32 %v14291_v27, 0.0  ;;  %v8783_v45 = vpop.f32.mrb[27].mxu1  ;;  %v9221_v3 = vld [vmem:[#allocation20 + $0xd20] sm:$0xff]  ;;  %v14179_v20 = vcombine.high %v9218_v10, %v9222_v11  ;;  %v9226_v27 = vld [vmem:[#allocation20 + $0xd48] sm:$0xff] }
 0x871   :  { %v8792_v46 = vmax.f32 %v14293_v48, 0.0  ;;  %v15861_v37 = vpack.c.bf16 %v8789_v40, %v8789_v40  ;;  %v14177_v17 = vcombine.high %v9217_v2, %v9221_v3  ;;  %v9225_v57 = vld [vmem:[#allocation20 + $0xd40] sm:$0xff]  ;;  %v9230_v33 = vld [vmem:[#allocation20 + $0xd68] sm:$0xff]  ;;  %v14176_v36 = vcombine.low %v9217_v2, %v9221_v3 }
 0x872   :  { %v15859_v31 = vpack.c.bf16 %v8790_v43, %v8790_v43  ;;  %12028 = vmatpush1.bf16.msra.mxu0 %v14136_v18  ;;  %12192 = vmatpush1.bf16.msra.mxu1 %v14138_v23  ;;  %v14178_v18 = vcombine.low %v9218_v10, %v9222_v11  ;;  %v14185_v23 = vcombine.high %v9225_v57, %v9229_v26  ;;  %v9233_v48 = vld [vmem:[#allocation20 + $0xd80] sm:$0xff]  ;;  %v9234_v9 = vld [vmem:[#allocation20 + $0xd88] sm:$0xff] }
 0x873   :  { %12038 = vmatprep.subr.bf16.mxu0 %v14145_v39  ;;  %12202 = vmatprep.subr.bf16.mxu1 %v14147_v42  ;;  %v15865_v4 = vpack.c.bf16 %v8792_v46, %v8792_v46  ;;  %v14187_v40 = vcombine.high %v9226_v27, %v9230_v33  ;;  %v9237_v41 = vld [vmem:[#allocation20 + $0xda0] sm:$0xff]  ;;  %v9238_v39 = vld [vmem:[#allocation20 + $0xda8] sm:$0xff]  ;;  %v14184_v42 = vcombine.low %v9225_v57, %v9229_v26 }
 0x874   :  { %12029 = vmatprep.mubr.bf16.mxu0 %v15859_v31  ;;  %12193 = vmatprep.mubr.bf16.mxu1 %v15859_v31  ;;  %v14186_v43 = vcombine.low %v9226_v27, %v9230_v33  ;;  %v14193_v45 = vcombine.high %v9233_v48, %v9237_v41  ;;  %v14195_v34 = vcombine.high %v9234_v9, %v9238_v39  ;;  %v9241_v46 = vld [vmem:[#allocation20 + $0xdc0] sm:$0xff]  ;;  %v9254_v49 = vld [vmem:[#allocation20 + $0xe28] sm:$0xff] }
 0x875   :  { %12030 = vmatmul.mubr.bf16.vlgmr.msra.gmra.mrb[24].mxu0 %v15861_v37  ;;  %12194 = vmatmul.mubr.bf16.vlgmr.msra.gmra.mrb[28].mxu1 %v15861_v37  ;;  %v14201_v8 = vcombine.high %v9241_v46, %v9245_v47  ;;  %v9257_v58 = vld [vmem:[#allocation20 + $0xe40] sm:$0xff]  ;;  %v9258_v59 = vld [vmem:[#allocation20 + $0xe48] sm:$0xff] }
 0x876   :  { %12039 = vmatpush1.bf16.msra.mxu0 %v14144_v32  ;;  %12203 = vmatpush1.bf16.msra.mxu1 %v14146_v25  ;;  %v14192_v32 = vcombine.low %v9233_v48, %v9237_v41  ;;  %v14194_v25 = vcombine.low %v9234_v9, %v9238_v39  ;;  %v9261_v54 = vld [vmem:[#allocation20 + $0xe60] sm:$0xff]  ;;  %v9262_v60 = vld [vmem:[#allocation20 + $0xe68] sm:$0xff] }
 0x877   :  { %12070 = vmatprep.mubr.bf16.mxu0 %v15865_v4  ;;  %12234 = vmatprep.mubr.bf16.mxu1 %v15865_v4  ;;  %v9265_v2 = vld [vmem:[#allocation20 + $0xe80] sm:$0xff]  ;;  %v9266_v10 = vld [vmem:[#allocation20 + $0xe88] sm:$0xff] }
 0x878   :  { %12040 = vmatprep.subr.bf16.mxu0 %v14153_v52  ;;  %12204 = vmatprep.subr.bf16.mxu1 %v14155_v38  ;;  %v14203_v52 = vcombine.high %v9242_v12, %v9246_v28  ;;  %v9249_v38 = vld [vmem:[#allocation20 + $0xe00] sm:$0xff]  ;;  %v9270_v11 = vld [vmem:[#allocation20 + $0xea8] sm:$0xff] }
 0x879   :  { %v9269_v3 = vld [vmem:[#allocation20 + $0xea0] sm:$0xff]  ;;  %v9274_v27 = vld [vmem:[#allocation20 + $0xec8] sm:$0xff] }
 0x87a   :  { %12041 = vmatpush1.bf16.msra.mxu0 %v14152_v51  ;;  %12205 = vmatpush1.bf16.msra.mxu1 %v14154_v56  ;;  %v14200_v51 = vcombine.low %v9241_v46, %v9245_v47  ;;  %v14202_v56 = vcombine.low %v9242_v12, %v9246_v28  ;;  %v9273_v57 = vld [vmem:[#allocation20 + $0xec0] sm:$0xff]  ;;  %v9278_v33 = vld [vmem:[#allocation20 + $0xee8] sm:$0xff] }
 0x87b   :  { %12042 = vmatprep.subr.bf16.mxu0 %v14161_v53  ;;  %12206 = vmatprep.subr.bf16.mxu1 %v14163_v55  ;;  %v14209_v53 = vcombine.high %v9249_v38, %v9253_v13  ;;  %v14211_v55 = vcombine.high %v9250_v19, %v9254_v49  ;;  %v9277_v26 = vld [vmem:[#allocation20 + $0xee0] sm:$0xff]  ;;  %v9282_v9 = vld [vmem:[#allocation20 + $0xf08] sm:$0xff] }
 0x87c   :  { %v9281_v48 = vld [vmem:[#allocation20 + $0xf00] sm:$0xff]  ;;  %v9286_v39 = vld [vmem:[#allocation20 + $0xf28] sm:$0xff] }
 0x87d   :  { %v9285_v41 = vld [vmem:[#allocation20 + $0xf20] sm:$0xff]  ;;  %v9290_v12 = vld [vmem:[#allocation20 + $0xf48] sm:$0xff] }
 0x87e   :  { %12043 = vmatpush1.bf16.msra.mxu0 %v14160_v61  ;;  %12207 = vmatpush1.bf16.msra.mxu1 %v14162_v62  ;;  %v14208_v61 = vcombine.low %v9249_v38, %v9253_v13  ;;  %v14210_v62 = vcombine.low %v9250_v19, %v9254_v49  ;;  %v9289_v46 = vld [vmem:[#allocation20 + $0xf40] sm:$0xff]  ;;  %v9294_v28 = vld [vmem:[#allocation20 + $0xf68] sm:$0xff] }
 0x87f   :  { %12044 = vmatprep.subr.bf16.mxu0 %v14169_v63  ;;  %12208 = vmatprep.subr.bf16.mxu1 %v14171_v0  ;;  %v14217_v63 = vcombine.high %v9257_v58, %v9261_v54  ;;  %v14219_v0 = vcombine.high %v9258_v59, %v9262_v60  ;;  %v9293_v47 = vld [vmem:[#allocation20 + $0xf60] sm:$0xff]  ;;  %v9298_v19 = vld [vmem:[#allocation20 + $0xf88] sm:$0xff] }
 0x880   :  { %v9297_v38 = vld [vmem:[#allocation20 + $0xf80] sm:$0xff]  ;;  %v9302_v49 = vld [vmem:[#allocation20 + $0xfa8] sm:$0xff] }
 0x881   :  { %v9301_v13 = vld [vmem:[#allocation20 + $0xfa0] sm:$0xff] }
 0x882   :  { %12045 = vmatpush1.bf16.msra.mxu0 %v14168_v14  ;;  %12209 = vmatpush1.bf16.msra.mxu1 %v14170_v16  ;;  %v14216_v14 = vcombine.low %v9257_v58, %v9261_v54  ;;  %v14218_v16 = vcombine.low %v9258_v59, %v9262_v60  ;;  %v14257_v58 = vcombine.high %v9297_v38, %v9301_v13  ;;  %v9305_v59 = vld [vmem:[#allocation20 + $0xfc0] sm:$0xff] }
 0x883   :  { %12046 = vmatprep.subr.bf16.mxu0 %v14177_v17  ;;  %12210 = vmatprep.subr.bf16.mxu1 %v14179_v20  ;;  %v14225_v17 = vcombine.high %v9265_v2, %v9269_v3  ;;  %v14227_v20 = vcombine.high %v9266_v10, %v9270_v11  ;;  %v14259_v54 = vcombine.high %v9298_v19, %v9302_v49  ;;  %v9309_v60 = vld [vmem:[#allocation20 + $0xfe0] sm:$0xff] }
 0x886   :  { %12047 = vmatpush1.bf16.msra.mxu0 %v14176_v36  ;;  %12211 = vmatpush1.bf16.msra.mxu1 %v14178_v18  ;;  %v14224_v36 = vcombine.low %v9265_v2, %v9269_v3  ;;  %v14226_v18 = vcombine.low %v9266_v10, %v9270_v11  ;;  %v14265_v3 = vcombine.high %v9305_v59, %v9309_v60  ;;  %v8803_v11 = vld [vmem:[#allocation20 + $0x10] sm:$0xff] }
 0x887   :  { %12048 = vmatprep.subr.bf16.mxu0 %v14185_v23  ;;  %12212 = vmatprep.subr.bf16.mxu1 %v14187_v40  ;;  %v14233_v23 = vcombine.high %v9273_v57, %v9277_v26  ;;  %v14235_v40 = vcombine.high %v9274_v27, %v9278_v33 }
 0x88a   :  { %12049 = vmatpush1.bf16.msra.mxu0 %v14184_v42  ;;  %12213 = vmatpush1.bf16.msra.mxu1 %v14186_v43  ;;  %v14232_v42 = vcombine.low %v9273_v57, %v9277_v26  ;;  %v14234_v43 = vcombine.low %v9274_v27, %v9278_v33 }
 0x88b   :  { %12050 = vmatprep.subr.bf16.mxu0 %v14193_v45  ;;  %12214 = vmatprep.subr.bf16.mxu1 %v14195_v34  ;;  %v14241_v45 = vcombine.high %v9281_v48, %v9285_v41  ;;  %v14243_v34 = vcombine.high %v9282_v9, %v9286_v39 }
 0x88e   :  { %12051 = vmatpush1.bf16.msra.mxu0 %v14192_v32  ;;  %12215 = vmatpush1.bf16.msra.mxu1 %v14194_v25  ;;  %v14240_v32 = vcombine.low %v9281_v48, %v9285_v41  ;;  %v14242_v25 = vcombine.low %v9282_v9, %v9286_v39 }
 0x88f   :  { %12052 = vmatprep.subr.bf16.mxu0 %v14201_v8  ;;  %12216 = vmatprep.subr.bf16.mxu1 %v14203_v52  ;;  %v14249_v8 = vcombine.high %v9289_v46, %v9293_v47  ;;  %v14251_v52 = vcombine.high %v9290_v12, %v9294_v28 }
 0x892   :  { %12053 = vmatpush1.bf16.msra.mxu0 %v14200_v51  ;;  %12217 = vmatpush1.bf16.msra.mxu1 %v14202_v56  ;;  %v14248_v51 = vcombine.low %v9289_v46, %v9293_v47  ;;  %v14250_v56 = vcombine.low %v9290_v12, %v9294_v28 }
 0x893   :  { %12054 = vmatprep.subr.bf16.mxu0 %v14209_v53  ;;  %12218 = vmatprep.subr.bf16.mxu1 %v14211_v55  ;;  %v15055_v53 = vld [vmem:[#allocation19] sm:$0xff] }
 0x894   :  { %v7164_v55 = vrot.slane %v15055_v53, %v15743_v29  ;;  %v8840_v53 = vld [vmem:[#allocation20 + $0x138] sm:$0xff] }
 0x896   :  { %12055 = vmatpush1.bf16.msra.mxu0 %v14208_v61  ;;  %12219 = vmatpush1.bf16.msra.mxu1 %v14210_v62  ;;  %v9306_v61 = vld [vmem:[#allocation20 + $0xfc8] sm:$0xff]  ;;  %v14292_v2 = vadd.f32 %v15857_v22, %v7164_v55  ;;  %v8812_v22 = vld [vmem:[#allocation20 + $0x58] sm:$0xff] }
 0x897   :  { %12056 = vmatprep.subr.bf16.mxu0 %v14217_v63  ;;  %12220 = vmatprep.subr.bf16.mxu1 %v14219_v0  ;;  %v9310_v62 = vld [vmem:[#allocation20 + $0xfe8] sm:$0xff]  ;;  %v14256_v63 = vcombine.low %v9297_v38, %v9301_v13  ;;  %v14258_v0 = vcombine.low %v9298_v19, %v9302_v49 }
 0x898   :  { %v14267_v10 = vcombine.high %v9306_v61, %v9310_v62  ;;  %v14266_v57 = vcombine.low %v9306_v61, %v9310_v62  ;;  %v8791_v26 = vmax.f32 %v14292_v2, 0.0  ;;  %v8847_v61 = vld [vmem:[#allocation20 + $0x170] sm:$0xff]  ;;  %v8844_v62 = vld [vmem:[#allocation20 + $0x158] sm:$0xff] }
 0x89a   :  { %12057 = vmatpush1.bf16.msra.mxu0 %v14216_v14  ;;  %12221 = vmatpush1.bf16.msra.mxu1 %v14218_v16  ;;  %v8807_v14 = vld [vmem:[#allocation20 + $0x30] sm:$0xff]  ;;  %v8804_v16 = vld [vmem:[#allocation20 + $0x18] sm:$0xff]  ;;  %v15873_v48 = vpack.c.bf16 %v8791_v26, %v8791_v26 }
 0x89b   :  { %12058 = vmatprep.subr.bf16.mxu0 %v14225_v17  ;;  %12222 = vmatprep.subr.bf16.mxu1 %v14227_v20  ;;  %v8808_v17 = vld [vmem:[#allocation20 + $0x38] sm:$0xff]  ;;  %v14264_v20 = vcombine.low %v9305_v59, %v9309_v60  ;;  %v13765_v27 = vcombine.high %v8803_v11, %v8807_v14  ;;  %v8843_v60 = vld [vmem:[#allocation20 + $0x150] sm:$0xff] }
 0x89c   :  { %v13767_v33 = vcombine.high %v8804_v16, %v8808_v17  ;;  %v13766_v41 = vcombine.low %v8804_v16, %v8808_v17  ;;  %v8852_v16 = vld [vmem:[#allocation20 + $0x198] sm:$0xff] }
 0x89d   :  { %v8856_v17 = vld [vmem:[#allocation20 + $0x1b8] sm:$0xff] }
 0x89e   :  { %12059 = vmatpush1.bf16.msra.mxu0 %v14224_v36  ;;  %12223 = vmatpush1.bf16.msra.mxu1 %v14226_v18  ;;  %v8811_v36 = vld [vmem:[#allocation20 + $0x50] sm:$0xff] }
 0x89f   :  { %12060 = vmatprep.subr.bf16.mxu0 %v14233_v23  ;;  %12224 = vmatprep.subr.bf16.mxu1 %v14235_v40  ;;  %v8815_v18 = vld [vmem:[#allocation20 + $0x70] sm:$0xff]  ;;  %v8816_v23 = vld [vmem:[#allocation20 + $0x78] sm:$0xff]  ;;  %v13764_v40 = vcombine.low %v8803_v11, %v8807_v14 }
 0x8a0   :  { %v13773_v9 = vcombine.high %v8811_v36, %v8815_v18  ;;  %v13775_v39 = vcombine.high %v8812_v22, %v8816_v23  ;;  %v13772_v46 = vcombine.low %v8811_v36, %v8815_v18  ;;  %v13774_v47 = vcombine.low %v8812_v22, %v8816_v23  ;;  %v8851_v11 = vld [vmem:[#allocation20 + $0x190] sm:$0xff]  ;;  %v8860_v18 = vld [vmem:[#allocation20 + $0x1d8] sm:$0xff] }
 0x8a1   :  { %v8855_v14 = vld [vmem:[#allocation20 + $0x1b0] sm:$0xff]  ;;  %v8864_v22 = vld [vmem:[#allocation20 + $0x1f8] sm:$0xff] }
 0x8a2   :  { %12061 = vmatpush1.bf16.msra.mxu0 %v14232_v42  ;;  %12225 = vmatpush1.bf16.msra.mxu1 %v14234_v43  ;;  %v8819_v42 = vld [vmem:[#allocation20 + $0x90] sm:$0xff]  ;;  %v13813_v26 = vcombine.high %v8851_v11, %v8855_v14  ;;  %v13812_v23 = vcombine.low %v8851_v11, %v8855_v14  ;;  %v8900_v14 = vld [vmem:[#allocation20 + $0x318] sm:$0xff] }
 0x8a3   :  { %12062 = vmatprep.subr.bf16.mxu0 %v14241_v45  ;;  %12226 = vmatprep.subr.bf16.mxu1 %v14243_v34  ;;  %v8823_v43 = vld [vmem:[#allocation20 + $0xb0] sm:$0xff]  ;;  %v8820_v45 = vld [vmem:[#allocation20 + $0x98] sm:$0xff] }
 0x8a4   :  { %v8824_v34 = vld [vmem:[#allocation20 + $0xb8] sm:$0xff]  ;;  %v13781_v12 = vcombine.high %v8819_v42, %v8823_v43  ;;  %v13780_v38 = vcombine.low %v8819_v42, %v8823_v43  ;;  %v8863_v36 = vld [vmem:[#allocation20 + $0x1f0] sm:$0xff] }
 0x8a5   :  { %v13783_v28 = vcombine.high %v8820_v45, %v8824_v34  ;;  %v13782_v13 = vcombine.low %v8820_v45, %v8824_v34  ;;  %v8871_v42 = vld [vmem:[#allocation20 + $0x230] sm:$0xff]  ;;  %v8868_v43 = vld [vmem:[#allocation20 + $0x218] sm:$0xff] }
 0x8a6   :  { %12063 = vmatpush1.bf16.msra.mxu0 %v14240_v32  ;;  %12227 = vmatpush1.bf16.msra.mxu1 %v14242_v25  ;;  %v8827_v32 = vld [vmem:[#allocation20 + $0xd0] sm:$0xff]  ;;  %v8872_v45 = vld [vmem:[#allocation20 + $0x238] sm:$0xff] }
 0x8a7   :  { %12064 = vmatprep.subr.bf16.mxu0 %v14249_v8  ;;  %12228 = vmatprep.subr.bf16.mxu1 %v14251_v52  ;;  %v8831_v25 = vld [vmem:[#allocation20 + $0xf0] sm:$0xff]  ;;  %v8828_v8 = vld [vmem:[#allocation20 + $0xd8] sm:$0xff] }
 0x8a8   :  { %v8832_v52 = vld [vmem:[#allocation20 + $0xf8] sm:$0xff]  ;;  %v13789_v19 = vcombine.high %v8827_v32, %v8831_v25  ;;  %v13788_v55 = vcombine.low %v8827_v32, %v8831_v25  ;;  %v8879_v32 = vld [vmem:[#allocation20 + $0x270] sm:$0xff] }
 0x8a9   :  { %v13791_v49 = vcombine.high %v8828_v8, %v8832_v52  ;;  %v8876_v25 = vld [vmem:[#allocation20 + $0x258] sm:$0xff]  ;;  %v8903_v11 = vld [vmem:[#allocation20 + $0x330] sm:$0xff] }
 0x8aa   :  { %12065 = vmatpush1.bf16.msra.mxu0 %v14248_v51  ;;  %12229 = vmatpush1.bf16.msra.mxu1 %v14250_v56  ;;  %v8835_v51 = vld [vmem:[#allocation20 + $0x110] sm:$0xff] }
 0x8ab   :  { %12066 = vmatprep.subr.bf16.mxu0 %v14257_v58  ;;  %12230 = vmatprep.subr.bf16.mxu1 %v14259_v54  ;;  %v8839_v56 = vld [vmem:[#allocation20 + $0x130] sm:$0xff]  ;;  %v13790_v58 = vcombine.low %v8828_v8, %v8832_v52  ;;  %v8880_v8 = vld [vmem:[#allocation20 + $0x278] sm:$0xff] }
 0x8ac   :  { %v13797_v54 = vcombine.high %v8835_v51, %v8839_v56 }
 0x8ae   :  { %12067 = vmatpush1.bf16.msra.mxu0 %v14256_v63  ;;  %12231 = vmatpush1.bf16.msra.mxu1 %v14258_v0  ;;  %v8848_v63 = vld [vmem:[#allocation20 + $0x178] sm:$0xff]  ;;  %v13796_v0 = vcombine.low %v8835_v51, %v8839_v56  ;;  %v8887_v51 = vld [vmem:[#allocation20 + $0x2b0] sm:$0xff] }
 0x8af   :  { %12068 = vmatprep.subr.bf16.mxu0 %v14265_v3  ;;  %12232 = vmatprep.subr.bf16.mxu1 %v14267_v10  ;;  %v13805_v3 = vcombine.high %v8843_v60, %v8847_v61  ;;  %v13807_v10 = vcombine.high %v8844_v62, %v8848_v63  ;;  %v8884_v56 = vld [vmem:[#allocation20 + $0x298] sm:$0xff] }
 0x8b2   :  { %12069 = vmatpush1.bf16.msra.mxu0 %v14264_v20  ;;  %12233 = vmatpush1.bf16.msra.mxu1 %v14266_v57  ;;  %v13804_v20 = vcombine.low %v8843_v60, %v8847_v61  ;;  %v13806_v57 = vcombine.low %v8844_v62, %v8848_v63  ;;  %v8895_v60 = vld [vmem:[#allocation20 + $0x2f0] sm:$0xff]  ;;  %v8892_v61 = vld [vmem:[#allocation20 + $0x2d8] sm:$0xff] }
 0x8b3   :  { %12243 = vmatprep.subr.bf16.mxu0 %v13765_v27  ;;  %12407 = vmatprep.subr.bf16.mxu1 %v13767_v33  ;;  %v13815_v27 = vcombine.high %v8852_v16, %v8856_v17  ;;  %v8859_v33 = vld [vmem:[#allocation20 + $0x1d0] sm:$0xff]  ;;  %v8896_v62 = vld [vmem:[#allocation20 + $0x2f8] sm:$0xff] }
 0x8b4   :  { %v13820_v34 = vcombine.low %v8859_v33, %v8863_v36 }
 0x8b5   :  { %12071 = vmatmul.mubr.bf16.vlgmr.msra.gmra.mrb[24].mxu0 %v15873_v48  ;;  %12235 = vmatmul.mubr.bf16.vlgmr.msra.gmra.mrb[28].mxu1 %v15873_v48 }
 0x8b6   :  { %12244 = vmatpush1.bf16.msra.mxu0 %v13764_v40  ;;  %12275 = vmatprep.mubr.bf16.mxu0 %v15832_v21  ;;  %v13814_v40 = vcombine.low %v8852_v16, %v8856_v17  ;;  %v8904_v16 = vld [vmem:[#allocation20 + $0x338] sm:$0xff] }
 0x8b7   :  { %12408 = vmatpush1.bf16.msra.mxu1 %v13766_v41  ;;  %12439 = vmatprep.mubr.bf16.mxu1 %v15832_v21  ;;  %v8836_v21 = vld [vmem:[#allocation20 + $0x118] sm:$0xff]  ;;  %v13821_v41 = vcombine.high %v8859_v33, %v8863_v36  ;;  %v8911_v33 = vld [vmem:[#allocation20 + $0x370] sm:$0xff] }
 0x8b8   :  { %12245 = vmatprep.subr.bf16.mxu0 %v13773_v9  ;;  %12409 = vmatprep.subr.bf16.mxu1 %v13775_v39  ;;  %v13799_v59 = vcombine.high %v8836_v21, %v8840_v53  ;;  %v13798_v2 = vcombine.low %v8836_v21, %v8840_v53  ;;  %v13823_v9 = vcombine.high %v8860_v18, %v8864_v22  ;;  %v8867_v39 = vld [vmem:[#allocation20 + $0x210] sm:$0xff]  ;;  %v8888_v21 = vld [vmem:[#allocation20 + $0x2b8] sm:$0xff] }
 0x8b9   :  { %v13828_v52 = vcombine.low %v8867_v39, %v8871_v42  ;;  %v8908_v36 = vld [vmem:[#allocation20 + $0x358] sm:$0xff] }
 0x8ba   :  { %12246 = vmatpush1.bf16.msra.mxu0 %v13772_v46  ;;  %v13822_v46 = vcombine.low %v8860_v18, %v8864_v22  ;;  %v8912_v18 = vld [vmem:[#allocation20 + $0x378] sm:$0xff] }
 0x8bb   :  { %12410 = vmatpush1.bf16.msra.mxu1 %v13774_v47  ;;  %12247 = vmatprep.subr.bf16.mxu0 %v13781_v12  ;;  %v13829_v47 = vcombine.high %v8867_v39, %v8871_v42  ;;  %v13831_v12 = vcombine.high %v8868_v43, %v8872_v45  ;;  %v8919_v39 = vld [vmem:[#allocation20 + $0x3b0] sm:$0xff]  ;;  %v8916_v42 = vld [vmem:[#allocation20 + $0x398] sm:$0xff] }
 0x8bc   :  { %12411 = vmatprep.subr.bf16.mxu1 %v13783_v28  ;;  %v8875_v28 = vld [vmem:[#allocation20 + $0x250] sm:$0xff] }
 0x8bd   :  { %v13836_v53 = vcombine.low %v8875_v28, %v8879_v32 }
 0x8be   :  { %12248 = vmatpush1.bf16.msra.mxu0 %v13780_v38  ;;  %v13830_v38 = vcombine.low %v8868_v43, %v8872_v45  ;;  %v8920_v43 = vld [vmem:[#allocation20 + $0x3b8] sm:$0xff] }
 0x8bf   :  { %12412 = vmatpush1.bf16.msra.mxu1 %v13782_v13  ;;  %12249 = vmatprep.subr.bf16.mxu0 %v13789_v19  ;;  %v13837_v13 = vcombine.high %v8875_v28, %v8879_v32  ;;  %v13839_v19 = vcombine.high %v8876_v25, %v8880_v8  ;;  %v8927_v28 = vld [vmem:[#allocation20 + $0x3f0] sm:$0xff]  ;;  %v8924_v32 = vld [vmem:[#allocation20 + $0x3d8] sm:$0xff] }
 0x8c0   :  { %12413 = vmatprep.subr.bf16.mxu1 %v13791_v49  ;;  %v8883_v49 = vld [vmem:[#allocation20 + $0x290] sm:$0xff] }
 0x8c1   :  { %v13844_v63 = vcombine.low %v8883_v49, %v8887_v51 }
 0x8c2   :  { %12250 = vmatpush1.bf16.msra.mxu0 %v13788_v55  ;;  %v13838_v55 = vcombine.low %v8876_v25, %v8880_v8  ;;  %v8928_v25 = vld [vmem:[#allocation20 + $0x3f8] sm:$0xff] }
 0x8c3   :  { %12414 = vmatpush1.bf16.msra.mxu1 %v13790_v58  ;;  %12251 = vmatprep.subr.bf16.mxu0 %v13797_v54  ;;  %v13845_v58 = vcombine.high %v8883_v49, %v8887_v51  ;;  %v13847_v54 = vcombine.high %v8884_v56, %v8888_v21  ;;  %v8935_v49 = vld [vmem:[#allocation20 + $0x430] sm:$0xff]  ;;  %v8932_v51 = vld [vmem:[#allocation20 + $0x418] sm:$0xff] }
 0x8c4   :  { %12415 = vmatprep.subr.bf16.mxu1 %v13799_v59  ;;  %v8891_v59 = vld [vmem:[#allocation20 + $0x2d0] sm:$0xff] }
 0x8c5   :  { %v13852_v17 = vcombine.low %v8891_v59, %v8895_v60 }
 0x8c6   :  { %12252 = vmatpush1.bf16.msra.mxu0 %v13796_v0  ;;  %v13846_v0 = vcombine.low %v8884_v56, %v8888_v21  ;;  %v8936_v56 = vld [vmem:[#allocation20 + $0x438] sm:$0xff] }
 0x8c7   :  { %12416 = vmatpush1.bf16.msra.mxu1 %v13798_v2  ;;  %12253 = vmatprep.subr.bf16.mxu0 %v13805_v3  ;;  %v13853_v2 = vcombine.high %v8891_v59, %v8895_v60  ;;  %v13855_v3 = vcombine.high %v8892_v61, %v8896_v62  ;;  %v8943_v59 = vld [vmem:[#allocation20 + $0x470] sm:$0xff] }
 0x8c8   :  { %12417 = vmatprep.subr.bf16.mxu1 %v13807_v10  ;;  %v8899_v10 = vld [vmem:[#allocation20 + $0x310] sm:$0xff] }
 0x8c9   :  { %v13860_v22 = vcombine.low %v8899_v10, %v8903_v11 }
 0x8ca   :  { %12254 = vmatpush1.bf16.msra.mxu0 %v13804_v20  ;;  %v13854_v20 = vcombine.low %v8892_v61, %v8896_v62  ;;  %v8940_v61 = vld [vmem:[#allocation20 + $0x458] sm:$0xff] }
 0x8cb   :  { %12418 = vmatpush1.bf16.msra.mxu1 %v13806_v57  ;;  %12255 = vmatprep.subr.bf16.mxu0 %v13813_v26  ;;  %v13861_v57 = vcombine.high %v8899_v10, %v8903_v11  ;;  %v13863_v26 = vcombine.high %v8900_v14, %v8904_v16  ;;  %v8944_v62 = vld [vmem:[#allocation20 + $0x478] sm:$0xff] }
 0x8cc   :  { %12419 = vmatprep.subr.bf16.mxu1 %v13815_v27  ;;  %v8907_v27 = vld [vmem:[#allocation20 + $0x350] sm:$0xff]  ;;  %v13903_v10 = vcombine.high %v8940_v61, %v8944_v62  ;;  %v8948_v11 = vld [vmem:[#allocation20 + $0x498] sm:$0xff] }
 0x8cd   :  { %v13868_v45 = vcombine.low %v8907_v27, %v8911_v33 }
 0x8ce   :  { %12256 = vmatpush1.bf16.msra.mxu0 %v13812_v23  ;;  %v13862_v23 = vcombine.low %v8900_v14, %v8904_v16  ;;  %v8952_v14 = vld [vmem:[#allocation20 + $0x4b8] sm:$0xff] }
 0x8cf   :  { %12420 = vmatpush1.bf16.msra.mxu1 %v13814_v40  ;;  %12257 = vmatprep.subr.bf16.mxu0 %v13821_v41  ;;  %v13869_v40 = vcombine.high %v8907_v27, %v8911_v33  ;;  %v13871_v41 = vcombine.high %v8908_v36, %v8912_v18  ;;  %v8959_v27 = vld [vmem:[#allocation20 + $0x4f0] sm:$0xff]  ;;  %v8956_v33 = vld [vmem:[#allocation20 + $0x4d8] sm:$0xff] }
 0x8d0   :  { %12421 = vmatprep.subr.bf16.mxu1 %v13823_v9  ;;  %v8915_v9 = vld [vmem:[#allocation20 + $0x390] sm:$0xff] }
 0x8d1   :  { %v13876_v8 = vcombine.low %v8915_v9, %v8919_v39 }
 0x8d2   :  { %12258 = vmatpush1.bf16.msra.mxu0 %v13820_v34  ;;  %v13870_v34 = vcombine.low %v8908_v36, %v8912_v18  ;;  %v8960_v36 = vld [vmem:[#allocation20 + $0x4f8] sm:$0xff] }
 0x8d3   :  { %12422 = vmatpush1.bf16.msra.mxu1 %v13822_v46  ;;  %12259 = vmatprep.subr.bf16.mxu0 %v13829_v47  ;;  %v13877_v46 = vcombine.high %v8915_v9, %v8919_v39  ;;  %v13879_v47 = vcombine.high %v8916_v42, %v8920_v43  ;;  %v8964_v9 = vld [vmem:[#allocation20 + $0x518] sm:$0xff] }
 0x8d4   :  { %12423 = vmatprep.subr.bf16.mxu1 %v13831_v12  ;;  %v8923_v12 = vld [vmem:[#allocation20 + $0x3d0] sm:$0xff]  ;;  %v8968_v39 = vld [vmem:[#allocation20 + $0x538] sm:$0xff] }
 0x8d5   :  { %v13884_v21 = vcombine.low %v8923_v12, %v8927_v28 }
 0x8d6   :  { %12260 = vmatpush1.bf16.msra.mxu0 %v13828_v52  ;;  %v13878_v52 = vcombine.low %v8916_v42, %v8920_v43  ;;  %v13918_v42 = vcombine.low %v8956_v33, %v8960_v36 }
 0x8d7   :  { %12424 = vmatpush1.bf16.msra.mxu1 %v13830_v38  ;;  %12261 = vmatprep.subr.bf16.mxu0 %v13837_v13  ;;  %v13885_v38 = vcombine.high %v8923_v12, %v8927_v28  ;;  %v13887_v13 = vcombine.high %v8924_v32, %v8928_v25  ;;  %v8976_v12 = vld [vmem:[#allocation20 + $0x578] sm:$0xff] }
 0x8d8   :  { %12425 = vmatprep.subr.bf16.mxu1 %v13839_v19  ;;  %v8931_v19 = vld [vmem:[#allocation20 + $0x410] sm:$0xff] }
 0x8d9   :  { %v13892_v60 = vcombine.low %v8931_v19, %v8935_v49 }
 0x8da   :  { %12262 = vmatpush1.bf16.msra.mxu0 %v13836_v53  ;;  %v13886_v53 = vcombine.low %v8924_v32, %v8928_v25  ;;  %v13926_v32 = vcombine.low %v8964_v9, %v8968_v39 }
 0x8db   :  { %12426 = vmatpush1.bf16.msra.mxu1 %v13838_v55  ;;  %12263 = vmatprep.subr.bf16.mxu0 %v13845_v58  ;;  %v13893_v55 = vcombine.high %v8931_v19, %v8935_v49  ;;  %v13895_v58 = vcombine.high %v8932_v51, %v8936_v56  ;;  %v8984_v19 = vld [vmem:[#allocation20 + $0x5b8] sm:$0xff] }
 0x8dc   :  { %12427 = vmatprep.subr.bf16.mxu1 %v13847_v54  ;;  %v8939_v54 = vld [vmem:[#allocation20 + $0x450] sm:$0xff] }
 0x8dd   :  { %v13900_v16 = vcombine.low %v8939_v54, %v8943_v59 }
 0x8de   :  { %12264 = vmatpush1.bf16.msra.mxu0 %v13844_v63  ;;  %v13894_v63 = vcombine.low %v8932_v51, %v8936_v56 }
 0x8df   :  { %12428 = vmatpush1.bf16.msra.mxu1 %v13846_v0  ;;  %12265 = vmatprep.subr.bf16.mxu0 %v13853_v2  ;;  %v13901_v0 = vcombine.high %v8939_v54, %v8943_v59  ;;  %v8947_v2 = vld [vmem:[#allocation20 + $0x490] sm:$0xff]  ;;  %v8992_v54 = vld [vmem:[#allocation20 + $0x5f8] sm:$0xff] }
 0x8e0   :  { %12429 = vmatprep.subr.bf16.mxu1 %v13855_v3  ;;  %v8951_v3 = vld [vmem:[#allocation20 + $0x4b0] sm:$0xff] }
 0x8e1   :  { %v13908_v18 = vcombine.low %v8947_v2, %v8951_v3 }
 0x8e2   :  { %12266 = vmatpush1.bf16.msra.mxu0 %v13852_v17  ;;  %v13902_v17 = vcombine.low %v8940_v61, %v8944_v62 }
 0x8e3   :  { %12430 = vmatpush1.bf16.msra.mxu1 %v13854_v20  ;;  %12267 = vmatprep.subr.bf16.mxu0 %v13861_v57  ;;  %v13909_v20 = vcombine.high %v8947_v2, %v8951_v3  ;;  %v13911_v57 = vcombine.high %v8948_v11, %v8952_v14  ;;  %v8996_v2 = vld [vmem:[#allocation20 + $0x618] sm:$0xff] }
 0x8e4   :  { %12431 = vmatprep.subr.bf16.mxu1 %v13863_v26  ;;  %v8955_v26 = vld [vmem:[#allocation20 + $0x4d0] sm:$0xff]  ;;  %v9000_v3 = vld [vmem:[#allocation20 + $0x638] sm:$0xff] }
 0x8e6   :  { %12268 = vmatpush1.bf16.msra.mxu0 %v13860_v22  ;;  %v13917_v22 = vcombine.high %v8955_v26, %v8959_v27 }
 0x8e7   :  { %12432 = vmatpush1.bf16.msra.mxu1 %v13862_v23  ;;  %12269 = vmatprep.subr.bf16.mxu0 %v13869_v40  ;;  %v13919_v23 = vcombine.high %v8956_v33, %v8960_v36  ;;  %v8963_v40 = vld [vmem:[#allocation20 + $0x510] sm:$0xff]  ;;  %v13958_v33 = vcombine.low %v8996_v2, %v9000_v3 }
 0x8e8   :  { %12433 = vmatprep.subr.bf16.mxu1 %v13871_v41  ;;  %v8967_v41 = vld [vmem:[#allocation20 + $0x530] sm:$0xff] }
 0x8e9   :  { %v13925_v43 = vcombine.high %v8963_v40, %v8967_v41  ;;  %v13924_v28 = vcombine.low %v8963_v40, %v8967_v41  ;;  %v9016_v40 = vld [vmem:[#allocation20 + $0x6b8] sm:$0xff] }
 0x8ea   :  { %12270 = vmatpush1.bf16.msra.mxu0 %v13868_v45  ;;  %v13927_v45 = vcombine.high %v8964_v9, %v8968_v39 }
 0x8eb   :  { %12434 = vmatpush1.bf16.msra.mxu1 %v13870_v34  ;;  %12271 = vmatprep.subr.bf16.mxu0 %v13877_v46  ;;  %v8971_v34 = vld [vmem:[#allocation20 + $0x550] sm:$0xff] }
 0x8ec   :  { %12435 = vmatprep.subr.bf16.mxu1 %v13879_v47  ;;  %v8975_v46 = vld [vmem:[#allocation20 + $0x570] sm:$0xff]  ;;  %v8972_v47 = vld [vmem:[#allocation20 + $0x558] sm:$0xff] }
 0x8ed   :  { %v13933_v25 = vcombine.high %v8971_v34, %v8975_v46  ;;  %v13932_v49 = vcombine.low %v8971_v34, %v8975_v46  ;;  %v13934_v51 = vcombine.low %v8972_v47, %v8976_v12  ;;  %v9024_v34 = vld [vmem:[#allocation20 + $0x6f8] sm:$0xff] }
 0x8ee   :  { %12272 = vmatpush1.bf16.msra.mxu0 %v13876_v8  ;;  %v13935_v8 = vcombine.high %v8972_v47, %v8976_v12 }
 0x8ef   :  { %12436 = vmatpush1.bf16.msra.mxu1 %v13878_v52  ;;  %12273 = vmatprep.subr.bf16.mxu0 %v13885_v38  ;;  %v8979_v52 = vld [vmem:[#allocation20 + $0x590] sm:$0xff] }
 0x8f0   :  { %12437 = vmatprep.subr.bf16.mxu1 %v13887_v13  ;;  %v8983_v38 = vld [vmem:[#allocation20 + $0x5b0] sm:$0xff]  ;;  %v8980_v13 = vld [vmem:[#allocation20 + $0x598] sm:$0xff] }
 0x8f1   :  { %v13941_v56 = vcombine.high %v8979_v52, %v8983_v38  ;;  %v13940_v59 = vcombine.low %v8979_v52, %v8983_v38  ;;  %v9032_v52 = vld [vmem:[#allocation20 + $0x738] sm:$0xff] }
 0x8f2   :  { %12274 = vmatpush1.bf16.msra.mxu0 %v13884_v21  ;;  %v13943_v21 = vcombine.high %v8980_v13, %v8984_v19 }
 0x8f3   :  { %12438 = vmatpush1.bf16.msra.mxu1 %v13886_v53  ;;  %12284 = vmatprep.subr.bf16.mxu0 %v13893_v55  ;;  %v8987_v53 = vld [vmem:[#allocation20 + $0x5d0] sm:$0xff] }
 0x8f4   :  { %12448 = vmatprep.subr.bf16.mxu1 %v13895_v58  ;;  %v8991_v55 = vld [vmem:[#allocation20 + $0x5f0] sm:$0xff]  ;;  %v8988_v58 = vld [vmem:[#allocation20 + $0x5d8] sm:$0xff] }
 0x8f5   :  { %12276 = vmatmul.mubr.bf16.vlgmr.msra.gmra.mrb[28].mxu0 %v15834_v24  ;;  %v13949_v61 = vcombine.high %v8987_v53, %v8991_v55  ;;  %v13951_v62 = vcombine.high %v8988_v58, %v8992_v54 }
 0x8f6   :  { %12440 = vmatmul.mubr.bf16.vlgmr.msra.gmra.mrb[32].mxu1 %v15834_v24  ;;  %12285 = vmatpush1.bf16.msra.mxu0 %v13892_v60  ;;  %v13910_v24 = vcombine.low %v8948_v11, %v8952_v14  ;;  %v13942_v60 = vcombine.low %v8980_v13, %v8984_v19  ;;  %v13950_v11 = vcombine.low %v8988_v58, %v8992_v54 }
 0x8f7   :  { %12316 = vmatprep.mubr.bf16.mxu0 %v15838_v1  ;;  %12449 = vmatpush1.bf16.msra.mxu1 %v13894_v63  ;;  %v8995_v63 = vld [vmem:[#allocation20 + $0x610] sm:$0xff] }
 0x8f8   :  { %12480 = vmatprep.mubr.bf16.mxu1 %v15838_v1  ;;  %12286 = vmatprep.subr.bf16.mxu0 %v13901_v0  ;;  %v13916_v1 = vcombine.low %v8955_v26, %v8959_v27  ;;  %v8999_v0 = vld [vmem:[#allocation20 + $0x630] sm:$0xff]  ;;  %v9008_v26 = vld [vmem:[#allocation20 + $0x678] sm:$0xff] }
 0x8f9   :  { %12450 = vmatprep.subr.bf16.mxu1 %v13903_v10  ;;  %v13948_v10 = vcombine.low %v8987_v53, %v8991_v55  ;;  %v13957_v14 = vcombine.high %v8995_v63, %v8999_v0  ;;  %v13956_v27 = vcombine.low %v8995_v63, %v8999_v0  ;;  %v9040_v53 = vld [vmem:[#allocation20 + $0x778] sm:$0xff] }
 0x8fa   :  { %12287 = vmatpush1.bf16.msra.mxu0 %v13900_v16  ;;  %v13959_v16 = vcombine.high %v8996_v2, %v9000_v3  ;;  %v9048_v63 = vld [vmem:[#allocation20 + $0x7b8] sm:$0xff] }
 0x8fb   :  { %12451 = vmatpush1.bf16.msra.mxu1 %v13902_v17  ;;  %12288 = vmatprep.subr.bf16.mxu0 %v13909_v20  ;;  %v9003_v17 = vld [vmem:[#allocation20 + $0x650] sm:$0xff] }
 0x8fc   :  { %12452 = vmatprep.subr.bf16.mxu1 %v13911_v57  ;;  %v9007_v20 = vld [vmem:[#allocation20 + $0x670] sm:$0xff]  ;;  %v9004_v57 = vld [vmem:[#allocation20 + $0x658] sm:$0xff] }
 0x8fd   :  { %v13965_v36 = vcombine.high %v9003_v17, %v9007_v20  ;;  %v13964_v41 = vcombine.low %v9003_v17, %v9007_v20  ;;  %v13966_v9 = vcombine.low %v9004_v57, %v9008_v26  ;;  %v9056_v17 = vld [vmem:[#allocation20 + $0x7f8] sm:$0xff] }
 0x8fe   :  { %12289 = vmatpush1.bf16.msra.mxu0 %v13908_v18  ;;  %v13967_v18 = vcombine.high %v9004_v57, %v9008_v26 }
 0x8ff   :  { %12453 = vmatpush1.bf16.msra.mxu1 %v13910_v24  ;;  %12290 = vmatprep.subr.bf16.mxu0 %v13917_v22  ;;  %v9011_v24 = vld [vmem:[#allocation20 + $0x690] sm:$0xff] }
 0x900   :  { %12454 = vmatprep.subr.bf16.mxu1 %v13919_v23  ;;  %v9015_v22 = vld [vmem:[#allocation20 + $0x6b0] sm:$0xff]  ;;  %v9012_v23 = vld [vmem:[#allocation20 + $0x698] sm:$0xff] }
 0x901   :  { %v13973_v39 = vcombine.high %v9011_v24, %v9015_v22  ;;  %v13972_v46 = vcombine.low %v9011_v24, %v9015_v22  ;;  %v13974_v47 = vcombine.low %v9012_v23, %v9016_v40  ;;  %v9064_v24 = vld [vmem:[#allocation20 + $0x838] sm:$0xff] }
 0x902   :  { %12291 = vmatpush1.bf16.msra.mxu0 %v13916_v1  ;;  %v13975_v1 = vcombine.high %v9012_v23, %v9016_v40 }
 0x903   :  { %12455 = vmatpush1.bf16.msra.mxu1 %v13918_v42  ;;  %12292 = vmatprep.subr.bf16.mxu0 %v13925_v43  ;;  %v9019_v42 = vld [vmem:[#allocation20 + $0x6d0] sm:$0xff] }
 0x904   :  { %12456 = vmatprep.subr.bf16.mxu1 %v13927_v45  ;;  %v9023_v43 = vld [vmem:[#allocation20 + $0x6f0] sm:$0xff]  ;;  %v9020_v45 = vld [vmem:[#allocation20 + $0x6d8] sm:$0xff] }
 0x905   :  { %v13981_v12 = vcombine.high %v9019_v42, %v9023_v43  ;;  %v13980_v38 = vcombine.low %v9019_v42, %v9023_v43  ;;  %v13982_v13 = vcombine.low %v9020_v45, %v9024_v34  ;;  %v9068_v42 = vld [vmem:[#allocation20 + $0x858] sm:$0xff] }
 0x906   :  { %12293 = vmatpush1.bf16.msra.mxu0 %v13924_v28  ;;  %v13983_v28 = vcombine.high %v9020_v45, %v9024_v34  ;;  %v9072_v43 = vld [vmem:[#allocation20 + $0x878] sm:$0xff] }
 0x907   :  { %12457 = vmatpush1.bf16.msra.mxu1 %v13926_v32  ;;  %12294 = vmatprep.subr.bf16.mxu0 %v13933_v25  ;;  %v9027_v32 = vld [vmem:[#allocation20 + $0x710] sm:$0xff] }
 0x908   :  { %12458 = vmatprep.subr.bf16.mxu1 %v13935_v8  ;;  %v9031_v25 = vld [vmem:[#allocation20 + $0x730] sm:$0xff]  ;;  %v9028_v8 = vld [vmem:[#allocation20 + $0x718] sm:$0xff] }
 0x909   :  { %v13989_v19 = vcombine.high %v9027_v32, %v9031_v25  ;;  %v13988_v55 = vcombine.low %v9027_v32, %v9031_v25  ;;  %v13990_v58 = vcombine.low %v9028_v8, %v9032_v52  ;;  %v9080_v32 = vld [vmem:[#allocation20 + $0x8b8] sm:$0xff] }
 0x90a   :  { %12295 = vmatpush1.bf16.msra.mxu0 %v13932_v49  ;;  %v13991_v49 = vcombine.high %v9028_v8, %v9032_v52  ;;  %v14030_v8 = vcombine.low %v9068_v42, %v9072_v43 }
 0x90b   :  { %12459 = vmatpush1.bf16.msra.mxu1 %v13934_v51  ;;  %12296 = vmatprep.subr.bf16.mxu0 %v13941_v56  ;;  %v9035_v51 = vld [vmem:[#allocation20 + $0x750] sm:$0xff] }
 0x90c   :  { %12460 = vmatprep.subr.bf16.mxu1 %v13943_v21  ;;  %v9039_v56 = vld [vmem:[#allocation20 + $0x770] sm:$0xff]  ;;  %v9036_v21 = vld [vmem:[#allocation20 + $0x758] sm:$0xff] }
 0x90d   :  { %v13997_v54 = vcombine.high %v9035_v51, %v9039_v56  ;;  %v13996_v0 = vcombine.low %v9035_v51, %v9039_v56  ;;  %v13998_v2 = vcombine.low %v9036_v21, %v9040_v53  ;;  %v9088_v51 = vld [vmem:[#allocation20 + $0x8f8] sm:$0xff] }
 0x90e   :  { %12297 = vmatpush1.bf16.msra.mxu0 %v13940_v59  ;;  %v13999_v59 = vcombine.high %v9036_v21, %v9040_v53 }
 0x90f   :  { %12461 = vmatpush1.bf16.msra.mxu1 %v13942_v60  ;;  %12298 = vmatprep.subr.bf16.mxu0 %v13949_v61  ;;  %v9043_v60 = vld [vmem:[#allocation20 + $0x790] sm:$0xff] }
 0x910   :  { %12462 = vmatprep.subr.bf16.mxu1 %v13951_v62  ;;  %v9047_v61 = vld [vmem:[#allocation20 + $0x7b0] sm:$0xff]  ;;  %v9044_v62 = vld [vmem:[#allocation20 + $0x798] sm:$0xff] }
 0x911   :  { %v14005_v3 = vcombine.high %v9043_v60, %v9047_v61  ;;  %v14004_v20 = vcombine.low %v9043_v60, %v9047_v61  ;;  %v14006_v57 = vcombine.low %v9044_v62, %v9048_v63 }
 0x912   :  { %12299 = vmatpush1.bf16.msra.mxu0 %v13948_v10  ;;  %v14007_v10 = vcombine.high %v9044_v62, %v9048_v63  ;;  %v9099_v63 = vld [vmem:[#allocation20 + $0x950] sm:$0xff] }
 0x913   :  { %12463 = vmatpush1.bf16.msra.mxu1 %v13950_v11  ;;  %12300 = vmatprep.subr.bf16.mxu0 %v13957_v14  ;;  %v9051_v11 = vld [vmem:[#allocation20 + $0x7d0] sm:$0xff] }
 0x914   :  { %12464 = vmatprep.subr.bf16.mxu1 %v13959_v16  ;;  %v9055_v14 = vld [vmem:[#allocation20 + $0x7f0] sm:$0xff]  ;;  %v9052_v16 = vld [vmem:[#allocation20 + $0x7d8] sm:$0xff] }
 0x915   :  { %v14013_v26 = vcombine.high %v9051_v11, %v9055_v14  ;;  %v14012_v22 = vcombine.low %v9051_v11, %v9055_v14  ;;  %v14014_v23 = vcombine.low %v9052_v16, %v9056_v17 }
 0x916   :  { %12301 = vmatpush1.bf16.msra.mxu0 %v13956_v27  ;;  %v14015_v27 = vcombine.high %v9052_v16, %v9056_v17  ;;  %v9107_v17 = vld [vmem:[#allocation20 + $0x990] sm:$0xff] }
 0x917   :  { %12465 = vmatpush1.bf16.msra.mxu1 %v13958_v33  ;;  %12302 = vmatprep.subr.bf16.mxu0 %v13965_v36  ;;  %v9059_v33 = vld [vmem:[#allocation20 + $0x810] sm:$0xff] }
 0x918   :  { %12466 = vmatprep.subr.bf16.mxu1 %v13967_v18  ;;  %v9063_v36 = vld [vmem:[#allocation20 + $0x830] sm:$0xff]  ;;  %v9060_v18 = vld [vmem:[#allocation20 + $0x818] sm:$0xff] }
 0x919   :  { %v14021_v40 = vcombine.high %v9059_v33, %v9063_v36  ;;  %v14022_v45 = vcombine.low %v9060_v18, %v9064_v24 }
 0x91a   :  { %12303 = vmatpush1.bf16.msra.mxu0 %v13964_v41  ;;  %v14023_v41 = vcombine.high %v9060_v18, %v9064_v24  ;;  %v9115_v24 = vld [vmem:[#allocation20 + $0x9d0] sm:$0xff] }
 0x91b   :  { %12467 = vmatpush1.bf16.msra.mxu1 %v13966_v9  ;;  %12304 = vmatprep.subr.bf16.mxu0 %v13973_v39  ;;  %v9067_v9 = vld [vmem:[#allocation20 + $0x850] sm:$0xff] }
 0x91c   :  { %12468 = vmatprep.subr.bf16.mxu1 %v13975_v1  ;;  %v9071_v39 = vld [vmem:[#allocation20 + $0x870] sm:$0xff]  ;;  %v14020_v1 = vcombine.low %v9059_v33, %v9063_v36 }
 0x91d   :  { %v14029_v34 = vcombine.high %v9067_v9, %v9071_v39  ;;  %v14028_v25 = vcombine.low %v9067_v9, %v9071_v39 }
 0x91e   :  { %12305 = vmatpush1.bf16.msra.mxu0 %v13972_v46  ;;  %v9075_v46 = vld [vmem:[#allocation20 + $0x890] sm:$0xff] }
 0x91f   :  { %12469 = vmatpush1.bf16.msra.mxu1 %v13974_v47  ;;  %12306 = vmatprep.subr.bf16.mxu0 %v13981_v12  ;;  %v9079_v47 = vld [vmem:[#allocation20 + $0x8b0] sm:$0xff]  ;;  %v14031_v12 = vcombine.high %v9068_v42, %v9072_v43 }
 0x920   :  { %12470 = vmatprep.subr.bf16.mxu1 %v13983_v28  ;;  %v9076_v28 = vld [vmem:[#allocation20 + $0x898] sm:$0xff]  ;;  %v14037_v52 = vcombine.high %v9075_v46, %v9079_v47  ;;  %v14036_v56 = vcombine.low %v9075_v46, %v9079_v47  ;;  %v9123_v42 = vld [vmem:[#allocation20 + $0xa10] sm:$0xff] }
 0x921   :  { %v9127_v43 = vld [vmem:[#allocation20 + $0xa30] sm:$0xff] }
 0x922   :  { %12307 = vmatpush1.bf16.msra.mxu0 %v13980_v38  ;;  %v14039_v38 = vcombine.high %v9076_v28, %v9080_v32 }
 0x923   :  { %12471 = vmatpush1.bf16.msra.mxu1 %v13982_v13  ;;  %12308 = vmatprep.subr.bf16.mxu0 %v13989_v19  ;;  %v9083_v13 = vld [vmem:[#allocation20 + $0x8d0] sm:$0xff] }
 0x924   :  { %12472 = vmatprep.subr.bf16.mxu1 %v13991_v49  ;;  %v9087_v19 = vld [vmem:[#allocation20 + $0x8f0] sm:$0xff]  ;;  %v9084_v49 = vld [vmem:[#allocation20 + $0x8d8] sm:$0xff] }
 0x925   :  { %v14045_v21 = vcombine.high %v9083_v13, %v9087_v19  ;;  %v14047_v53 = vcombine.high %v9084_v49, %v9088_v51  ;;  %v14046_v60 = vcombine.low %v9084_v49, %v9088_v51  ;;  %v9139_v51 = vld [vmem:[#allocation20 + $0xa90] sm:$0xff] }
 0x926   :  { %12309 = vmatpush1.bf16.msra.mxu0 %v13988_v55  ;;  %v9091_v55 = vld [vmem:[#allocation20 + $0x910] sm:$0xff] }
 0x927   :  { %12473 = vmatpush1.bf16.msra.mxu1 %v13990_v58  ;;  %12310 = vmatprep.subr.bf16.mxu0 %v13997_v54  ;;  %v9095_v58 = vld [vmem:[#allocation20 + $0x930] sm:$0xff]  ;;  %v9092_v54 = vld [vmem:[#allocation20 + $0x918] sm:$0xff] }
 0x928   :  { %12474 = vmatprep.subr.bf16.mxu1 %v13999_v59  ;;  %v9096_v59 = vld [vmem:[#allocation20 + $0x938] sm:$0xff]  ;;  %v14053_v61 = vcombine.high %v9091_v55, %v9095_v58 }
 0x929   :  { %v14055_v62 = vcombine.high %v9092_v54, %v9096_v59  ;;  %v14054_v11 = vcombine.low %v9092_v54, %v9096_v59  ;;  %v9147_v59 = vld [vmem:[#allocation20 + $0xad0] sm:$0xff] }
 0x92a   :  { %12311 = vmatpush1.bf16.msra.mxu0 %v13996_v0  ;;  %v9103_v0 = vld [vmem:[#allocation20 + $0x970] sm:$0xff] }
 0x92b   :  { %12475 = vmatpush1.bf16.msra.mxu1 %v13998_v2  ;;  %12312 = vmatprep.subr.bf16.mxu0 %v14005_v3  ;;  %v9100_v2 = vld [vmem:[#allocation20 + $0x958] sm:$0xff]  ;;  %v14061_v14 = vcombine.high %v9099_v63, %v9103_v0 }
 0x92c   :  { %12476 = vmatprep.subr.bf16.mxu1 %v14007_v10  ;;  %v9104_v3 = vld [vmem:[#allocation20 + $0x978] sm:$0xff]  ;;  %v14052_v10 = vcombine.low %v9091_v55, %v9095_v58 }
 0x92d   :  { %v14063_v16 = vcombine.high %v9100_v2, %v9104_v3  ;;  %v14062_v33 = vcombine.low %v9100_v2, %v9104_v3  ;;  %v9155_v3 = vld [vmem:[#allocation20 + $0xb10] sm:$0xff] }
 0x92e   :  { %12313 = vmatpush1.bf16.msra.mxu0 %v14004_v20  ;;  %v9111_v20 = vld [vmem:[#allocation20 + $0x9b0] sm:$0xff] }
 0x92f   :  { %12477 = vmatpush1.bf16.msra.mxu1 %v14006_v57  ;;  %12314 = vmatprep.subr.bf16.mxu0 %v14013_v26  ;;  %v9108_v57 = vld [vmem:[#allocation20 + $0x998] sm:$0xff]  ;;  %v14069_v36 = vcombine.high %v9107_v17, %v9111_v20 }
 0x930   :  { %12478 = vmatprep.subr.bf16.mxu1 %v14015_v27  ;;  %v9112_v26 = vld [vmem:[#allocation20 + $0x9b8] sm:$0xff]  ;;  %v14060_v27 = vcombine.low %v9099_v63, %v9103_v0 }
 0x931   :  { %v14071_v18 = vcombine.high %v9108_v57, %v9112_v26  ;;  %v14070_v9 = vcombine.low %v9108_v57, %v9112_v26  ;;  %v9163_v26 = vld [vmem:[#allocation20 + $0xb50] sm:$0xff] }
 0x932   :  { %12315 = vmatpush1.bf16.msra.mxu0 %v14012_v22  ;;  %v9119_v22 = vld [vmem:[#allocation20 + $0x9f0] sm:$0xff] }
 0x933   :  { %12479 = vmatpush1.bf16.msra.mxu1 %v14014_v23  ;;  %12325 = vmatprep.subr.bf16.mxu0 %v14021_v40  ;;  %v9116_v23 = vld [vmem:[#allocation20 + $0x9d8] sm:$0xff]  ;;  %v14077_v39 = vcombine.high %v9115_v24, %v9119_v22  ;;  %v14076_v46 = vcombine.low %v9115_v24, %v9119_v22 }
 0x934   :  { %12489 = vmatprep.subr.bf16.mxu1 %v14023_v41  ;;  %v9120_v40 = vld [vmem:[#allocation20 + $0x9f8] sm:$0xff]  ;;  %v14068_v41 = vcombine.low %v9107_v17, %v9111_v20 }
 0x935   :  { %12317 = vmatmul.mubr.bf16.vlgmr.msra.gmra.mrb[28].mxu0 %v15847_v50  ;;  %v14078_v47 = vcombine.low %v9116_v23, %v9120_v40 }
 0x936   :  { %12481 = vmatmul.mubr.bf16.vlgmr.msra.gmra.mrb[32].mxu1 %v15847_v50  ;;  %12326 = vmatpush1.bf16.msra.mxu0 %v14020_v1  ;;  %v14038_v50 = vcombine.low %v9076_v28, %v9080_v32  ;;  %v14079_v1 = vcombine.high %v9116_v23, %v9120_v40  ;;  %v9131_v32 = vld [vmem:[#allocation20 + $0xa50] sm:$0xff] }
 0x937   :  { %12357 = vmatprep.mubr.bf16.mxu0 %v15859_v31  ;;  %12490 = vmatpush1.bf16.msra.mxu1 %v14022_v45  ;;  %v9124_v45 = vld [vmem:[#allocation20 + $0xa18] sm:$0xff]  ;;  %v9171_v40 = vld [vmem:[#allocation20 + $0xb90] sm:$0xff] }
 0x938   :  { %12521 = vmatprep.mubr.bf16.mxu1 %v15859_v31  ;;  %12327 = vmatprep.subr.bf16.mxu0 %v14029_v34  ;;  %v14044_v31 = vcombine.low %v9083_v13, %v9087_v19  ;;  %v9128_v34 = vld [vmem:[#allocation20 + $0xa38] sm:$0xff] }
 0x939   :  { %12491 = vmatprep.subr.bf16.mxu1 %v14031_v12  ;;  %v14085_v12 = vcombine.high %v9123_v42, %v9127_v43  ;;  %v14087_v28 = vcombine.high %v9124_v45, %v9128_v34  ;;  %v14086_v13 = vcombine.low %v9124_v45, %v9128_v34  ;;  %v9179_v34 = vld [vmem:[#allocation20 + $0xbd0] sm:$0xff] }
 0x93a   :  { %12328 = vmatpush1.bf16.msra.mxu0 %v14028_v25  ;;  %v9135_v25 = vld [vmem:[#allocation20 + $0xa70] sm:$0xff] }
 0x93b   :  { %12492 = vmatpush1.bf16.msra.mxu1 %v14030_v8  ;;  %12329 = vmatprep.subr.bf16.mxu0 %v14037_v52  ;;  %v9132_v8 = vld [vmem:[#allocation20 + $0xa58] sm:$0xff]  ;;  %v14093_v19 = vcombine.high %v9131_v32, %v9135_v25 }
 0x93c   :  { %12493 = vmatprep.subr.bf16.mxu1 %v14039_v38  ;;  %v9136_v52 = vld [vmem:[#allocation20 + $0xa78] sm:$0xff]  ;;  %v14084_v38 = vcombine.low %v9123_v42, %v9127_v43 }
 0x93d   :  { %v14095_v49 = vcombine.high %v9132_v8, %v9136_v52  ;;  %v14094_v55 = vcombine.low %v9132_v8, %v9136_v52  ;;  %v9187_v52 = vld [vmem:[#allocation20 + $0xc10] sm:$0xff] }
 0x93e   :  { %12330 = vmatpush1.bf16.msra.mxu0 %v14036_v56  ;;  %v9143_v56 = vld [vmem:[#allocation20 + $0xab0] sm:$0xff] }
 0x93f   :  { %12494 = vmatpush1.bf16.msra.mxu1 %v14038_v50  ;;  %12331 = vmatprep.subr.bf16.mxu0 %v14045_v21  ;;  %v9140_v50 = vld [vmem:[#allocation20 + $0xa98] sm:$0xff]  ;;  %v14101_v58 = vcombine.high %v9139_v51, %v9143_v56 }
 0x940   :  { %12495 = vmatprep.subr.bf16.mxu1 %v14047_v53  ;;  %v9144_v21 = vld [vmem:[#allocation20 + $0xab8] sm:$0xff]  ;;  %v14092_v53 = vcombine.low %v9131_v32, %v9135_v25 }
 0x941   :  { %v14103_v54 = vcombine.high %v9140_v50, %v9144_v21  ;;  %v14102_v63 = vcombine.low %v9140_v50, %v9144_v21  ;;  %v9195_v21 = vld [vmem:[#allocation20 + $0xc50] sm:$0xff] }
 0x942   :  { %12332 = vmatpush1.bf16.msra.mxu0 %v14044_v31  ;;  %v9151_v31 = vld [vmem:[#allocation20 + $0xaf0] sm:$0xff] }
 0x943   :  { %12496 = vmatpush1.bf16.msra.mxu1 %v14046_v60  ;;  %12333 = vmatprep.subr.bf16.mxu0 %v14053_v61  ;;  %v9148_v60 = vld [vmem:[#allocation20 + $0xad8] sm:$0xff]  ;;  %v14109_v0 = vcombine.high %v9147_v59, %v9151_v31 }
 0x944   :  { %12497 = vmatprep.subr.bf16.mxu1 %v14055_v62  ;;  %v9152_v61 = vld [vmem:[#allocation20 + $0xaf8] sm:$0xff]  ;;  %v14100_v62 = vcombine.low %v9139_v51, %v9143_v56 }
 0x945   :  { %v14111_v2 = vcombine.high %v9148_v60, %v9152_v61  ;;  %v14110_v17 = vcombine.low %v9148_v60, %v9152_v61  ;;  %v9203_v60 = vld [vmem:[#allocation20 + $0xc90] sm:$0xff] }
 0x946   :  { %12334 = vmatpush1.bf16.msra.mxu0 %v14052_v10  ;;  %v9159_v10 = vld [vmem:[#allocation20 + $0xb30] sm:$0xff] }
 0x947   :  { %12498 = vmatpush1.bf16.msra.mxu1 %v14054_v11  ;;  %12335 = vmatprep.subr.bf16.mxu0 %v14061_v14  ;;  %v9156_v11 = vld [vmem:[#allocation20 + $0xb18] sm:$0xff]  ;;  %v14117_v20 = vcombine.high %v9155_v3, %v9159_v10  ;;  %v9207_v61 = vld [vmem:[#allocation20 + $0xcb0] sm:$0xff] }
 0x948   :  { %12499 = vmatprep.subr.bf16.mxu1 %v14063_v16  ;;  %v9160_v14 = vld [vmem:[#allocation20 + $0xb38] sm:$0xff]  ;;  %v14108_v16 = vcombine.low %v9147_v59, %v9151_v31 }
 0x949   :  { %v14119_v57 = vcombine.high %v9156_v11, %v9160_v14  ;;  %v14118_v24 = vcombine.low %v9156_v11, %v9160_v14  ;;  %v9211_v14 = vld [vmem:[#allocation20 + $0xcd0] sm:$0xff] }
 0x94a   :  { %12336 = vmatpush1.bf16.msra.mxu0 %v14060_v27  ;;  %v9167_v27 = vld [vmem:[#allocation20 + $0xb70] sm:$0xff] }
 0x94b   :  { %12500 = vmatpush1.bf16.msra.mxu1 %v14062_v33  ;;  %12337 = vmatprep.subr.bf16.mxu0 %v14069_v36  ;;  %v9164_v33 = vld [vmem:[#allocation20 + $0xb58] sm:$0xff]  ;;  %v14125_v22 = vcombine.high %v9163_v26, %v9167_v27 }
 0x94c   :  { %12501 = vmatprep.subr.bf16.mxu1 %v14071_v18  ;;  %v9168_v36 = vld [vmem:[#allocation20 + $0xb78] sm:$0xff]  ;;  %v14116_v18 = vcombine.low %v9155_v3, %v9159_v10  ;;  %v14165_v10 = vcombine.high %v9203_v60, %v9207_v61 }
 0x94d   :  { %v14127_v23 = vcombine.high %v9164_v33, %v9168_v36  ;;  %v14126_v42 = vcombine.low %v9164_v33, %v9168_v36  ;;  %v9219_v33 = vld [vmem:[#allocation20 + $0xd10] sm:$0xff] }
 0x94e   :  { %12338 = vmatpush1.bf16.msra.mxu0 %v14068_v41  ;;  %v9175_v41 = vld [vmem:[#allocation20 + $0xbb0] sm:$0xff] }
 0x94f   :  { %12502 = vmatpush1.bf16.msra.mxu1 %v14070_v9  ;;  %12339 = vmatprep.subr.bf16.mxu0 %v14077_v39  ;;  %v9172_v9 = vld [vmem:[#allocation20 + $0xb98] sm:$0xff]  ;;  %v14133_v43 = vcombine.high %v9171_v40, %v9175_v41  ;;  %v9223_v36 = vld [vmem:[#allocation20 + $0xd30] sm:$0xff] }
 0x950   :  { %12503 = vmatprep.subr.bf16.mxu1 %v14079_v1  ;;  %v9176_v39 = vld [vmem:[#allocation20 + $0xbb8] sm:$0xff]  ;;  %v14124_v1 = vcombine.low %v9163_v26, %v9167_v27 }
 0x951   :  { %v14135_v45 = vcombine.high %v9172_v9, %v9176_v39  ;;  %v14134_v32 = vcombine.low %v9172_v9, %v9176_v39  ;;  %v9231_v9 = vld [vmem:[#allocation20 + $0xd70] sm:$0xff]  ;;  %v9228_v39 = vld [vmem:[#allocation20 + $0xd58] sm:$0xff] }
 0x952   :  { %12340 = vmatpush1.bf16.msra.mxu0 %v14076_v46  ;;  %v9183_v46 = vld [vmem:[#allocation20 + $0xbf0] sm:$0xff] }
 0x953   :  { %12504 = vmatpush1.bf16.msra.mxu1 %v14078_v47  ;;  %12341 = vmatprep.subr.bf16.mxu0 %v14085_v12  ;;  %v9180_v47 = vld [vmem:[#allocation20 + $0xbd8] sm:$0xff]  ;;  %v14141_v25 = vcombine.high %v9179_v34, %v9183_v46 }
 0x954   :  { %12505 = vmatprep.subr.bf16.mxu1 %v14087_v28  ;;  %v9184_v12 = vld [vmem:[#allocation20 + $0xbf8] sm:$0xff]  ;;  %v14132_v28 = vcombine.low %v9171_v40, %v9175_v41  ;;  %v9227_v41 = vld [vmem:[#allocation20 + $0xd50] sm:$0xff] }
 0x955   :  { %v14143_v8 = vcombine.high %v9180_v47, %v9184_v12  ;;  %v14142_v51 = vcombine.low %v9180_v47, %v9184_v12  ;;  %v9235_v47 = vld [vmem:[#allocation20 + $0xd90] sm:$0xff] }
 0x956   :  { %12342 = vmatpush1.bf16.msra.mxu0 %v14084_v38  ;;  %v9191_v38 = vld [vmem:[#allocation20 + $0xc30] sm:$0xff] }
 0x957   :  { %12506 = vmatpush1.bf16.msra.mxu1 %v14086_v13  ;;  %12343 = vmatprep.subr.bf16.mxu0 %v14093_v19  ;;  %v9188_v13 = vld [vmem:[#allocation20 + $0xc18] sm:$0xff]  ;;  %v14149_v56 = vcombine.high %v9187_v52, %v9191_v38  ;;  %v9239_v12 = vld [vmem:[#allocation20 + $0xdb0] sm:$0xff] }
 0x958   :  { %12507 = vmatprep.subr.bf16.mxu1 %v14095_v49  ;;  %v9192_v19 = vld [vmem:[#allocation20 + $0xc38] sm:$0xff]  ;;  %v14140_v49 = vcombine.low %v9179_v34, %v9183_v46  ;;  %v14189_v34 = vcombine.high %v9227_v41, %v9231_v9 }
 0x959   :  { %v14151_v50 = vcombine.high %v9188_v13, %v9192_v19  ;;  %v14150_v59 = vcombine.low %v9188_v13, %v9192_v19  ;;  %v14188_v13 = vcombine.low %v9227_v41, %v9231_v9  ;;  %v9268_v9 = vld [vmem:[#allocation20 + $0xe98] sm:$0xff] }
 0x95a   :  { %12344 = vmatpush1.bf16.msra.mxu0 %v14092_v53  ;;  %v9199_v53 = vld [vmem:[#allocation20 + $0xc70] sm:$0xff] }
 0x95b   :  { %12508 = vmatpush1.bf16.msra.mxu1 %v14094_v55  ;;  %12345 = vmatprep.subr.bf16.mxu0 %v14101_v58  ;;  %v14148_v55 = vcombine.low %v9187_v52, %v9191_v38  ;;  %v9196_v58 = vld [vmem:[#allocation20 + $0xc58] sm:$0xff]  ;;  %v14157_v31 = vcombine.high %v9195_v21, %v9199_v53 }
 0x95c   :  { %12509 = vmatprep.subr.bf16.mxu1 %v14103_v54  ;;  %v9200_v54 = vld [vmem:[#allocation20 + $0xc78] sm:$0xff] }
 0x95d   :  { %v14158_v3 = vcombine.low %v9196_v58, %v9200_v54 }
 0x95e   :  { %12346 = vmatpush1.bf16.msra.mxu0 %v14100_v62  ;;  %v14159_v62 = vcombine.high %v9196_v58, %v9200_v54  ;;  %v9244_v54 = vld [vmem:[#allocation20 + $0xdd8] sm:$0xff] }
 0x95f   :  { %12510 = vmatpush1.bf16.msra.mxu1 %v14102_v63  ;;  %12347 = vmatprep.subr.bf16.mxu0 %v14109_v0  ;;  %v9204_v63 = vld [vmem:[#allocation20 + $0xc98] sm:$0xff] }
 0x960   :  { %12511 = vmatprep.subr.bf16.mxu1 %v14111_v2  ;;  %v9208_v0 = vld [vmem:[#allocation20 + $0xcb8] sm:$0xff]  ;;  %v14156_v2 = vcombine.low %v9195_v21, %v9199_v53 }
 0x961   :  { %v14167_v11 = vcombine.high %v9204_v63, %v9208_v0 }
 0x962   :  { %12348 = vmatpush1.bf16.msra.mxu0 %v14108_v16  ;;  %v9215_v16 = vld [vmem:[#allocation20 + $0xcf0] sm:$0xff] }
 0x963   :  { %12512 = vmatpush1.bf16.msra.mxu1 %v14110_v17  ;;  %12349 = vmatprep.subr.bf16.mxu0 %v14117_v20  ;;  %v9212_v17 = vld [vmem:[#allocation20 + $0xcd8] sm:$0xff]  ;;  %v14173_v26 = vcombine.high %v9211_v14, %v9215_v16 }
 0x964   :  { %12513 = vmatprep.subr.bf16.mxu1 %v14119_v57  ;;  %v9216_v20 = vld [vmem:[#allocation20 + $0xcf8] sm:$0xff]  ;;  %v14164_v57 = vcombine.low %v9203_v60, %v9207_v61  ;;  %v14196_v61 = vcombine.low %v9235_v47, %v9239_v12 }
 0x965   :  { %v14175_v27 = vcombine.high %v9212_v17, %v9216_v20 }
 0x966   :  { %12350 = vmatpush1.bf16.msra.mxu0 %v14116_v18  ;;  %v9220_v18 = vld [vmem:[#allocation20 + $0xd18] sm:$0xff] }
 0x967   :  { %12514 = vmatpush1.bf16.msra.mxu1 %v14118_v24  ;;  %12351 = vmatprep.subr.bf16.mxu0 %v14125_v22  ;;  %v9224_v24 = vld [vmem:[#allocation20 + $0xd38] sm:$0xff]  ;;  %v14174_v22 = vcombine.low %v9212_v17, %v9216_v20 }
 0x968   :  { %12515 = vmatprep.subr.bf16.mxu1 %v14127_v23  ;;  %v14181_v23 = vcombine.high %v9219_v33, %v9223_v36  ;;  %v14183_v40 = vcombine.high %v9220_v18, %v9224_v24 }
 0x96a   :  { %12352 = vmatpush1.bf16.msra.mxu0 %v14124_v1  ;;  %v9232_v1 = vld [vmem:[#allocation20 + $0xd78] sm:$0xff] }
 0x96b   :  { %12516 = vmatpush1.bf16.msra.mxu1 %v14126_v42  ;;  %12353 = vmatprep.subr.bf16.mxu0 %v14133_v43  ;;  %v14180_v42 = vcombine.low %v9219_v33, %v9223_v36  ;;  %v15891_v43 = vld [vmem:[#allocation22] sm:$0xff]  ;;  %v14191_v46 = vcombine.high %v9228_v39, %v9232_v1  ;;  %v14190_v19 = vcombine.low %v9228_v39, %v9232_v1  ;;  %v9260_v33 = vld [vmem:[#allocation20 + $0xe58] sm:$0xff] }
 0x96c   :  { %12517 = vmatprep.subr.bf16.mxu1 %v14135_v45  ;;  %v14182_v45 = vcombine.low %v9220_v18, %v9224_v24  ;;  %v9322_v52 = vrot.slane %v15891_v43, %v15698_v15  ;;  %v9330_v38 = vrot.slane %v15891_v43, %v15711_v35  ;;  %v9248_v15 = vld [vmem:[#allocation20 + $0xdf8] sm:$0xff] }
 0x96d   :  { %v14206_v20 = vcombine.low %v9244_v54, %v9248_v15  ;;  %v9264_v36 = vld [vmem:[#allocation20 + $0xe78] sm:$0xff] }
 0x96e   :  { %12354 = vmatpush1.bf16.msra.mxu0 %v14132_v28  ;;  %v9318_v28 = vrot.slane %v15891_v43, %v15708_v30  ;;  %v9272_v39 = vld [vmem:[#allocation20 + $0xeb8] sm:$0xff] }
 0x96f   :  { %12518 = vmatpush1.bf16.msra.mxu1 %v14134_v32  ;;  %12355 = vmatprep.subr.bf16.mxu0 %v14141_v25  ;;  %v9326_v32 = vrot.slane %v15891_v43, %v15720_v44  ;;  %v9236_v25 = vld [vmem:[#allocation20 + $0xd98] sm:$0xff]  ;;  %v9247_v44 = vld [vmem:[#allocation20 + $0xdf0] sm:$0xff] }
 0x970   :  { %12519 = vmatprep.subr.bf16.mxu1 %v14143_v8  ;;  %v9240_v8 = vld [vmem:[#allocation20 + $0xdb8] sm:$0xff] }
 0x971   :  { %v14199_v30 = vcombine.high %v9236_v25, %v9240_v8 }
 0x972   :  { %12356 = vmatpush1.bf16.msra.mxu0 %v14140_v49  ;;  %v14197_v49 = vcombine.high %v9235_v47, %v9239_v12  ;;  %v14231_v12 = vcombine.high %v9268_v9, %v9272_v39 }
 0x973   :  { %12520 = vmatpush1.bf16.msra.mxu1 %v14142_v51  ;;  %12366 = vmatprep.subr.bf16.mxu0 %v14149_v56 }
 0x974   :  { %12530 = vmatprep.subr.bf16.mxu1 %v14151_v50  ;;  %v9243_v50 = vld [vmem:[#allocation20 + $0xdd0] sm:$0xff] }
 0x975   :  { %12358 = vmatmul.mubr.bf16.vlgmr.msra.gmra.mrb[28].mxu0 %v15861_v37  ;;  %v14204_v17 = vcombine.low %v9243_v50, %v9247_v44 }
 0x976   :  { %12522 = vmatmul.mubr.bf16.vlgmr.msra.gmra.mrb[32].mxu1 %v15861_v37  ;;  %12367 = vmatpush1.bf16.msra.mxu0 %v14148_v55  ;;  %v14166_v37 = vcombine.low %v9204_v63, %v9208_v0  ;;  %v14198_v0 = vcombine.low %v9236_v25, %v9240_v8  ;;  %v9276_v25 = vld [vmem:[#allocation20 + $0xed8] sm:$0xff] }
 0x977   :  { %12398 = vmatprep.mubr.bf16.mxu0 %v15865_v4  ;;  %12531 = vmatpush1.bf16.msra.mxu1 %v14150_v59  ;;  %v9280_v8 = vld [vmem:[#allocation20 + $0xef8] sm:$0xff] }
 0x978   :  { %12562 = vmatprep.mubr.bf16.mxu1 %v15865_v4  ;;  %12368 = vmatprep.subr.bf16.mxu0 %v14157_v31  ;;  %v14172_v4 = vcombine.low %v9211_v14, %v9215_v16  ;;  %v9252_v14 = vld [vmem:[#allocation20 + $0xe18] sm:$0xff] }
 0x979   :  { %12532 = vmatprep.subr.bf16.mxu1 %v14159_v62  ;;  %v9256_v16 = vld [vmem:[#allocation20 + $0xe38] sm:$0xff] }
 0x97a   :  { %12369 = vmatpush1.bf16.msra.mxu0 %v14156_v2  ;;  %v14205_v2 = vcombine.high %v9243_v50, %v9247_v44  ;;  %v14214_v24 = vcombine.low %v9252_v14, %v9256_v16  ;;  %v14238_v44 = vcombine.low %v9276_v25, %v9280_v8 }
 0x97b   :  { %12533 = vmatpush1.bf16.msra.mxu1 %v14158_v3  ;;  %12370 = vmatprep.subr.bf16.mxu0 %v14165_v10  ;;  %v14207_v3 = vcombine.high %v9244_v54, %v9248_v15  ;;  %v9251_v10 = vld [vmem:[#allocation20 + $0xe10] sm:$0xff]  ;;  %v9292_v54 = vld [vmem:[#allocation20 + $0xf58] sm:$0xff] }
 0x97c   :  { %12534 = vmatprep.subr.bf16.mxu1 %v14167_v11  ;;  %v9255_v11 = vld [vmem:[#allocation20 + $0xe30] sm:$0xff]  ;;  %v9296_v15 = vld [vmem:[#allocation20 + $0xf78] sm:$0xff] }
 0x97d   :  { %v14212_v18 = vcombine.low %v9251_v10, %v9255_v11 }
 0x97e   :  { %12371 = vmatpush1.bf16.msra.mxu0 %v14164_v57  ;;  %v14213_v57 = vcombine.high %v9251_v10, %v9255_v11 }
 0x97f   :  { %12535 = vmatpush1.bf16.msra.mxu1 %v14166_v37  ;;  %12372 = vmatprep.subr.bf16.mxu0 %v14173_v26  ;;  %v14215_v37 = vcombine.high %v9252_v14, %v9256_v16  ;;  %v9259_v26 = vld [vmem:[#allocation20 + $0xe50] sm:$0xff] }
 0x980   :  { %12536 = vmatprep.subr.bf16.mxu1 %v14175_v27  ;;  %v9263_v27 = vld [vmem:[#allocation20 + $0xe70] sm:$0xff] }
 0x981   :  { %v9307_v14 = vld [vmem:[#allocation20 + $0xfd0] sm:$0xff] }
 0x982   :  { %12373 = vmatpush1.bf16.msra.mxu0 %v14172_v4  ;;  %v14221_v4 = vcombine.high %v9259_v26, %v9263_v27  ;;  %v9311_v16 = vld [vmem:[#allocation20 + $0xff0] sm:$0xff] }
 0x983   :  { %12537 = vmatpush1.bf16.msra.mxu1 %v14174_v22  ;;  %12374 = vmatprep.subr.bf16.mxu0 %v14181_v23  ;;  %v14223_v22 = vcombine.high %v9260_v33, %v9264_v36  ;;  %v9267_v23 = vld [vmem:[#allocation20 + $0xe90] sm:$0xff] }
 0x984   :  { %12538 = vmatprep.subr.bf16.mxu1 %v14183_v40  ;;  %v9271_v40 = vld [vmem:[#allocation20 + $0xeb0] sm:$0xff] }
 0x986   :  { %12375 = vmatpush1.bf16.msra.mxu0 %v14180_v42  ;;  %v14220_v42 = vcombine.low %v9259_v26, %v9263_v27  ;;  %v14269_v26 = vcombine.high %v9307_v14, %v9311_v16 }
 0x987   :  { %12539 = vmatpush1.bf16.msra.mxu1 %v14182_v45  ;;  %12376 = vmatprep.subr.bf16.mxu0 %v14189_v34  ;;  %v14222_v34 = vcombine.low %v9260_v33, %v9264_v36  ;;  %v14268_v33 = vcombine.low %v9307_v14, %v9311_v16 }
 0x988   :  { %v12072_v51 = vpop.f32.mrb[24].mxu0  ;;  %v12236_v56 = vpop.f32.mrb[28].mxu1  ;;  %12540 = vmatprep.subr.bf16.mxu1 %v14191_v46  ;;  %v14229_v46 = vcombine.high %v9267_v23, %v9271_v40 }
 0x989   :  { %v14294_v21 = vadd.f32 %v12072_v51, %v9318_v28  ;;  %v14296_v53 = vadd.f32 %v12236_v56, %v9326_v32  ;;  %v12074_v55 = vpop.f32.mrb[25].mxu0  ;;  %v12238_v58 = vpop.f32.mrb[29].mxu1  ;;  %v9275_v28 = vld [vmem:[#allocation20 + $0xed0] sm:$0xff]  ;;  %v9284_v56 = vld [vmem:[#allocation20 + $0xf18] sm:$0xff] }
 0x98a   :  { %v14295_v59 = vadd.f32 %v12074_v55, %v9322_v52  ;;  %v14297_v31 = vadd.f32 %v12238_v58, %v9330_v38  ;;  %v12076_v35 = vpop.f32.mrb[26].mxu0  ;;  %v12240_v60 = vpop.f32.mrb[30].mxu1  ;;  %12377 = vmatpush1.bf16.msra.mxu0 %v14188_v13  ;;  %v9279_v32 = vld [vmem:[#allocation20 + $0xef0] sm:$0xff]  ;;  %v14228_v52 = vcombine.low %v9267_v23, %v9271_v40  ;;  %v14230_v38 = vcombine.low %v9268_v9, %v9272_v39 }
 0x98b   :  { %15038 = vtanh.f32 %v14294_v21  ;;  %12541 = vmatpush1.bf16.msra.mxu1 %v14190_v19  ;;  %v12077_v62 = vpop.f32.mrb[27].mxu0  ;;  %v12241_v63 = vpop.f32.mrb[31].mxu1  ;;  %12378 = vmatprep.subr.bf16.mxu0 %v14197_v49  ;;  %v14237_v13 = vcombine.high %v9275_v28, %v9279_v32  ;;  %v14239_v19 = vcombine.high %v9276_v25, %v9280_v8  ;;  %v9283_v49 = vld [vmem:[#allocation20 + $0xf10] sm:$0xff]  ;;  %v14236_v50 = vcombine.low %v9275_v28, %v9279_v32 }
 0x98c   :  { %15040 = vtanh.f32 %v14296_v53  ;;  %12542 = vmatprep.subr.bf16.mxu1 %v14199_v30  ;;  %v9287_v51 = vld [vmem:[#allocation20 + $0xf30] sm:$0xff]  ;;  %v9288_v30 = vld [vmem:[#allocation20 + $0xf38] sm:$0xff]  ;;  %v14255_v60 = vcombine.high %v9292_v54, %v9296_v15 }
 0x98d   :  { %15042 = vtanh.f32 %v14295_v59  ;;  %v14245_v21 = vcombine.high %v9283_v49, %v9287_v51  ;;  %v14247_v53 = vcombine.high %v9284_v56, %v9288_v30  ;;  %v9291_v55 = vld [vmem:[#allocation20 + $0xf50] sm:$0xff]  ;;  %v14244_v59 = vcombine.low %v9283_v49, %v9287_v51  ;;  %v9300_v63 = vld [vmem:[#allocation20 + $0xf98] sm:$0xff] }
 0x98e   :  { %15044 = vtanh.f32 %v14297_v31  ;;  %12379 = vmatpush1.bf16.msra.mxu0 %v14196_v61  ;;  %v9295_v58 = vld [vmem:[#allocation20 + $0xf70] sm:$0xff]  ;;  %v14246_v31 = vcombine.low %v9284_v56, %v9288_v30 }
 0x98f   :  { %12543 = vmatpush1.bf16.msra.mxu1 %v14198_v0  ;;  %12380 = vmatprep.subr.bf16.mxu0 %v14205_v2  ;;  %v14253_v35 = vcombine.high %v9291_v55, %v9295_v58  ;;  %v9299_v61 = vld [vmem:[#allocation20 + $0xf90] sm:$0xff]  ;;  %v9304_v0 = vld [vmem:[#allocation20 + $0xfb8] sm:$0xff]  ;;  %v14252_v2 = vcombine.low %v9291_v55, %v9295_v58 }
 0x990   :  { %12544 = vmatprep.subr.bf16.mxu1 %v14207_v3  ;;  %v9303_v62 = vld [vmem:[#allocation20 + $0xfb0] sm:$0xff]  ;;  %v14254_v3 = vcombine.low %v9292_v54, %v9296_v15  ;;  %v14263_v11 = vcombine.high %v9300_v63, %v9304_v0 }
 0x991   :  { %v14261_v10 = vcombine.high %v9299_v61, %v9303_v62 }
 0x992   :  { %12381 = vmatpush1.bf16.msra.mxu0 %v14204_v17  ;;  %v9308_v17 = vld [vmem:[#allocation20 + $0xfd8] sm:$0xff] }
 0x993   :  { %12545 = vmatpush1.bf16.msra.mxu1 %v14206_v20  ;;  %12382 = vmatprep.subr.bf16.mxu0 %v14213_v57  ;;  %v9312_v20 = vld [vmem:[#allocation20 + $0xff8] sm:$0xff]  ;;  %v14260_v57 = vcombine.low %v9299_v61, %v9303_v62 }
 0x994   :  { %12546 = vmatprep.subr.bf16.mxu1 %v14215_v37  ;;  %v14262_v37 = vcombine.low %v9300_v63, %v9304_v0  ;;  %v14271_v27 = vcombine.high %v9308_v17, %v9312_v20  ;;  %v14270_v36 = vcombine.low %v9308_v17, %v9312_v20 }
 0x995   :  { %v15039_v41 = vpop.eup %15038 }
 0x996   :  { %v15041_v1 = vpop.eup %15040  ;;  %12579 = vst [vmem:[#allocation23] sm:$0xff] %v15039_v41  ;;  %12383 = vmatpush1.bf16.msra.mxu0 %v14212_v18  ;;  %v9334_v18 = vrot.slane %v15891_v43, %v15726_v5 }
 0x997   :  { %v15043_v45 = vpop.eup %15042  ;;  %12581 = vst [vmem:[#allocation23 + $0x10] sm:$0xff] %v15041_v1  ;;  %12547 = vmatpush1.bf16.msra.mxu1 %v14214_v24  ;;  %12384 = vmatprep.subr.bf16.mxu0 %v14221_v4  ;;  %v9342_v24 = vrot.slane %v15891_v43, %v15743_v29  ;;  %v9338_v4 = vrot.slane %v15891_v43, %v15729_v6 }
 0x998   :  { %v15045_v47 = vpop.eup %15044  ;;  %12580 = vst [vmem:[#allocation23 + $0x8] sm:$0xff] %v15043_v45  ;;  %12548 = vmatprep.subr.bf16.mxu1 %v14223_v22  ;;  %v9346_v22 = vrot.slane %v15891_v43, %v15732_v7 }
 0x999   :  { %12582 = vst [vmem:[#allocation23 + $0x18] sm:$0xff] %v15045_v47 }
 0x99a   :  { %12385 = vmatpush1.bf16.msra.mxu0 %v14220_v42 }
 0x99b   :  { %12549 = vmatpush1.bf16.msra.mxu1 %v14222_v34  ;;  %12386 = vmatprep.subr.bf16.mxu0 %v14229_v46 }
 0x99c   :  { %12550 = vmatprep.subr.bf16.mxu1 %v14231_v12 }
 0x99e   :  { %12387 = vmatpush1.bf16.msra.mxu0 %v14228_v52 }
 0x99f   :  { %12551 = vmatpush1.bf16.msra.mxu1 %v14230_v38  ;;  %12388 = vmatprep.subr.bf16.mxu0 %v14237_v13 }
 0x9a0   :  { %12552 = vmatprep.subr.bf16.mxu1 %v14239_v19 }
 0x9a2   :  { %12389 = vmatpush1.bf16.msra.mxu0 %v14236_v50 }
 0x9a3   :  { %12553 = vmatpush1.bf16.msra.mxu1 %v14238_v44  ;;  %12390 = vmatprep.subr.bf16.mxu0 %v14245_v21 }
 0x9a4   :  { %12554 = vmatprep.subr.bf16.mxu1 %v14247_v53 }
 0x9a6   :  { %12391 = vmatpush1.bf16.msra.mxu0 %v14244_v59 }
 0x9a7   :  { %12555 = vmatpush1.bf16.msra.mxu1 %v14246_v31  ;;  %12392 = vmatprep.subr.bf16.mxu0 %v14253_v35 }
 0x9a8   :  { %12556 = vmatprep.subr.bf16.mxu1 %v14255_v60 }
 0x9aa   :  { %12393 = vmatpush1.bf16.msra.mxu0 %v14252_v2 }
 0x9ab   :  { %12557 = vmatpush1.bf16.msra.mxu1 %v14254_v3  ;;  %12394 = vmatprep.subr.bf16.mxu0 %v14261_v10 }
 0x9ac   :  { %12558 = vmatprep.subr.bf16.mxu1 %v14263_v11 }
 0x9ae   :  { %12395 = vmatpush1.bf16.msra.mxu0 %v14260_v57 }
 0x9af   :  { %12559 = vmatpush1.bf16.msra.mxu1 %v14262_v37  ;;  %12396 = vmatprep.subr.bf16.mxu0 %v14269_v26 }
 0x9b0   :  { %12560 = vmatprep.subr.bf16.mxu1 %v14271_v27 }
 0x9b2   :  { %12397 = vmatpush1.bf16.msra.mxu0 %v14268_v33 }
 0x9b3   :  { %12561 = vmatpush1.bf16.msra.mxu1 %v14270_v36 }
 0x9b5   :  { %12399 = vmatmul.mubr.bf16.vlgmr.msra.gmra.mrb[28].mxu0 %v15873_v48 }
 0x9b6   :  { %12563 = vmatmul.mubr.bf16.vlgmr.msra.gmra.mrb[32].mxu1 %v15873_v48 }
 0xa88   :  { %v12400_v23 = vpop.f32.mrb[28].mxu0 }
 0xa89   :  { %v14298_v40 = vadd.f32 %v12400_v23, %v9334_v18  ;;  %v12564_v41 = vpop.f32.mrb[32].mxu1  ;;  %v12402_v9 = vpop.f32.mrb[29].mxu0 }
 0xa8a   :  { %v14300_v39 = vadd.f32 %v12564_v41, %v9342_v24  ;;  %v14299_v1 = vadd.f32 %v12402_v9, %v9338_v4  ;;  %v12566_v42 = vpop.f32.mrb[33].mxu1  ;;  %v12404_v48 = vpop.f32.mrb[30].mxu0 }
 0xa8b   :  { %15046 = vtanh.f32 %v14298_v40  ;;  %v14301_v45 = vadd.f32 %v12566_v42, %v9346_v22  ;;  %v12568_v5 = vpop.f32.mrb[34].mxu1  ;;  %v12405_v34 = vpop.f32.mrb[31].mxu0 }
 0xa8c   :  { %15048 = vtanh.f32 %v14300_v39  ;;  %v12569_v29 = vpop.f32.mrb[35].mxu1 }
 0xa8d   :  { %15050 = vtanh.f32 %v14299_v1 }
 0xa8e   :  { %15052 = vtanh.f32 %v14301_v45 }
 0xa95   :  { %v15047_v6 = vpop.eup %15046 }
 0xa96   :  { %v15049_v7 = vpop.eup %15048  ;;  %12583 = vst [vmem:[#allocation23 + $0x20] sm:$0xff] %v15047_v6 }
 0xa97   :  { %v15051_v43 = vpop.eup %15050  ;;  %12585 = vst [vmem:[#allocation23 + $0x30] sm:$0xff] %v15049_v7 }
 0xa98   :  { %v15053_v46 = vpop.eup %15052  ;;  %12584 = vst [vmem:[#allocation23 + $0x28] sm:$0xff] %v15051_v43 }
 0xa99   :  { %12586 = vst [vmem:[#allocation23 + $0x38] sm:$0xff] %v15053_v46 }
 0xa9a   :  { %15353 = shalt.err (!%p15350_p10)
}
 0xa9b   :  { %s15354_s20 = scalar_lea.hbm %s15936_s13, 1024 }
 0xa9c   :  { %p15355_p11 = scmp.ne.s32.totalorder %s15936_s13, %s15354_s20  ;;  %p15358_p12 = scmp.lt.u32.totalorder %s15354_s20, %s15936_s13 }
 0xa9e   :  { %p15360_p13 = pnand %p15358_p12, %p15355_p11 }
 0xaa0   :  { %15363 = shalt.err (!%p15360_p13)
}
 0xaa1   :  { %12596 = dma.vmem_to_hbm [thread:$0]  %s12594_s27, 1024, %s15936_s13, [#allocation4]  }
 0xaa2   :  { %15378 = dma.done.wait [#allocation4], 1024  }
 0xaa3   :  { %15379 = vsyncadd [#allocation4], 4294966272 }
 0xaa4   :  { %12600 = vsyncpa [#allocation3], 1 }
 0xaa5   :  { %12601 = vsyncpa [#allocation6], 1 }
 0xaa6   :  { %12602 = vsyncpa [#allocation9], 1 }
 0xaa7   :  { %12603 = vsyncpa [#allocation12], 1 }
 0xaa8   :  { %12604 = vsyncpa [#allocation15], 1 }
 0xaa9   :  { %12605 = vsyncpa [#allocation18], 1 }
 0xaaa   :  { %12606 = vsyncpa [#allocation21], 1 }
 0xaab   :  { %12607 = vsyncpa [#allocation4], 1 }

</bundles_post_ra>
